<compile_context>
chip_gen: v5e
topology: v5e:2x2
jax: 0.10.0
libtpu: 0.0.40
codegen_flags: <defaults>
</compile_context>

<pallas_src>
import functools
from typing import NamedTuple

import jax
import jax.numpy as jnp
from jax import lax
from jax.experimental import pallas as pl
from jax.experimental.pallas import tpu as pltpu


# ----------------------------------------------------------------------------
# Static model configuration (hashable -> usable as a jit static argument)
# ----------------------------------------------------------------------------
class VQVAEConfig(NamedTuple):
    input_dim: int = 263
    nb_code: int = 1024
    code_dim: int = 512
    down_t: int = 3
    stride_t: int = 2
    width: int = 512
    depth: int = 3
    dilation_growth_rate: int = 3


def _res_dilations(cfg: VQVAEConfig):
    # Resnet1D(reverse_dilation=True): dilations 1, dgr, dgr^2, ... then reversed.
    return tuple(cfg.dilation_growth_rate ** d for d in range(cfg.depth))[::-1]


# ----------------------------------------------------------------------------
# Generic Conv1d: one pallas_call, channels-last, in-kernel K shifted dots
# ----------------------------------------------------------------------------
def _conv_kernel_factory(N, K, stride, dilation, Tout, relu_in, relu_out):
    n_phase = stride

    def kernel(*refs):
        phase_refs = refs[:n_phase]          # each (N, len_r, Cin)
        w_ref = refs[n_phase]                # (K, Cin, Cout)
        b_ref = refs[n_phase + 1]            # (1, Cout)
        o_ref = refs[n_phase + 2]            # (N, Tout, Cout)
        for n in range(N):                   # static unroll; no per-batch grid steps
            phases = []
            for r in range(n_phase):
                p = phase_refs[r][n]         # (len_r, Cin)
                if relu_in:
                    p = jnp.maximum(p, 0.0)  # relu applied once, before the taps
                phases.append(p)
            acc = None
            for k in range(K):               # im2col as K shifted dots (no K-x DMA)
                o = k * dilation
                xk = phases[o % stride][(o // stride):(o // stride) + Tout, :]
                y = jnp.dot(xk, w_ref[k], preferred_element_type=jnp.float32)
                acc = y if acc is None else acc + y
            acc = acc + b_ref[...]           # bias folded into the accumulator
            if relu_out:
                acc = jnp.maximum(acc, 0.0)
            o_ref[n] = acc

    return kernel


def conv1d(x, w, b, *, stride=1, padding=0, dilation=1,
           relu_in=False, relu_out=False):
    """Conv1d with PyTorch semantics, channels-last storage.

    x: (N, T, Cin) f32,  w: (K, Cin, Cout),  b: (Cout,).
    """
    N, T, Cin = x.shape
    K, _, Cout = w.shape
    xp = jnp.pad(x, ((0, 0), (padding, padding), (0, 0)))
    Tp = T + 2 * padding
    Tout = (Tp - dilation * (K - 1) - 1) // stride + 1

    # Phase decomposition of the padded input (cheap XLA strided slices) so every
    # tap inside the kernel is a contiguous slice, even for strided down-convs.
    phases = [xp[:, r::stride, :] for r in range(stride)]
    b2 = b.reshape(1, Cout)

    kernel = _conv_kernel_factory(N, K, stride, dilation, Tout, relu_in, relu_out)
    return pl.pallas_call(
        kernel,
        out_shape=jax.ShapeDtypeStruct((N, Tout, Cout), jnp.float32),
    )(*phases, w, b2)


# ----------------------------------------------------------------------------
# Fused Resnet1D stack: `depth` x [relu -> conv(k=3, dilated) -> relu -> conv(k=1)
#                                  -> +residual] in a single pallas_call.
# The activation stays in one padded VMEM scratch buffer for the whole stack; the
# zero halo (width = max dilation) makes every dilated tap a static slice + dot.
# ----------------------------------------------------------------------------
def _res_stack_kernel_factory(N, T, dils):
    maxd = max(dils)
    nblk = len(dils)

    def kernel(*refs):
        x_ref = refs[0]                       # (N, T, C)
        w_refs = refs[1:1 + 4 * nblk]         # per block: w1 (3,C,C), b1, w2 (1,C,C), b2
        o_ref = refs[1 + 4 * nblk]            # (N, T, C)
        buf = refs[2 + 4 * nblk]              # VMEM scratch (T + 2*maxd, C)

        buf[...] = jnp.zeros_like(buf)        # zero the halo rows once
        for n in range(N):
            buf[maxd:maxd + T, :] = x_ref[n]  # centre = current activation
            for bi, d in enumerate(dils):
                w1 = w_refs[4 * bi]
                b1 = w_refs[4 * bi + 1]
                w2 = w_refs[4 * bi + 2]
                b2 = w_refs[4 * bi + 3]
                xr = jnp.maximum(buf[...], 0.0)          # relu (halo zeros stay zero)
                h = None
                for k in range(3):                        # dilated k=3 conv, shifted dots
                    off = maxd + (k - 1) * d
                    y = jnp.dot(xr[off:off + T, :], w1[k],
                                preferred_element_type=jnp.float32)
                    h = y if h is None else h + y
                h = jnp.maximum(h + b1[...], 0.0)         # relu before the 1x1 conv
                y = jnp.dot(h, w2[0], preferred_element_type=jnp.float32) + b2[...]
                buf[maxd:maxd + T, :] = y + buf[maxd:maxd + T, :]   # residual, in place
            o_ref[n] = buf[maxd:maxd + T, :]

    return kernel


def res_stack(x, blocks, dils):
    N, T, C = x.shape
    maxd = max(dils)
    args = [x]
    for p in blocks:
        args += [p["conv1"]["w"], p["conv1"]["b"].reshape(1, C),
                 p["conv2"]["w"], p["conv2"]["b"].reshape(1, C)]
    kernel = _res_stack_kernel_factory(N, T, tuple(dils))
    return pl.pallas_call(
        kernel,
        out_shape=jax.ShapeDtypeStruct((N, T, C), jnp.float32),
        scratch_shapes=[pltpu.VMEM((T + 2 * maxd, C), jnp.float32)],
    )(*args)


# ----------------------------------------------------------------------------
# Fused nearest-neighbour 2x upsample + Conv1d(k=3, pad=1)
#   even output[2m]   = w0*h[m-1] + (w1+w2)*h[m]
#   odd  output[2m+1] = (w0+w1)*h[m] + w2*h[m+1]
# ----------------------------------------------------------------------------
def _upconv_kernel_factory(N, T):
    def kernel(hp_ref, w_ref, b_ref, o_ref):
        # hp_ref: (N, T+2, Cin); w_ref: (3, Cin, Cout); o_ref: (N, T, 2, Cout)
        w0 = w_ref[0]
        w1 = w_ref[1]
        w2 = w_ref[2]
        we1 = w1 + w2
        wo0 = w0 + w1
        b = b_ref[...]
        for n in range(N):
            hp = hp_ref[n]                       # (T+2, Cin)
            h0 = hp[0:T, :]
            h1 = hp[1:T + 1, :]
            h2 = hp[2:T + 2, :]
            even = (jnp.dot(h0, w0, preferred_element_type=jnp.float32)
                    + jnp.dot(h1, we1, preferred_element_type=jnp.float32) + b)
            odd = (jnp.dot(h1, wo0, preferred_element_type=jnp.float32)
                   + jnp.dot(h2, w2, preferred_element_type=jnp.float32) + b)
            o_ref[n, :, 0, :] = even
            o_ref[n, :, 1, :] = odd

    return kernel


def upsample2x_conv(h, w, b):
    N, T, Cin = h.shape
    Cout = w.shape[-1]
    hp = jnp.pad(h, ((0, 0), (1, 1), (0, 0)))
    kernel = _upconv_kernel_factory(N, T)
    out4 = pl.pallas_call(
        kernel,
        out_shape=jax.ShapeDtypeStruct((N, T, 2, Cout), jnp.float32),
    )(hp, w, b.reshape(1, Cout))
    # row-major (N, T, 2, C) -> (N, 2T, C) is a free layout-preserving reshape.
    return out4.reshape(N, 2 * T, Cout)


# ----------------------------------------------------------------------------
# Vector quantizer: nearest codebook entry + gather, tiled over M
# ----------------------------------------------------------------------------
def _vq_kernel(z_ref, cb_ref, c2_ref, idx_ref, q_ref):
    z = z_ref[...]                                            # (Mb, D)
    cb = cb_ref[...]                                          # (K, D)
    # z^2 term dropped: argmin over the codebook is invariant to a per-row constant.
    zc = lax.dot_general(z, cb, (((1,), (1,)), ((), ())),
                         preferred_element_type=jnp.float32)  # (Mb, K)
    d = c2_ref[...] - 2.0 * zc                                # ||c||^2 precomputed
    idx = jnp.argmin(d, axis=1).astype(jnp.int32)             # (Mb,)
    idx_ref[...] = idx[None, :]                               # lane-dense (1, Mb)
    onehot = (lax.broadcasted_iota(jnp.int32, d.shape, 1)
              == idx[:, None]).astype(jnp.float32)            # (Mb, K)
    q_ref[...] = jnp.dot(onehot, cb, preferred_element_type=jnp.float32)


def vector_quantize(z_flat, codebook):
    """z_flat: (M, D), codebook: (K, D) -> (indices (M,) int32, quantized (M, D))."""
    M, D = z_flat.shape
    Kc = codebook.shape[0]
    c2 = jnp.sum(codebook * codebook, axis=1).reshape(1, Kc)  # computed once, not per tile
    # Tile over M when it divides cleanly into 128-multiples (keeps the index output
    # lane-aligned); otherwise a single block.  Codebook stays resident.
    if M % 512 == 0:
        bm = 512
    elif M % 256 == 0:
        bm = 256
    elif M % 128 == 0:
        bm = 128
    else:
        bm = M
    grid = (M // bm,)
    idx, q = pl.pallas_call(
        _vq_kernel,
        out_shape=(jax.ShapeDtypeStruct((1, M), jnp.int32),
                   jax.ShapeDtypeStruct((M, D), jnp.float32)),
        grid=grid,
        in_specs=[pl.BlockSpec((bm, D), lambda i: (i, 0)),
                  pl.BlockSpec((Kc, D), lambda i: (0, 0)),
                  pl.BlockSpec((1, Kc), lambda i: (0, 0))],
        out_specs=(pl.BlockSpec((1, bm), lambda i: (0, i)),
                   pl.BlockSpec((bm, D), lambda i: (i, 0))),
        compiler_params=pltpu.CompilerParams(dimension_semantics=("parallel",)),
    )(z_flat, codebook, c2)
    return idx[0], q


# ----------------------------------------------------------------------------
# Parameters (deterministic synthetic init; weights stored as (K, Cin, Cout),
# i.e. PyTorch's (Cout, Cin, K) transposed to the kernel-friendly layout)
# ----------------------------------------------------------------------------
def _conv_params(key, cin, cout, k):
    kw, kb = jax.random.split(key)
    w = jax.random.normal(kw, (k, cin, cout), jnp.float32) / jnp.sqrt(float(cin * k))
    b = jax.random.normal(kb, (cout,), jnp.float32) * 0.01
    return {"w": w, "b": b}


def init_params(key, cfg: VQVAEConfig):
    keys = iter(jax.random.split(key, 1024))

    def res_blocks():
        return [{"conv1": _conv_params(next(keys), cfg.width, cfg.width, 3),
                 "conv2": _conv_params(next(keys), cfg.width, cfg.width, 1)}
                for _ in range(cfg.depth)]

    enc = {"conv_in": _conv_params(next(keys), cfg.input_dim, cfg.width, 3),
           "downs": []}
    for _ in range(cfg.down_t):
        enc["downs"].append({
            "down": _conv_params(next(keys), cfg.width, cfg.width, cfg.stride_t * 2),
            "res": res_blocks(),
        })
    enc["conv_out"] = _conv_params(next(keys), cfg.width, cfg.code_dim, 3)

    dec = {"conv_in": _conv_params(next(keys), cfg.code_dim, cfg.width, 3), "ups": []}
    for _ in range(cfg.down_t):
        dec["ups"].append({
            "res": res_blocks(),
            "up_conv": _conv_params(next(keys), cfg.width, cfg.width, 3),
        })
    dec["conv_out1"] = _conv_params(next(keys), cfg.width, cfg.width, 3)
    dec["conv_out2"] = _conv_params(next(keys), cfg.width, cfg.input_dim, 3)

    # TODO(synk): the original VectorQuantize uses kmeans_init on the first batch and
    # EMA/affine codebook updates; here the codebook is a deterministic random init.
    codebook = jax.random.normal(next(keys), (cfg.nb_code, cfg.code_dim), jnp.float32)
    return {"enc": enc, "dec": dec, "codebook": codebook}


# ----------------------------------------------------------------------------
# Model forward (mirrors Encoder / Resnet1D / Decoder / VQVAE2.forward, mask=None)
# ----------------------------------------------------------------------------
def encoder_fwd(x, p, cfg):
    h = conv1d(x, p["conv_in"]["w"], p["conv_in"]["b"], padding=1, relu_out=True)
    dils = _res_dilations(cfg)
    for blk in p["downs"]:
        h = conv1d(h, blk["down"]["w"], blk["down"]["b"],
                   stride=cfg.stride_t, padding=cfg.stride_t // 2)
        h = res_stack(h, blk["res"], dils)
    h = conv1d(h, p["conv_out"]["w"], p["conv_out"]["b"], padding=1)
    return h


def decoder_fwd(x, p, cfg):
    h = conv1d(x, p["conv_in"]["w"], p["conv_in"]["b"], padding=1, relu_out=True)
    dils = _res_dilations(cfg)
    for blk in p["ups"]:
        h = res_stack(h, blk["res"], dils)
        h = upsample2x_conv(h, blk["up_conv"]["w"], blk["up_conv"]["b"])
    h = conv1d(h, p["conv_out1"]["w"], p["conv_out1"]["b"], padding=1, relu_out=True)
    h = conv1d(h, p["conv_out2"]["w"], p["conv_out2"]["b"], padding=1)
    return h


@functools.partial(jax.jit, static_argnames=("cfg",))
def vqvae2_forward(params, x, *, cfg: VQVAEConfig):
    """x: (N, T, input_dim).  Returns dict mirroring VQVAEOutput (eval-mode, mask=None).

    Activations stay channels-last throughout, so PyTorch's preprocess/postprocess
    permutes become no-ops (the math is identical to the NCW Conv1d reference).
    """
    x_in = x.astype(jnp.float32)
    x_encoder = encoder_fwd(x_in, params["enc"], cfg)          # (N, T', code_dim)

    N, Tq, D = x_encoder.shape
    z = x_encoder.reshape(N * Tq, D)
    code_idx, q = vector_quantize(z, params["codebook"])
    # TODO(synk): stochastic code sampling and EMA/affine codebook updates are
    # training-time behaviors of the lucidrains VectorQuantize; eval-mode nearest-
    # neighbor quantization is implemented.  commit_loss = MSE(quantized, encoder out),
    # matching F.mse_loss (mean) followed by .sum() over the single quantizer.
    commit_loss = jnp.mean((q - z) ** 2)

    x_quantized = q.reshape(N, Tq, D)                           # (N, T', code_dim)
    x_decoder = decoder_fwd(x_quantized, params["dec"], cfg)    # (N, T, input_dim)

    return {
        "decoded_motion": x_decoder,                            # (N, T, input_dim)
        "indices": code_idx.reshape(N, Tq),                     # (N, T')
        "commit_loss": commit_loss,                             # scalar
        "quantized_motion": x_quantized,                        # (N, T', code_dim)
    }


# ----------------------------------------------------------------------------
if __name__ == "__main__":
    # Small config consistent with the module (down_t=2 -> T' = T/4).
    cfg = VQVAEConfig(input_dim=16, nb_code=32, code_dim=32, down_t=2,
                      stride_t=2, width=32, depth=2, dilation_growth_rate=3)
    N, T = 2, 16

    key = jax.random.PRNGKey(0)
    k_params, k_x = jax.random.split(key)
    params = init_params(k_params, cfg)
    x = jax.random.normal(k_x, (N, T, cfg.input_dim), jnp.float32)

    out = vqvae2_forward(params, x, cfg=cfg)
    jax.block_until_ready(out)

    assert out["decoded_motion"].shape == (N, T, cfg.input_dim)
    assert out["indices"].shape == (N, T // 4)
    assert out["quantized_motion"].shape == (N, T // 4, cfg.code_dim)
    assert out["commit_loss"].shape == ()
    assert jnp.isfinite(out["decoded_motion"]).all()
    print("KERNEL_OK")
</pallas_src>

<mosaic_0001>
module attributes {stable_mosaic.version = 11 : i64} {
  func.func @kernel(%arg0: memref<2x18x16xf32, #tpu.memory_space<vmem>>, %arg1: memref<3x16x32xf32, #tpu.memory_space<vmem>>, %arg2: memref<1x32xf32, #tpu.memory_space<vmem>>, %arg3: memref<2x16x32xf32, #tpu.memory_space<vmem>>) attributes {dimension_semantics = [], scalar_prefetch = 0 : i64, scratch_operands = 0 : i64, tpu.core_type = #tpu.core_type<tc>} {
    %c0 = arith.constant 0 : index
    %c0_0 = arith.constant 0 : index
    %c0_1 = arith.constant 0 : index
    %0 = vector.load %arg0[%c0, %c0_0, %c0_1] : memref<2x18x16xf32, #tpu.memory_space<vmem>>, vector<1x18x16xf32>
    %1 = vector.shape_cast %0 : vector<1x18x16xf32> to vector<18x16xf32>
    %2 = vector.extract_strided_slice %1 {offsets = [0, 0], sizes = [16, 16], strides = [1, 1]} : vector<18x16xf32> to vector<16x16xf32>
    %c0_2 = arith.constant 0 : index
    %c0_3 = arith.constant 0 : index
    %c0_4 = arith.constant 0 : index
    %3 = vector.load %arg1[%c0_2, %c0_3, %c0_4] : memref<3x16x32xf32, #tpu.memory_space<vmem>>, vector<1x16x32xf32>
    %4 = vector.shape_cast %3 : vector<1x16x32xf32> to vector<16x32xf32>
    %cst = arith.constant dense<0.000000e+00> : vector<16x32xf32>
    %5 = tpu.matmul %2, %4, %cst {dimension_numbers = #tpu.dot_dimension_numbers<[1], [0], [0], [1], [0, 0, 1, 1], [], []>} : vector<16x16xf32>, vector<16x32xf32>, vector<16x32xf32> -> vector<16x32xf32>
    %6 = vector.extract_strided_slice %1 {offsets = [1, 0], sizes = [16, 16], strides = [1, 1]} : vector<18x16xf32> to vector<16x16xf32>
    %c1 = arith.constant 1 : index
    %c0_5 = arith.constant 0 : index
    %c0_6 = arith.constant 0 : index
    %7 = vector.load %arg1[%c1, %c0_5, %c0_6] : memref<3x16x32xf32, #tpu.memory_space<vmem>>, vector<1x16x32xf32>
    %8 = vector.shape_cast %7 : vector<1x16x32xf32> to vector<16x32xf32>
    %cst_7 = arith.constant dense<0.000000e+00> : vector<16x32xf32>
    %9 = tpu.matmul %6, %8, %cst_7 {dimension_numbers = #tpu.dot_dimension_numbers<[1], [0], [0], [1], [0, 0, 1, 1], [], []>} : vector<16x16xf32>, vector<16x32xf32>, vector<16x32xf32> -> vector<16x32xf32>
    %10 = arith.addf %5, %9 : vector<16x32xf32>
    %11 = vector.extract_strided_slice %1 {offsets = [2, 0], sizes = [16, 16], strides = [1, 1]} : vector<18x16xf32> to vector<16x16xf32>
    %c2 = arith.constant 2 : index
    %c0_8 = arith.constant 0 : index
    %c0_9 = arith.constant 0 : index
    %12 = vector.load %arg1[%c2, %c0_8, %c0_9] : memref<3x16x32xf32, #tpu.memory_space<vmem>>, vector<1x16x32xf32>
    %13 = vector.shape_cast %12 : vector<1x16x32xf32> to vector<16x32xf32>
    %cst_10 = arith.constant dense<0.000000e+00> : vector<16x32xf32>
    %14 = tpu.matmul %11, %13, %cst_10 {dimension_numbers = #tpu.dot_dimension_numbers<[1], [0], [0], [1], [0, 0, 1, 1], [], []>} : vector<16x16xf32>, vector<16x32xf32>, vector<16x32xf32> -> vector<16x32xf32>
    %15 = arith.addf %10, %14 : vector<16x32xf32>
    %c0_11 = arith.constant 0 : index
    %c0_12 = arith.constant 0 : index
    %16 = vector.load %arg2[%c0_11, %c0_12] : memref<1x32xf32, #tpu.memory_space<vmem>>, vector<1x32xf32>
    %17 = vector.broadcast %16 : vector<1x32xf32> to vector<16x32xf32>
    %18 = arith.addf %15, %17 : vector<16x32xf32>
    %cst_13 = arith.constant 0.000000e+00 : f32
    %19 = vector.broadcast %cst_13 : f32 to vector<16x32xf32>
    %20 = arith.maximumf %18, %19 : vector<16x32xf32>
    %c0_14 = arith.constant 0 : index
    %c0_15 = arith.constant 0 : index
    %c0_16 = arith.constant 0 : index
    %21 = vector.load %arg3[%c0_14, %c0_15, %c0_16] : memref<2x16x32xf32, #tpu.memory_space<vmem>>, vector<1x16x32xf32>
    %22 = vector.shape_cast %21 : vector<1x16x32xf32> to vector<16x32xf32>
    %23 = vector.shape_cast %20 : vector<16x32xf32> to vector<1x16x32xf32>
    tpu.vector_store %arg3[%c0_14, %c0_15, %c0_16], %23 {strides = array<i32>} : memref<2x16x32xf32, #tpu.memory_space<vmem>>, vector<1x16x32xf32>,
    %c1_17 = arith.constant 1 : index
    %c0_18 = arith.constant 0 : index
    %c0_19 = arith.constant 0 : index
    %24 = vector.load %arg0[%c1_17, %c0_18, %c0_19] : memref<2x18x16xf32, #tpu.memory_space<vmem>>, vector<1x18x16xf32>
    %25 = vector.shape_cast %24 : vector<1x18x16xf32> to vector<18x16xf32>
    %26 = vector.extract_strided_slice %25 {offsets = [0, 0], sizes = [16, 16], strides = [1, 1]} : vector<18x16xf32> to vector<16x16xf32>
    %c0_20 = arith.constant 0 : index
    %c0_21 = arith.constant 0 : index
    %c0_22 = arith.constant 0 : index
    %27 = vector.load %arg1[%c0_20, %c0_21, %c0_22] : memref<3x16x32xf32, #tpu.memory_space<vmem>>, vector<1x16x32xf32>
    %28 = vector.shape_cast %27 : vector<1x16x32xf32> to vector<16x32xf32>
    %cst_23 = arith.constant dense<0.000000e+00> : vector<16x32xf32>
    %29 = tpu.matmul %26, %28, %cst_23 {dimension_numbers = #tpu.dot_dimension_numbers<[1], [0], [0], [1], [0, 0, 1, 1], [], []>} : vector<16x16xf32>, vector<16x32xf32>, vector<16x32xf32> -> vector<16x32xf32>
    %30 = vector.extract_strided_slice %25 {offsets = [1, 0], sizes = [16, 16], strides = [1, 1]} : vector<18x16xf32> to vector<16x16xf32>
    %c1_24 = arith.constant 1 : index
    %c0_25 = arith.constant 0 : index
    %c0_26 = arith.constant 0 : index
    %31 = vector.load %arg1[%c1_24, %c0_25, %c0_26] : memref<3x16x32xf32, #tpu.memory_space<vmem>>, vector<1x16x32xf32>
    %32 = vector.shape_cast %31 : vector<1x16x32xf32> to vector<16x32xf32>
    %cst_27 = arith.constant dense<0.000000e+00> : vector<16x32xf32>
    %33 = tpu.matmul %30, %32, %cst_27 {dimension_numbers = #tpu.dot_dimension_numbers<[1], [0], [0], [1], [0, 0, 1, 1], [], []>} : vector<16x16xf32>, vector<16x32xf32>, vector<16x32xf32> -> vector<16x32xf32>
    %34 = arith.addf %29, %33 : vector<16x32xf32>
    %35 = vector.extract_strided_slice %25 {offsets = [2, 0], sizes = [16, 16], strides = [1, 1]} : vector<18x16xf32> to vector<16x16xf32>
    %c2_28 = arith.constant 2 : index
    %c0_29 = arith.constant 0 : index
    %c0_30 = arith.constant 0 : index
    %36 = vector.load %arg1[%c2_28, %c0_29, %c0_30] : memref<3x16x32xf32, #tpu.memory_space<vmem>>, vector<1x16x32xf32>
    %37 = vector.shape_cast %36 : vector<1x16x32xf32> to vector<16x32xf32>
    %cst_31 = arith.constant dense<0.000000e+00> : vector<16x32xf32>
    %38 = tpu.matmul %35, %37, %cst_31 {dimension_numbers = #tpu.dot_dimension_numbers<[1], [0], [0], [1], [0, 0, 1, 1], [], []>} : vector<16x16xf32>, vector<16x32xf32>, vector<16x32xf32> -> vector<16x32xf32>
    %39 = arith.addf %34, %38 : vector<16x32xf32>
    %c0_32 = arith.constant 0 : index
    %c0_33 = arith.constant 0 : index
    %40 = vector.load %arg2[%c0_32, %c0_33] : memref<1x32xf32, #tpu.memory_space<vmem>>, vector<1x32xf32>
    %41 = vector.broadcast %40 : vector<1x32xf32> to vector<16x32xf32>
    %42 = arith.addf %39, %41 : vector<16x32xf32>
    %cst_34 = arith.constant 0.000000e+00 : f32
    %43 = vector.broadcast %cst_34 : f32 to vector<16x32xf32>
    %44 = arith.maximumf %42, %43 : vector<16x32xf32>
    %c1_35 = arith.constant 1 : index
    %c0_36 = arith.constant 0 : index
    %c0_37 = arith.constant 0 : index
    %45 = vector.load %arg3[%c1_35, %c0_36, %c0_37] : memref<2x16x32xf32, #tpu.memory_space<vmem>>, vector<1x16x32xf32>
    %46 = vector.shape_cast %45 : vector<1x16x32xf32> to vector<16x32xf32>
    %47 = vector.shape_cast %44 : vector<16x32xf32> to vector<1x16x32xf32>
    tpu.vector_store %arg3[%c1_35, %c0_36, %c0_37], %47 {strides = array<i32>} : memref<2x16x32xf32, #tpu.memory_space<vmem>>, vector<1x16x32xf32>,
    return
  }
}

module attributes {stable_mosaic.version = 11 : i64} {
  func.func @kernel(%arg0: memref<2x9x32xf32, #tpu.memory_space<vmem>>, %arg1: memref<2x9x32xf32, #tpu.memory_space<vmem>>, %arg2: memref<4x32x32xf32, #tpu.memory_space<vmem>>, %arg3: memref<1x32xf32, #tpu.memory_space<vmem>>, %arg4: memref<2x8x32xf32, #tpu.memory_space<vmem>>) attributes {dimension_semantics = [], scalar_prefetch = 0 : i64, scratch_operands = 0 : i64, tpu.core_type = #tpu.core_type<tc>} {
    %c0 = arith.constant 0 : index
    %c0_0 = arith.constant 0 : index
    %c0_1 = arith.constant 0 : index
    %0 = vector.load %arg0[%c0, %c0_0, %c0_1] : memref<2x9x32xf32, #tpu.memory_space<vmem>>, vector<1x9x32xf32>
    %1 = vector.shape_cast %0 : vector<1x9x32xf32> to vector<9x32xf32>
    %c0_2 = arith.constant 0 : index
    %c0_3 = arith.constant 0 : index
    %c0_4 = arith.constant 0 : index
    %2 = vector.load %arg1[%c0_2, %c0_3, %c0_4] : memref<2x9x32xf32, #tpu.memory_space<vmem>>, vector<1x9x32xf32>
    %3 = vector.shape_cast %2 : vector<1x9x32xf32> to vector<9x32xf32>
    %4 = vector.extract_strided_slice %1 {offsets = [0, 0], sizes = [8, 32], strides = [1, 1]} : vector<9x32xf32> to vector<8x32xf32>
    %c0_5 = arith.constant 0 : index
    %c0_6 = arith.constant 0 : index
    %c0_7 = arith.constant 0 : index
    %5 = vector.load %arg2[%c0_5, %c0_6, %c0_7] : memref<4x32x32xf32, #tpu.memory_space<vmem>>, vector<1x32x32xf32>
    %6 = vector.shape_cast %5 : vector<1x32x32xf32> to vector<32x32xf32>
    %cst = arith.constant dense<0.000000e+00> : vector<8x32xf32>
    %7 = tpu.matmul %4, %6, %cst {dimension_numbers = #tpu.dot_dimension_numbers<[1], [0], [0], [1], [0, 0, 1, 1], [], []>} : vector<8x32xf32>, vector<32x32xf32>, vector<8x32xf32> -> vector<8x32xf32>
    %8 = vector.extract_strided_slice %3 {offsets = [0, 0], sizes = [8, 32], strides = [1, 1]} : vector<9x32xf32> to vector<8x32xf32>
    %c1 = arith.constant 1 : index
    %c0_8 = arith.constant 0 : index
    %c0_9 = arith.constant 0 : index
    %9 = vector.load %arg2[%c1, %c0_8, %c0_9] : memref<4x32x32xf32, #tpu.memory_space<vmem>>, vector<1x32x32xf32>
    %10 = vector.shape_cast %9 : vector<1x32x32xf32> to vector<32x32xf32>
    %cst_10 = arith.constant dense<0.000000e+00> : vector<8x32xf32>
    %11 = tpu.matmul %8, %10, %cst_10 {dimension_numbers = #tpu.dot_dimension_numbers<[1], [0], [0], [1], [0, 0, 1, 1], [], []>} : vector<8x32xf32>, vector<32x32xf32>, vector<8x32xf32> -> vector<8x32xf32>
    %12 = arith.addf %7, %11 : vector<8x32xf32>
    %13 = vector.extract_strided_slice %1 {offsets = [1, 0], sizes = [8, 32], strides = [1, 1]} : vector<9x32xf32> to vector<8x32xf32>
    %c2 = arith.constant 2 : index
    %c0_11 = arith.constant 0 : index
    %c0_12 = arith.constant 0 : index
    %14 = vector.load %arg2[%c2, %c0_11, %c0_12] : memref<4x32x32xf32, #tpu.memory_space<vmem>>, vector<1x32x32xf32>
    %15 = vector.shape_cast %14 : vector<1x32x32xf32> to vector<32x32xf32>
    %cst_13 = arith.constant dense<0.000000e+00> : vector<8x32xf32>
    %16 = tpu.matmul %13, %15, %cst_13 {dimension_numbers = #tpu.dot_dimension_numbers<[1], [0], [0], [1], [0, 0, 1, 1], [], []>} : vector<8x32xf32>, vector<32x32xf32>, vector<8x32xf32> -> vector<8x32xf32>
    %17 = arith.addf %12, %16 : vector<8x32xf32>
    %18 = vector.extract_strided_slice %3 {offsets = [1, 0], sizes = [8, 32], strides = [1, 1]} : vector<9x32xf32> to vector<8x32xf32>
    %c3 = arith.constant 3 : index
    %c0_14 = arith.constant 0 : index
    %c0_15 = arith.constant 0 : index
    %19 = vector.load %arg2[%c3, %c0_14, %c0_15] : memref<4x32x32xf32, #tpu.memory_space<vmem>>, vector<1x32x32xf32>
    %20 = vector.shape_cast %19 : vector<1x32x32xf32> to vector<32x32xf32>
    %cst_16 = arith.constant dense<0.000000e+00> : vector<8x32xf32>
    %21 = tpu.matmul %18, %20, %cst_16 {dimension_numbers = #tpu.dot_dimension_numbers<[1], [0], [0], [1], [0, 0, 1, 1], [], []>} : vector<8x32xf32>, vector<32x32xf32>, vector<8x32xf32> -> vector<8x32xf32>
    %22 = arith.addf %17, %21 : vector<8x32xf32>
    %c0_17 = arith.constant 0 : index
    %c0_18 = arith.constant 0 : index
    %23 = vector.load %arg3[%c0_17, %c0_18] : memref<1x32xf32, #tpu.memory_space<vmem>>, vector<1x32xf32>
    %24 = vector.broadcast %23 : vector<1x32xf32> to vector<8x32xf32>
    %25 = arith.addf %22, %24 : vector<8x32xf32>
    %c0_19 = arith.constant 0 : index
    %c0_20 = arith.constant 0 : index
    %c0_21 = arith.constant 0 : index
    %26 = vector.load %arg4[%c0_19, %c0_20, %c0_21] : memref<2x8x32xf32, #tpu.memory_space<vmem>>, vector<1x8x32xf32>
    %27 = vector.shape_cast %26 : vector<1x8x32xf32> to vector<8x32xf32>
    %28 = vector.shape_cast %25 : vector<8x32xf32> to vector<1x8x32xf32>
    tpu.vector_store %arg4[%c0_19, %c0_20, %c0_21], %28 {strides = array<i32>} : memref<2x8x32xf32, #tpu.memory_space<vmem>>, vector<1x8x32xf32>,
    %c1_22 = arith.constant 1 : index
    %c0_23 = arith.constant 0 : index
    %c0_24 = arith.constant 0 : index
    %29 = vector.load %arg0[%c1_22, %c0_23, %c0_24] : memref<2x9x32xf32, #tpu.memory_space<vmem>>, vector<1x9x32xf32>
    %30 = vector.shape_cast %29 : vector<1x9x32xf32> to vector<9x32xf32>
    %c1_25 = arith.constant 1 : index
    %c0_26 = arith.constant 0 : index
    %c0_27 = arith.constant 0 : index
    %31 = vector.load %arg1[%c1_25, %c0_26, %c0_27] : memref<2x9x32xf32, #tpu.memory_space<vmem>>, vector<1x9x32xf32>
    %32 = vector.shape_cast %31 : vector<1x9x32xf32> to vector<9x32xf32>
    %33 = vector.extract_strided_slice %30 {offsets = [0, 0], sizes = [8, 32], strides = [1, 1]} : vector<9x32xf32> to vector<8x32xf32>
    %c0_28 = arith.constant 0 : index
    %c0_29 = arith.constant 0 : index
    %c0_30 = arith.constant 0 : index
    %34 = vector.load %arg2[%c0_28, %c0_29, %c0_30] : memref<4x32x32xf32, #tpu.memory_space<vmem>>, vector<1x32x32xf32>
    %35 = vector.shape_cast %34 : vector<1x32x32xf32> to vector<32x32xf32>
    %cst_31 = arith.constant dense<0.000000e+00> : vector<8x32xf32>
    %36 = tpu.matmul %33, %35, %cst_31 {dimension_numbers = #tpu.dot_dimension_numbers<[1], [0], [0], [1], [0, 0, 1, 1], [], []>} : vector<8x32xf32>, vector<32x32xf32>, vector<8x32xf32> -> vector<8x32xf32>
    %37 = vector.extract_strided_slice %32 {offsets = [0, 0], sizes = [8, 32], strides = [1, 1]} : vector<9x32xf32> to vector<8x32xf32>
    %c1_32 = arith.constant 1 : index
    %c0_33 = arith.constant 0 : index
    %c0_34 = arith.constant 0 : index
    %38 = vector.load %arg2[%c1_32, %c0_33, %c0_34] : memref<4x32x32xf32, #tpu.memory_space<vmem>>, vector<1x32x32xf32>
    %39 = vector.shape_cast %38 : vector<1x32x32xf32> to vector<32x32xf32>
    %cst_35 = arith.constant dense<0.000000e+00> : vector<8x32xf32>
    %40 = tpu.matmul %37, %39, %cst_35 {dimension_numbers = #tpu.dot_dimension_numbers<[1], [0], [0], [1], [0, 0, 1, 1], [], []>} : vector<8x32xf32>, vector<32x32xf32>, vector<8x32xf32> -> vector<8x32xf32>
    %41 = arith.addf %36, %40 : vector<8x32xf32>
    %42 = vector.extract_strided_slice %30 {offsets = [1, 0], sizes = [8, 32], strides = [1, 1]} : vector<9x32xf32> to vector<8x32xf32>
    %c2_36 = arith.constant 2 : index
    %c0_37 = arith.constant 0 : index
    %c0_38 = arith.constant 0 : index
    %43 = vector.load %arg2[%c2_36, %c0_37, %c0_38] : memref<4x32x32xf32, #tpu.memory_space<vmem>>, vector<1x32x32xf32>
    %44 = vector.shape_cast %43 : vector<1x32x32xf32> to vector<32x32xf32>
    %cst_39 = arith.constant dense<0.000000e+00> : vector<8x32xf32>
    %45 = tpu.matmul %42, %44, %cst_39 {dimension_numbers = #tpu.dot_dimension_numbers<[1], [0], [0], [1], [0, 0, 1, 1], [], []>} : vector<8x32xf32>, vector<32x32xf32>, vector<8x32xf32> -> vector<8x32xf32>
    %46 = arith.addf %41, %45 : vector<8x32xf32>
    %47 = vector.extract_strided_slice %32 {offsets = [1, 0], sizes = [8, 32], strides = [1, 1]} : vector<9x32xf32> to vector<8x32xf32>
    %c3_40 = arith.constant 3 : index
    %c0_41 = arith.constant 0 : index
    %c0_42 = arith.constant 0 : index
    %48 = vector.load %arg2[%c3_40, %c0_41, %c0_42] : memref<4x32x32xf32, #tpu.memory_space<vmem>>, vector<1x32x32xf32>
    %49 = vector.shape_cast %48 : vector<1x32x32xf32> to vector<32x32xf32>
    %cst_43 = arith.constant dense<0.000000e+00> : vector<8x32xf32>
    %50 = tpu.matmul %47, %49, %cst_43 {dimension_numbers = #tpu.dot_dimension_numbers<[1], [0], [0], [1], [0, 0, 1, 1], [], []>} : vector<8x32xf32>, vector<32x32xf32>, vector<8x32xf32> -> vector<8x32xf32>
    %51 = arith.addf %46, %50 : vector<8x32xf32>
    %c0_44 = arith.constant 0 : index
    %c0_45 = arith.constant 0 : index
    %52 = vector.load %arg3[%c0_44, %c0_45] : memref<1x32xf32, #tpu.memory_space<vmem>>, vector<1x32xf32>
    %53 = vector.broadcast %52 : vector<1x32xf32> to vector<8x32xf32>
    %54 = arith.addf %51, %53 : vector<8x32xf32>
    %c1_46 = arith.constant 1 : index
    %c0_47 = arith.constant 0 : index
    %c0_48 = arith.constant 0 : index
    %55 = vector.load %arg4[%c1_46, %c0_47, %c0_48] : memref<2x8x32xf32, #tpu.memory_space<vmem>>, vector<1x8x32xf32>
    %56 = vector.shape_cast %55 : vector<1x8x32xf32> to vector<8x32xf32>
    %57 = vector.shape_cast %54 : vector<8x32xf32> to vector<1x8x32xf32>
    tpu.vector_store %arg4[%c1_46, %c0_47, %c0_48], %57 {strides = array<i32>} : memref<2x8x32xf32, #tpu.memory_space<vmem>>, vector<1x8x32xf32>,
    return
  }
}

module attributes {stable_mosaic.version = 11 : i64} {
  func.func @kernel(%arg0: memref<2x8x32xf32, #tpu.memory_space<vmem>>, %arg1: memref<3x32x32xf32, #tpu.memory_space<vmem>>, %arg2: memref<1x32xf32, #tpu.memory_space<vmem>>, %arg3: memref<1x32x32xf32, #tpu.memory_space<vmem>>, %arg4: memref<1x32xf32, #tpu.memory_space<vmem>>, %arg5: memref<3x32x32xf32, #tpu.memory_space<vmem>>, %arg6: memref<1x32xf32, #tpu.memory_space<vmem>>, %arg7: memref<1x32x32xf32, #tpu.memory_space<vmem>>, %arg8: memref<1x32xf32, #tpu.memory_space<vmem>>, %arg9: memref<2x8x32xf32, #tpu.memory_space<vmem>>, %arg10: memref<14x32xf32, #tpu.memory_space<vmem>>) attributes {dimension_semantics = [], scalar_prefetch = 0 : i64, scratch_operands = 1 : i64, tpu.core_type = #tpu.core_type<tc>} {
    %cst = arith.constant 0.000000e+00 : f32
    %0 = vector.broadcast %cst : f32 to vector<14x32xf32>
    %c0 = arith.constant 0 : index
    %c0_0 = arith.constant 0 : index
    %1 = vector.load %arg10[%c0, %c0_0] : memref<14x32xf32, #tpu.memory_space<vmem>>, vector<14x32xf32>
    tpu.vector_store %arg10[%c0, %c0_0], %0 {strides = array<i32>} : memref<14x32xf32, #tpu.memory_space<vmem>>, vector<14x32xf32>,
    %c0_1 = arith.constant 0 : index
    %c0_2 = arith.constant 0 : index
    %c0_3 = arith.constant 0 : index
    %2 = vector.load %arg0[%c0_1, %c0_2, %c0_3] : memref<2x8x32xf32, #tpu.memory_space<vmem>>, vector<1x8x32xf32>
    %3 = vector.shape_cast %2 : vector<1x8x32xf32> to vector<8x32xf32>
    %c3 = arith.constant 3 : index
    %c0_4 = arith.constant 0 : index
    %4 = vector.load %arg10[%c3, %c0_4] : memref<14x32xf32, #tpu.memory_space<vmem>>, vector<8x32xf32>
    tpu.vector_store %arg10[%c3, %c0_4], %3 {strides = array<i32>} : memref<14x32xf32, #tpu.memory_space<vmem>>, vector<8x32xf32>,
    %c0_5 = arith.constant 0 : index
    %c0_6 = arith.constant 0 : index
    %5 = vector.load %arg10[%c0_5, %c0_6] : memref<14x32xf32, #tpu.memory_space<vmem>>, vector<14x32xf32>
    %cst_7 = arith.constant 0.000000e+00 : f32
    %6 = vector.broadcast %cst_7 : f32 to vector<14x32xf32>
    %7 = arith.maximumf %5, %6 : vector<14x32xf32>
    %8 = vector.extract_strided_slice %7 {offsets = [0, 0], sizes = [8, 32], strides = [1, 1]} : vector<14x32xf32> to vector<8x32xf32>
    %c0_8 = arith.constant 0 : index
    %c0_9 = arith.constant 0 : index
    %c0_10 = arith.constant 0 : index
    %9 = vector.load %arg1[%c0_8, %c0_9, %c0_10] : memref<3x32x32xf32, #tpu.memory_space<vmem>>, vector<1x32x32xf32>
    %10 = vector.shape_cast %9 : vector<1x32x32xf32> to vector<32x32xf32>
    %cst_11 = arith.constant dense<0.000000e+00> : vector<8x32xf32>
    %11 = tpu.matmul %8, %10, %cst_11 {dimension_numbers = #tpu.dot_dimension_numbers<[1], [0], [0], [1], [0, 0, 1, 1], [], []>} : vector<8x32xf32>, vector<32x32xf32>, vector<8x32xf32> -> vector<8x32xf32>
    %12 = vector.extract_strided_slice %7 {offsets = [3, 0], sizes = [8, 32], strides = [1, 1]} : vector<14x32xf32> to vector<8x32xf32>
    %c1 = arith.constant 1 : index
    %c0_12 = arith.constant 0 : index
    %c0_13 = arith.constant 0 : index
    %13 = vector.load %arg1[%c1, %c0_12, %c0_13] : memref<3x32x32xf32, #tpu.memory_space<vmem>>, vector<1x32x32xf32>
    %14 = vector.shape_cast %13 : vector<1x32x32xf32> to vector<32x32xf32>
    %cst_14 = arith.constant dense<0.000000e+00> : vector<8x32xf32>
    %15 = tpu.matmul %12, %14, %cst_14 {dimension_numbers = #tpu.dot_dimension_numbers<[1], [0], [0], [1], [0, 0, 1, 1], [], []>} : vector<8x32xf32>, vector<32x32xf32>, vector<8x32xf32> -> vector<8x32xf32>
    %16 = arith.addf %11, %15 : vector<8x32xf32>
    %17 = vector.extract_strided_slice %7 {offsets = [6, 0], sizes = [8, 32], strides = [1, 1]} : vector<14x32xf32> to vector<8x32xf32>
    %c2 = arith.constant 2 : index
    %c0_15 = arith.constant 0 : index
    %c0_16 = arith.constant 0 : index
    %18 = vector.load %arg1[%c2, %c0_15, %c0_16] : memref<3x32x32xf32, #tpu.memory_space<vmem>>, vector<1x32x32xf32>
    %19 = vector.shape_cast %18 : vector<1x32x32xf32> to vector<32x32xf32>
    %cst_17 = arith.constant dense<0.000000e+00> : vector<8x32xf32>
    %20 = tpu.matmul %17, %19, %cst_17 {dimension_numbers = #tpu.dot_dimension_numbers<[1], [0], [0], [1], [0, 0, 1, 1], [], []>} : vector<8x32xf32>, vector<32x32xf32>, vector<8x32xf32> -> vector<8x32xf32>
    %21 = arith.addf %16, %20 : vector<8x32xf32>
    %c0_18 = arith.constant 0 : index
    %c0_19 = arith.constant 0 : index
    %22 = vector.load %arg2[%c0_18, %c0_19] : memref<1x32xf32, #tpu.memory_space<vmem>>, vector<1x32xf32>
    %23 = vector.broadcast %22 : vector<1x32xf32> to vector<8x32xf32>
    %24 = arith.addf %21, %23 : vector<8x32xf32>
    %cst_20 = arith.constant 0.000000e+00 : f32
    %25 = vector.broadcast %cst_20 : f32 to vector<8x32xf32>
    %26 = arith.maximumf %24, %25 : vector<8x32xf32>
    %c0_21 = arith.constant 0 : index
    %c0_22 = arith.constant 0 : index
    %c0_23 = arith.constant 0 : index
    %27 = vector.load %arg3[%c0_21, %c0_22, %c0_23] : memref<1x32x32xf32, #tpu.memory_space<vmem>>, vector<1x32x32xf32>
    %28 = vector.shape_cast %27 : vector<1x32x32xf32> to vector<32x32xf32>
    %cst_24 = arith.constant dense<0.000000e+00> : vector<8x32xf32>
    %29 = tpu.matmul %26, %28, %cst_24 {dimension_numbers = #tpu.dot_dimension_numbers<[1], [0], [0], [1], [0, 0, 1, 1], [], []>} : vector<8x32xf32>, vector<32x32xf32>, vector<8x32xf32> -> vector<8x32xf32>
    %c0_25 = arith.constant 0 : index
    %c0_26 = arith.constant 0 : index
    %30 = vector.load %arg4[%c0_25, %c0_26] : memref<1x32xf32, #tpu.memory_space<vmem>>, vector<1x32xf32>
    %31 = vector.broadcast %30 : vector<1x32xf32> to vector<8x32xf32>
    %32 = arith.addf %29, %31 : vector<8x32xf32>
    %c3_27 = arith.constant 3 : index
    %c0_28 = arith.constant 0 : index
    %33 = vector.load %arg10[%c3_27, %c0_28] : memref<14x32xf32, #tpu.memory_space<vmem>>, vector<8x32xf32>
    %34 = arith.addf %32, %33 : vector<8x32xf32>
    %c3_29 = arith.constant 3 : index
    %c0_30 = arith.constant 0 : index
    %35 = vector.load %arg10[%c3_29, %c0_30] : memref<14x32xf32, #tpu.memory_space<vmem>>, vector<8x32xf32>
    tpu.vector_store %arg10[%c3_29, %c0_30], %34 {strides = array<i32>} : memref<14x32xf32, #tpu.memory_space<vmem>>, vector<8x32xf32>,
    %c0_31 = arith.constant 0 : index
    %c0_32 = arith.constant 0 : index
    %36 = vector.load %arg10[%c0_31, %c0_32] : memref<14x32xf32, #tpu.memory_space<vmem>>, vector<14x32xf32>
    %cst_33 = arith.constant 0.000000e+00 : f32
    %37 = vector.broadcast %cst_33 : f32 to vector<14x32xf32>
    %38 = arith.maximumf %36, %37 : vector<14x32xf32>
    %39 = vector.extract_strided_slice %38 {offsets = [2, 0], sizes = [8, 32], strides = [1, 1]} : vector<14x32xf32> to vector<8x32xf32>
    %c0_34 = arith.constant 0 : index
    %c0_35 = arith.constant 0 : index
    %c0_36 = arith.constant 0 : index
    %40 = vector.load %arg5[%c0_34, %c0_35, %c0_36] : memref<3x32x32xf32, #tpu.memory_space<vmem>>, vector<1x32x32xf32>
    %41 = vector.shape_cast %40 : vector<1x32x32xf32> to vector<32x32xf32>
    %cst_37 = arith.constant dense<0.000000e+00> : vector<8x32xf32>
    %42 = tpu.matmul %39, %41, %cst_37 {dimension_numbers = #tpu.dot_dimension_numbers<[1], [0], [0], [1], [0, 0, 1, 1], [], []>} : vector<8x32xf32>, vector<32x32xf32>, vector<8x32xf32> -> vector<8x32xf32>
    %43 = vector.extract_strided_slice %38 {offsets = [3, 0], sizes = [8, 32], strides = [1, 1]} : vector<14x32xf32> to vector<8x32xf32>
    %c1_38 = arith.constant 1 : index
    %c0_39 = arith.constant 0 : index
    %c0_40 = arith.constant 0 : index
    %44 = vector.load %arg5[%c1_38, %c0_39, %c0_40] : memref<3x32x32xf32, #tpu.memory_space<vmem>>, vector<1x32x32xf32>
    %45 = vector.shape_cast %44 : vector<1x32x32xf32> to vector<32x32xf32>
    %cst_41 = arith.constant dense<0.000000e+00> : vector<8x32xf32>
    %46 = tpu.matmul %43, %45, %cst_41 {dimension_numbers = #tpu.dot_dimension_numbers<[1], [0], [0], [1], [0, 0, 1, 1], [], []>} : vector<8x32xf32>, vector<32x32xf32>, vector<8x32xf32> -> vector<8x32xf32>
    %47 = arith.addf %42, %46 : vector<8x32xf32>
    %48 = vector.extract_strided_slice %38 {offsets = [4, 0], sizes = [8, 32], strides = [1, 1]} : vector<14x32xf32> to vector<8x32xf32>
    %c2_42 = arith.constant 2 : index
    %c0_43 = arith.constant 0 : index
    %c0_44 = arith.constant 0 : index
    %49 = vector.load %arg5[%c2_42, %c0_43, %c0_44] : memref<3x32x32xf32, #tpu.memory_space<vmem>>, vector<1x32x32xf32>
    %50 = vector.shape_cast %49 : vector<1x32x32xf32> to vector<32x32xf32>
    %cst_45 = arith.constant dense<0.000000e+00> : vector<8x32xf32>
    %51 = tpu.matmul %48, %50, %cst_45 {dimension_numbers = #tpu.dot_dimension_numbers<[1], [0], [0], [1], [0, 0, 1, 1], [], []>} : vector<8x32xf32>, vector<32x32xf32>, vector<8x32xf32> -> vector<8x32xf32>
    %52 = arith.addf %47, %51 : vector<8x32xf32>
    %c0_46 = arith.constant 0 : index
    %c0_47 = arith.constant 0 : index
    %53 = vector.load %arg6[%c0_46, %c0_47] : memref<1x32xf32, #tpu.memory_space<vmem>>, vector<1x32xf32>
    %54 = vector.broadcast %53 : vector<1x32xf32> to vector<8x32xf32>
    %55 = arith.addf %52, %54 : vector<8x32xf32>
    %cst_48 = arith.constant 0.000000e+00 : f32
    %56 = vector.broadcast %cst_48 : f32 to vector<8x32xf32>
    %57 = arith.maximumf %55, %56 : vector<8x32xf32>
    %c0_49 = arith.constant 0 : index
    %c0_50 = arith.constant 0 : index
    %c0_51 = arith.constant 0 : index
    %58 = vector.load %arg7[%c0_49, %c0_50, %c0_51] : memref<1x32x32xf32, #tpu.memory_space<vmem>>, vector<1x32x32xf32>
    %59 = vector.shape_cast %58 : vector<1x32x32xf32> to vector<32x32xf32>
    %cst_52 = arith.constant dense<0.000000e+00> : vector<8x32xf32>
    %60 = tpu.matmul %57, %59, %cst_52 {dimension_numbers = #tpu.dot_dimension_numbers<[1], [0], [0], [1], [0, 0, 1, 1], [], []>} : vector<8x32xf32>, vector<32x32xf32>, vector<8x32xf32> -> vector<8x32xf32>
    %c0_53 = arith.constant 0 : index
    %c0_54 = arith.constant 0 : index
    %61 = vector.load %arg8[%c0_53, %c0_54] : memref<1x32xf32, #tpu.memory_space<vmem>>, vector<1x32xf32>
    %62 = vector.broadcast %61 : vector<1x32xf32> to vector<8x32xf32>
    %63 = arith.addf %60, %62 : vector<8x32xf32>
    %c3_55 = arith.constant 3 : index
    %c0_56 = arith.constant 0 : index
    %64 = vector.load %arg10[%c3_55, %c0_56] : memref<14x32xf32, #tpu.memory_space<vmem>>, vector<8x32xf32>
    %65 = arith.addf %63, %64 : vector<8x32xf32>
    %c3_57 = arith.constant 3 : index
    %c0_58 = arith.constant 0 : index
    %66 = vector.load %arg10[%c3_57, %c0_58] : memref<14x32xf32, #tpu.memory_space<vmem>>, vector<8x32xf32>
    tpu.vector_store %arg10[%c3_57, %c0_58], %65 {strides = array<i32>} : memref<14x32xf32, #tpu.memory_space<vmem>>, vector<8x32xf32>,
    %c3_59 = arith.constant 3 : index
    %c0_60 = arith.constant 0 : index
    %67 = vector.load %arg10[%c3_59, %c0_60] : memref<14x32xf32, #tpu.memory_space<vmem>>, vector<8x32xf32>
    %c0_61 = arith.constant 0 : index
    %c0_62 = arith.constant 0 : index
    %c0_63 = arith.constant 0 : index
    %68 = vector.load %arg9[%c0_61, %c0_62, %c0_63] : memref<2x8x32xf32, #tpu.memory_space<vmem>>, vector<1x8x32xf32>
    %69 = vector.shape_cast %68 : vector<1x8x32xf32> to vector<8x32xf32>
    %70 = vector.shape_cast %67 : vector<8x32xf32> to vector<1x8x32xf32>
    tpu.vector_store %arg9[%c0_61, %c0_62, %c0_63], %70 {strides = array<i32>} : memref<2x8x32xf32, #tpu.memory_space<vmem>>, vector<1x8x32xf32>,
    %c1_64 = arith.constant 1 : index
    %c0_65 = arith.constant 0 : index
    %c0_66 = arith.constant 0 : index
    %71 = vector.load %arg0[%c1_64, %c0_65, %c0_66] : memref<2x8x32xf32, #tpu.memory_space<vmem>>, vector<1x8x32xf32>
    %72 = vector.shape_cast %71 : vector<1x8x32xf32> to vector<8x32xf32>
    %c3_67 = arith.constant 3 : index
    %c0_68 = arith.constant 0 : index
    %73 = vector.load %arg10[%c3_67, %c0_68] : memref<14x32xf32, #tpu.memory_space<vmem>>, vector<8x32xf32>
    tpu.vector_store %arg10[%c3_67, %c0_68], %72 {strides = array<i32>} : memref<14x32xf32, #tpu.memory_space<vmem>>, vector<8x32xf32>,
    %c0_69 = arith.constant 0 : index
    %c0_70 = arith.constant 0 : index
    %74 = vector.load %arg10[%c0_69, %c0_70] : memref<14x32xf32, #tpu.memory_space<vmem>>, vector<14x32xf32>
    %cst_71 = arith.constant 0.000000e+00 : f32
    %75 = vector.broadcast %cst_71 : f32 to vector<14x32xf32>
    %76 = arith.maximumf %74, %75 : vector<14x32xf32>
    %77 = vector.extract_strided_slice %76 {offsets = [0, 0], sizes = [8, 32], strides = [1, 1]} : vector<14x32xf32> to vector<8x32xf32>
    %c0_72 = arith.constant 0 : index
    %c0_73 = arith.constant 0 : index
    %c0_74 = arith.constant 0 : index
    %78 = vector.load %arg1[%c0_72, %c0_73, %c0_74] : memref<3x32x32xf32, #tpu.memory_space<vmem>>, vector<1x32x32xf32>
    %79 = vector.shape_cast %78 : vector<1x32x32xf32> to vector<32x32xf32>
    %cst_75 = arith.constant dense<0.000000e+00> : vector<8x32xf32>
    %80 = tpu.matmul %77, %79, %cst_75 {dimension_numbers = #tpu.dot_dimension_numbers<[1], [0], [0], [1], [0, 0, 1, 1], [], []>} : vector<8x32xf32>, vector<32x32xf32>, vector<8x32xf32> -> vector<8x32xf32>
    %81 = vector.extract_strided_slice %76 {offsets = [3, 0], sizes = [8, 32], strides = [1, 1]} : vector<14x32xf32> to vector<8x32xf32>
    %c1_76 = arith.constant 1 : index
    %c0_77 = arith.constant 0 : index
    %c0_78 = arith.constant 0 : index
    %82 = vector.load %arg1[%c1_76, %c0_77, %c0_78] : memref<3x32x32xf32, #tpu.memory_space<vmem>>, vector<1x32x32xf32>
    %83 = vector.shape_cast %82 : vector<1x32x32xf32> to vector<32x32xf32>
    %cst_79 = arith.constant dense<0.000000e+00> : vector<8x32xf32>
    %84 = tpu.matmul %81, %83, %cst_79 {dimension_numbers = #tpu.dot_dimension_numbers<[1], [0], [0], [1], [0, 0, 1, 1], [], []>} : vector<8x32xf32>, vector<32x32xf32>, vector<8x32xf32> -> vector<8x32xf32>
    %85 = arith.addf %80, %84 : vector<8x32xf32>
    %86 = vector.extract_strided_slice %76 {offsets = [6, 0], sizes = [8, 32], strides = [1, 1]} : vector<14x32xf32> to vector<8x32xf32>
    %c2_80 = arith.constant 2 : index
    %c0_81 = arith.constant 0 : index
    %c0_82 = arith.constant 0 : index
    %87 = vector.load %arg1[%c2_80, %c0_81, %c0_82] : memref<3x32x32xf32, #tpu.memory_space<vmem>>, vector<1x32x32xf32>
    %88 = vector.shape_cast %87 : vector<1x32x32xf32> to vector<32x32xf32>
    %cst_83 = arith.constant dense<0.000000e+00> : vector<8x32xf32>
    %89 = tpu.matmul %86, %88, %cst_83 {dimension_numbers = #tpu.dot_dimension_numbers<[1], [0], [0], [1], [0, 0, 1, 1], [], []>} : vector<8x32xf32>, vector<32x32xf32>, vector<8x32xf32> -> vector<8x32xf32>
    %90 = arith.addf %85, %89 : vector<8x32xf32>
    %c0_84 = arith.constant 0 : index
    %c0_85 = arith.constant 0 : index
    %91 = vector.load %arg2[%c0_84, %c0_85] : memref<1x32xf32, #tpu.memory_space<vmem>>, vector<1x32xf32>
    %92 = vector.broadcast %91 : vector<1x32xf32> to vector<8x32xf32>
    %93 = arith.addf %90, %92 : vector<8x32xf32>
    %cst_86 = arith.constant 0.000000e+00 : f32
    %94 = vector.broadcast %cst_86 : f32 to vector<8x32xf32>
    %95 = arith.maximumf %93, %94 : vector<8x32xf32>
    %c0_87 = arith.constant 0 : index
    %c0_88 = arith.constant 0 : index
    %c0_89 = arith.constant 0 : index
    %96 = vector.load %arg3[%c0_87, %c0_88, %c0_89] : memref<1x32x32xf32, #tpu.memory_space<vmem>>, vector<1x32x32xf32>
    %97 = vector.shape_cast %96 : vector<1x32x32xf32> to vector<32x32xf32>
    %cst_90 = arith.constant dense<0.000000e+00> : vector<8x32xf32>
    %98 = tpu.matmul %95, %97, %cst_90 {dimension_numbers = #tpu.dot_dimension_numbers<[1], [0], [0], [1], [0, 0, 1, 1], [], []>} : vector<8x32xf32>, vector<32x32xf32>, vector<8x32xf32> -> vector<8x32xf32>
    %c0_91 = arith.constant 0 : index
    %c0_92 = arith.constant 0 : index
    %99 = vector.load %arg4[%c0_91, %c0_92] : memref<1x32xf32, #tpu.memory_space<vmem>>, vector<1x32xf32>
    %100 = vector.broadcast %99 : vector<1x32xf32> to vector<8x32xf32>
    %101 = arith.addf %98, %100 : vector<8x32xf32>
    %c3_93 = arith.constant 3 : index
    %c0_94 = arith.constant 0 : index
    %102 = vector.load %arg10[%c3_93, %c0_94] : memref<14x32xf32, #tpu.memory_space<vmem>>, vector<8x32xf32>
    %103 = arith.addf %101, %102 : vector<8x32xf32>
    %c3_95 = arith.constant 3 : index
    %c0_96 = arith.constant 0 : index
    %104 = vector.load %arg10[%c3_95, %c0_96] : memref<14x32xf32, #tpu.memory_space<vmem>>, vector<8x32xf32>
    tpu.vector_store %arg10[%c3_95, %c0_96], %103 {strides = array<i32>} : memref<14x32xf32, #tpu.memory_space<vmem>>, vector<8x32xf32>,
    %c0_97 = arith.constant 0 : index
    %c0_98 = arith.constant 0 : index
    %105 = vector.load %arg10[%c0_97, %c0_98] : memref<14x32xf32, #tpu.memory_space<vmem>>, vector<14x32xf32>
    %cst_99 = arith.constant 0.000000e+00 : f32
    %106 = vector.broadcast %cst_99 : f32 to vector<14x32xf32>
    %107 = arith.maximumf %105, %106 : vector<14x32xf32>
    %108 = vector.extract_strided_slice %107 {offsets = [2, 0], sizes = [8, 32], strides = [1, 1]} : vector<14x32xf32> to vector<8x32xf32>
    %c0_100 = arith.constant 0 : index
    %c0_101 = arith.constant 0 : index
    %c0_102 = arith.constant 0 : index
    %109 = vector.load %arg5[%c0_100, %c0_101, %c0_102] : memref<3x32x32xf32, #tpu.memory_space<vmem>>, vector<1x32x32xf32>
    %110 = vector.shape_cast %109 : vector<1x32x32xf32> to vector<32x32xf32>
    %cst_103 = arith.constant dense<0.000000e+00> : vector<8x32xf32>
    %111 = tpu.matmul %108, %110, %cst_103 {dimension_numbers = #tpu.dot_dimension_numbers<[1], [0], [0], [1], [0, 0, 1, 1], [], []>} : vector<8x32xf32>, vector<32x32xf32>, vector<8x32xf32> -> vector<8x32xf32>
    %112 = vector.extract_strided_slice %107 {offsets = [3, 0], sizes = [8, 32], strides = [1, 1]} : vector<14x32xf32> to vector<8x32xf32>
    %c1_104 = arith.constant 1 : index
    %c0_105 = arith.constant 0 : index
    %c0_106 = arith.constant 0 : index
    %113 = vector.load %arg5[%c1_104, %c0_105, %c0_106] : memref<3x32x32xf32, #tpu.memory_space<vmem>>, vector<1x32x32xf32>
    %114 = vector.shape_cast %113 : vector<1x32x32xf32> to vector<32x32xf32>
    %cst_107 = arith.constant dense<0.000000e+00> : vector<8x32xf32>
    %115 = tpu.matmul %112, %114, %cst_107 {dimension_numbers = #tpu.dot_dimension_numbers<[1], [0], [0], [1], [0, 0, 1, 1], [], []>} : vector<8x32xf32>, vector<32x32xf32>, vector<8x32xf32> -> vector<8x32xf32>
    %116 = arith.addf %111, %115 : vector<8x32xf32>
    %117 = vector.extract_strided_slice %107 {offsets = [4, 0], sizes = [8, 32], strides = [1, 1]} : vector<14x32xf32> to vector<8x32xf32>
    %c2_108 = arith.constant 2 : index
    %c0_109 = arith.constant 0 : index
    %c0_110 = arith.constant 0 : index
    %118 = vector.load %arg5[%c2_108, %c0_109, %c0_110] : memref<3x32x32xf32, #tpu.memory_space<vmem>>, vector<1x32x32xf32>
    %119 = vector.shape_cast %118 : vector<1x32x32xf32> to vector<32x32xf32>
    %cst_111 = arith.constant dense<0.000000e+00> : vector<8x32xf32>
    %120 = tpu.matmul %117, %119, %cst_111 {dimension_numbers = #tpu.dot_dimension_numbers<[1], [0], [0], [1], [0, 0, 1, 1], [], []>} : vector<8x32xf32>, vector<32x32xf32>, vector<8x32xf32> -> vector<8x32xf32>
    %121 = arith.addf %116, %120 : vector<8x32xf32>
    %c0_112 = arith.constant 0 : index
    %c0_113 = arith.constant 0 : index
    %122 = vector.load %arg6[%c0_112, %c0_113] : memref<1x32xf32, #tpu.memory_space<vmem>>, vector<1x32xf32>
    %123 = vector.broadcast %122 : vector<1x32xf32> to vector<8x32xf32>
    %124 = arith.addf %121, %123 : vector<8x32xf32>
    %cst_114 = arith.constant 0.000000e+00 : f32
    %125 = vector.broadcast %cst_114 : f32 to vector<8x32xf32>
    %126 = arith.maximumf %124, %125 : vector<8x32xf32>
    %c0_115 = arith.constant 0 : index
    %c0_116 = arith.constant 0 : index
    %c0_117 = arith.constant 0 : index
    %127 = vector.load %arg7[%c0_115, %c0_116, %c0_117] : memref<1x32x32xf32, #tpu.memory_space<vmem>>, vector<1x32x32xf32>
    %128 = vector.shape_cast %127 : vector<1x32x32xf32> to vector<32x32xf32>
    %cst_118 = arith.constant dense<0.000000e+00> : vector<8x32xf32>
    %129 = tpu.matmul %126, %128, %cst_118 {dimension_numbers = #tpu.dot_dimension_numbers<[1], [0], [0], [1], [0, 0, 1, 1], [], []>} : vector<8x32xf32>, vector<32x32xf32>, vector<8x32xf32> -> vector<8x32xf32>
    %c0_119 = arith.constant 0 : index
    %c0_120 = arith.constant 0 : index
    %130 = vector.load %arg8[%c0_119, %c0_120] : memref<1x32xf32, #tpu.memory_space<vmem>>, vector<1x32xf32>
    %131 = vector.broadcast %130 : vector<1x32xf32> to vector<8x32xf32>
    %132 = arith.addf %129, %131 : vector<8x32xf32>
    %c3_121 = arith.constant 3 : index
    %c0_122 = arith.constant 0 : index
    %133 = vector.load %arg10[%c3_121, %c0_122] : memref<14x32xf32, #tpu.memory_space<vmem>>, vector<8x32xf32>
    %134 = arith.addf %132, %133 : vector<8x32xf32>
    %c3_123 = arith.constant 3 : index
    %c0_124 = arith.constant 0 : index
    %135 = vector.load %arg10[%c3_123, %c0_124] : memref<14x32xf32, #tpu.memory_space<vmem>>, vector<8x32xf32>
    tpu.vector_store %arg10[%c3_123, %c0_124], %134 {strides = array<i32>} : memref<14x32xf32, #tpu.memory_space<vmem>>, vector<8x32xf32>,
    %c3_125 = arith.constant 3 : index
    %c0_126 = arith.constant 0 : index
    %136 = vector.load %arg10[%c3_125, %c0_126] : memref<14x32xf32, #tpu.memory_space<vmem>>, vector<8x32xf32>
    %c1_127 = arith.constant 1 : index
    %c0_128 = arith.constant 0 : index
    %c0_129 = arith.constant 0 : index
    %137 = vector.load %arg9[%c1_127, %c0_128, %c0_129] : memref<2x8x32xf32, #tpu.memory_space<vmem>>, vector<1x8x32xf32>
    %138 = vector.shape_cast %137 : vector<1x8x32xf32> to vector<8x32xf32>
    %139 = vector.shape_cast %136 : vector<8x32xf32> to vector<1x8x32xf32>
    tpu.vector_store %arg9[%c1_127, %c0_128, %c0_129], %139 {strides = array<i32>} : memref<2x8x32xf32, #tpu.memory_space<vmem>>, vector<1x8x32xf32>,
    return
  }
}

module attributes {stable_mosaic.version = 11 : i64} {
  func.func @kernel(%arg0: memref<2x5x32xf32, #tpu.memory_space<vmem>>, %arg1: memref<2x5x32xf32, #tpu.memory_space<vmem>>, %arg2: memref<4x32x32xf32, #tpu.memory_space<vmem>>, %arg3: memref<1x32xf32, #tpu.memory_space<vmem>>, %arg4: memref<2x4x32xf32, #tpu.memory_space<vmem>>) attributes {dimension_semantics = [], scalar_prefetch = 0 : i64, scratch_operands = 0 : i64, tpu.core_type = #tpu.core_type<tc>} {
    %c0 = arith.constant 0 : index
    %c0_0 = arith.constant 0 : index
    %c0_1 = arith.constant 0 : index
    %0 = vector.load %arg0[%c0, %c0_0, %c0_1] : memref<2x5x32xf32, #tpu.memory_space<vmem>>, vector<1x5x32xf32>
    %1 = vector.shape_cast %0 : vector<1x5x32xf32> to vector<5x32xf32>
    %c0_2 = arith.constant 0 : index
    %c0_3 = arith.constant 0 : index
    %c0_4 = arith.constant 0 : index
    %2 = vector.load %arg1[%c0_2, %c0_3, %c0_4] : memref<2x5x32xf32, #tpu.memory_space<vmem>>, vector<1x5x32xf32>
    %3 = vector.shape_cast %2 : vector<1x5x32xf32> to vector<5x32xf32>
    %4 = vector.extract_strided_slice %1 {offsets = [0, 0], sizes = [4, 32], strides = [1, 1]} : vector<5x32xf32> to vector<4x32xf32>
    %c0_5 = arith.constant 0 : index
    %c0_6 = arith.constant 0 : index
    %c0_7 = arith.constant 0 : index
    %5 = vector.load %arg2[%c0_5, %c0_6, %c0_7] : memref<4x32x32xf32, #tpu.memory_space<vmem>>, vector<1x32x32xf32>
    %6 = vector.shape_cast %5 : vector<1x32x32xf32> to vector<32x32xf32>
    %cst = arith.constant dense<0.000000e+00> : vector<4x32xf32>
    %7 = tpu.matmul %4, %6, %cst {dimension_numbers = #tpu.dot_dimension_numbers<[1], [0], [0], [1], [0, 0, 1, 1], [], []>} : vector<4x32xf32>, vector<32x32xf32>, vector<4x32xf32> -> vector<4x32xf32>
    %8 = vector.extract_strided_slice %3 {offsets = [0, 0], sizes = [4, 32], strides = [1, 1]} : vector<5x32xf32> to vector<4x32xf32>
    %c1 = arith.constant 1 : index
    %c0_8 = arith.constant 0 : index
    %c0_9 = arith.constant 0 : index
    %9 = vector.load %arg2[%c1, %c0_8, %c0_9] : memref<4x32x32xf32, #tpu.memory_space<vmem>>, vector<1x32x32xf32>
    %10 = vector.shape_cast %9 : vector<1x32x32xf32> to vector<32x32xf32>
    %cst_10 = arith.constant dense<0.000000e+00> : vector<4x32xf32>
    %11 = tpu.matmul %8, %10, %cst_10 {dimension_numbers = #tpu.dot_dimension_numbers<[1], [0], [0], [1], [0, 0, 1, 1], [], []>} : vector<4x32xf32>, vector<32x32xf32>, vector<4x32xf32> -> vector<4x32xf32>
    %12 = arith.addf %7, %11 : vector<4x32xf32>
    %13 = vector.extract_strided_slice %1 {offsets = [1, 0], sizes = [4, 32], strides = [1, 1]} : vector<5x32xf32> to vector<4x32xf32>
    %c2 = arith.constant 2 : index
    %c0_11 = arith.constant 0 : index
    %c0_12 = arith.constant 0 : index
    %14 = vector.load %arg2[%c2, %c0_11, %c0_12] : memref<4x32x32xf32, #tpu.memory_space<vmem>>, vector<1x32x32xf32>
    %15 = vector.shape_cast %14 : vector<1x32x32xf32> to vector<32x32xf32>
    %cst_13 = arith.constant dense<0.000000e+00> : vector<4x32xf32>
    %16 = tpu.matmul %13, %15, %cst_13 {dimension_numbers = #tpu.dot_dimension_numbers<[1], [0], [0], [1], [0, 0, 1, 1], [], []>} : vector<4x32xf32>, vector<32x32xf32>, vector<4x32xf32> -> vector<4x32xf32>
    %17 = arith.addf %12, %16 : vector<4x32xf32>
    %18 = vector.extract_strided_slice %3 {offsets = [1, 0], sizes = [4, 32], strides = [1, 1]} : vector<5x32xf32> to vector<4x32xf32>
    %c3 = arith.constant 3 : index
    %c0_14 = arith.constant 0 : index
    %c0_15 = arith.constant 0 : index
    %19 = vector.load %arg2[%c3, %c0_14, %c0_15] : memref<4x32x32xf32, #tpu.memory_space<vmem>>, vector<1x32x32xf32>
    %20 = vector.shape_cast %19 : vector<1x32x32xf32> to vector<32x32xf32>
    %cst_16 = arith.constant dense<0.000000e+00> : vector<4x32xf32>
    %21 = tpu.matmul %18, %20, %cst_16 {dimension_numbers = #tpu.dot_dimension_numbers<[1], [0], [0], [1], [0, 0, 1, 1], [], []>} : vector<4x32xf32>, vector<32x32xf32>, vector<4x32xf32> -> vector<4x32xf32>
    %22 = arith.addf %17, %21 : vector<4x32xf32>
    %c0_17 = arith.constant 0 : index
    %c0_18 = arith.constant 0 : index
    %23 = vector.load %arg3[%c0_17, %c0_18] : memref<1x32xf32, #tpu.memory_space<vmem>>, vector<1x32xf32>
    %24 = vector.broadcast %23 : vector<1x32xf32> to vector<4x32xf32>
    %25 = arith.addf %22, %24 : vector<4x32xf32>
    %c0_19 = arith.constant 0 : index
    %c0_20 = arith.constant 0 : index
    %c0_21 = arith.constant 0 : index
    %26 = vector.load %arg4[%c0_19, %c0_20, %c0_21] : memref<2x4x32xf32, #tpu.memory_space<vmem>>, vector<1x4x32xf32>
    %27 = vector.shape_cast %26 : vector<1x4x32xf32> to vector<4x32xf32>
    %28 = vector.shape_cast %25 : vector<4x32xf32> to vector<1x4x32xf32>
    tpu.vector_store %arg4[%c0_19, %c0_20, %c0_21], %28 {strides = array<i32>} : memref<2x4x32xf32, #tpu.memory_space<vmem>>, vector<1x4x32xf32>,
    %c1_22 = arith.constant 1 : index
    %c0_23 = arith.constant 0 : index
    %c0_24 = arith.constant 0 : index
    %29 = vector.load %arg0[%c1_22, %c0_23, %c0_24] : memref<2x5x32xf32, #tpu.memory_space<vmem>>, vector<1x5x32xf32>
    %30 = vector.shape_cast %29 : vector<1x5x32xf32> to vector<5x32xf32>
    %c1_25 = arith.constant 1 : index
    %c0_26 = arith.constant 0 : index
    %c0_27 = arith.constant 0 : index
    %31 = vector.load %arg1[%c1_25, %c0_26, %c0_27] : memref<2x5x32xf32, #tpu.memory_space<vmem>>, vector<1x5x32xf32>
    %32 = vector.shape_cast %31 : vector<1x5x32xf32> to vector<5x32xf32>
    %33 = vector.extract_strided_slice %30 {offsets = [0, 0], sizes = [4, 32], strides = [1, 1]} : vector<5x32xf32> to vector<4x32xf32>
    %c0_28 = arith.constant 0 : index
    %c0_29 = arith.constant 0 : index
    %c0_30 = arith.constant 0 : index
    %34 = vector.load %arg2[%c0_28, %c0_29, %c0_30] : memref<4x32x32xf32, #tpu.memory_space<vmem>>, vector<1x32x32xf32>
    %35 = vector.shape_cast %34 : vector<1x32x32xf32> to vector<32x32xf32>
    %cst_31 = arith.constant dense<0.000000e+00> : vector<4x32xf32>
    %36 = tpu.matmul %33, %35, %cst_31 {dimension_numbers = #tpu.dot_dimension_numbers<[1], [0], [0], [1], [0, 0, 1, 1], [], []>} : vector<4x32xf32>, vector<32x32xf32>, vector<4x32xf32> -> vector<4x32xf32>
    %37 = vector.extract_strided_slice %32 {offsets = [0, 0], sizes = [4, 32], strides = [1, 1]} : vector<5x32xf32> to vector<4x32xf32>
    %c1_32 = arith.constant 1 : index
    %c0_33 = arith.constant 0 : index
    %c0_34 = arith.constant 0 : index
    %38 = vector.load %arg2[%c1_32, %c0_33, %c0_34] : memref<4x32x32xf32, #tpu.memory_space<vmem>>, vector<1x32x32xf32>
    %39 = vector.shape_cast %38 : vector<1x32x32xf32> to vector<32x32xf32>
    %cst_35 = arith.constant dense<0.000000e+00> : vector<4x32xf32>
    %40 = tpu.matmul %37, %39, %cst_35 {dimension_numbers = #tpu.dot_dimension_numbers<[1], [0], [0], [1], [0, 0, 1, 1], [], []>} : vector<4x32xf32>, vector<32x32xf32>, vector<4x32xf32> -> vector<4x32xf32>
    %41 = arith.addf %36, %40 : vector<4x32xf32>
    %42 = vector.extract_strided_slice %30 {offsets = [1, 0], sizes = [4, 32], strides = [1, 1]} : vector<5x32xf32> to vector<4x32xf32>
    %c2_36 = arith.constant 2 : index
    %c0_37 = arith.constant 0 : index
    %c0_38 = arith.constant 0 : index
    %43 = vector.load %arg2[%c2_36, %c0_37, %c0_38] : memref<4x32x32xf32, #tpu.memory_space<vmem>>, vector<1x32x32xf32>
    %44 = vector.shape_cast %43 : vector<1x32x32xf32> to vector<32x32xf32>
    %cst_39 = arith.constant dense<0.000000e+00> : vector<4x32xf32>
    %45 = tpu.matmul %42, %44, %cst_39 {dimension_numbers = #tpu.dot_dimension_numbers<[1], [0], [0], [1], [0, 0, 1, 1], [], []>} : vector<4x32xf32>, vector<32x32xf32>, vector<4x32xf32> -> vector<4x32xf32>
    %46 = arith.addf %41, %45 : vector<4x32xf32>
    %47 = vector.extract_strided_slice %32 {offsets = [1, 0], sizes = [4, 32], strides = [1, 1]} : vector<5x32xf32> to vector<4x32xf32>
    %c3_40 = arith.constant 3 : index
    %c0_41 = arith.constant 0 : index
    %c0_42 = arith.constant 0 : index
    %48 = vector.load %arg2[%c3_40, %c0_41, %c0_42] : memref<4x32x32xf32, #tpu.memory_space<vmem>>, vector<1x32x32xf32>
    %49 = vector.shape_cast %48 : vector<1x32x32xf32> to vector<32x32xf32>
    %cst_43 = arith.constant dense<0.000000e+00> : vector<4x32xf32>
    %50 = tpu.matmul %47, %49, %cst_43 {dimension_numbers = #tpu.dot_dimension_numbers<[1], [0], [0], [1], [0, 0, 1, 1], [], []>} : vector<4x32xf32>, vector<32x32xf32>, vector<4x32xf32> -> vector<4x32xf32>
    %51 = arith.addf %46, %50 : vector<4x32xf32>
    %c0_44 = arith.constant 0 : index
    %c0_45 = arith.constant 0 : index
    %52 = vector.load %arg3[%c0_44, %c0_45] : memref<1x32xf32, #tpu.memory_space<vmem>>, vector<1x32xf32>
    %53 = vector.broadcast %52 : vector<1x32xf32> to vector<4x32xf32>
    %54 = arith.addf %51, %53 : vector<4x32xf32>
    %c1_46 = arith.constant 1 : index
    %c0_47 = arith.constant 0 : index
    %c0_48 = arith.constant 0 : index
    %55 = vector.load %arg4[%c1_46, %c0_47, %c0_48] : memref<2x4x32xf32, #tpu.memory_space<vmem>>, vector<1x4x32xf32>
    %56 = vector.shape_cast %55 : vector<1x4x32xf32> to vector<4x32xf32>
    %57 = vector.shape_cast %54 : vector<4x32xf32> to vector<1x4x32xf32>
    tpu.vector_store %arg4[%c1_46, %c0_47, %c0_48], %57 {strides = array<i32>} : memref<2x4x32xf32, #tpu.memory_space<vmem>>, vector<1x4x32xf32>,
    return
  }
}

module attributes {stable_mosaic.version = 11 : i64} {
  func.func @kernel(%arg0: memref<2x4x32xf32, #tpu.memory_space<vmem>>, %arg1: memref<3x32x32xf32, #tpu.memory_space<vmem>>, %arg2: memref<1x32xf32, #tpu.memory_space<vmem>>, %arg3: memref<1x32x32xf32, #tpu.memory_space<vmem>>, %arg4: memref<1x32xf32, #tpu.memory_space<vmem>>, %arg5: memref<3x32x32xf32, #tpu.memory_space<vmem>>, %arg6: memref<1x32xf32, #tpu.memory_space<vmem>>, %arg7: memref<1x32x32xf32, #tpu.memory_space<vmem>>, %arg8: memref<1x32xf32, #tpu.memory_space<vmem>>, %arg9: memref<2x4x32xf32, #tpu.memory_space<vmem>>, %arg10: memref<10x32xf32, #tpu.memory_space<vmem>>) attributes {dimension_semantics = [], scalar_prefetch = 0 : i64, scratch_operands = 1 : i64, tpu.core_type = #tpu.core_type<tc>} {
    %cst = arith.constant 0.000000e+00 : f32
    %0 = vector.broadcast %cst : f32 to vector<10x32xf32>
    %c0 = arith.constant 0 : index
    %c0_0 = arith.constant 0 : index
    %1 = vector.load %arg10[%c0, %c0_0] : memref<10x32xf32, #tpu.memory_space<vmem>>, vector<10x32xf32>
    tpu.vector_store %arg10[%c0, %c0_0], %0 {strides = array<i32>} : memref<10x32xf32, #tpu.memory_space<vmem>>, vector<10x32xf32>,
    %c0_1 = arith.constant 0 : index
    %c0_2 = arith.constant 0 : index
    %c0_3 = arith.constant 0 : index
    %2 = vector.load %arg0[%c0_1, %c0_2, %c0_3] : memref<2x4x32xf32, #tpu.memory_space<vmem>>, vector<1x4x32xf32>
    %3 = vector.shape_cast %2 : vector<1x4x32xf32> to vector<4x32xf32>
    %c3 = arith.constant 3 : index
    %c0_4 = arith.constant 0 : index
    %4 = vector.load %arg10[%c3, %c0_4] : memref<10x32xf32, #tpu.memory_space<vmem>>, vector<4x32xf32>
    tpu.vector_store %arg10[%c3, %c0_4], %3 {strides = array<i32>} : memref<10x32xf32, #tpu.memory_space<vmem>>, vector<4x32xf32>,
    %c0_5 = arith.constant 0 : index
    %c0_6 = arith.constant 0 : index
    %5 = vector.load %arg10[%c0_5, %c0_6] : memref<10x32xf32, #tpu.memory_space<vmem>>, vector<10x32xf32>
    %cst_7 = arith.constant 0.000000e+00 : f32
    %6 = vector.broadcast %cst_7 : f32 to vector<10x32xf32>
    %7 = arith.maximumf %5, %6 : vector<10x32xf32>
    %8 = vector.extract_strided_slice %7 {offsets = [0, 0], sizes = [4, 32], strides = [1, 1]} : vector<10x32xf32> to vector<4x32xf32>
    %c0_8 = arith.constant 0 : index
    %c0_9 = arith.constant 0 : index
    %c0_10 = arith.constant 0 : index
    %9 = vector.load %arg1[%c0_8, %c0_9, %c0_10] : memref<3x32x32xf32, #tpu.memory_space<vmem>>, vector<1x32x32xf32>
    %10 = vector.shape_cast %9 : vector<1x32x32xf32> to vector<32x32xf32>
    %cst_11 = arith.constant dense<0.000000e+00> : vector<4x32xf32>
    %11 = tpu.matmul %8, %10, %cst_11 {dimension_numbers = #tpu.dot_dimension_numbers<[1], [0], [0], [1], [0, 0, 1, 1], [], []>} : vector<4x32xf32>, vector<32x32xf32>, vector<4x32xf32> -> vector<4x32xf32>
    %12 = vector.extract_strided_slice %7 {offsets = [3, 0], sizes = [4, 32], strides = [1, 1]} : vector<10x32xf32> to vector<4x32xf32>
    %c1 = arith.constant 1 : index
    %c0_12 = arith.constant 0 : index
    %c0_13 = arith.constant 0 : index
    %13 = vector.load %arg1[%c1, %c0_12, %c0_13] : memref<3x32x32xf32, #tpu.memory_space<vmem>>, vector<1x32x32xf32>
    %14 = vector.shape_cast %13 : vector<1x32x32xf32> to vector<32x32xf32>
    %cst_14 = arith.constant dense<0.000000e+00> : vector<4x32xf32>
    %15 = tpu.matmul %12, %14, %cst_14 {dimension_numbers = #tpu.dot_dimension_numbers<[1], [0], [0], [1], [0, 0, 1, 1], [], []>} : vector<4x32xf32>, vector<32x32xf32>, vector<4x32xf32> -> vector<4x32xf32>
    %16 = arith.addf %11, %15 : vector<4x32xf32>
    %17 = vector.extract_strided_slice %7 {offsets = [6, 0], sizes = [4, 32], strides = [1, 1]} : vector<10x32xf32> to vector<4x32xf32>
    %c2 = arith.constant 2 : index
    %c0_15 = arith.constant 0 : index
    %c0_16 = arith.constant 0 : index
    %18 = vector.load %arg1[%c2, %c0_15, %c0_16] : memref<3x32x32xf32, #tpu.memory_space<vmem>>, vector<1x32x32xf32>
    %19 = vector.shape_cast %18 : vector<1x32x32xf32> to vector<32x32xf32>
    %cst_17 = arith.constant dense<0.000000e+00> : vector<4x32xf32>
    %20 = tpu.matmul %17, %19, %cst_17 {dimension_numbers = #tpu.dot_dimension_numbers<[1], [0], [0], [1], [0, 0, 1, 1], [], []>} : vector<4x32xf32>, vector<32x32xf32>, vector<4x32xf32> -> vector<4x32xf32>
    %21 = arith.addf %16, %20 : vector<4x32xf32>
    %c0_18 = arith.constant 0 : index
    %c0_19 = arith.constant 0 : index
    %22 = vector.load %arg2[%c0_18, %c0_19] : memref<1x32xf32, #tpu.memory_space<vmem>>, vector<1x32xf32>
    %23 = vector.broadcast %22 : vector<1x32xf32> to vector<4x32xf32>
    %24 = arith.addf %21, %23 : vector<4x32xf32>
    %cst_20 = arith.constant 0.000000e+00 : f32
    %25 = vector.broadcast %cst_20 : f32 to vector<4x32xf32>
    %26 = arith.maximumf %24, %25 : vector<4x32xf32>
    %c0_21 = arith.constant 0 : index
    %c0_22 = arith.constant 0 : index
    %c0_23 = arith.constant 0 : index
    %27 = vector.load %arg3[%c0_21, %c0_22, %c0_23] : memref<1x32x32xf32, #tpu.memory_space<vmem>>, vector<1x32x32xf32>
    %28 = vector.shape_cast %27 : vector<1x32x32xf32> to vector<32x32xf32>
    %cst_24 = arith.constant dense<0.000000e+00> : vector<4x32xf32>
    %29 = tpu.matmul %26, %28, %cst_24 {dimension_numbers = #tpu.dot_dimension_numbers<[1], [0], [0], [1], [0, 0, 1, 1], [], []>} : vector<4x32xf32>, vector<32x32xf32>, vector<4x32xf32> -> vector<4x32xf32>
    %c0_25 = arith.constant 0 : index
    %c0_26 = arith.constant 0 : index
    %30 = vector.load %arg4[%c0_25, %c0_26] : memref<1x32xf32, #tpu.memory_space<vmem>>, vector<1x32xf32>
    %31 = vector.broadcast %30 : vector<1x32xf32> to vector<4x32xf32>
    %32 = arith.addf %29, %31 : vector<4x32xf32>
    %c3_27 = arith.constant 3 : index
    %c0_28 = arith.constant 0 : index
    %33 = vector.load %arg10[%c3_27, %c0_28] : memref<10x32xf32, #tpu.memory_space<vmem>>, vector<4x32xf32>
    %34 = arith.addf %32, %33 : vector<4x32xf32>
    %c3_29 = arith.constant 3 : index
    %c0_30 = arith.constant 0 : index
    %35 = vector.load %arg10[%c3_29, %c0_30] : memref<10x32xf32, #tpu.memory_space<vmem>>, vector<4x32xf32>
    tpu.vector_store %arg10[%c3_29, %c0_30], %34 {strides = array<i32>} : memref<10x32xf32, #tpu.memory_space<vmem>>, vector<4x32xf32>,
    %c0_31 = arith.constant 0 : index
    %c0_32 = arith.constant 0 : index
    %36 = vector.load %arg10[%c0_31, %c0_32] : memref<10x32xf32, #tpu.memory_space<vmem>>, vector<10x32xf32>
    %cst_33 = arith.constant 0.000000e+00 : f32
    %37 = vector.broadcast %cst_33 : f32 to vector<10x32xf32>
    %38 = arith.maximumf %36, %37 : vector<10x32xf32>
    %39 = vector.extract_strided_slice %38 {offsets = [2, 0], sizes = [4, 32], strides = [1, 1]} : vector<10x32xf32> to vector<4x32xf32>
    %c0_34 = arith.constant 0 : index
    %c0_35 = arith.constant 0 : index
    %c0_36 = arith.constant 0 : index
    %40 = vector.load %arg5[%c0_34, %c0_35, %c0_36] : memref<3x32x32xf32, #tpu.memory_space<vmem>>, vector<1x32x32xf32>
    %41 = vector.shape_cast %40 : vector<1x32x32xf32> to vector<32x32xf32>
    %cst_37 = arith.constant dense<0.000000e+00> : vector<4x32xf32>
    %42 = tpu.matmul %39, %41, %cst_37 {dimension_numbers = #tpu.dot_dimension_numbers<[1], [0], [0], [1], [0, 0, 1, 1], [], []>} : vector<4x32xf32>, vector<32x32xf32>, vector<4x32xf32> -> vector<4x32xf32>
    %43 = vector.extract_strided_slice %38 {offsets = [3, 0], sizes = [4, 32], strides = [1, 1]} : vector<10x32xf32> to vector<4x32xf32>
    %c1_38 = arith.constant 1 : index
    %c0_39 = arith.constant 0 : index
    %c0_40 = arith.constant 0 : index
    %44 = vector.load %arg5[%c1_38, %c0_39, %c0_40] : memref<3x32x32xf32, #tpu.memory_space<vmem>>, vector<1x32x32xf32>
    %45 = vector.shape_cast %44 : vector<1x32x32xf32> to vector<32x32xf32>
    %cst_41 = arith.constant dense<0.000000e+00> : vector<4x32xf32>
    %46 = tpu.matmul %43, %45, %cst_41 {dimension_numbers = #tpu.dot_dimension_numbers<[1], [0], [0], [1], [0, 0, 1, 1], [], []>} : vector<4x32xf32>, vector<32x32xf32>, vector<4x32xf32> -> vector<4x32xf32>
    %47 = arith.addf %42, %46 : vector<4x32xf32>
    %48 = vector.extract_strided_slice %38 {offsets = [4, 0], sizes = [4, 32], strides = [1, 1]} : vector<10x32xf32> to vector<4x32xf32>
    %c2_42 = arith.constant 2 : index
    %c0_43 = arith.constant 0 : index
    %c0_44 = arith.constant 0 : index
    %49 = vector.load %arg5[%c2_42, %c0_43, %c0_44] : memref<3x32x32xf32, #tpu.memory_space<vmem>>, vector<1x32x32xf32>
    %50 = vector.shape_cast %49 : vector<1x32x32xf32> to vector<32x32xf32>
    %cst_45 = arith.constant dense<0.000000e+00> : vector<4x32xf32>
    %51 = tpu.matmul %48, %50, %cst_45 {dimension_numbers = #tpu.dot_dimension_numbers<[1], [0], [0], [1], [0, 0, 1, 1], [], []>} : vector<4x32xf32>, vector<32x32xf32>, vector<4x32xf32> -> vector<4x32xf32>
    %52 = arith.addf %47, %51 : vector<4x32xf32>
    %c0_46 = arith.constant 0 : index
    %c0_47 = arith.constant 0 : index
    %53 = vector.load %arg6[%c0_46, %c0_47] : memref<1x32xf32, #tpu.memory_space<vmem>>, vector<1x32xf32>
    %54 = vector.broadcast %53 : vector<1x32xf32> to vector<4x32xf32>
    %55 = arith.addf %52, %54 : vector<4x32xf32>
    %cst_48 = arith.constant 0.000000e+00 : f32
    %56 = vector.broadcast %cst_48 : f32 to vector<4x32xf32>
    %57 = arith.maximumf %55, %56 : vector<4x32xf32>
    %c0_49 = arith.constant 0 : index
    %c0_50 = arith.constant 0 : index
    %c0_51 = arith.constant 0 : index
    %58 = vector.load %arg7[%c0_49, %c0_50, %c0_51] : memref<1x32x32xf32, #tpu.memory_space<vmem>>, vector<1x32x32xf32>
    %59 = vector.shape_cast %58 : vector<1x32x32xf32> to vector<32x32xf32>
    %cst_52 = arith.constant dense<0.000000e+00> : vector<4x32xf32>
    %60 = tpu.matmul %57, %59, %cst_52 {dimension_numbers = #tpu.dot_dimension_numbers<[1], [0], [0], [1], [0, 0, 1, 1], [], []>} : vector<4x32xf32>, vector<32x32xf32>, vector<4x32xf32> -> vector<4x32xf32>
    %c0_53 = arith.constant 0 : index
    %c0_54 = arith.constant 0 : index
    %61 = vector.load %arg8[%c0_53, %c0_54] : memref<1x32xf32, #tpu.memory_space<vmem>>, vector<1x32xf32>
    %62 = vector.broadcast %61 : vector<1x32xf32> to vector<4x32xf32>
    %63 = arith.addf %60, %62 : vector<4x32xf32>
    %c3_55 = arith.constant 3 : index
    %c0_56 = arith.constant 0 : index
    %64 = vector.load %arg10[%c3_55, %c0_56] : memref<10x32xf32, #tpu.memory_space<vmem>>, vector<4x32xf32>
    %65 = arith.addf %63, %64 : vector<4x32xf32>
    %c3_57 = arith.constant 3 : index
    %c0_58 = arith.constant 0 : index
    %66 = vector.load %arg10[%c3_57, %c0_58] : memref<10x32xf32, #tpu.memory_space<vmem>>, vector<4x32xf32>
    tpu.vector_store %arg10[%c3_57, %c0_58], %65 {strides = array<i32>} : memref<10x32xf32, #tpu.memory_space<vmem>>, vector<4x32xf32>,
    %c3_59 = arith.constant 3 : index
    %c0_60 = arith.constant 0 : index
    %67 = vector.load %arg10[%c3_59, %c0_60] : memref<10x32xf32, #tpu.memory_space<vmem>>, vector<4x32xf32>
    %c0_61 = arith.constant 0 : index
    %c0_62 = arith.constant 0 : index
    %c0_63 = arith.constant 0 : index
    %68 = vector.load %arg9[%c0_61, %c0_62, %c0_63] : memref<2x4x32xf32, #tpu.memory_space<vmem>>, vector<1x4x32xf32>
    %69 = vector.shape_cast %68 : vector<1x4x32xf32> to vector<4x32xf32>
    %70 = vector.shape_cast %67 : vector<4x32xf32> to vector<1x4x32xf32>
    tpu.vector_store %arg9[%c0_61, %c0_62, %c0_63], %70 {strides = array<i32>} : memref<2x4x32xf32, #tpu.memory_space<vmem>>, vector<1x4x32xf32>,
    %c1_64 = arith.constant 1 : index
    %c0_65 = arith.constant 0 : index
    %c0_66 = arith.constant 0 : index
    %71 = vector.load %arg0[%c1_64, %c0_65, %c0_66] : memref<2x4x32xf32, #tpu.memory_space<vmem>>, vector<1x4x32xf32>
    %72 = vector.shape_cast %71 : vector<1x4x32xf32> to vector<4x32xf32>
    %c3_67 = arith.constant 3 : index
    %c0_68 = arith.constant 0 : index
    %73 = vector.load %arg10[%c3_67, %c0_68] : memref<10x32xf32, #tpu.memory_space<vmem>>, vector<4x32xf32>
    tpu.vector_store %arg10[%c3_67, %c0_68], %72 {strides = array<i32>} : memref<10x32xf32, #tpu.memory_space<vmem>>, vector<4x32xf32>,
    %c0_69 = arith.constant 0 : index
    %c0_70 = arith.constant 0 : index
    %74 = vector.load %arg10[%c0_69, %c0_70] : memref<10x32xf32, #tpu.memory_space<vmem>>, vector<10x32xf32>
    %cst_71 = arith.constant 0.000000e+00 : f32
    %75 = vector.broadcast %cst_71 : f32 to vector<10x32xf32>
    %76 = arith.maximumf %74, %75 : vector<10x32xf32>
    %77 = vector.extract_strided_slice %76 {offsets = [0, 0], sizes = [4, 32], strides = [1, 1]} : vector<10x32xf32> to vector<4x32xf32>
    %c0_72 = arith.constant 0 : index
    %c0_73 = arith.constant 0 : index
    %c0_74 = arith.constant 0 : index
    %78 = vector.load %arg1[%c0_72, %c0_73, %c0_74] : memref<3x32x32xf32, #tpu.memory_space<vmem>>, vector<1x32x32xf32>
    %79 = vector.shape_cast %78 : vector<1x32x32xf32> to vector<32x32xf32>
    %cst_75 = arith.constant dense<0.000000e+00> : vector<4x32xf32>
    %80 = tpu.matmul %77, %79, %cst_75 {dimension_numbers = #tpu.dot_dimension_numbers<[1], [0], [0], [1], [0, 0, 1, 1], [], []>} : vector<4x32xf32>, vector<32x32xf32>, vector<4x32xf32> -> vector<4x32xf32>
    %81 = vector.extract_strided_slice %76 {offsets = [3, 0], sizes = [4, 32], strides = [1, 1]} : vector<10x32xf32> to vector<4x32xf32>
    %c1_76 = arith.constant 1 : index
    %c0_77 = arith.constant 0 : index
    %c0_78 = arith.constant 0 : index
    %82 = vector.load %arg1[%c1_76, %c0_77, %c0_78] : memref<3x32x32xf32, #tpu.memory_space<vmem>>, vector<1x32x32xf32>
    %83 = vector.shape_cast %82 : vector<1x32x32xf32> to vector<32x32xf32>
    %cst_79 = arith.constant dense<0.000000e+00> : vector<4x32xf32>
    %84 = tpu.matmul %81, %83, %cst_79 {dimension_numbers = #tpu.dot_dimension_numbers<[1], [0], [0], [1], [0, 0, 1, 1], [], []>} : vector<4x32xf32>, vector<32x32xf32>, vector<4x32xf32> -> vector<4x32xf32>
    %85 = arith.addf %80, %84 : vector<4x32xf32>
    %86 = vector.extract_strided_slice %76 {offsets = [6, 0], sizes = [4, 32], strides = [1, 1]} : vector<10x32xf32> to vector<4x32xf32>
    %c2_80 = arith.constant 2 : index
    %c0_81 = arith.constant 0 : index
    %c0_82 = arith.constant 0 : index
    %87 = vector.load %arg1[%c2_80, %c0_81, %c0_82] : memref<3x32x32xf32, #tpu.memory_space<vmem>>, vector<1x32x32xf32>
    %88 = vector.shape_cast %87 : vector<1x32x32xf32> to vector<32x32xf32>
    %cst_83 = arith.constant dense<0.000000e+00> : vector<4x32xf32>
    %89 = tpu.matmul %86, %88, %cst_83 {dimension_numbers = #tpu.dot_dimension_numbers<[1], [0], [0], [1], [0, 0, 1, 1], [], []>} : vector<4x32xf32>, vector<32x32xf32>, vector<4x32xf32> -> vector<4x32xf32>
    %90 = arith.addf %85, %89 : vector<4x32xf32>
    %c0_84 = arith.constant 0 : index
    %c0_85 = arith.constant 0 : index
    %91 = vector.load %arg2[%c0_84, %c0_85] : memref<1x32xf32, #tpu.memory_space<vmem>>, vector<1x32xf32>
    %92 = vector.broadcast %91 : vector<1x32xf32> to vector<4x32xf32>
    %93 = arith.addf %90, %92 : vector<4x32xf32>
    %cst_86 = arith.constant 0.000000e+00 : f32
    %94 = vector.broadcast %cst_86 : f32 to vector<4x32xf32>
    %95 = arith.maximumf %93, %94 : vector<4x32xf32>
    %c0_87 = arith.constant 0 : index
    %c0_88 = arith.constant 0 : index
    %c0_89 = arith.constant 0 : index
    %96 = vector.load %arg3[%c0_87, %c0_88, %c0_89] : memref<1x32x32xf32, #tpu.memory_space<vmem>>, vector<1x32x32xf32>
    %97 = vector.shape_cast %96 : vector<1x32x32xf32> to vector<32x32xf32>
    %cst_90 = arith.constant dense<0.000000e+00> : vector<4x32xf32>
    %98 = tpu.matmul %95, %97, %cst_90 {dimension_numbers = #tpu.dot_dimension_numbers<[1], [0], [0], [1], [0, 0, 1, 1], [], []>} : vector<4x32xf32>, vector<32x32xf32>, vector<4x32xf32> -> vector<4x32xf32>
    %c0_91 = arith.constant 0 : index
    %c0_92 = arith.constant 0 : index
    %99 = vector.load %arg4[%c0_91, %c0_92] : memref<1x32xf32, #tpu.memory_space<vmem>>, vector<1x32xf32>
    %100 = vector.broadcast %99 : vector<1x32xf32> to vector<4x32xf32>
    %101 = arith.addf %98, %100 : vector<4x32xf32>
    %c3_93 = arith.constant 3 : index
    %c0_94 = arith.constant 0 : index
    %102 = vector.load %arg10[%c3_93, %c0_94] : memref<10x32xf32, #tpu.memory_space<vmem>>, vector<4x32xf32>
    %103 = arith.addf %101, %102 : vector<4x32xf32>
    %c3_95 = arith.constant 3 : index
    %c0_96 = arith.constant 0 : index
    %104 = vector.load %arg10[%c3_95, %c0_96] : memref<10x32xf32, #tpu.memory_space<vmem>>, vector<4x32xf32>
    tpu.vector_store %arg10[%c3_95, %c0_96], %103 {strides = array<i32>} : memref<10x32xf32, #tpu.memory_space<vmem>>, vector<4x32xf32>,
    %c0_97 = arith.constant 0 : index
    %c0_98 = arith.constant 0 : index
    %105 = vector.load %arg10[%c0_97, %c0_98] : memref<10x32xf32, #tpu.memory_space<vmem>>, vector<10x32xf32>
    %cst_99 = arith.constant 0.000000e+00 : f32
    %106 = vector.broadcast %cst_99 : f32 to vector<10x32xf32>
    %107 = arith.maximumf %105, %106 : vector<10x32xf32>
    %108 = vector.extract_strided_slice %107 {offsets = [2, 0], sizes = [4, 32], strides = [1, 1]} : vector<10x32xf32> to vector<4x32xf32>
    %c0_100 = arith.constant 0 : index
    %c0_101 = arith.constant 0 : index
    %c0_102 = arith.constant 0 : index
    %109 = vector.load %arg5[%c0_100, %c0_101, %c0_102] : memref<3x32x32xf32, #tpu.memory_space<vmem>>, vector<1x32x32xf32>
    %110 = vector.shape_cast %109 : vector<1x32x32xf32> to vector<32x32xf32>
    %cst_103 = arith.constant dense<0.000000e+00> : vector<4x32xf32>
    %111 = tpu.matmul %108, %110, %cst_103 {dimension_numbers = #tpu.dot_dimension_numbers<[1], [0], [0], [1], [0, 0, 1, 1], [], []>} : vector<4x32xf32>, vector<32x32xf32>, vector<4x32xf32> -> vector<4x32xf32>
    %112 = vector.extract_strided_slice %107 {offsets = [3, 0], sizes = [4, 32], strides = [1, 1]} : vector<10x32xf32> to vector<4x32xf32>
    %c1_104 = arith.constant 1 : index
    %c0_105 = arith.constant 0 : index
    %c0_106 = arith.constant 0 : index
    %113 = vector.load %arg5[%c1_104, %c0_105, %c0_106] : memref<3x32x32xf32, #tpu.memory_space<vmem>>, vector<1x32x32xf32>
    %114 = vector.shape_cast %113 : vector<1x32x32xf32> to vector<32x32xf32>
    %cst_107 = arith.constant dense<0.000000e+00> : vector<4x32xf32>
    %115 = tpu.matmul %112, %114, %cst_107 {dimension_numbers = #tpu.dot_dimension_numbers<[1], [0], [0], [1], [0, 0, 1, 1], [], []>} : vector<4x32xf32>, vector<32x32xf32>, vector<4x32xf32> -> vector<4x32xf32>
    %116 = arith.addf %111, %115 : vector<4x32xf32>
    %117 = vector.extract_strided_slice %107 {offsets = [4, 0], sizes = [4, 32], strides = [1, 1]} : vector<10x32xf32> to vector<4x32xf32>
    %c2_108 = arith.constant 2 : index
    %c0_109 = arith.constant 0 : index
    %c0_110 = arith.constant 0 : index
    %118 = vector.load %arg5[%c2_108, %c0_109, %c0_110] : memref<3x32x32xf32, #tpu.memory_space<vmem>>, vector<1x32x32xf32>
    %119 = vector.shape_cast %118 : vector<1x32x32xf32> to vector<32x32xf32>
    %cst_111 = arith.constant dense<0.000000e+00> : vector<4x32xf32>
    %120 = tpu.matmul %117, %119, %cst_111 {dimension_numbers = #tpu.dot_dimension_numbers<[1], [0], [0], [1], [0, 0, 1, 1], [], []>} : vector<4x32xf32>, vector<32x32xf32>, vector<4x32xf32> -> vector<4x32xf32>
    %121 = arith.addf %116, %120 : vector<4x32xf32>
    %c0_112 = arith.constant 0 : index
    %c0_113 = arith.constant 0 : index
    %122 = vector.load %arg6[%c0_112, %c0_113] : memref<1x32xf32, #tpu.memory_space<vmem>>, vector<1x32xf32>
    %123 = vector.broadcast %122 : vector<1x32xf32> to vector<4x32xf32>
    %124 = arith.addf %121, %123 : vector<4x32xf32>
    %cst_114 = arith.constant 0.000000e+00 : f32
    %125 = vector.broadcast %cst_114 : f32 to vector<4x32xf32>
    %126 = arith.maximumf %124, %125 : vector<4x32xf32>
    %c0_115 = arith.constant 0 : index
    %c0_116 = arith.constant 0 : index
    %c0_117 = arith.constant 0 : index
    %127 = vector.load %arg7[%c0_115, %c0_116, %c0_117] : memref<1x32x32xf32, #tpu.memory_space<vmem>>, vector<1x32x32xf32>
    %128 = vector.shape_cast %127 : vector<1x32x32xf32> to vector<32x32xf32>
    %cst_118 = arith.constant dense<0.000000e+00> : vector<4x32xf32>
    %129 = tpu.matmul %126, %128, %cst_118 {dimension_numbers = #tpu.dot_dimension_numbers<[1], [0], [0], [1], [0, 0, 1, 1], [], []>} : vector<4x32xf32>, vector<32x32xf32>, vector<4x32xf32> -> vector<4x32xf32>
    %c0_119 = arith.constant 0 : index
    %c0_120 = arith.constant 0 : index
    %130 = vector.load %arg8[%c0_119, %c0_120] : memref<1x32xf32, #tpu.memory_space<vmem>>, vector<1x32xf32>
    %131 = vector.broadcast %130 : vector<1x32xf32> to vector<4x32xf32>
    %132 = arith.addf %129, %131 : vector<4x32xf32>
    %c3_121 = arith.constant 3 : index
    %c0_122 = arith.constant 0 : index
    %133 = vector.load %arg10[%c3_121, %c0_122] : memref<10x32xf32, #tpu.memory_space<vmem>>, vector<4x32xf32>
    %134 = arith.addf %132, %133 : vector<4x32xf32>
    %c3_123 = arith.constant 3 : index
    %c0_124 = arith.constant 0 : index
    %135 = vector.load %arg10[%c3_123, %c0_124] : memref<10x32xf32, #tpu.memory_space<vmem>>, vector<4x32xf32>
    tpu.vector_store %arg10[%c3_123, %c0_124], %134 {strides = array<i32>} : memref<10x32xf32, #tpu.memory_space<vmem>>, vector<4x32xf32>,
    %c3_125 = arith.constant 3 : index
    %c0_126 = arith.constant 0 : index
    %136 = vector.load %arg10[%c3_125, %c0_126] : memref<10x32xf32, #tpu.memory_space<vmem>>, vector<4x32xf32>
    %c1_127 = arith.constant 1 : index
    %c0_128 = arith.constant 0 : index
    %c0_129 = arith.constant 0 : index
    %137 = vector.load %arg9[%c1_127, %c0_128, %c0_129] : memref<2x4x32xf32, #tpu.memory_space<vmem>>, vector<1x4x32xf32>
    %138 = vector.shape_cast %137 : vector<1x4x32xf32> to vector<4x32xf32>
    %139 = vector.shape_cast %136 : vector<4x32xf32> to vector<1x4x32xf32>
    tpu.vector_store %arg9[%c1_127, %c0_128, %c0_129], %139 {strides = array<i32>} : memref<2x4x32xf32, #tpu.memory_space<vmem>>, vector<1x4x32xf32>,
    return
  }
}

module attributes {stable_mosaic.version = 11 : i64} {
  func.func @_vq_kernel(%arg0: i32, %arg1: memref<8x32xf32, #tpu.memory_space<vmem>>, %arg2: memref<32x32xf32, #tpu.memory_space<vmem>>, %arg3: memref<1x32xf32, #tpu.memory_space<vmem>>, %arg4: memref<1x8xi32, #tpu.memory_space<vmem>>, %arg5: memref<8x32xf32, #tpu.memory_space<vmem>>) attributes {dimension_semantics = [#tpu.dimension_semantics<parallel>], iteration_bounds = array<i64: 1>, scalar_prefetch = 0 : i64, scratch_operands = 0 : i64, tpu.core_type = #tpu.core_type<tc>, window_params = [{transform_indices = @transform_0, window_bounds = array<i64: 8, 32>}, {pipeline_mode = #tpu.pipeline_mode<synchronous>, transform_indices = @transform_1, window_bounds = array<i64: 32, 32>}, {pipeline_mode = #tpu.pipeline_mode<synchronous>, transform_indices = @transform_2, window_bounds = array<i64: 1, 32>}, {transform_indices = @transform_3, window_bounds = array<i64: 1, 8>}, {transform_indices = @transform_4, window_bounds = array<i64: 8, 32>}]} {
    %c0 = arith.constant 0 : index
    %c0_0 = arith.constant 0 : index
    %0 = vector.load %arg1[%c0, %c0_0] : memref<8x32xf32, #tpu.memory_space<vmem>>, vector<8x32xf32>
    %c0_1 = arith.constant 0 : index
    %c0_2 = arith.constant 0 : index
    %1 = vector.load %arg2[%c0_1, %c0_2] : memref<32x32xf32, #tpu.memory_space<vmem>>, vector<32x32xf32>
    %cst = arith.constant dense<0.000000e+00> : vector<8x32xf32>
    %2 = tpu.matmul %0, %1, %cst {dimension_numbers = #tpu.dot_dimension_numbers<[1], [1], [0], [0], [0, 0, 1, 0], [], []>} : vector<8x32xf32>, vector<32x32xf32>, vector<8x32xf32> -> vector<8x32xf32>
    %c0_3 = arith.constant 0 : index
    %c0_4 = arith.constant 0 : index
    %3 = vector.load %arg3[%c0_3, %c0_4] : memref<1x32xf32, #tpu.memory_space<vmem>>, vector<1x32xf32>
    %cst_5 = arith.constant 2.000000e+00 : f32
    %4 = vector.broadcast %cst_5 : f32 to vector<8x32xf32>
    %5 = arith.mulf %4, %2 : vector<8x32xf32>
    %6 = vector.broadcast %3 : vector<1x32xf32> to vector<8x32xf32>
    %7 = arith.subf %6, %5 : vector<8x32xf32>
    %8 = tpu.reduce_index %7 {axis = 1 : i32, kind = #tpu.reduction_kind<arg_min>} : vector<8x32xf32> -> vector<8xi32>
    %9 = vector.shape_cast %8 : vector<8xi32> to vector<1x8xi32>
    %c0_6 = arith.constant 0 : index
    %c0_7 = arith.constant 0 : index
    %10 = vector.load %arg4[%c0_6, %c0_7] : memref<1x8xi32, #tpu.memory_space<vmem>>, vector<1x8xi32>
    tpu.vector_store %arg4[%c0_6, %c0_7], %9 {strides = array<i32>} : memref<1x8xi32, #tpu.memory_space<vmem>>, vector<1x8xi32>,
    %11 = tpu.iota {dimensions = array<i32: 1>} : vector<8x32xi32>
    %12 = vector.shape_cast %8 : vector<8xi32> to vector<8x1xi32>
    %13 = vector.broadcast %12 : vector<8x1xi32> to vector<8x32xi32>
    %14 = arith.cmpi eq, %11, %13 : vector<8x32xi32>
    %15 = arith.extui %14 : vector<8x32xi1> to vector<8x32xi32>
    %16 = arith.sitofp %15 : vector<8x32xi32> to vector<8x32xf32>
    %cst_8 = arith.constant dense<0.000000e+00> : vector<8x32xf32>
    %17 = tpu.matmul %16, %1, %cst_8 {dimension_numbers = #tpu.dot_dimension_numbers<[1], [0], [0], [1], [0, 0, 1, 1], [], []>} : vector<8x32xf32>, vector<32x32xf32>, vector<8x32xf32> -> vector<8x32xf32>
    %c0_9 = arith.constant 0 : index
    %c0_10 = arith.constant 0 : index
    %18 = vector.load %arg5[%c0_9, %c0_10] : memref<8x32xf32, #tpu.memory_space<vmem>>, vector<8x32xf32>
    tpu.vector_store %arg5[%c0_9, %c0_10], %17 {strides = array<i32>} : memref<8x32xf32, #tpu.memory_space<vmem>>, vector<8x32xf32>,
    return
  }
  func.func @transform_0(%arg0: i32) -> (i32, i32) {
    %c0_i32 = arith.constant 0 : i32
    %c0_i32_0 = arith.constant 0 : i32
    return %arg0, %c0_i32 : i32, i32
  }
  func.func @transform_1(%arg0: i32) -> (i32, i32) {
    %c0_i32 = arith.constant 0 : i32
    %c0_i32_0 = arith.constant 0 : i32
    %c0_i32_1 = arith.constant 0 : i32
    return %c0_i32, %c0_i32_0 : i32, i32
  }
  func.func @transform_2(%arg0: i32) -> (i32, i32) {
    %c0_i32 = arith.constant 0 : i32
    %c0_i32_0 = arith.constant 0 : i32
    %c0_i32_1 = arith.constant 0 : i32
    return %c0_i32, %c0_i32_0 : i32, i32
  }
  func.func @transform_3(%arg0: i32) -> (i32, i32) {
    %c0_i32 = arith.constant 0 : i32
    %c0_i32_0 = arith.constant 0 : i32
    return %c0_i32, %arg0 : i32, i32
  }
  func.func @transform_4(%arg0: i32) -> (i32, i32) {
    %c0_i32 = arith.constant 0 : i32
    %c0_i32_0 = arith.constant 0 : i32
    return %arg0, %c0_i32 : i32, i32
  }
}

module attributes {stable_mosaic.version = 11 : i64} {
  func.func @kernel(%arg0: memref<2x6x32xf32, #tpu.memory_space<vmem>>, %arg1: memref<3x32x32xf32, #tpu.memory_space<vmem>>, %arg2: memref<1x32xf32, #tpu.memory_space<vmem>>, %arg3: memref<2x4x32xf32, #tpu.memory_space<vmem>>) attributes {dimension_semantics = [], scalar_prefetch = 0 : i64, scratch_operands = 0 : i64, tpu.core_type = #tpu.core_type<tc>} {
    %c0 = arith.constant 0 : index
    %c0_0 = arith.constant 0 : index
    %c0_1 = arith.constant 0 : index
    %0 = vector.load %arg0[%c0, %c0_0, %c0_1] : memref<2x6x32xf32, #tpu.memory_space<vmem>>, vector<1x6x32xf32>
    %1 = vector.shape_cast %0 : vector<1x6x32xf32> to vector<6x32xf32>
    %2 = vector.extract_strided_slice %1 {offsets = [0, 0], sizes = [4, 32], strides = [1, 1]} : vector<6x32xf32> to vector<4x32xf32>
    %c0_2 = arith.constant 0 : index
    %c0_3 = arith.constant 0 : index
    %c0_4 = arith.constant 0 : index
    %3 = vector.load %arg1[%c0_2, %c0_3, %c0_4] : memref<3x32x32xf32, #tpu.memory_space<vmem>>, vector<1x32x32xf32>
    %4 = vector.shape_cast %3 : vector<1x32x32xf32> to vector<32x32xf32>
    %cst = arith.constant dense<0.000000e+00> : vector<4x32xf32>
    %5 = tpu.matmul %2, %4, %cst {dimension_numbers = #tpu.dot_dimension_numbers<[1], [0], [0], [1], [0, 0, 1, 1], [], []>} : vector<4x32xf32>, vector<32x32xf32>, vector<4x32xf32> -> vector<4x32xf32>
    %6 = vector.extract_strided_slice %1 {offsets = [1, 0], sizes = [4, 32], strides = [1, 1]} : vector<6x32xf32> to vector<4x32xf32>
    %c1 = arith.constant 1 : index
    %c0_5 = arith.constant 0 : index
    %c0_6 = arith.constant 0 : index
    %7 = vector.load %arg1[%c1, %c0_5, %c0_6] : memref<3x32x32xf32, #tpu.memory_space<vmem>>, vector<1x32x32xf32>
    %8 = vector.shape_cast %7 : vector<1x32x32xf32> to vector<32x32xf32>
    %cst_7 = arith.constant dense<0.000000e+00> : vector<4x32xf32>
    %9 = tpu.matmul %6, %8, %cst_7 {dimension_numbers = #tpu.dot_dimension_numbers<[1], [0], [0], [1], [0, 0, 1, 1], [], []>} : vector<4x32xf32>, vector<32x32xf32>, vector<4x32xf32> -> vector<4x32xf32>
    %10 = arith.addf %5, %9 : vector<4x32xf32>
    %11 = vector.extract_strided_slice %1 {offsets = [2, 0], sizes = [4, 32], strides = [1, 1]} : vector<6x32xf32> to vector<4x32xf32>
    %c2 = arith.constant 2 : index
    %c0_8 = arith.constant 0 : index
    %c0_9 = arith.constant 0 : index
    %12 = vector.load %arg1[%c2, %c0_8, %c0_9] : memref<3x32x32xf32, #tpu.memory_space<vmem>>, vector<1x32x32xf32>
    %13 = vector.shape_cast %12 : vector<1x32x32xf32> to vector<32x32xf32>
    %cst_10 = arith.constant dense<0.000000e+00> : vector<4x32xf32>
    %14 = tpu.matmul %11, %13, %cst_10 {dimension_numbers = #tpu.dot_dimension_numbers<[1], [0], [0], [1], [0, 0, 1, 1], [], []>} : vector<4x32xf32>, vector<32x32xf32>, vector<4x32xf32> -> vector<4x32xf32>
    %15 = arith.addf %10, %14 : vector<4x32xf32>
    %c0_11 = arith.constant 0 : index
    %c0_12 = arith.constant 0 : index
    %16 = vector.load %arg2[%c0_11, %c0_12] : memref<1x32xf32, #tpu.memory_space<vmem>>, vector<1x32xf32>
    %17 = vector.broadcast %16 : vector<1x32xf32> to vector<4x32xf32>
    %18 = arith.addf %15, %17 : vector<4x32xf32>
    %c0_13 = arith.constant 0 : index
    %c0_14 = arith.constant 0 : index
    %c0_15 = arith.constant 0 : index
    %19 = vector.load %arg3[%c0_13, %c0_14, %c0_15] : memref<2x4x32xf32, #tpu.memory_space<vmem>>, vector<1x4x32xf32>
    %20 = vector.shape_cast %19 : vector<1x4x32xf32> to vector<4x32xf32>
    %21 = vector.shape_cast %18 : vector<4x32xf32> to vector<1x4x32xf32>
    tpu.vector_store %arg3[%c0_13, %c0_14, %c0_15], %21 {strides = array<i32>} : memref<2x4x32xf32, #tpu.memory_space<vmem>>, vector<1x4x32xf32>,
    %c1_16 = arith.constant 1 : index
    %c0_17 = arith.constant 0 : index
    %c0_18 = arith.constant 0 : index
    %22 = vector.load %arg0[%c1_16, %c0_17, %c0_18] : memref<2x6x32xf32, #tpu.memory_space<vmem>>, vector<1x6x32xf32>
    %23 = vector.shape_cast %22 : vector<1x6x32xf32> to vector<6x32xf32>
    %24 = vector.extract_strided_slice %23 {offsets = [0, 0], sizes = [4, 32], strides = [1, 1]} : vector<6x32xf32> to vector<4x32xf32>
    %c0_19 = arith.constant 0 : index
    %c0_20 = arith.constant 0 : index
    %c0_21 = arith.constant 0 : index
    %25 = vector.load %arg1[%c0_19, %c0_20, %c0_21] : memref<3x32x32xf32, #tpu.memory_space<vmem>>, vector<1x32x32xf32>
    %26 = vector.shape_cast %25 : vector<1x32x32xf32> to vector<32x32xf32>
    %cst_22 = arith.constant dense<0.000000e+00> : vector<4x32xf32>
    %27 = tpu.matmul %24, %26, %cst_22 {dimension_numbers = #tpu.dot_dimension_numbers<[1], [0], [0], [1], [0, 0, 1, 1], [], []>} : vector<4x32xf32>, vector<32x32xf32>, vector<4x32xf32> -> vector<4x32xf32>
    %28 = vector.extract_strided_slice %23 {offsets = [1, 0], sizes = [4, 32], strides = [1, 1]} : vector<6x32xf32> to vector<4x32xf32>
    %c1_23 = arith.constant 1 : index
    %c0_24 = arith.constant 0 : index
    %c0_25 = arith.constant 0 : index
    %29 = vector.load %arg1[%c1_23, %c0_24, %c0_25] : memref<3x32x32xf32, #tpu.memory_space<vmem>>, vector<1x32x32xf32>
    %30 = vector.shape_cast %29 : vector<1x32x32xf32> to vector<32x32xf32>
    %cst_26 = arith.constant dense<0.000000e+00> : vector<4x32xf32>
    %31 = tpu.matmul %28, %30, %cst_26 {dimension_numbers = #tpu.dot_dimension_numbers<[1], [0], [0], [1], [0, 0, 1, 1], [], []>} : vector<4x32xf32>, vector<32x32xf32>, vector<4x32xf32> -> vector<4x32xf32>
    %32 = arith.addf %27, %31 : vector<4x32xf32>
    %33 = vector.extract_strided_slice %23 {offsets = [2, 0], sizes = [4, 32], strides = [1, 1]} : vector<6x32xf32> to vector<4x32xf32>
    %c2_27 = arith.constant 2 : index
    %c0_28 = arith.constant 0 : index
    %c0_29 = arith.constant 0 : index
    %34 = vector.load %arg1[%c2_27, %c0_28, %c0_29] : memref<3x32x32xf32, #tpu.memory_space<vmem>>, vector<1x32x32xf32>
    %35 = vector.shape_cast %34 : vector<1x32x32xf32> to vector<32x32xf32>
    %cst_30 = arith.constant dense<0.000000e+00> : vector<4x32xf32>
    %36 = tpu.matmul %33, %35, %cst_30 {dimension_numbers = #tpu.dot_dimension_numbers<[1], [0], [0], [1], [0, 0, 1, 1], [], []>} : vector<4x32xf32>, vector<32x32xf32>, vector<4x32xf32> -> vector<4x32xf32>
    %37 = arith.addf %32, %36 : vector<4x32xf32>
    %c0_31 = arith.constant 0 : index
    %c0_32 = arith.constant 0 : index
    %38 = vector.load %arg2[%c0_31, %c0_32] : memref<1x32xf32, #tpu.memory_space<vmem>>, vector<1x32xf32>
    %39 = vector.broadcast %38 : vector<1x32xf32> to vector<4x32xf32>
    %40 = arith.addf %37, %39 : vector<4x32xf32>
    %c1_33 = arith.constant 1 : index
    %c0_34 = arith.constant 0 : index
    %c0_35 = arith.constant 0 : index
    %41 = vector.load %arg3[%c1_33, %c0_34, %c0_35] : memref<2x4x32xf32, #tpu.memory_space<vmem>>, vector<1x4x32xf32>
    %42 = vector.shape_cast %41 : vector<1x4x32xf32> to vector<4x32xf32>
    %43 = vector.shape_cast %40 : vector<4x32xf32> to vector<1x4x32xf32>
    tpu.vector_store %arg3[%c1_33, %c0_34, %c0_35], %43 {strides = array<i32>} : memref<2x4x32xf32, #tpu.memory_space<vmem>>, vector<1x4x32xf32>,
    return
  }
}

module attributes {stable_mosaic.version = 11 : i64} {
  func.func @kernel(%arg0: memref<2x6x32xf32, #tpu.memory_space<vmem>>, %arg1: memref<3x32x32xf32, #tpu.memory_space<vmem>>, %arg2: memref<1x32xf32, #tpu.memory_space<vmem>>, %arg3: memref<2x4x32xf32, #tpu.memory_space<vmem>>) attributes {dimension_semantics = [], scalar_prefetch = 0 : i64, scratch_operands = 0 : i64, tpu.core_type = #tpu.core_type<tc>} {
    %c0 = arith.constant 0 : index
    %c0_0 = arith.constant 0 : index
    %c0_1 = arith.constant 0 : index
    %0 = vector.load %arg0[%c0, %c0_0, %c0_1] : memref<2x6x32xf32, #tpu.memory_space<vmem>>, vector<1x6x32xf32>
    %1 = vector.shape_cast %0 : vector<1x6x32xf32> to vector<6x32xf32>
    %2 = vector.extract_strided_slice %1 {offsets = [0, 0], sizes = [4, 32], strides = [1, 1]} : vector<6x32xf32> to vector<4x32xf32>
    %c0_2 = arith.constant 0 : index
    %c0_3 = arith.constant 0 : index
    %c0_4 = arith.constant 0 : index
    %3 = vector.load %arg1[%c0_2, %c0_3, %c0_4] : memref<3x32x32xf32, #tpu.memory_space<vmem>>, vector<1x32x32xf32>
    %4 = vector.shape_cast %3 : vector<1x32x32xf32> to vector<32x32xf32>
    %cst = arith.constant dense<0.000000e+00> : vector<4x32xf32>
    %5 = tpu.matmul %2, %4, %cst {dimension_numbers = #tpu.dot_dimension_numbers<[1], [0], [0], [1], [0, 0, 1, 1], [], []>} : vector<4x32xf32>, vector<32x32xf32>, vector<4x32xf32> -> vector<4x32xf32>
    %6 = vector.extract_strided_slice %1 {offsets = [1, 0], sizes = [4, 32], strides = [1, 1]} : vector<6x32xf32> to vector<4x32xf32>
    %c1 = arith.constant 1 : index
    %c0_5 = arith.constant 0 : index
    %c0_6 = arith.constant 0 : index
    %7 = vector.load %arg1[%c1, %c0_5, %c0_6] : memref<3x32x32xf32, #tpu.memory_space<vmem>>, vector<1x32x32xf32>
    %8 = vector.shape_cast %7 : vector<1x32x32xf32> to vector<32x32xf32>
    %cst_7 = arith.constant dense<0.000000e+00> : vector<4x32xf32>
    %9 = tpu.matmul %6, %8, %cst_7 {dimension_numbers = #tpu.dot_dimension_numbers<[1], [0], [0], [1], [0, 0, 1, 1], [], []>} : vector<4x32xf32>, vector<32x32xf32>, vector<4x32xf32> -> vector<4x32xf32>
    %10 = arith.addf %5, %9 : vector<4x32xf32>
    %11 = vector.extract_strided_slice %1 {offsets = [2, 0], sizes = [4, 32], strides = [1, 1]} : vector<6x32xf32> to vector<4x32xf32>
    %c2 = arith.constant 2 : index
    %c0_8 = arith.constant 0 : index
    %c0_9 = arith.constant 0 : index
    %12 = vector.load %arg1[%c2, %c0_8, %c0_9] : memref<3x32x32xf32, #tpu.memory_space<vmem>>, vector<1x32x32xf32>
    %13 = vector.shape_cast %12 : vector<1x32x32xf32> to vector<32x32xf32>
    %cst_10 = arith.constant dense<0.000000e+00> : vector<4x32xf32>
    %14 = tpu.matmul %11, %13, %cst_10 {dimension_numbers = #tpu.dot_dimension_numbers<[1], [0], [0], [1], [0, 0, 1, 1], [], []>} : vector<4x32xf32>, vector<32x32xf32>, vector<4x32xf32> -> vector<4x32xf32>
    %15 = arith.addf %10, %14 : vector<4x32xf32>
    %c0_11 = arith.constant 0 : index
    %c0_12 = arith.constant 0 : index
    %16 = vector.load %arg2[%c0_11, %c0_12] : memref<1x32xf32, #tpu.memory_space<vmem>>, vector<1x32xf32>
    %17 = vector.broadcast %16 : vector<1x32xf32> to vector<4x32xf32>
    %18 = arith.addf %15, %17 : vector<4x32xf32>
    %cst_13 = arith.constant 0.000000e+00 : f32
    %19 = vector.broadcast %cst_13 : f32 to vector<4x32xf32>
    %20 = arith.maximumf %18, %19 : vector<4x32xf32>
    %c0_14 = arith.constant 0 : index
    %c0_15 = arith.constant 0 : index
    %c0_16 = arith.constant 0 : index
    %21 = vector.load %arg3[%c0_14, %c0_15, %c0_16] : memref<2x4x32xf32, #tpu.memory_space<vmem>>, vector<1x4x32xf32>
    %22 = vector.shape_cast %21 : vector<1x4x32xf32> to vector<4x32xf32>
    %23 = vector.shape_cast %20 : vector<4x32xf32> to vector<1x4x32xf32>
    tpu.vector_store %arg3[%c0_14, %c0_15, %c0_16], %23 {strides = array<i32>} : memref<2x4x32xf32, #tpu.memory_space<vmem>>, vector<1x4x32xf32>,
    %c1_17 = arith.constant 1 : index
    %c0_18 = arith.constant 0 : index
    %c0_19 = arith.constant 0 : index
    %24 = vector.load %arg0[%c1_17, %c0_18, %c0_19] : memref<2x6x32xf32, #tpu.memory_space<vmem>>, vector<1x6x32xf32>
    %25 = vector.shape_cast %24 : vector<1x6x32xf32> to vector<6x32xf32>
    %26 = vector.extract_strided_slice %25 {offsets = [0, 0], sizes = [4, 32], strides = [1, 1]} : vector<6x32xf32> to vector<4x32xf32>
    %c0_20 = arith.constant 0 : index
    %c0_21 = arith.constant 0 : index
    %c0_22 = arith.constant 0 : index
    %27 = vector.load %arg1[%c0_20, %c0_21, %c0_22] : memref<3x32x32xf32, #tpu.memory_space<vmem>>, vector<1x32x32xf32>
    %28 = vector.shape_cast %27 : vector<1x32x32xf32> to vector<32x32xf32>
    %cst_23 = arith.constant dense<0.000000e+00> : vector<4x32xf32>
    %29 = tpu.matmul %26, %28, %cst_23 {dimension_numbers = #tpu.dot_dimension_numbers<[1], [0], [0], [1], [0, 0, 1, 1], [], []>} : vector<4x32xf32>, vector<32x32xf32>, vector<4x32xf32> -> vector<4x32xf32>
    %30 = vector.extract_strided_slice %25 {offsets = [1, 0], sizes = [4, 32], strides = [1, 1]} : vector<6x32xf32> to vector<4x32xf32>
    %c1_24 = arith.constant 1 : index
    %c0_25 = arith.constant 0 : index
    %c0_26 = arith.constant 0 : index
    %31 = vector.load %arg1[%c1_24, %c0_25, %c0_26] : memref<3x32x32xf32, #tpu.memory_space<vmem>>, vector<1x32x32xf32>
    %32 = vector.shape_cast %31 : vector<1x32x32xf32> to vector<32x32xf32>
    %cst_27 = arith.constant dense<0.000000e+00> : vector<4x32xf32>
    %33 = tpu.matmul %30, %32, %cst_27 {dimension_numbers = #tpu.dot_dimension_numbers<[1], [0], [0], [1], [0, 0, 1, 1], [], []>} : vector<4x32xf32>, vector<32x32xf32>, vector<4x32xf32> -> vector<4x32xf32>
    %34 = arith.addf %29, %33 : vector<4x32xf32>
    %35 = vector.extract_strided_slice %25 {offsets = [2, 0], sizes = [4, 32], strides = [1, 1]} : vector<6x32xf32> to vector<4x32xf32>
    %c2_28 = arith.constant 2 : index
    %c0_29 = arith.constant 0 : index
    %c0_30 = arith.constant 0 : index
    %36 = vector.load %arg1[%c2_28, %c0_29, %c0_30] : memref<3x32x32xf32, #tpu.memory_space<vmem>>, vector<1x32x32xf32>
    %37 = vector.shape_cast %36 : vector<1x32x32xf32> to vector<32x32xf32>
    %cst_31 = arith.constant dense<0.000000e+00> : vector<4x32xf32>
    %38 = tpu.matmul %35, %37, %cst_31 {dimension_numbers = #tpu.dot_dimension_numbers<[1], [0], [0], [1], [0, 0, 1, 1], [], []>} : vector<4x32xf32>, vector<32x32xf32>, vector<4x32xf32> -> vector<4x32xf32>
    %39 = arith.addf %34, %38 : vector<4x32xf32>
    %c0_32 = arith.constant 0 : index
    %c0_33 = arith.constant 0 : index
    %40 = vector.load %arg2[%c0_32, %c0_33] : memref<1x32xf32, #tpu.memory_space<vmem>>, vector<1x32xf32>
    %41 = vector.broadcast %40 : vector<1x32xf32> to vector<4x32xf32>
    %42 = arith.addf %39, %41 : vector<4x32xf32>
    %cst_34 = arith.constant 0.000000e+00 : f32
    %43 = vector.broadcast %cst_34 : f32 to vector<4x32xf32>
    %44 = arith.maximumf %42, %43 : vector<4x32xf32>
    %c1_35 = arith.constant 1 : index
    %c0_36 = arith.constant 0 : index
    %c0_37 = arith.constant 0 : index
    %45 = vector.load %arg3[%c1_35, %c0_36, %c0_37] : memref<2x4x32xf32, #tpu.memory_space<vmem>>, vector<1x4x32xf32>
    %46 = vector.shape_cast %45 : vector<1x4x32xf32> to vector<4x32xf32>
    %47 = vector.shape_cast %44 : vector<4x32xf32> to vector<1x4x32xf32>
    tpu.vector_store %arg3[%c1_35, %c0_36, %c0_37], %47 {strides = array<i32>} : memref<2x4x32xf32, #tpu.memory_space<vmem>>, vector<1x4x32xf32>,
    return
  }
}

module attributes {stable_mosaic.version = 11 : i64} {
  func.func @kernel(%arg0: memref<2x6x32xf32, #tpu.memory_space<vmem>>, %arg1: memref<3x32x32xf32, #tpu.memory_space<vmem>>, %arg2: memref<1x32xf32, #tpu.memory_space<vmem>>, %arg3: memref<2x4x2x32xf32, #tpu.memory_space<vmem>>) attributes {dimension_semantics = [], scalar_prefetch = 0 : i64, scratch_operands = 0 : i64, tpu.core_type = #tpu.core_type<tc>} {
    %c0 = arith.constant 0 : index
    %c0_0 = arith.constant 0 : index
    %c0_1 = arith.constant 0 : index
    %0 = vector.load %arg1[%c0, %c0_0, %c0_1] : memref<3x32x32xf32, #tpu.memory_space<vmem>>, vector<1x32x32xf32>
    %1 = vector.shape_cast %0 : vector<1x32x32xf32> to vector<32x32xf32>
    %c1 = arith.constant 1 : index
    %c0_2 = arith.constant 0 : index
    %c0_3 = arith.constant 0 : index
    %2 = vector.load %arg1[%c1, %c0_2, %c0_3] : memref<3x32x32xf32, #tpu.memory_space<vmem>>, vector<1x32x32xf32>
    %3 = vector.shape_cast %2 : vector<1x32x32xf32> to vector<32x32xf32>
    %c2 = arith.constant 2 : index
    %c0_4 = arith.constant 0 : index
    %c0_5 = arith.constant 0 : index
    %4 = vector.load %arg1[%c2, %c0_4, %c0_5] : memref<3x32x32xf32, #tpu.memory_space<vmem>>, vector<1x32x32xf32>
    %5 = vector.shape_cast %4 : vector<1x32x32xf32> to vector<32x32xf32>
    %6 = arith.addf %3, %5 : vector<32x32xf32>
    %7 = arith.addf %1, %3 : vector<32x32xf32>
    %c0_6 = arith.constant 0 : index
    %c0_7 = arith.constant 0 : index
    %8 = vector.load %arg2[%c0_6, %c0_7] : memref<1x32xf32, #tpu.memory_space<vmem>>, vector<1x32xf32>
    %c0_8 = arith.constant 0 : index
    %c0_9 = arith.constant 0 : index
    %c0_10 = arith.constant 0 : index
    %9 = vector.load %arg0[%c0_8, %c0_9, %c0_10] : memref<2x6x32xf32, #tpu.memory_space<vmem>>, vector<1x6x32xf32>
    %10 = vector.shape_cast %9 : vector<1x6x32xf32> to vector<6x32xf32>
    %11 = vector.extract_strided_slice %10 {offsets = [0, 0], sizes = [4, 32], strides = [1, 1]} : vector<6x32xf32> to vector<4x32xf32>
    %12 = vector.extract_strided_slice %10 {offsets = [1, 0], sizes = [4, 32], strides = [1, 1]} : vector<6x32xf32> to vector<4x32xf32>
    %13 = vector.extract_strided_slice %10 {offsets = [2, 0], sizes = [4, 32], strides = [1, 1]} : vector<6x32xf32> to vector<4x32xf32>
    %cst = arith.constant dense<0.000000e+00> : vector<4x32xf32>
    %14 = tpu.matmul %11, %1, %cst {dimension_numbers = #tpu.dot_dimension_numbers<[1], [0], [0], [1], [0, 0, 1, 1], [], []>} : vector<4x32xf32>, vector<32x32xf32>, vector<4x32xf32> -> vector<4x32xf32>
    %cst_11 = arith.constant dense<0.000000e+00> : vector<4x32xf32>
    %15 = tpu.matmul %12, %6, %cst_11 {dimension_numbers = #tpu.dot_dimension_numbers<[1], [0], [0], [1], [0, 0, 1, 1], [], []>} : vector<4x32xf32>, vector<32x32xf32>, vector<4x32xf32> -> vector<4x32xf32>
    %16 = arith.addf %14, %15 : vector<4x32xf32>
    %17 = vector.broadcast %8 : vector<1x32xf32> to vector<4x32xf32>
    %18 = arith.addf %16, %17 : vector<4x32xf32>
    %cst_12 = arith.constant dense<0.000000e+00> : vector<4x32xf32>
    %19 = tpu.matmul %12, %7, %cst_12 {dimension_numbers = #tpu.dot_dimension_numbers<[1], [0], [0], [1], [0, 0, 1, 1], [], []>} : vector<4x32xf32>, vector<32x32xf32>, vector<4x32xf32> -> vector<4x32xf32>
    %cst_13 = arith.constant dense<0.000000e+00> : vector<4x32xf32>
    %20 = tpu.matmul %13, %5, %cst_13 {dimension_numbers = #tpu.dot_dimension_numbers<[1], [0], [0], [1], [0, 0, 1, 1], [], []>} : vector<4x32xf32>, vector<32x32xf32>, vector<4x32xf32> -> vector<4x32xf32>
    %21 = arith.addf %19, %20 : vector<4x32xf32>
    %22 = vector.broadcast %8 : vector<1x32xf32> to vector<4x32xf32>
    %23 = arith.addf %21, %22 : vector<4x32xf32>
    %c0_14 = arith.constant 0 : index
    %c0_15 = arith.constant 0 : index
    %c0_16 = arith.constant 0 : index
    %c0_17 = arith.constant 0 : index
    %24 = vector.load %arg3[%c0_14, %c0_15, %c0_16, %c0_17] : memref<2x4x2x32xf32, #tpu.memory_space<vmem>>, vector<1x4x1x32xf32>
    %25 = vector.shape_cast %24 : vector<1x4x1x32xf32> to vector<4x32xf32>
    %26 = vector.shape_cast %18 : vector<4x32xf32> to vector<1x4x1x32xf32>
    tpu.vector_store %arg3[%c0_14, %c0_15, %c0_16, %c0_17], %26 {strides = array<i32>} : memref<2x4x2x32xf32, #tpu.memory_space<vmem>>, vector<1x4x1x32xf32>,
    %c0_18 = arith.constant 0 : index
    %c0_19 = arith.constant 0 : index
    %c1_20 = arith.constant 1 : index
    %c0_21 = arith.constant 0 : index
    %27 = vector.load %arg3[%c0_18, %c0_19, %c1_20, %c0_21] : memref<2x4x2x32xf32, #tpu.memory_space<vmem>>, vector<1x4x1x32xf32>
    %28 = vector.shape_cast %27 : vector<1x4x1x32xf32> to vector<4x32xf32>
    %29 = vector.shape_cast %23 : vector<4x32xf32> to vector<1x4x1x32xf32>
    tpu.vector_store %arg3[%c0_18, %c0_19, %c1_20, %c0_21], %29 {strides = array<i32>} : memref<2x4x2x32xf32, #tpu.memory_space<vmem>>, vector<1x4x1x32xf32>,
    %c1_22 = arith.constant 1 : index
    %c0_23 = arith.constant 0 : index
    %c0_24 = arith.constant 0 : index
    %30 = vector.load %arg0[%c1_22, %c0_23, %c0_24] : memref<2x6x32xf32, #tpu.memory_space<vmem>>, vector<1x6x32xf32>
    %31 = vector.shape_cast %30 : vector<1x6x32xf32> to vector<6x32xf32>
    %32 = vector.extract_strided_slice %31 {offsets = [0, 0], sizes = [4, 32], strides = [1, 1]} : vector<6x32xf32> to vector<4x32xf32>
    %33 = vector.extract_strided_slice %31 {offsets = [1, 0], sizes = [4, 32], strides = [1, 1]} : vector<6x32xf32> to vector<4x32xf32>
    %34 = vector.extract_strided_slice %31 {offsets = [2, 0], sizes = [4, 32], strides = [1, 1]} : vector<6x32xf32> to vector<4x32xf32>
    %cst_25 = arith.constant dense<0.000000e+00> : vector<4x32xf32>
    %35 = tpu.matmul %32, %1, %cst_25 {dimension_numbers = #tpu.dot_dimension_numbers<[1], [0], [0], [1], [0, 0, 1, 1], [], []>} : vector<4x32xf32>, vector<32x32xf32>, vector<4x32xf32> -> vector<4x32xf32>
    %cst_26 = arith.constant dense<0.000000e+00> : vector<4x32xf32>
    %36 = tpu.matmul %33, %6, %cst_26 {dimension_numbers = #tpu.dot_dimension_numbers<[1], [0], [0], [1], [0, 0, 1, 1], [], []>} : vector<4x32xf32>, vector<32x32xf32>, vector<4x32xf32> -> vector<4x32xf32>
    %37 = arith.addf %35, %36 : vector<4x32xf32>
    %38 = vector.broadcast %8 : vector<1x32xf32> to vector<4x32xf32>
    %39 = arith.addf %37, %38 : vector<4x32xf32>
    %cst_27 = arith.constant dense<0.000000e+00> : vector<4x32xf32>
    %40 = tpu.matmul %33, %7, %cst_27 {dimension_numbers = #tpu.dot_dimension_numbers<[1], [0], [0], [1], [0, 0, 1, 1], [], []>} : vector<4x32xf32>, vector<32x32xf32>, vector<4x32xf32> -> vector<4x32xf32>
    %cst_28 = arith.constant dense<0.000000e+00> : vector<4x32xf32>
    %41 = tpu.matmul %34, %5, %cst_28 {dimension_numbers = #tpu.dot_dimension_numbers<[1], [0], [0], [1], [0, 0, 1, 1], [], []>} : vector<4x32xf32>, vector<32x32xf32>, vector<4x32xf32> -> vector<4x32xf32>
    %42 = arith.addf %40, %41 : vector<4x32xf32>
    %43 = vector.broadcast %8 : vector<1x32xf32> to vector<4x32xf32>
    %44 = arith.addf %42, %43 : vector<4x32xf32>
    %c1_29 = arith.constant 1 : index
    %c0_30 = arith.constant 0 : index
    %c0_31 = arith.constant 0 : index
    %c0_32 = arith.constant 0 : index
    %45 = vector.load %arg3[%c1_29, %c0_30, %c0_31, %c0_32] : memref<2x4x2x32xf32, #tpu.memory_space<vmem>>, vector<1x4x1x32xf32>
    %46 = vector.shape_cast %45 : vector<1x4x1x32xf32> to vector<4x32xf32>
    %47 = vector.shape_cast %39 : vector<4x32xf32> to vector<1x4x1x32xf32>
    tpu.vector_store %arg3[%c1_29, %c0_30, %c0_31, %c0_32], %47 {strides = array<i32>} : memref<2x4x2x32xf32, #tpu.memory_space<vmem>>, vector<1x4x1x32xf32>,
    %c1_33 = arith.constant 1 : index
    %c0_34 = arith.constant 0 : index
    %c1_35 = arith.constant 1 : index
    %c0_36 = arith.constant 0 : index
    %48 = vector.load %arg3[%c1_33, %c0_34, %c1_35, %c0_36] : memref<2x4x2x32xf32, #tpu.memory_space<vmem>>, vector<1x4x1x32xf32>
    %49 = vector.shape_cast %48 : vector<1x4x1x32xf32> to vector<4x32xf32>
    %50 = vector.shape_cast %44 : vector<4x32xf32> to vector<1x4x1x32xf32>
    tpu.vector_store %arg3[%c1_33, %c0_34, %c1_35, %c0_36], %50 {strides = array<i32>} : memref<2x4x2x32xf32, #tpu.memory_space<vmem>>, vector<1x4x1x32xf32>,
    return
  }
}

module attributes {stable_mosaic.version = 11 : i64} {
  func.func @kernel(%arg0: memref<2x4x32xf32, #tpu.memory_space<vmem>>, %arg1: memref<3x32x32xf32, #tpu.memory_space<vmem>>, %arg2: memref<1x32xf32, #tpu.memory_space<vmem>>, %arg3: memref<1x32x32xf32, #tpu.memory_space<vmem>>, %arg4: memref<1x32xf32, #tpu.memory_space<vmem>>, %arg5: memref<3x32x32xf32, #tpu.memory_space<vmem>>, %arg6: memref<1x32xf32, #tpu.memory_space<vmem>>, %arg7: memref<1x32x32xf32, #tpu.memory_space<vmem>>, %arg8: memref<1x32xf32, #tpu.memory_space<vmem>>, %arg9: memref<2x4x32xf32, #tpu.memory_space<vmem>>, %arg10: memref<10x32xf32, #tpu.memory_space<vmem>>) attributes {dimension_semantics = [], scalar_prefetch = 0 : i64, scratch_operands = 1 : i64, tpu.core_type = #tpu.core_type<tc>} {
    %cst = arith.constant 0.000000e+00 : f32
    %0 = vector.broadcast %cst : f32 to vector<10x32xf32>
    %c0 = arith.constant 0 : index
    %c0_0 = arith.constant 0 : index
    %1 = vector.load %arg10[%c0, %c0_0] : memref<10x32xf32, #tpu.memory_space<vmem>>, vector<10x32xf32>
    tpu.vector_store %arg10[%c0, %c0_0], %0 {strides = array<i32>} : memref<10x32xf32, #tpu.memory_space<vmem>>, vector<10x32xf32>,
    %c0_1 = arith.constant 0 : index
    %c0_2 = arith.constant 0 : index
    %c0_3 = arith.constant 0 : index
    %2 = vector.load %arg0[%c0_1, %c0_2, %c0_3] : memref<2x4x32xf32, #tpu.memory_space<vmem>>, vector<1x4x32xf32>
    %3 = vector.shape_cast %2 : vector<1x4x32xf32> to vector<4x32xf32>
    %c3 = arith.constant 3 : index
    %c0_4 = arith.constant 0 : index
    %4 = vector.load %arg10[%c3, %c0_4] : memref<10x32xf32, #tpu.memory_space<vmem>>, vector<4x32xf32>
    tpu.vector_store %arg10[%c3, %c0_4], %3 {strides = array<i32>} : memref<10x32xf32, #tpu.memory_space<vmem>>, vector<4x32xf32>,
    %c0_5 = arith.constant 0 : index
    %c0_6 = arith.constant 0 : index
    %5 = vector.load %arg10[%c0_5, %c0_6] : memref<10x32xf32, #tpu.memory_space<vmem>>, vector<10x32xf32>
    %cst_7 = arith.constant 0.000000e+00 : f32
    %6 = vector.broadcast %cst_7 : f32 to vector<10x32xf32>
    %7 = arith.maximumf %5, %6 : vector<10x32xf32>
    %8 = vector.extract_strided_slice %7 {offsets = [0, 0], sizes = [4, 32], strides = [1, 1]} : vector<10x32xf32> to vector<4x32xf32>
    %c0_8 = arith.constant 0 : index
    %c0_9 = arith.constant 0 : index
    %c0_10 = arith.constant 0 : index
    %9 = vector.load %arg1[%c0_8, %c0_9, %c0_10] : memref<3x32x32xf32, #tpu.memory_space<vmem>>, vector<1x32x32xf32>
    %10 = vector.shape_cast %9 : vector<1x32x32xf32> to vector<32x32xf32>
    %cst_11 = arith.constant dense<0.000000e+00> : vector<4x32xf32>
    %11 = tpu.matmul %8, %10, %cst_11 {dimension_numbers = #tpu.dot_dimension_numbers<[1], [0], [0], [1], [0, 0, 1, 1], [], []>} : vector<4x32xf32>, vector<32x32xf32>, vector<4x32xf32> -> vector<4x32xf32>
    %12 = vector.extract_strided_slice %7 {offsets = [3, 0], sizes = [4, 32], strides = [1, 1]} : vector<10x32xf32> to vector<4x32xf32>
    %c1 = arith.constant 1 : index
    %c0_12 = arith.constant 0 : index
    %c0_13 = arith.constant 0 : index
    %13 = vector.load %arg1[%c1, %c0_12, %c0_13] : memref<3x32x32xf32, #tpu.memory_space<vmem>>, vector<1x32x32xf32>
    %14 = vector.shape_cast %13 : vector<1x32x32xf32> to vector<32x32xf32>
    %cst_14 = arith.constant dense<0.000000e+00> : vector<4x32xf32>
    %15 = tpu.matmul %12, %14, %cst_14 {dimension_numbers = #tpu.dot_dimension_numbers<[1], [0], [0], [1], [0, 0, 1, 1], [], []>} : vector<4x32xf32>, vector<32x32xf32>, vector<4x32xf32> -> vector<4x32xf32>
    %16 = arith.addf %11, %15 : vector<4x32xf32>
    %17 = vector.extract_strided_slice %7 {offsets = [6, 0], sizes = [4, 32], strides = [1, 1]} : vector<10x32xf32> to vector<4x32xf32>
    %c2 = arith.constant 2 : index
    %c0_15 = arith.constant 0 : index
    %c0_16 = arith.constant 0 : index
    %18 = vector.load %arg1[%c2, %c0_15, %c0_16] : memref<3x32x32xf32, #tpu.memory_space<vmem>>, vector<1x32x32xf32>
    %19 = vector.shape_cast %18 : vector<1x32x32xf32> to vector<32x32xf32>
    %cst_17 = arith.constant dense<0.000000e+00> : vector<4x32xf32>
    %20 = tpu.matmul %17, %19, %cst_17 {dimension_numbers = #tpu.dot_dimension_numbers<[1], [0], [0], [1], [0, 0, 1, 1], [], []>} : vector<4x32xf32>, vector<32x32xf32>, vector<4x32xf32> -> vector<4x32xf32>
    %21 = arith.addf %16, %20 : vector<4x32xf32>
    %c0_18 = arith.constant 0 : index
    %c0_19 = arith.constant 0 : index
    %22 = vector.load %arg2[%c0_18, %c0_19] : memref<1x32xf32, #tpu.memory_space<vmem>>, vector<1x32xf32>
    %23 = vector.broadcast %22 : vector<1x32xf32> to vector<4x32xf32>
    %24 = arith.addf %21, %23 : vector<4x32xf32>
    %cst_20 = arith.constant 0.000000e+00 : f32
    %25 = vector.broadcast %cst_20 : f32 to vector<4x32xf32>
    %26 = arith.maximumf %24, %25 : vector<4x32xf32>
    %c0_21 = arith.constant 0 : index
    %c0_22 = arith.constant 0 : index
    %c0_23 = arith.constant 0 : index
    %27 = vector.load %arg3[%c0_21, %c0_22, %c0_23] : memref<1x32x32xf32, #tpu.memory_space<vmem>>, vector<1x32x32xf32>
    %28 = vector.shape_cast %27 : vector<1x32x32xf32> to vector<32x32xf32>
    %cst_24 = arith.constant dense<0.000000e+00> : vector<4x32xf32>
    %29 = tpu.matmul %26, %28, %cst_24 {dimension_numbers = #tpu.dot_dimension_numbers<[1], [0], [0], [1], [0, 0, 1, 1], [], []>} : vector<4x32xf32>, vector<32x32xf32>, vector<4x32xf32> -> vector<4x32xf32>
    %c0_25 = arith.constant 0 : index
    %c0_26 = arith.constant 0 : index
    %30 = vector.load %arg4[%c0_25, %c0_26] : memref<1x32xf32, #tpu.memory_space<vmem>>, vector<1x32xf32>
    %31 = vector.broadcast %30 : vector<1x32xf32> to vector<4x32xf32>
    %32 = arith.addf %29, %31 : vector<4x32xf32>
    %c3_27 = arith.constant 3 : index
    %c0_28 = arith.constant 0 : index
    %33 = vector.load %arg10[%c3_27, %c0_28] : memref<10x32xf32, #tpu.memory_space<vmem>>, vector<4x32xf32>
    %34 = arith.addf %32, %33 : vector<4x32xf32>
    %c3_29 = arith.constant 3 : index
    %c0_30 = arith.constant 0 : index
    %35 = vector.load %arg10[%c3_29, %c0_30] : memref<10x32xf32, #tpu.memory_space<vmem>>, vector<4x32xf32>
    tpu.vector_store %arg10[%c3_29, %c0_30], %34 {strides = array<i32>} : memref<10x32xf32, #tpu.memory_space<vmem>>, vector<4x32xf32>,
    %c0_31 = arith.constant 0 : index
    %c0_32 = arith.constant 0 : index
    %36 = vector.load %arg10[%c0_31, %c0_32] : memref<10x32xf32, #tpu.memory_space<vmem>>, vector<10x32xf32>
    %cst_33 = arith.constant 0.000000e+00 : f32
    %37 = vector.broadcast %cst_33 : f32 to vector<10x32xf32>
    %38 = arith.maximumf %36, %37 : vector<10x32xf32>
    %39 = vector.extract_strided_slice %38 {offsets = [2, 0], sizes = [4, 32], strides = [1, 1]} : vector<10x32xf32> to vector<4x32xf32>
    %c0_34 = arith.constant 0 : index
    %c0_35 = arith.constant 0 : index
    %c0_36 = arith.constant 0 : index
    %40 = vector.load %arg5[%c0_34, %c0_35, %c0_36] : memref<3x32x32xf32, #tpu.memory_space<vmem>>, vector<1x32x32xf32>
    %41 = vector.shape_cast %40 : vector<1x32x32xf32> to vector<32x32xf32>
    %cst_37 = arith.constant dense<0.000000e+00> : vector<4x32xf32>
    %42 = tpu.matmul %39, %41, %cst_37 {dimension_numbers = #tpu.dot_dimension_numbers<[1], [0], [0], [1], [0, 0, 1, 1], [], []>} : vector<4x32xf32>, vector<32x32xf32>, vector<4x32xf32> -> vector<4x32xf32>
    %43 = vector.extract_strided_slice %38 {offsets = [3, 0], sizes = [4, 32], strides = [1, 1]} : vector<10x32xf32> to vector<4x32xf32>
    %c1_38 = arith.constant 1 : index
    %c0_39 = arith.constant 0 : index
    %c0_40 = arith.constant 0 : index
    %44 = vector.load %arg5[%c1_38, %c0_39, %c0_40] : memref<3x32x32xf32, #tpu.memory_space<vmem>>, vector<1x32x32xf32>
    %45 = vector.shape_cast %44 : vector<1x32x32xf32> to vector<32x32xf32>
    %cst_41 = arith.constant dense<0.000000e+00> : vector<4x32xf32>
    %46 = tpu.matmul %43, %45, %cst_41 {dimension_numbers = #tpu.dot_dimension_numbers<[1], [0], [0], [1], [0, 0, 1, 1], [], []>} : vector<4x32xf32>, vector<32x32xf32>, vector<4x32xf32> -> vector<4x32xf32>
    %47 = arith.addf %42, %46 : vector<4x32xf32>
    %48 = vector.extract_strided_slice %38 {offsets = [4, 0], sizes = [4, 32], strides = [1, 1]} : vector<10x32xf32> to vector<4x32xf32>
    %c2_42 = arith.constant 2 : index
    %c0_43 = arith.constant 0 : index
    %c0_44 = arith.constant 0 : index
    %49 = vector.load %arg5[%c2_42, %c0_43, %c0_44] : memref<3x32x32xf32, #tpu.memory_space<vmem>>, vector<1x32x32xf32>
    %50 = vector.shape_cast %49 : vector<1x32x32xf32> to vector<32x32xf32>
    %cst_45 = arith.constant dense<0.000000e+00> : vector<4x32xf32>
    %51 = tpu.matmul %48, %50, %cst_45 {dimension_numbers = #tpu.dot_dimension_numbers<[1], [0], [0], [1], [0, 0, 1, 1], [], []>} : vector<4x32xf32>, vector<32x32xf32>, vector<4x32xf32> -> vector<4x32xf32>
    %52 = arith.addf %47, %51 : vector<4x32xf32>
    %c0_46 = arith.constant 0 : index
    %c0_47 = arith.constant 0 : index
    %53 = vector.load %arg6[%c0_46, %c0_47] : memref<1x32xf32, #tpu.memory_space<vmem>>, vector<1x32xf32>
    %54 = vector.broadcast %53 : vector<1x32xf32> to vector<4x32xf32>
    %55 = arith.addf %52, %54 : vector<4x32xf32>
    %cst_48 = arith.constant 0.000000e+00 : f32
    %56 = vector.broadcast %cst_48 : f32 to vector<4x32xf32>
    %57 = arith.maximumf %55, %56 : vector<4x32xf32>
    %c0_49 = arith.constant 0 : index
    %c0_50 = arith.constant 0 : index
    %c0_51 = arith.constant 0 : index
    %58 = vector.load %arg7[%c0_49, %c0_50, %c0_51] : memref<1x32x32xf32, #tpu.memory_space<vmem>>, vector<1x32x32xf32>
    %59 = vector.shape_cast %58 : vector<1x32x32xf32> to vector<32x32xf32>
    %cst_52 = arith.constant dense<0.000000e+00> : vector<4x32xf32>
    %60 = tpu.matmul %57, %59, %cst_52 {dimension_numbers = #tpu.dot_dimension_numbers<[1], [0], [0], [1], [0, 0, 1, 1], [], []>} : vector<4x32xf32>, vector<32x32xf32>, vector<4x32xf32> -> vector<4x32xf32>
    %c0_53 = arith.constant 0 : index
    %c0_54 = arith.constant 0 : index
    %61 = vector.load %arg8[%c0_53, %c0_54] : memref<1x32xf32, #tpu.memory_space<vmem>>, vector<1x32xf32>
    %62 = vector.broadcast %61 : vector<1x32xf32> to vector<4x32xf32>
    %63 = arith.addf %60, %62 : vector<4x32xf32>
    %c3_55 = arith.constant 3 : index
    %c0_56 = arith.constant 0 : index
    %64 = vector.load %arg10[%c3_55, %c0_56] : memref<10x32xf32, #tpu.memory_space<vmem>>, vector<4x32xf32>
    %65 = arith.addf %63, %64 : vector<4x32xf32>
    %c3_57 = arith.constant 3 : index
    %c0_58 = arith.constant 0 : index
    %66 = vector.load %arg10[%c3_57, %c0_58] : memref<10x32xf32, #tpu.memory_space<vmem>>, vector<4x32xf32>
    tpu.vector_store %arg10[%c3_57, %c0_58], %65 {strides = array<i32>} : memref<10x32xf32, #tpu.memory_space<vmem>>, vector<4x32xf32>,
    %c3_59 = arith.constant 3 : index
    %c0_60 = arith.constant 0 : index
    %67 = vector.load %arg10[%c3_59, %c0_60] : memref<10x32xf32, #tpu.memory_space<vmem>>, vector<4x32xf32>
    %c0_61 = arith.constant 0 : index
    %c0_62 = arith.constant 0 : index
    %c0_63 = arith.constant 0 : index
    %68 = vector.load %arg9[%c0_61, %c0_62, %c0_63] : memref<2x4x32xf32, #tpu.memory_space<vmem>>, vector<1x4x32xf32>
    %69 = vector.shape_cast %68 : vector<1x4x32xf32> to vector<4x32xf32>
    %70 = vector.shape_cast %67 : vector<4x32xf32> to vector<1x4x32xf32>
    tpu.vector_store %arg9[%c0_61, %c0_62, %c0_63], %70 {strides = array<i32>} : memref<2x4x32xf32, #tpu.memory_space<vmem>>, vector<1x4x32xf32>,
    %c1_64 = arith.constant 1 : index
    %c0_65 = arith.constant 0 : index
    %c0_66 = arith.constant 0 : index
    %71 = vector.load %arg0[%c1_64, %c0_65, %c0_66] : memref<2x4x32xf32, #tpu.memory_space<vmem>>, vector<1x4x32xf32>
    %72 = vector.shape_cast %71 : vector<1x4x32xf32> to vector<4x32xf32>
    %c3_67 = arith.constant 3 : index
    %c0_68 = arith.constant 0 : index
    %73 = vector.load %arg10[%c3_67, %c0_68] : memref<10x32xf32, #tpu.memory_space<vmem>>, vector<4x32xf32>
    tpu.vector_store %arg10[%c3_67, %c0_68], %72 {strides = array<i32>} : memref<10x32xf32, #tpu.memory_space<vmem>>, vector<4x32xf32>,
    %c0_69 = arith.constant 0 : index
    %c0_70 = arith.constant 0 : index
    %74 = vector.load %arg10[%c0_69, %c0_70] : memref<10x32xf32, #tpu.memory_space<vmem>>, vector<10x32xf32>
    %cst_71 = arith.constant 0.000000e+00 : f32
    %75 = vector.broadcast %cst_71 : f32 to vector<10x32xf32>
    %76 = arith.maximumf %74, %75 : vector<10x32xf32>
    %77 = vector.extract_strided_slice %76 {offsets = [0, 0], sizes = [4, 32], strides = [1, 1]} : vector<10x32xf32> to vector<4x32xf32>
    %c0_72 = arith.constant 0 : index
    %c0_73 = arith.constant 0 : index
    %c0_74 = arith.constant 0 : index
    %78 = vector.load %arg1[%c0_72, %c0_73, %c0_74] : memref<3x32x32xf32, #tpu.memory_space<vmem>>, vector<1x32x32xf32>
    %79 = vector.shape_cast %78 : vector<1x32x32xf32> to vector<32x32xf32>
    %cst_75 = arith.constant dense<0.000000e+00> : vector<4x32xf32>
    %80 = tpu.matmul %77, %79, %cst_75 {dimension_numbers = #tpu.dot_dimension_numbers<[1], [0], [0], [1], [0, 0, 1, 1], [], []>} : vector<4x32xf32>, vector<32x32xf32>, vector<4x32xf32> -> vector<4x32xf32>
    %81 = vector.extract_strided_slice %76 {offsets = [3, 0], sizes = [4, 32], strides = [1, 1]} : vector<10x32xf32> to vector<4x32xf32>
    %c1_76 = arith.constant 1 : index
    %c0_77 = arith.constant 0 : index
    %c0_78 = arith.constant 0 : index
    %82 = vector.load %arg1[%c1_76, %c0_77, %c0_78] : memref<3x32x32xf32, #tpu.memory_space<vmem>>, vector<1x32x32xf32>
    %83 = vector.shape_cast %82 : vector<1x32x32xf32> to vector<32x32xf32>
    %cst_79 = arith.constant dense<0.000000e+00> : vector<4x32xf32>
    %84 = tpu.matmul %81, %83, %cst_79 {dimension_numbers = #tpu.dot_dimension_numbers<[1], [0], [0], [1], [0, 0, 1, 1], [], []>} : vector<4x32xf32>, vector<32x32xf32>, vector<4x32xf32> -> vector<4x32xf32>
    %85 = arith.addf %80, %84 : vector<4x32xf32>
    %86 = vector.extract_strided_slice %76 {offsets = [6, 0], sizes = [4, 32], strides = [1, 1]} : vector<10x32xf32> to vector<4x32xf32>
    %c2_80 = arith.constant 2 : index
    %c0_81 = arith.constant 0 : index
    %c0_82 = arith.constant 0 : index
    %87 = vector.load %arg1[%c2_80, %c0_81, %c0_82] : memref<3x32x32xf32, #tpu.memory_space<vmem>>, vector<1x32x32xf32>
    %88 = vector.shape_cast %87 : vector<1x32x32xf32> to vector<32x32xf32>
    %cst_83 = arith.constant dense<0.000000e+00> : vector<4x32xf32>
    %89 = tpu.matmul %86, %88, %cst_83 {dimension_numbers = #tpu.dot_dimension_numbers<[1], [0], [0], [1], [0, 0, 1, 1], [], []>} : vector<4x32xf32>, vector<32x32xf32>, vector<4x32xf32> -> vector<4x32xf32>
    %90 = arith.addf %85, %89 : vector<4x32xf32>
    %c0_84 = arith.constant 0 : index
    %c0_85 = arith.constant 0 : index
    %91 = vector.load %arg2[%c0_84, %c0_85] : memref<1x32xf32, #tpu.memory_space<vmem>>, vector<1x32xf32>
    %92 = vector.broadcast %91 : vector<1x32xf32> to vector<4x32xf32>
    %93 = arith.addf %90, %92 : vector<4x32xf32>
    %cst_86 = arith.constant 0.000000e+00 : f32
    %94 = vector.broadcast %cst_86 : f32 to vector<4x32xf32>
    %95 = arith.maximumf %93, %94 : vector<4x32xf32>
    %c0_87 = arith.constant 0 : index
    %c0_88 = arith.constant 0 : index
    %c0_89 = arith.constant 0 : index
    %96 = vector.load %arg3[%c0_87, %c0_88, %c0_89] : memref<1x32x32xf32, #tpu.memory_space<vmem>>, vector<1x32x32xf32>
    %97 = vector.shape_cast %96 : vector<1x32x32xf32> to vector<32x32xf32>
    %cst_90 = arith.constant dense<0.000000e+00> : vector<4x32xf32>
    %98 = tpu.matmul %95, %97, %cst_90 {dimension_numbers = #tpu.dot_dimension_numbers<[1], [0], [0], [1], [0, 0, 1, 1], [], []>} : vector<4x32xf32>, vector<32x32xf32>, vector<4x32xf32> -> vector<4x32xf32>
    %c0_91 = arith.constant 0 : index
    %c0_92 = arith.constant 0 : index
    %99 = vector.load %arg4[%c0_91, %c0_92] : memref<1x32xf32, #tpu.memory_space<vmem>>, vector<1x32xf32>
    %100 = vector.broadcast %99 : vector<1x32xf32> to vector<4x32xf32>
    %101 = arith.addf %98, %100 : vector<4x32xf32>
    %c3_93 = arith.constant 3 : index
    %c0_94 = arith.constant 0 : index
    %102 = vector.load %arg10[%c3_93, %c0_94] : memref<10x32xf32, #tpu.memory_space<vmem>>, vector<4x32xf32>
    %103 = arith.addf %101, %102 : vector<4x32xf32>
    %c3_95 = arith.constant 3 : index
    %c0_96 = arith.constant 0 : index
    %104 = vector.load %arg10[%c3_95, %c0_96] : memref<10x32xf32, #tpu.memory_space<vmem>>, vector<4x32xf32>
    tpu.vector_store %arg10[%c3_95, %c0_96], %103 {strides = array<i32>} : memref<10x32xf32, #tpu.memory_space<vmem>>, vector<4x32xf32>,
    %c0_97 = arith.constant 0 : index
    %c0_98 = arith.constant 0 : index
    %105 = vector.load %arg10[%c0_97, %c0_98] : memref<10x32xf32, #tpu.memory_space<vmem>>, vector<10x32xf32>
    %cst_99 = arith.constant 0.000000e+00 : f32
    %106 = vector.broadcast %cst_99 : f32 to vector<10x32xf32>
    %107 = arith.maximumf %105, %106 : vector<10x32xf32>
    %108 = vector.extract_strided_slice %107 {offsets = [2, 0], sizes = [4, 32], strides = [1, 1]} : vector<10x32xf32> to vector<4x32xf32>
    %c0_100 = arith.constant 0 : index
    %c0_101 = arith.constant 0 : index
    %c0_102 = arith.constant 0 : index
    %109 = vector.load %arg5[%c0_100, %c0_101, %c0_102] : memref<3x32x32xf32, #tpu.memory_space<vmem>>, vector<1x32x32xf32>
    %110 = vector.shape_cast %109 : vector<1x32x32xf32> to vector<32x32xf32>
    %cst_103 = arith.constant dense<0.000000e+00> : vector<4x32xf32>
    %111 = tpu.matmul %108, %110, %cst_103 {dimension_numbers = #tpu.dot_dimension_numbers<[1], [0], [0], [1], [0, 0, 1, 1], [], []>} : vector<4x32xf32>, vector<32x32xf32>, vector<4x32xf32> -> vector<4x32xf32>
    %112 = vector.extract_strided_slice %107 {offsets = [3, 0], sizes = [4, 32], strides = [1, 1]} : vector<10x32xf32> to vector<4x32xf32>
    %c1_104 = arith.constant 1 : index
    %c0_105 = arith.constant 0 : index
    %c0_106 = arith.constant 0 : index
    %113 = vector.load %arg5[%c1_104, %c0_105, %c0_106] : memref<3x32x32xf32, #tpu.memory_space<vmem>>, vector<1x32x32xf32>
    %114 = vector.shape_cast %113 : vector<1x32x32xf32> to vector<32x32xf32>
    %cst_107 = arith.constant dense<0.000000e+00> : vector<4x32xf32>
    %115 = tpu.matmul %112, %114, %cst_107 {dimension_numbers = #tpu.dot_dimension_numbers<[1], [0], [0], [1], [0, 0, 1, 1], [], []>} : vector<4x32xf32>, vector<32x32xf32>, vector<4x32xf32> -> vector<4x32xf32>
    %116 = arith.addf %111, %115 : vector<4x32xf32>
    %117 = vector.extract_strided_slice %107 {offsets = [4, 0], sizes = [4, 32], strides = [1, 1]} : vector<10x32xf32> to vector<4x32xf32>
    %c2_108 = arith.constant 2 : index
    %c0_109 = arith.constant 0 : index
    %c0_110 = arith.constant 0 : index
    %118 = vector.load %arg5[%c2_108, %c0_109, %c0_110] : memref<3x32x32xf32, #tpu.memory_space<vmem>>, vector<1x32x32xf32>
    %119 = vector.shape_cast %118 : vector<1x32x32xf32> to vector<32x32xf32>
    %cst_111 = arith.constant dense<0.000000e+00> : vector<4x32xf32>
    %120 = tpu.matmul %117, %119, %cst_111 {dimension_numbers = #tpu.dot_dimension_numbers<[1], [0], [0], [1], [0, 0, 1, 1], [], []>} : vector<4x32xf32>, vector<32x32xf32>, vector<4x32xf32> -> vector<4x32xf32>
    %121 = arith.addf %116, %120 : vector<4x32xf32>
    %c0_112 = arith.constant 0 : index
    %c0_113 = arith.constant 0 : index
    %122 = vector.load %arg6[%c0_112, %c0_113] : memref<1x32xf32, #tpu.memory_space<vmem>>, vector<1x32xf32>
    %123 = vector.broadcast %122 : vector<1x32xf32> to vector<4x32xf32>
    %124 = arith.addf %121, %123 : vector<4x32xf32>
    %cst_114 = arith.constant 0.000000e+00 : f32
    %125 = vector.broadcast %cst_114 : f32 to vector<4x32xf32>
    %126 = arith.maximumf %124, %125 : vector<4x32xf32>
    %c0_115 = arith.constant 0 : index
    %c0_116 = arith.constant 0 : index
    %c0_117 = arith.constant 0 : index
    %127 = vector.load %arg7[%c0_115, %c0_116, %c0_117] : memref<1x32x32xf32, #tpu.memory_space<vmem>>, vector<1x32x32xf32>
    %128 = vector.shape_cast %127 : vector<1x32x32xf32> to vector<32x32xf32>
    %cst_118 = arith.constant dense<0.000000e+00> : vector<4x32xf32>
    %129 = tpu.matmul %126, %128, %cst_118 {dimension_numbers = #tpu.dot_dimension_numbers<[1], [0], [0], [1], [0, 0, 1, 1], [], []>} : vector<4x32xf32>, vector<32x32xf32>, vector<4x32xf32> -> vector<4x32xf32>
    %c0_119 = arith.constant 0 : index
    %c0_120 = arith.constant 0 : index
    %130 = vector.load %arg8[%c0_119, %c0_120] : memref<1x32xf32, #tpu.memory_space<vmem>>, vector<1x32xf32>
    %131 = vector.broadcast %130 : vector<1x32xf32> to vector<4x32xf32>
    %132 = arith.addf %129, %131 : vector<4x32xf32>
    %c3_121 = arith.constant 3 : index
    %c0_122 = arith.constant 0 : index
    %133 = vector.load %arg10[%c3_121, %c0_122] : memref<10x32xf32, #tpu.memory_space<vmem>>, vector<4x32xf32>
    %134 = arith.addf %132, %133 : vector<4x32xf32>
    %c3_123 = arith.constant 3 : index
    %c0_124 = arith.constant 0 : index
    %135 = vector.load %arg10[%c3_123, %c0_124] : memref<10x32xf32, #tpu.memory_space<vmem>>, vector<4x32xf32>
    tpu.vector_store %arg10[%c3_123, %c0_124], %134 {strides = array<i32>} : memref<10x32xf32, #tpu.memory_space<vmem>>, vector<4x32xf32>,
    %c3_125 = arith.constant 3 : index
    %c0_126 = arith.constant 0 : index
    %136 = vector.load %arg10[%c3_125, %c0_126] : memref<10x32xf32, #tpu.memory_space<vmem>>, vector<4x32xf32>
    %c1_127 = arith.constant 1 : index
    %c0_128 = arith.constant 0 : index
    %c0_129 = arith.constant 0 : index
    %137 = vector.load %arg9[%c1_127, %c0_128, %c0_129] : memref<2x4x32xf32, #tpu.memory_space<vmem>>, vector<1x4x32xf32>
    %138 = vector.shape_cast %137 : vector<1x4x32xf32> to vector<4x32xf32>
    %139 = vector.shape_cast %136 : vector<4x32xf32> to vector<1x4x32xf32>
    tpu.vector_store %arg9[%c1_127, %c0_128, %c0_129], %139 {strides = array<i32>} : memref<2x4x32xf32, #tpu.memory_space<vmem>>, vector<1x4x32xf32>,
    return
  }
}

module attributes {stable_mosaic.version = 11 : i64} {
  func.func @kernel(%arg0: memref<2x8x32xf32, #tpu.memory_space<vmem>>, %arg1: memref<3x32x32xf32, #tpu.memory_space<vmem>>, %arg2: memref<1x32xf32, #tpu.memory_space<vmem>>, %arg3: memref<1x32x32xf32, #tpu.memory_space<vmem>>, %arg4: memref<1x32xf32, #tpu.memory_space<vmem>>, %arg5: memref<3x32x32xf32, #tpu.memory_space<vmem>>, %arg6: memref<1x32xf32, #tpu.memory_space<vmem>>, %arg7: memref<1x32x32xf32, #tpu.memory_space<vmem>>, %arg8: memref<1x32xf32, #tpu.memory_space<vmem>>, %arg9: memref<2x8x32xf32, #tpu.memory_space<vmem>>, %arg10: memref<14x32xf32, #tpu.memory_space<vmem>>) attributes {dimension_semantics = [], scalar_prefetch = 0 : i64, scratch_operands = 1 : i64, tpu.core_type = #tpu.core_type<tc>} {
    %cst = arith.constant 0.000000e+00 : f32
    %0 = vector.broadcast %cst : f32 to vector<14x32xf32>
    %c0 = arith.constant 0 : index
    %c0_0 = arith.constant 0 : index
    %1 = vector.load %arg10[%c0, %c0_0] : memref<14x32xf32, #tpu.memory_space<vmem>>, vector<14x32xf32>
    tpu.vector_store %arg10[%c0, %c0_0], %0 {strides = array<i32>} : memref<14x32xf32, #tpu.memory_space<vmem>>, vector<14x32xf32>,
    %c0_1 = arith.constant 0 : index
    %c0_2 = arith.constant 0 : index
    %c0_3 = arith.constant 0 : index
    %2 = vector.load %arg0[%c0_1, %c0_2, %c0_3] : memref<2x8x32xf32, #tpu.memory_space<vmem>>, vector<1x8x32xf32>
    %3 = vector.shape_cast %2 : vector<1x8x32xf32> to vector<8x32xf32>
    %c3 = arith.constant 3 : index
    %c0_4 = arith.constant 0 : index
    %4 = vector.load %arg10[%c3, %c0_4] : memref<14x32xf32, #tpu.memory_space<vmem>>, vector<8x32xf32>
    tpu.vector_store %arg10[%c3, %c0_4], %3 {strides = array<i32>} : memref<14x32xf32, #tpu.memory_space<vmem>>, vector<8x32xf32>,
    %c0_5 = arith.constant 0 : index
    %c0_6 = arith.constant 0 : index
    %5 = vector.load %arg10[%c0_5, %c0_6] : memref<14x32xf32, #tpu.memory_space<vmem>>, vector<14x32xf32>
    %cst_7 = arith.constant 0.000000e+00 : f32
    %6 = vector.broadcast %cst_7 : f32 to vector<14x32xf32>
    %7 = arith.maximumf %5, %6 : vector<14x32xf32>
    %8 = vector.extract_strided_slice %7 {offsets = [0, 0], sizes = [8, 32], strides = [1, 1]} : vector<14x32xf32> to vector<8x32xf32>
    %c0_8 = arith.constant 0 : index
    %c0_9 = arith.constant 0 : index
    %c0_10 = arith.constant 0 : index
    %9 = vector.load %arg1[%c0_8, %c0_9, %c0_10] : memref<3x32x32xf32, #tpu.memory_space<vmem>>, vector<1x32x32xf32>
    %10 = vector.shape_cast %9 : vector<1x32x32xf32> to vector<32x32xf32>
    %cst_11 = arith.constant dense<0.000000e+00> : vector<8x32xf32>
    %11 = tpu.matmul %8, %10, %cst_11 {dimension_numbers = #tpu.dot_dimension_numbers<[1], [0], [0], [1], [0, 0, 1, 1], [], []>} : vector<8x32xf32>, vector<32x32xf32>, vector<8x32xf32> -> vector<8x32xf32>
    %12 = vector.extract_strided_slice %7 {offsets = [3, 0], sizes = [8, 32], strides = [1, 1]} : vector<14x32xf32> to vector<8x32xf32>
    %c1 = arith.constant 1 : index
    %c0_12 = arith.constant 0 : index
    %c0_13 = arith.constant 0 : index
    %13 = vector.load %arg1[%c1, %c0_12, %c0_13] : memref<3x32x32xf32, #tpu.memory_space<vmem>>, vector<1x32x32xf32>
    %14 = vector.shape_cast %13 : vector<1x32x32xf32> to vector<32x32xf32>
    %cst_14 = arith.constant dense<0.000000e+00> : vector<8x32xf32>
    %15 = tpu.matmul %12, %14, %cst_14 {dimension_numbers = #tpu.dot_dimension_numbers<[1], [0], [0], [1], [0, 0, 1, 1], [], []>} : vector<8x32xf32>, vector<32x32xf32>, vector<8x32xf32> -> vector<8x32xf32>
    %16 = arith.addf %11, %15 : vector<8x32xf32>
    %17 = vector.extract_strided_slice %7 {offsets = [6, 0], sizes = [8, 32], strides = [1, 1]} : vector<14x32xf32> to vector<8x32xf32>
    %c2 = arith.constant 2 : index
    %c0_15 = arith.constant 0 : index
    %c0_16 = arith.constant 0 : index
    %18 = vector.load %arg1[%c2, %c0_15, %c0_16] : memref<3x32x32xf32, #tpu.memory_space<vmem>>, vector<1x32x32xf32>
    %19 = vector.shape_cast %18 : vector<1x32x32xf32> to vector<32x32xf32>
    %cst_17 = arith.constant dense<0.000000e+00> : vector<8x32xf32>
    %20 = tpu.matmul %17, %19, %cst_17 {dimension_numbers = #tpu.dot_dimension_numbers<[1], [0], [0], [1], [0, 0, 1, 1], [], []>} : vector<8x32xf32>, vector<32x32xf32>, vector<8x32xf32> -> vector<8x32xf32>
    %21 = arith.addf %16, %20 : vector<8x32xf32>
    %c0_18 = arith.constant 0 : index
    %c0_19 = arith.constant 0 : index
    %22 = vector.load %arg2[%c0_18, %c0_19] : memref<1x32xf32, #tpu.memory_space<vmem>>, vector<1x32xf32>
    %23 = vector.broadcast %22 : vector<1x32xf32> to vector<8x32xf32>
    %24 = arith.addf %21, %23 : vector<8x32xf32>
    %cst_20 = arith.constant 0.000000e+00 : f32
    %25 = vector.broadcast %cst_20 : f32 to vector<8x32xf32>
    %26 = arith.maximumf %24, %25 : vector<8x32xf32>
    %c0_21 = arith.constant 0 : index
    %c0_22 = arith.constant 0 : index
    %c0_23 = arith.constant 0 : index
    %27 = vector.load %arg3[%c0_21, %c0_22, %c0_23] : memref<1x32x32xf32, #tpu.memory_space<vmem>>, vector<1x32x32xf32>
    %28 = vector.shape_cast %27 : vector<1x32x32xf32> to vector<32x32xf32>
    %cst_24 = arith.constant dense<0.000000e+00> : vector<8x32xf32>
    %29 = tpu.matmul %26, %28, %cst_24 {dimension_numbers = #tpu.dot_dimension_numbers<[1], [0], [0], [1], [0, 0, 1, 1], [], []>} : vector<8x32xf32>, vector<32x32xf32>, vector<8x32xf32> -> vector<8x32xf32>
    %c0_25 = arith.constant 0 : index
    %c0_26 = arith.constant 0 : index
    %30 = vector.load %arg4[%c0_25, %c0_26] : memref<1x32xf32, #tpu.memory_space<vmem>>, vector<1x32xf32>
    %31 = vector.broadcast %30 : vector<1x32xf32> to vector<8x32xf32>
    %32 = arith.addf %29, %31 : vector<8x32xf32>
    %c3_27 = arith.constant 3 : index
    %c0_28 = arith.constant 0 : index
    %33 = vector.load %arg10[%c3_27, %c0_28] : memref<14x32xf32, #tpu.memory_space<vmem>>, vector<8x32xf32>
    %34 = arith.addf %32, %33 : vector<8x32xf32>
    %c3_29 = arith.constant 3 : index
    %c0_30 = arith.constant 0 : index
    %35 = vector.load %arg10[%c3_29, %c0_30] : memref<14x32xf32, #tpu.memory_space<vmem>>, vector<8x32xf32>
    tpu.vector_store %arg10[%c3_29, %c0_30], %34 {strides = array<i32>} : memref<14x32xf32, #tpu.memory_space<vmem>>, vector<8x32xf32>,
    %c0_31 = arith.constant 0 : index
    %c0_32 = arith.constant 0 : index
    %36 = vector.load %arg10[%c0_31, %c0_32] : memref<14x32xf32, #tpu.memory_space<vmem>>, vector<14x32xf32>
    %cst_33 = arith.constant 0.000000e+00 : f32
    %37 = vector.broadcast %cst_33 : f32 to vector<14x32xf32>
    %38 = arith.maximumf %36, %37 : vector<14x32xf32>
    %39 = vector.extract_strided_slice %38 {offsets = [2, 0], sizes = [8, 32], strides = [1, 1]} : vector<14x32xf32> to vector<8x32xf32>
    %c0_34 = arith.constant 0 : index
    %c0_35 = arith.constant 0 : index
    %c0_36 = arith.constant 0 : index
    %40 = vector.load %arg5[%c0_34, %c0_35, %c0_36] : memref<3x32x32xf32, #tpu.memory_space<vmem>>, vector<1x32x32xf32>
    %41 = vector.shape_cast %40 : vector<1x32x32xf32> to vector<32x32xf32>
    %cst_37 = arith.constant dense<0.000000e+00> : vector<8x32xf32>
    %42 = tpu.matmul %39, %41, %cst_37 {dimension_numbers = #tpu.dot_dimension_numbers<[1], [0], [0], [1], [0, 0, 1, 1], [], []>} : vector<8x32xf32>, vector<32x32xf32>, vector<8x32xf32> -> vector<8x32xf32>
    %43 = vector.extract_strided_slice %38 {offsets = [3, 0], sizes = [8, 32], strides = [1, 1]} : vector<14x32xf32> to vector<8x32xf32>
    %c1_38 = arith.constant 1 : index
    %c0_39 = arith.constant 0 : index
    %c0_40 = arith.constant 0 : index
    %44 = vector.load %arg5[%c1_38, %c0_39, %c0_40] : memref<3x32x32xf32, #tpu.memory_space<vmem>>, vector<1x32x32xf32>
    %45 = vector.shape_cast %44 : vector<1x32x32xf32> to vector<32x32xf32>
    %cst_41 = arith.constant dense<0.000000e+00> : vector<8x32xf32>
    %46 = tpu.matmul %43, %45, %cst_41 {dimension_numbers = #tpu.dot_dimension_numbers<[1], [0], [0], [1], [0, 0, 1, 1], [], []>} : vector<8x32xf32>, vector<32x32xf32>, vector<8x32xf32> -> vector<8x32xf32>
    %47 = arith.addf %42, %46 : vector<8x32xf32>
    %48 = vector.extract_strided_slice %38 {offsets = [4, 0], sizes = [8, 32], strides = [1, 1]} : vector<14x32xf32> to vector<8x32xf32>
    %c2_42 = arith.constant 2 : index
    %c0_43 = arith.constant 0 : index
    %c0_44 = arith.constant 0 : index
    %49 = vector.load %arg5[%c2_42, %c0_43, %c0_44] : memref<3x32x32xf32, #tpu.memory_space<vmem>>, vector<1x32x32xf32>
    %50 = vector.shape_cast %49 : vector<1x32x32xf32> to vector<32x32xf32>
    %cst_45 = arith.constant dense<0.000000e+00> : vector<8x32xf32>
    %51 = tpu.matmul %48, %50, %cst_45 {dimension_numbers = #tpu.dot_dimension_numbers<[1], [0], [0], [1], [0, 0, 1, 1], [], []>} : vector<8x32xf32>, vector<32x32xf32>, vector<8x32xf32> -> vector<8x32xf32>
    %52 = arith.addf %47, %51 : vector<8x32xf32>
    %c0_46 = arith.constant 0 : index
    %c0_47 = arith.constant 0 : index
    %53 = vector.load %arg6[%c0_46, %c0_47] : memref<1x32xf32, #tpu.memory_space<vmem>>, vector<1x32xf32>
    %54 = vector.broadcast %53 : vector<1x32xf32> to vector<8x32xf32>
    %55 = arith.addf %52, %54 : vector<8x32xf32>
    %cst_48 = arith.constant 0.000000e+00 : f32
    %56 = vector.broadcast %cst_48 : f32 to vector<8x32xf32>
    %57 = arith.maximumf %55, %56 : vector<8x32xf32>
    %c0_49 = arith.constant 0 : index
    %c0_50 = arith.constant 0 : index
    %c0_51 = arith.constant 0 : index
    %58 = vector.load %arg7[%c0_49, %c0_50, %c0_51] : memref<1x32x32xf32, #tpu.memory_space<vmem>>, vector<1x32x32xf32>
    %59 = vector.shape_cast %58 : vector<1x32x32xf32> to vector<32x32xf32>
    %cst_52 = arith.constant dense<0.000000e+00> : vector<8x32xf32>
    %60 = tpu.matmul %57, %59, %cst_52 {dimension_numbers = #tpu.dot_dimension_numbers<[1], [0], [0], [1], [0, 0, 1, 1], [], []>} : vector<8x32xf32>, vector<32x32xf32>, vector<8x32xf32> -> vector<8x32xf32>
    %c0_53 = arith.constant 0 : index
    %c0_54 = arith.constant 0 : index
    %61 = vector.load %arg8[%c0_53, %c0_54] : memref<1x32xf32, #tpu.memory_space<vmem>>, vector<1x32xf32>
    %62 = vector.broadcast %61 : vector<1x32xf32> to vector<8x32xf32>
    %63 = arith.addf %60, %62 : vector<8x32xf32>
    %c3_55 = arith.constant 3 : index
    %c0_56 = arith.constant 0 : index
    %64 = vector.load %arg10[%c3_55, %c0_56] : memref<14x32xf32, #tpu.memory_space<vmem>>, vector<8x32xf32>
    %65 = arith.addf %63, %64 : vector<8x32xf32>
    %c3_57 = arith.constant 3 : index
    %c0_58 = arith.constant 0 : index
    %66 = vector.load %arg10[%c3_57, %c0_58] : memref<14x32xf32, #tpu.memory_space<vmem>>, vector<8x32xf32>
    tpu.vector_store %arg10[%c3_57, %c0_58], %65 {strides = array<i32>} : memref<14x32xf32, #tpu.memory_space<vmem>>, vector<8x32xf32>,
    %c3_59 = arith.constant 3 : index
    %c0_60 = arith.constant 0 : index
    %67 = vector.load %arg10[%c3_59, %c0_60] : memref<14x32xf32, #tpu.memory_space<vmem>>, vector<8x32xf32>
    %c0_61 = arith.constant 0 : index
    %c0_62 = arith.constant 0 : index
    %c0_63 = arith.constant 0 : index
    %68 = vector.load %arg9[%c0_61, %c0_62, %c0_63] : memref<2x8x32xf32, #tpu.memory_space<vmem>>, vector<1x8x32xf32>
    %69 = vector.shape_cast %68 : vector<1x8x32xf32> to vector<8x32xf32>
    %70 = vector.shape_cast %67 : vector<8x32xf32> to vector<1x8x32xf32>
    tpu.vector_store %arg9[%c0_61, %c0_62, %c0_63], %70 {strides = array<i32>} : memref<2x8x32xf32, #tpu.memory_space<vmem>>, vector<1x8x32xf32>,
    %c1_64 = arith.constant 1 : index
    %c0_65 = arith.constant 0 : index
    %c0_66 = arith.constant 0 : index
    %71 = vector.load %arg0[%c1_64, %c0_65, %c0_66] : memref<2x8x32xf32, #tpu.memory_space<vmem>>, vector<1x8x32xf32>
    %72 = vector.shape_cast %71 : vector<1x8x32xf32> to vector<8x32xf32>
    %c3_67 = arith.constant 3 : index
    %c0_68 = arith.constant 0 : index
    %73 = vector.load %arg10[%c3_67, %c0_68] : memref<14x32xf32, #tpu.memory_space<vmem>>, vector<8x32xf32>
    tpu.vector_store %arg10[%c3_67, %c0_68], %72 {strides = array<i32>} : memref<14x32xf32, #tpu.memory_space<vmem>>, vector<8x32xf32>,
    %c0_69 = arith.constant 0 : index
    %c0_70 = arith.constant 0 : index
    %74 = vector.load %arg10[%c0_69, %c0_70] : memref<14x32xf32, #tpu.memory_space<vmem>>, vector<14x32xf32>
    %cst_71 = arith.constant 0.000000e+00 : f32
    %75 = vector.broadcast %cst_71 : f32 to vector<14x32xf32>
    %76 = arith.maximumf %74, %75 : vector<14x32xf32>
    %77 = vector.extract_strided_slice %76 {offsets = [0, 0], sizes = [8, 32], strides = [1, 1]} : vector<14x32xf32> to vector<8x32xf32>
    %c0_72 = arith.constant 0 : index
    %c0_73 = arith.constant 0 : index
    %c0_74 = arith.constant 0 : index
    %78 = vector.load %arg1[%c0_72, %c0_73, %c0_74] : memref<3x32x32xf32, #tpu.memory_space<vmem>>, vector<1x32x32xf32>
    %79 = vector.shape_cast %78 : vector<1x32x32xf32> to vector<32x32xf32>
    %cst_75 = arith.constant dense<0.000000e+00> : vector<8x32xf32>
    %80 = tpu.matmul %77, %79, %cst_75 {dimension_numbers = #tpu.dot_dimension_numbers<[1], [0], [0], [1], [0, 0, 1, 1], [], []>} : vector<8x32xf32>, vector<32x32xf32>, vector<8x32xf32> -> vector<8x32xf32>
    %81 = vector.extract_strided_slice %76 {offsets = [3, 0], sizes = [8, 32], strides = [1, 1]} : vector<14x32xf32> to vector<8x32xf32>
    %c1_76 = arith.constant 1 : index
    %c0_77 = arith.constant 0 : index
    %c0_78 = arith.constant 0 : index
    %82 = vector.load %arg1[%c1_76, %c0_77, %c0_78] : memref<3x32x32xf32, #tpu.memory_space<vmem>>, vector<1x32x32xf32>
    %83 = vector.shape_cast %82 : vector<1x32x32xf32> to vector<32x32xf32>
    %cst_79 = arith.constant dense<0.000000e+00> : vector<8x32xf32>
    %84 = tpu.matmul %81, %83, %cst_79 {dimension_numbers = #tpu.dot_dimension_numbers<[1], [0], [0], [1], [0, 0, 1, 1], [], []>} : vector<8x32xf32>, vector<32x32xf32>, vector<8x32xf32> -> vector<8x32xf32>
    %85 = arith.addf %80, %84 : vector<8x32xf32>
    %86 = vector.extract_strided_slice %76 {offsets = [6, 0], sizes = [8, 32], strides = [1, 1]} : vector<14x32xf32> to vector<8x32xf32>
    %c2_80 = arith.constant 2 : index
    %c0_81 = arith.constant 0 : index
    %c0_82 = arith.constant 0 : index
    %87 = vector.load %arg1[%c2_80, %c0_81, %c0_82] : memref<3x32x32xf32, #tpu.memory_space<vmem>>, vector<1x32x32xf32>
    %88 = vector.shape_cast %87 : vector<1x32x32xf32> to vector<32x32xf32>
    %cst_83 = arith.constant dense<0.000000e+00> : vector<8x32xf32>
    %89 = tpu.matmul %86, %88, %cst_83 {dimension_numbers = #tpu.dot_dimension_numbers<[1], [0], [0], [1], [0, 0, 1, 1], [], []>} : vector<8x32xf32>, vector<32x32xf32>, vector<8x32xf32> -> vector<8x32xf32>
    %90 = arith.addf %85, %89 : vector<8x32xf32>
    %c0_84 = arith.constant 0 : index
    %c0_85 = arith.constant 0 : index
    %91 = vector.load %arg2[%c0_84, %c0_85] : memref<1x32xf32, #tpu.memory_space<vmem>>, vector<1x32xf32>
    %92 = vector.broadcast %91 : vector<1x32xf32> to vector<8x32xf32>
    %93 = arith.addf %90, %92 : vector<8x32xf32>
    %cst_86 = arith.constant 0.000000e+00 : f32
    %94 = vector.broadcast %cst_86 : f32 to vector<8x32xf32>
    %95 = arith.maximumf %93, %94 : vector<8x32xf32>
    %c0_87 = arith.constant 0 : index
    %c0_88 = arith.constant 0 : index
    %c0_89 = arith.constant 0 : index
    %96 = vector.load %arg3[%c0_87, %c0_88, %c0_89] : memref<1x32x32xf32, #tpu.memory_space<vmem>>, vector<1x32x32xf32>
    %97 = vector.shape_cast %96 : vector<1x32x32xf32> to vector<32x32xf32>
    %cst_90 = arith.constant dense<0.000000e+00> : vector<8x32xf32>
    %98 = tpu.matmul %95, %97, %cst_90 {dimension_numbers = #tpu.dot_dimension_numbers<[1], [0], [0], [1], [0, 0, 1, 1], [], []>} : vector<8x32xf32>, vector<32x32xf32>, vector<8x32xf32> -> vector<8x32xf32>
    %c0_91 = arith.constant 0 : index
    %c0_92 = arith.constant 0 : index
    %99 = vector.load %arg4[%c0_91, %c0_92] : memref<1x32xf32, #tpu.memory_space<vmem>>, vector<1x32xf32>
    %100 = vector.broadcast %99 : vector<1x32xf32> to vector<8x32xf32>
    %101 = arith.addf %98, %100 : vector<8x32xf32>
    %c3_93 = arith.constant 3 : index
    %c0_94 = arith.constant 0 : index
    %102 = vector.load %arg10[%c3_93, %c0_94] : memref<14x32xf32, #tpu.memory_space<vmem>>, vector<8x32xf32>
    %103 = arith.addf %101, %102 : vector<8x32xf32>
    %c3_95 = arith.constant 3 : index
    %c0_96 = arith.constant 0 : index
    %104 = vector.load %arg10[%c3_95, %c0_96] : memref<14x32xf32, #tpu.memory_space<vmem>>, vector<8x32xf32>
    tpu.vector_store %arg10[%c3_95, %c0_96], %103 {strides = array<i32>} : memref<14x32xf32, #tpu.memory_space<vmem>>, vector<8x32xf32>,
    %c0_97 = arith.constant 0 : index
    %c0_98 = arith.constant 0 : index
    %105 = vector.load %arg10[%c0_97, %c0_98] : memref<14x32xf32, #tpu.memory_space<vmem>>, vector<14x32xf32>
    %cst_99 = arith.constant 0.000000e+00 : f32
    %106 = vector.broadcast %cst_99 : f32 to vector<14x32xf32>
    %107 = arith.maximumf %105, %106 : vector<14x32xf32>
    %108 = vector.extract_strided_slice %107 {offsets = [2, 0], sizes = [8, 32], strides = [1, 1]} : vector<14x32xf32> to vector<8x32xf32>
    %c0_100 = arith.constant 0 : index
    %c0_101 = arith.constant 0 : index
    %c0_102 = arith.constant 0 : index
    %109 = vector.load %arg5[%c0_100, %c0_101, %c0_102] : memref<3x32x32xf32, #tpu.memory_space<vmem>>, vector<1x32x32xf32>
    %110 = vector.shape_cast %109 : vector<1x32x32xf32> to vector<32x32xf32>
    %cst_103 = arith.constant dense<0.000000e+00> : vector<8x32xf32>
    %111 = tpu.matmul %108, %110, %cst_103 {dimension_numbers = #tpu.dot_dimension_numbers<[1], [0], [0], [1], [0, 0, 1, 1], [], []>} : vector<8x32xf32>, vector<32x32xf32>, vector<8x32xf32> -> vector<8x32xf32>
    %112 = vector.extract_strided_slice %107 {offsets = [3, 0], sizes = [8, 32], strides = [1, 1]} : vector<14x32xf32> to vector<8x32xf32>
    %c1_104 = arith.constant 1 : index
    %c0_105 = arith.constant 0 : index
    %c0_106 = arith.constant 0 : index
    %113 = vector.load %arg5[%c1_104, %c0_105, %c0_106] : memref<3x32x32xf32, #tpu.memory_space<vmem>>, vector<1x32x32xf32>
    %114 = vector.shape_cast %113 : vector<1x32x32xf32> to vector<32x32xf32>
    %cst_107 = arith.constant dense<0.000000e+00> : vector<8x32xf32>
    %115 = tpu.matmul %112, %114, %cst_107 {dimension_numbers = #tpu.dot_dimension_numbers<[1], [0], [0], [1], [0, 0, 1, 1], [], []>} : vector<8x32xf32>, vector<32x32xf32>, vector<8x32xf32> -> vector<8x32xf32>
    %116 = arith.addf %111, %115 : vector<8x32xf32>
    %117 = vector.extract_strided_slice %107 {offsets = [4, 0], sizes = [8, 32], strides = [1, 1]} : vector<14x32xf32> to vector<8x32xf32>
    %c2_108 = arith.constant 2 : index
    %c0_109 = arith.constant 0 : index
    %c0_110 = arith.constant 0 : index
    %118 = vector.load %arg5[%c2_108, %c0_109, %c0_110] : memref<3x32x32xf32, #tpu.memory_space<vmem>>, vector<1x32x32xf32>
    %119 = vector.shape_cast %118 : vector<1x32x32xf32> to vector<32x32xf32>
    %cst_111 = arith.constant dense<0.000000e+00> : vector<8x32xf32>
    %120 = tpu.matmul %117, %119, %cst_111 {dimension_numbers = #tpu.dot_dimension_numbers<[1], [0], [0], [1], [0, 0, 1, 1], [], []>} : vector<8x32xf32>, vector<32x32xf32>, vector<8x32xf32> -> vector<8x32xf32>
    %121 = arith.addf %116, %120 : vector<8x32xf32>
    %c0_112 = arith.constant 0 : index
    %c0_113 = arith.constant 0 : index
    %122 = vector.load %arg6[%c0_112, %c0_113] : memref<1x32xf32, #tpu.memory_space<vmem>>, vector<1x32xf32>
    %123 = vector.broadcast %122 : vector<1x32xf32> to vector<8x32xf32>
    %124 = arith.addf %121, %123 : vector<8x32xf32>
    %cst_114 = arith.constant 0.000000e+00 : f32
    %125 = vector.broadcast %cst_114 : f32 to vector<8x32xf32>
    %126 = arith.maximumf %124, %125 : vector<8x32xf32>
    %c0_115 = arith.constant 0 : index
    %c0_116 = arith.constant 0 : index
    %c0_117 = arith.constant 0 : index
    %127 = vector.load %arg7[%c0_115, %c0_116, %c0_117] : memref<1x32x32xf32, #tpu.memory_space<vmem>>, vector<1x32x32xf32>
    %128 = vector.shape_cast %127 : vector<1x32x32xf32> to vector<32x32xf32>
    %cst_118 = arith.constant dense<0.000000e+00> : vector<8x32xf32>
    %129 = tpu.matmul %126, %128, %cst_118 {dimension_numbers = #tpu.dot_dimension_numbers<[1], [0], [0], [1], [0, 0, 1, 1], [], []>} : vector<8x32xf32>, vector<32x32xf32>, vector<8x32xf32> -> vector<8x32xf32>
    %c0_119 = arith.constant 0 : index
    %c0_120 = arith.constant 0 : index
    %130 = vector.load %arg8[%c0_119, %c0_120] : memref<1x32xf32, #tpu.memory_space<vmem>>, vector<1x32xf32>
    %131 = vector.broadcast %130 : vector<1x32xf32> to vector<8x32xf32>
    %132 = arith.addf %129, %131 : vector<8x32xf32>
    %c3_121 = arith.constant 3 : index
    %c0_122 = arith.constant 0 : index
    %133 = vector.load %arg10[%c3_121, %c0_122] : memref<14x32xf32, #tpu.memory_space<vmem>>, vector<8x32xf32>
    %134 = arith.addf %132, %133 : vector<8x32xf32>
    %c3_123 = arith.constant 3 : index
    %c0_124 = arith.constant 0 : index
    %135 = vector.load %arg10[%c3_123, %c0_124] : memref<14x32xf32, #tpu.memory_space<vmem>>, vector<8x32xf32>
    tpu.vector_store %arg10[%c3_123, %c0_124], %134 {strides = array<i32>} : memref<14x32xf32, #tpu.memory_space<vmem>>, vector<8x32xf32>,
    %c3_125 = arith.constant 3 : index
    %c0_126 = arith.constant 0 : index
    %136 = vector.load %arg10[%c3_125, %c0_126] : memref<14x32xf32, #tpu.memory_space<vmem>>, vector<8x32xf32>
    %c1_127 = arith.constant 1 : index
    %c0_128 = arith.constant 0 : index
    %c0_129 = arith.constant 0 : index
    %137 = vector.load %arg9[%c1_127, %c0_128, %c0_129] : memref<2x8x32xf32, #tpu.memory_space<vmem>>, vector<1x8x32xf32>
    %138 = vector.shape_cast %137 : vector<1x8x32xf32> to vector<8x32xf32>
    %139 = vector.shape_cast %136 : vector<8x32xf32> to vector<1x8x32xf32>
    tpu.vector_store %arg9[%c1_127, %c0_128, %c0_129], %139 {strides = array<i32>} : memref<2x8x32xf32, #tpu.memory_space<vmem>>, vector<1x8x32xf32>,
    return
  }
}

module attributes {stable_mosaic.version = 11 : i64} {
  func.func @kernel(%arg0: memref<2x10x32xf32, #tpu.memory_space<vmem>>, %arg1: memref<3x32x32xf32, #tpu.memory_space<vmem>>, %arg2: memref<1x32xf32, #tpu.memory_space<vmem>>, %arg3: memref<2x8x2x32xf32, #tpu.memory_space<vmem>>) attributes {dimension_semantics = [], scalar_prefetch = 0 : i64, scratch_operands = 0 : i64, tpu.core_type = #tpu.core_type<tc>} {
    %c0 = arith.constant 0 : index
    %c0_0 = arith.constant 0 : index
    %c0_1 = arith.constant 0 : index
    %0 = vector.load %arg1[%c0, %c0_0, %c0_1] : memref<3x32x32xf32, #tpu.memory_space<vmem>>, vector<1x32x32xf32>
    %1 = vector.shape_cast %0 : vector<1x32x32xf32> to vector<32x32xf32>
    %c1 = arith.constant 1 : index
    %c0_2 = arith.constant 0 : index
    %c0_3 = arith.constant 0 : index
    %2 = vector.load %arg1[%c1, %c0_2, %c0_3] : memref<3x32x32xf32, #tpu.memory_space<vmem>>, vector<1x32x32xf32>
    %3 = vector.shape_cast %2 : vector<1x32x32xf32> to vector<32x32xf32>
    %c2 = arith.constant 2 : index
    %c0_4 = arith.constant 0 : index
    %c0_5 = arith.constant 0 : index
    %4 = vector.load %arg1[%c2, %c0_4, %c0_5] : memref<3x32x32xf32, #tpu.memory_space<vmem>>, vector<1x32x32xf32>
    %5 = vector.shape_cast %4 : vector<1x32x32xf32> to vector<32x32xf32>
    %6 = arith.addf %3, %5 : vector<32x32xf32>
    %7 = arith.addf %1, %3 : vector<32x32xf32>
    %c0_6 = arith.constant 0 : index
    %c0_7 = arith.constant 0 : index
    %8 = vector.load %arg2[%c0_6, %c0_7] : memref<1x32xf32, #tpu.memory_space<vmem>>, vector<1x32xf32>
    %c0_8 = arith.constant 0 : index
    %c0_9 = arith.constant 0 : index
    %c0_10 = arith.constant 0 : index
    %9 = vector.load %arg0[%c0_8, %c0_9, %c0_10] : memref<2x10x32xf32, #tpu.memory_space<vmem>>, vector<1x10x32xf32>
    %10 = vector.shape_cast %9 : vector<1x10x32xf32> to vector<10x32xf32>
    %11 = vector.extract_strided_slice %10 {offsets = [0, 0], sizes = [8, 32], strides = [1, 1]} : vector<10x32xf32> to vector<8x32xf32>
    %12 = vector.extract_strided_slice %10 {offsets = [1, 0], sizes = [8, 32], strides = [1, 1]} : vector<10x32xf32> to vector<8x32xf32>
    %13 = vector.extract_strided_slice %10 {offsets = [2, 0], sizes = [8, 32], strides = [1, 1]} : vector<10x32xf32> to vector<8x32xf32>
    %cst = arith.constant dense<0.000000e+00> : vector<8x32xf32>
    %14 = tpu.matmul %11, %1, %cst {dimension_numbers = #tpu.dot_dimension_numbers<[1], [0], [0], [1], [0, 0, 1, 1], [], []>} : vector<8x32xf32>, vector<32x32xf32>, vector<8x32xf32> -> vector<8x32xf32>
    %cst_11 = arith.constant dense<0.000000e+00> : vector<8x32xf32>
    %15 = tpu.matmul %12, %6, %cst_11 {dimension_numbers = #tpu.dot_dimension_numbers<[1], [0], [0], [1], [0, 0, 1, 1], [], []>} : vector<8x32xf32>, vector<32x32xf32>, vector<8x32xf32> -> vector<8x32xf32>
    %16 = arith.addf %14, %15 : vector<8x32xf32>
    %17 = vector.broadcast %8 : vector<1x32xf32> to vector<8x32xf32>
    %18 = arith.addf %16, %17 : vector<8x32xf32>
    %cst_12 = arith.constant dense<0.000000e+00> : vector<8x32xf32>
    %19 = tpu.matmul %12, %7, %cst_12 {dimension_numbers = #tpu.dot_dimension_numbers<[1], [0], [0], [1], [0, 0, 1, 1], [], []>} : vector<8x32xf32>, vector<32x32xf32>, vector<8x32xf32> -> vector<8x32xf32>
    %cst_13 = arith.constant dense<0.000000e+00> : vector<8x32xf32>
    %20 = tpu.matmul %13, %5, %cst_13 {dimension_numbers = #tpu.dot_dimension_numbers<[1], [0], [0], [1], [0, 0, 1, 1], [], []>} : vector<8x32xf32>, vector<32x32xf32>, vector<8x32xf32> -> vector<8x32xf32>
    %21 = arith.addf %19, %20 : vector<8x32xf32>
    %22 = vector.broadcast %8 : vector<1x32xf32> to vector<8x32xf32>
    %23 = arith.addf %21, %22 : vector<8x32xf32>
    %c0_14 = arith.constant 0 : index
    %c0_15 = arith.constant 0 : index
    %c0_16 = arith.constant 0 : index
    %c0_17 = arith.constant 0 : index
    %24 = vector.load %arg3[%c0_14, %c0_15, %c0_16, %c0_17] : memref<2x8x2x32xf32, #tpu.memory_space<vmem>>, vector<1x8x1x32xf32>
    %25 = vector.shape_cast %24 : vector<1x8x1x32xf32> to vector<8x32xf32>
    %26 = vector.shape_cast %18 : vector<8x32xf32> to vector<1x8x1x32xf32>
    tpu.vector_store %arg3[%c0_14, %c0_15, %c0_16, %c0_17], %26 {strides = array<i32>} : memref<2x8x2x32xf32, #tpu.memory_space<vmem>>, vector<1x8x1x32xf32>,
    %c0_18 = arith.constant 0 : index
    %c0_19 = arith.constant 0 : index
    %c1_20 = arith.constant 1 : index
    %c0_21 = arith.constant 0 : index
    %27 = vector.load %arg3[%c0_18, %c0_19, %c1_20, %c0_21] : memref<2x8x2x32xf32, #tpu.memory_space<vmem>>, vector<1x8x1x32xf32>
    %28 = vector.shape_cast %27 : vector<1x8x1x32xf32> to vector<8x32xf32>
    %29 = vector.shape_cast %23 : vector<8x32xf32> to vector<1x8x1x32xf32>
    tpu.vector_store %arg3[%c0_18, %c0_19, %c1_20, %c0_21], %29 {strides = array<i32>} : memref<2x8x2x32xf32, #tpu.memory_space<vmem>>, vector<1x8x1x32xf32>,
    %c1_22 = arith.constant 1 : index
    %c0_23 = arith.constant 0 : index
    %c0_24 = arith.constant 0 : index
    %30 = vector.load %arg0[%c1_22, %c0_23, %c0_24] : memref<2x10x32xf32, #tpu.memory_space<vmem>>, vector<1x10x32xf32>
    %31 = vector.shape_cast %30 : vector<1x10x32xf32> to vector<10x32xf32>
    %32 = vector.extract_strided_slice %31 {offsets = [0, 0], sizes = [8, 32], strides = [1, 1]} : vector<10x32xf32> to vector<8x32xf32>
    %33 = vector.extract_strided_slice %31 {offsets = [1, 0], sizes = [8, 32], strides = [1, 1]} : vector<10x32xf32> to vector<8x32xf32>
    %34 = vector.extract_strided_slice %31 {offsets = [2, 0], sizes = [8, 32], strides = [1, 1]} : vector<10x32xf32> to vector<8x32xf32>
    %cst_25 = arith.constant dense<0.000000e+00> : vector<8x32xf32>
    %35 = tpu.matmul %32, %1, %cst_25 {dimension_numbers = #tpu.dot_dimension_numbers<[1], [0], [0], [1], [0, 0, 1, 1], [], []>} : vector<8x32xf32>, vector<32x32xf32>, vector<8x32xf32> -> vector<8x32xf32>
    %cst_26 = arith.constant dense<0.000000e+00> : vector<8x32xf32>
    %36 = tpu.matmul %33, %6, %cst_26 {dimension_numbers = #tpu.dot_dimension_numbers<[1], [0], [0], [1], [0, 0, 1, 1], [], []>} : vector<8x32xf32>, vector<32x32xf32>, vector<8x32xf32> -> vector<8x32xf32>
    %37 = arith.addf %35, %36 : vector<8x32xf32>
    %38 = vector.broadcast %8 : vector<1x32xf32> to vector<8x32xf32>
    %39 = arith.addf %37, %38 : vector<8x32xf32>
    %cst_27 = arith.constant dense<0.000000e+00> : vector<8x32xf32>
    %40 = tpu.matmul %33, %7, %cst_27 {dimension_numbers = #tpu.dot_dimension_numbers<[1], [0], [0], [1], [0, 0, 1, 1], [], []>} : vector<8x32xf32>, vector<32x32xf32>, vector<8x32xf32> -> vector<8x32xf32>
    %cst_28 = arith.constant dense<0.000000e+00> : vector<8x32xf32>
    %41 = tpu.matmul %34, %5, %cst_28 {dimension_numbers = #tpu.dot_dimension_numbers<[1], [0], [0], [1], [0, 0, 1, 1], [], []>} : vector<8x32xf32>, vector<32x32xf32>, vector<8x32xf32> -> vector<8x32xf32>
    %42 = arith.addf %40, %41 : vector<8x32xf32>
    %43 = vector.broadcast %8 : vector<1x32xf32> to vector<8x32xf32>
    %44 = arith.addf %42, %43 : vector<8x32xf32>
    %c1_29 = arith.constant 1 : index
    %c0_30 = arith.constant 0 : index
    %c0_31 = arith.constant 0 : index
    %c0_32 = arith.constant 0 : index
    %45 = vector.load %arg3[%c1_29, %c0_30, %c0_31, %c0_32] : memref<2x8x2x32xf32, #tpu.memory_space<vmem>>, vector<1x8x1x32xf32>
    %46 = vector.shape_cast %45 : vector<1x8x1x32xf32> to vector<8x32xf32>
    %47 = vector.shape_cast %39 : vector<8x32xf32> to vector<1x8x1x32xf32>
    tpu.vector_store %arg3[%c1_29, %c0_30, %c0_31, %c0_32], %47 {strides = array<i32>} : memref<2x8x2x32xf32, #tpu.memory_space<vmem>>, vector<1x8x1x32xf32>,
    %c1_33 = arith.constant 1 : index
    %c0_34 = arith.constant 0 : index
    %c1_35 = arith.constant 1 : index
    %c0_36 = arith.constant 0 : index
    %48 = vector.load %arg3[%c1_33, %c0_34, %c1_35, %c0_36] : memref<2x8x2x32xf32, #tpu.memory_space<vmem>>, vector<1x8x1x32xf32>
    %49 = vector.shape_cast %48 : vector<1x8x1x32xf32> to vector<8x32xf32>
    %50 = vector.shape_cast %44 : vector<8x32xf32> to vector<1x8x1x32xf32>
    tpu.vector_store %arg3[%c1_33, %c0_34, %c1_35, %c0_36], %50 {strides = array<i32>} : memref<2x8x2x32xf32, #tpu.memory_space<vmem>>, vector<1x8x1x32xf32>,
    return
  }
}

module attributes {stable_mosaic.version = 11 : i64} {
  func.func @kernel(%arg0: memref<2x18x32xf32, #tpu.memory_space<vmem>>, %arg1: memref<3x32x32xf32, #tpu.memory_space<vmem>>, %arg2: memref<1x32xf32, #tpu.memory_space<vmem>>, %arg3: memref<2x16x32xf32, #tpu.memory_space<vmem>>) attributes {dimension_semantics = [], scalar_prefetch = 0 : i64, scratch_operands = 0 : i64, tpu.core_type = #tpu.core_type<tc>} {
    %c0 = arith.constant 0 : index
    %c0_0 = arith.constant 0 : index
    %c0_1 = arith.constant 0 : index
    %0 = vector.load %arg0[%c0, %c0_0, %c0_1] : memref<2x18x32xf32, #tpu.memory_space<vmem>>, vector<1x18x32xf32>
    %1 = vector.shape_cast %0 : vector<1x18x32xf32> to vector<18x32xf32>
    %2 = vector.extract_strided_slice %1 {offsets = [0, 0], sizes = [16, 32], strides = [1, 1]} : vector<18x32xf32> to vector<16x32xf32>
    %c0_2 = arith.constant 0 : index
    %c0_3 = arith.constant 0 : index
    %c0_4 = arith.constant 0 : index
    %3 = vector.load %arg1[%c0_2, %c0_3, %c0_4] : memref<3x32x32xf32, #tpu.memory_space<vmem>>, vector<1x32x32xf32>
    %4 = vector.shape_cast %3 : vector<1x32x32xf32> to vector<32x32xf32>
    %cst = arith.constant dense<0.000000e+00> : vector<16x32xf32>
    %5 = tpu.matmul %2, %4, %cst {dimension_numbers = #tpu.dot_dimension_numbers<[1], [0], [0], [1], [0, 0, 1, 1], [], []>} : vector<16x32xf32>, vector<32x32xf32>, vector<16x32xf32> -> vector<16x32xf32>
    %6 = vector.extract_strided_slice %1 {offsets = [1, 0], sizes = [16, 32], strides = [1, 1]} : vector<18x32xf32> to vector<16x32xf32>
    %c1 = arith.constant 1 : index
    %c0_5 = arith.constant 0 : index
    %c0_6 = arith.constant 0 : index
    %7 = vector.load %arg1[%c1, %c0_5, %c0_6] : memref<3x32x32xf32, #tpu.memory_space<vmem>>, vector<1x32x32xf32>
    %8 = vector.shape_cast %7 : vector<1x32x32xf32> to vector<32x32xf32>
    %cst_7 = arith.constant dense<0.000000e+00> : vector<16x32xf32>
    %9 = tpu.matmul %6, %8, %cst_7 {dimension_numbers = #tpu.dot_dimension_numbers<[1], [0], [0], [1], [0, 0, 1, 1], [], []>} : vector<16x32xf32>, vector<32x32xf32>, vector<16x32xf32> -> vector<16x32xf32>
    %10 = arith.addf %5, %9 : vector<16x32xf32>
    %11 = vector.extract_strided_slice %1 {offsets = [2, 0], sizes = [16, 32], strides = [1, 1]} : vector<18x32xf32> to vector<16x32xf32>
    %c2 = arith.constant 2 : index
    %c0_8 = arith.constant 0 : index
    %c0_9 = arith.constant 0 : index
    %12 = vector.load %arg1[%c2, %c0_8, %c0_9] : memref<3x32x32xf32, #tpu.memory_space<vmem>>, vector<1x32x32xf32>
    %13 = vector.shape_cast %12 : vector<1x32x32xf32> to vector<32x32xf32>
    %cst_10 = arith.constant dense<0.000000e+00> : vector<16x32xf32>
    %14 = tpu.matmul %11, %13, %cst_10 {dimension_numbers = #tpu.dot_dimension_numbers<[1], [0], [0], [1], [0, 0, 1, 1], [], []>} : vector<16x32xf32>, vector<32x32xf32>, vector<16x32xf32> -> vector<16x32xf32>
    %15 = arith.addf %10, %14 : vector<16x32xf32>
    %c0_11 = arith.constant 0 : index
    %c0_12 = arith.constant 0 : index
    %16 = vector.load %arg2[%c0_11, %c0_12] : memref<1x32xf32, #tpu.memory_space<vmem>>, vector<1x32xf32>
    %17 = vector.broadcast %16 : vector<1x32xf32> to vector<16x32xf32>
    %18 = arith.addf %15, %17 : vector<16x32xf32>
    %cst_13 = arith.constant 0.000000e+00 : f32
    %19 = vector.broadcast %cst_13 : f32 to vector<16x32xf32>
    %20 = arith.maximumf %18, %19 : vector<16x32xf32>
    %c0_14 = arith.constant 0 : index
    %c0_15 = arith.constant 0 : index
    %c0_16 = arith.constant 0 : index
    %21 = vector.load %arg3[%c0_14, %c0_15, %c0_16] : memref<2x16x32xf32, #tpu.memory_space<vmem>>, vector<1x16x32xf32>
    %22 = vector.shape_cast %21 : vector<1x16x32xf32> to vector<16x32xf32>
    %23 = vector.shape_cast %20 : vector<16x32xf32> to vector<1x16x32xf32>
    tpu.vector_store %arg3[%c0_14, %c0_15, %c0_16], %23 {strides = array<i32>} : memref<2x16x32xf32, #tpu.memory_space<vmem>>, vector<1x16x32xf32>,
    %c1_17 = arith.constant 1 : index
    %c0_18 = arith.constant 0 : index
    %c0_19 = arith.constant 0 : index
    %24 = vector.load %arg0[%c1_17, %c0_18, %c0_19] : memref<2x18x32xf32, #tpu.memory_space<vmem>>, vector<1x18x32xf32>
    %25 = vector.shape_cast %24 : vector<1x18x32xf32> to vector<18x32xf32>
    %26 = vector.extract_strided_slice %25 {offsets = [0, 0], sizes = [16, 32], strides = [1, 1]} : vector<18x32xf32> to vector<16x32xf32>
    %c0_20 = arith.constant 0 : index
    %c0_21 = arith.constant 0 : index
    %c0_22 = arith.constant 0 : index
    %27 = vector.load %arg1[%c0_20, %c0_21, %c0_22] : memref<3x32x32xf32, #tpu.memory_space<vmem>>, vector<1x32x32xf32>
    %28 = vector.shape_cast %27 : vector<1x32x32xf32> to vector<32x32xf32>
    %cst_23 = arith.constant dense<0.000000e+00> : vector<16x32xf32>
    %29 = tpu.matmul %26, %28, %cst_23 {dimension_numbers = #tpu.dot_dimension_numbers<[1], [0], [0], [1], [0, 0, 1, 1], [], []>} : vector<16x32xf32>, vector<32x32xf32>, vector<16x32xf32> -> vector<16x32xf32>
    %30 = vector.extract_strided_slice %25 {offsets = [1, 0], sizes = [16, 32], strides = [1, 1]} : vector<18x32xf32> to vector<16x32xf32>
    %c1_24 = arith.constant 1 : index
    %c0_25 = arith.constant 0 : index
    %c0_26 = arith.constant 0 : index
    %31 = vector.load %arg1[%c1_24, %c0_25, %c0_26] : memref<3x32x32xf32, #tpu.memory_space<vmem>>, vector<1x32x32xf32>
    %32 = vector.shape_cast %31 : vector<1x32x32xf32> to vector<32x32xf32>
    %cst_27 = arith.constant dense<0.000000e+00> : vector<16x32xf32>
    %33 = tpu.matmul %30, %32, %cst_27 {dimension_numbers = #tpu.dot_dimension_numbers<[1], [0], [0], [1], [0, 0, 1, 1], [], []>} : vector<16x32xf32>, vector<32x32xf32>, vector<16x32xf32> -> vector<16x32xf32>
    %34 = arith.addf %29, %33 : vector<16x32xf32>
    %35 = vector.extract_strided_slice %25 {offsets = [2, 0], sizes = [16, 32], strides = [1, 1]} : vector<18x32xf32> to vector<16x32xf32>
    %c2_28 = arith.constant 2 : index
    %c0_29 = arith.constant 0 : index
    %c0_30 = arith.constant 0 : index
    %36 = vector.load %arg1[%c2_28, %c0_29, %c0_30] : memref<3x32x32xf32, #tpu.memory_space<vmem>>, vector<1x32x32xf32>
    %37 = vector.shape_cast %36 : vector<1x32x32xf32> to vector<32x32xf32>
    %cst_31 = arith.constant dense<0.000000e+00> : vector<16x32xf32>
    %38 = tpu.matmul %35, %37, %cst_31 {dimension_numbers = #tpu.dot_dimension_numbers<[1], [0], [0], [1], [0, 0, 1, 1], [], []>} : vector<16x32xf32>, vector<32x32xf32>, vector<16x32xf32> -> vector<16x32xf32>
    %39 = arith.addf %34, %38 : vector<16x32xf32>
    %c0_32 = arith.constant 0 : index
    %c0_33 = arith.constant 0 : index
    %40 = vector.load %arg2[%c0_32, %c0_33] : memref<1x32xf32, #tpu.memory_space<vmem>>, vector<1x32xf32>
    %41 = vector.broadcast %40 : vector<1x32xf32> to vector<16x32xf32>
    %42 = arith.addf %39, %41 : vector<16x32xf32>
    %cst_34 = arith.constant 0.000000e+00 : f32
    %43 = vector.broadcast %cst_34 : f32 to vector<16x32xf32>
    %44 = arith.maximumf %42, %43 : vector<16x32xf32>
    %c1_35 = arith.constant 1 : index
    %c0_36 = arith.constant 0 : index
    %c0_37 = arith.constant 0 : index
    %45 = vector.load %arg3[%c1_35, %c0_36, %c0_37] : memref<2x16x32xf32, #tpu.memory_space<vmem>>, vector<1x16x32xf32>
    %46 = vector.shape_cast %45 : vector<1x16x32xf32> to vector<16x32xf32>
    %47 = vector.shape_cast %44 : vector<16x32xf32> to vector<1x16x32xf32>
    tpu.vector_store %arg3[%c1_35, %c0_36, %c0_37], %47 {strides = array<i32>} : memref<2x16x32xf32, #tpu.memory_space<vmem>>, vector<1x16x32xf32>,
    return
  }
}

module attributes {stable_mosaic.version = 11 : i64} {
  func.func @kernel(%arg0: memref<2x18x32xf32, #tpu.memory_space<vmem>>, %arg1: memref<3x32x16xf32, #tpu.memory_space<vmem>>, %arg2: memref<1x16xf32, #tpu.memory_space<vmem>>, %arg3: memref<2x16x16xf32, #tpu.memory_space<vmem>>) attributes {dimension_semantics = [], scalar_prefetch = 0 : i64, scratch_operands = 0 : i64, tpu.core_type = #tpu.core_type<tc>} {
    %c0 = arith.constant 0 : index
    %c0_0 = arith.constant 0 : index
    %c0_1 = arith.constant 0 : index
    %0 = vector.load %arg0[%c0, %c0_0, %c0_1] : memref<2x18x32xf32, #tpu.memory_space<vmem>>, vector<1x18x32xf32>
    %1 = vector.shape_cast %0 : vector<1x18x32xf32> to vector<18x32xf32>
    %2 = vector.extract_strided_slice %1 {offsets = [0, 0], sizes = [16, 32], strides = [1, 1]} : vector<18x32xf32> to vector<16x32xf32>
    %c0_2 = arith.constant 0 : index
    %c0_3 = arith.constant 0 : index
    %c0_4 = arith.constant 0 : index
    %3 = vector.load %arg1[%c0_2, %c0_3, %c0_4] : memref<3x32x16xf32, #tpu.memory_space<vmem>>, vector<1x32x16xf32>
    %4 = vector.shape_cast %3 : vector<1x32x16xf32> to vector<32x16xf32>
    %cst = arith.constant dense<0.000000e+00> : vector<16x16xf32>
    %5 = tpu.matmul %2, %4, %cst {dimension_numbers = #tpu.dot_dimension_numbers<[1], [0], [0], [1], [0, 0, 1, 1], [], []>} : vector<16x32xf32>, vector<32x16xf32>, vector<16x16xf32> -> vector<16x16xf32>
    %6 = vector.extract_strided_slice %1 {offsets = [1, 0], sizes = [16, 32], strides = [1, 1]} : vector<18x32xf32> to vector<16x32xf32>
    %c1 = arith.constant 1 : index
    %c0_5 = arith.constant 0 : index
    %c0_6 = arith.constant 0 : index
    %7 = vector.load %arg1[%c1, %c0_5, %c0_6] : memref<3x32x16xf32, #tpu.memory_space<vmem>>, vector<1x32x16xf32>
    %8 = vector.shape_cast %7 : vector<1x32x16xf32> to vector<32x16xf32>
    %cst_7 = arith.constant dense<0.000000e+00> : vector<16x16xf32>
    %9 = tpu.matmul %6, %8, %cst_7 {dimension_numbers = #tpu.dot_dimension_numbers<[1], [0], [0], [1], [0, 0, 1, 1], [], []>} : vector<16x32xf32>, vector<32x16xf32>, vector<16x16xf32> -> vector<16x16xf32>
    %10 = arith.addf %5, %9 : vector<16x16xf32>
    %11 = vector.extract_strided_slice %1 {offsets = [2, 0], sizes = [16, 32], strides = [1, 1]} : vector<18x32xf32> to vector<16x32xf32>
    %c2 = arith.constant 2 : index
    %c0_8 = arith.constant 0 : index
    %c0_9 = arith.constant 0 : index
    %12 = vector.load %arg1[%c2, %c0_8, %c0_9] : memref<3x32x16xf32, #tpu.memory_space<vmem>>, vector<1x32x16xf32>
    %13 = vector.shape_cast %12 : vector<1x32x16xf32> to vector<32x16xf32>
    %cst_10 = arith.constant dense<0.000000e+00> : vector<16x16xf32>
    %14 = tpu.matmul %11, %13, %cst_10 {dimension_numbers = #tpu.dot_dimension_numbers<[1], [0], [0], [1], [0, 0, 1, 1], [], []>} : vector<16x32xf32>, vector<32x16xf32>, vector<16x16xf32> -> vector<16x16xf32>
    %15 = arith.addf %10, %14 : vector<16x16xf32>
    %c0_11 = arith.constant 0 : index
    %c0_12 = arith.constant 0 : index
    %16 = vector.load %arg2[%c0_11, %c0_12] : memref<1x16xf32, #tpu.memory_space<vmem>>, vector<1x16xf32>
    %17 = vector.broadcast %16 : vector<1x16xf32> to vector<16x16xf32>
    %18 = arith.addf %15, %17 : vector<16x16xf32>
    %c0_13 = arith.constant 0 : index
    %c0_14 = arith.constant 0 : index
    %c0_15 = arith.constant 0 : index
    %19 = vector.load %arg3[%c0_13, %c0_14, %c0_15] : memref<2x16x16xf32, #tpu.memory_space<vmem>>, vector<1x16x16xf32>
    %20 = vector.shape_cast %19 : vector<1x16x16xf32> to vector<16x16xf32>
    %21 = vector.shape_cast %18 : vector<16x16xf32> to vector<1x16x16xf32>
    tpu.vector_store %arg3[%c0_13, %c0_14, %c0_15], %21 {strides = array<i32>} : memref<2x16x16xf32, #tpu.memory_space<vmem>>, vector<1x16x16xf32>,
    %c1_16 = arith.constant 1 : index
    %c0_17 = arith.constant 0 : index
    %c0_18 = arith.constant 0 : index
    %22 = vector.load %arg0[%c1_16, %c0_17, %c0_18] : memref<2x18x32xf32, #tpu.memory_space<vmem>>, vector<1x18x32xf32>
    %23 = vector.shape_cast %22 : vector<1x18x32xf32> to vector<18x32xf32>
    %24 = vector.extract_strided_slice %23 {offsets = [0, 0], sizes = [16, 32], strides = [1, 1]} : vector<18x32xf32> to vector<16x32xf32>
    %c0_19 = arith.constant 0 : index
    %c0_20 = arith.constant 0 : index
    %c0_21 = arith.constant 0 : index
    %25 = vector.load %arg1[%c0_19, %c0_20, %c0_21] : memref<3x32x16xf32, #tpu.memory_space<vmem>>, vector<1x32x16xf32>
    %26 = vector.shape_cast %25 : vector<1x32x16xf32> to vector<32x16xf32>
    %cst_22 = arith.constant dense<0.000000e+00> : vector<16x16xf32>
    %27 = tpu.matmul %24, %26, %cst_22 {dimension_numbers = #tpu.dot_dimension_numbers<[1], [0], [0], [1], [0, 0, 1, 1], [], []>} : vector<16x32xf32>, vector<32x16xf32>, vector<16x16xf32> -> vector<16x16xf32>
    %28 = vector.extract_strided_slice %23 {offsets = [1, 0], sizes = [16, 32], strides = [1, 1]} : vector<18x32xf32> to vector<16x32xf32>
    %c1_23 = arith.constant 1 : index
    %c0_24 = arith.constant 0 : index
    %c0_25 = arith.constant 0 : index
    %29 = vector.load %arg1[%c1_23, %c0_24, %c0_25] : memref<3x32x16xf32, #tpu.memory_space<vmem>>, vector<1x32x16xf32>
    %30 = vector.shape_cast %29 : vector<1x32x16xf32> to vector<32x16xf32>
    %cst_26 = arith.constant dense<0.000000e+00> : vector<16x16xf32>
    %31 = tpu.matmul %28, %30, %cst_26 {dimension_numbers = #tpu.dot_dimension_numbers<[1], [0], [0], [1], [0, 0, 1, 1], [], []>} : vector<16x32xf32>, vector<32x16xf32>, vector<16x16xf32> -> vector<16x16xf32>
    %32 = arith.addf %27, %31 : vector<16x16xf32>
    %33 = vector.extract_strided_slice %23 {offsets = [2, 0], sizes = [16, 32], strides = [1, 1]} : vector<18x32xf32> to vector<16x32xf32>
    %c2_27 = arith.constant 2 : index
    %c0_28 = arith.constant 0 : index
    %c0_29 = arith.constant 0 : index
    %34 = vector.load %arg1[%c2_27, %c0_28, %c0_29] : memref<3x32x16xf32, #tpu.memory_space<vmem>>, vector<1x32x16xf32>
    %35 = vector.shape_cast %34 : vector<1x32x16xf32> to vector<32x16xf32>
    %cst_30 = arith.constant dense<0.000000e+00> : vector<16x16xf32>
    %36 = tpu.matmul %33, %35, %cst_30 {dimension_numbers = #tpu.dot_dimension_numbers<[1], [0], [0], [1], [0, 0, 1, 1], [], []>} : vector<16x32xf32>, vector<32x16xf32>, vector<16x16xf32> -> vector<16x16xf32>
    %37 = arith.addf %32, %36 : vector<16x16xf32>
    %c0_31 = arith.constant 0 : index
    %c0_32 = arith.constant 0 : index
    %38 = vector.load %arg2[%c0_31, %c0_32] : memref<1x16xf32, #tpu.memory_space<vmem>>, vector<1x16xf32>
    %39 = vector.broadcast %38 : vector<1x16xf32> to vector<16x16xf32>
    %40 = arith.addf %37, %39 : vector<16x16xf32>
    %c1_33 = arith.constant 1 : index
    %c0_34 = arith.constant 0 : index
    %c0_35 = arith.constant 0 : index
    %41 = vector.load %arg3[%c1_33, %c0_34, %c0_35] : memref<2x16x16xf32, #tpu.memory_space<vmem>>, vector<1x16x16xf32>
    %42 = vector.shape_cast %41 : vector<1x16x16xf32> to vector<16x16xf32>
    %43 = vector.shape_cast %40 : vector<16x16xf32> to vector<1x16x16xf32>
    tpu.vector_store %arg3[%c1_33, %c0_34, %c0_35], %43 {strides = array<i32>} : memref<2x16x16xf32, #tpu.memory_space<vmem>>, vector<1x16x16xf32>,
    return
  }
}

</mosaic_0001>

<bundles_post_ra>
// kernel: vqvae2_forward.14
= control target key start
LH: loop header
LB: loop body
LE: loop exit
PB: predicated region body
PF: predicated region fallthrough
CT: control target
= control target key end

     0   :  { %8 = vsyncpa [#allocation3], 0  ;;  %s325_s15 = smov [#allocation2]   ;;  %s326_s17 = smov 128   ;;  %s411_s0 = inlined_call_operand.vmem [shape: f32[2,18,16], index: 0, kind: input, shape index: {}]   ;;  %s412_s1 = inlined_call_operand.hbm [shape: f32[3,16,32], index: 1, kind: input, shape index: {}]   ;;  %s413_s2 = inlined_call_operand.vmem [shape: f32[1,32], index: 2, kind: input, shape index: {}]   ;;  %s414_s3 = inlined_call_operand.vmem [shape: f32[2,16,32], index: 3, kind: output, shape index: {}]  }
   0x1   :  { %s15_s14 = sshll.u32 %s412_s1, 4  ;;  %s17_s16 = sshll.u32 %s325_s15, 4  ;;  %s16_s14 = int_to_ptr.hbm [resolvable:$true] %s15_s14  ;;  %s18_s16 = int_to_ptr.vmem [resolvable:$true] %s17_s16 }
   0x2   :  { %s327_s18 = smov 8  }
   0x3   :  { %23 = dma.hbm_to_vmem [thread:$0]  %s16_s14, 768, %s18_s16, [#allocation3], %s326_s17, %s326_s17, %s327_s18  }
   0x4   :  { %323 = dma.done.wait [#allocation3], 768  }
   0x5   :  { %324 = vsyncadd [#allocation3], 4294966528  ;;  %v37_v0 = vld [vmem:[#allocation2 + $0x18] sm:$0xff]  ;;  %v34_v1 = vld [vmem:[#allocation2 + $0x8] sm:$0xff]  ;;  %vm41_vm0 = vcmask 1046528   ;;  %vm47_vm1 = vcmask 130048  }
   0x6   :  { %v36_v2 = vld [vmem:[#allocation2 + $0x10] sm:$0xff]  ;;  %290 = vmatpush.msra.mxu2 %v37_v0  ;;  %292 = vmatpush.msra.mxu3 %v34_v1  ;;  %v33_v3 = vld [vmem:[#allocation2] sm:$0xff]  ;;  %v31_v4 = vld [vmem:[%s411_s0 + $0x8] sm:$0xff]  ;;  %vm105_vm2 = vcmask 1045504   ;;  %vm148_vm3 = vcmask 261120  }
   0x7   :  { %v32_v5 = vld [vmem:[%s411_s0 + $0x10] sm:$0x3]  ;;  %v43_v6 = vrot.slane %v31_v4, 1  ;;  %v104_v8 = vld [vmem:[#allocation2 + $0x28] sm:$0xff]  ;;  %66 = vmatpush.msra.mxu0 %v37_v0  ;;  %93 = vmatpush.msra.mxu1 %v34_v1  ;;  %v30_v9 = vld [vmem:[%s411_s0] sm:$0xff]  ;;  %v107_v19 = vrot.slane %v31_v4, 2 }
   0x8   :  { %v45_v7 = vrot.slane %v32_v5, 1  ;;  %291 = vmatpush.msra.mxu2 %v36_v2  ;;  %293 = vmatpush.msra.mxu3 %v33_v3  ;;  %v42_v10 = vrot.slane %v30_v9, 1  ;;  %v279_v11 = vld [vmem:[%s411_s0 + $0x18] sm:$0xff]  ;;  %v280_v12 = vld [vmem:[%s411_s0 + $0x20] sm:$0xff]  ;;  %v106_v18 = vrot.slane %v30_v9, 2  ;;  %v109_v27 = vrot.slane %v32_v5, 2 }
   0x9   :  { %276 = vmatmul.msk.f32.vlgmr.msra.gmra.mxu3 %vm47_vm1, %v31_v4  ;;  %v103_v14 = vld [vmem:[#allocation2 + $0x20] sm:$0xff]  ;;  %v162_v16 = vrot.slane %v279_v11, 1  ;;  %v163_v17 = vrot.slane %v280_v12, 1  ;;  %67 = vmatpush.msra.mxu0 %v36_v2  ;;  %v223_v21 = vrot.slane %v279_v11, 2  ;;  %v224_v22 = vrot.slane %v280_v12, 2 }
   0xa   :  { %v46_v13 = vsel %vm41_vm0, %v43_v6, %v45_v7  ;;  %129 = vmatpush.msrb.mxu2 %v104_v8  ;;  %185 = vmatpush.msrb.mxu3 %v37_v0  ;;  %v44_v15 = vsel %vm41_vm0, %v42_v10, %v43_v6  ;;  %v108_v23 = vsel %vm105_vm2, %v106_v18, %v107_v19  ;;  %v281_v24 = vld [vmem:[%s411_s0 + $0x28] sm:$0x3]  ;;  %v297_v39 = vld [vmem:[%s413_s2] ss:$0 sm:$0xff] }
   0xb   :  { %274 = vmatmul.msk.f32.vlgmr.msra.gmra.mxu2 %vm47_vm1, %v46_v13  ;;  %94 = vmatpush.msra.mxu1 %v33_v3  ;;  %v164_v20 = vsel %vm41_vm0, %v162_v16, %v163_v17  ;;  %v165_v25 = vrot.slane %v281_v24, 1  ;;  %v225_v26 = vsel %vm105_vm2, %v223_v21, %v224_v22  ;;  %v226_v29 = vrot.slane %v281_v24, 2  ;;  %v298_v43 = vld [vmem:[%s413_s2] ss:$0 sm:$0xff] }
   0xc   :  { %186 = vmatpush.msrb.mxu3 %v36_v2  ;;  %273 = vmatmul.msk.f32.vlgmr.msra.gmra.mxu0 %vm47_vm1, %v44_v15  ;;  %v110_v30 = vsel %vm105_vm2, %v107_v19, %v109_v27 }
   0xd   :  { %275 = vmatmul.msk.f32.vlgmr.msra.gmra.mxu1 %vm47_vm1, %v30_v9  ;;  %130 = vmatpush.msrb.mxu2 %v103_v14  ;;  %v166_v28 = vsel %vm41_vm0, %v163_v17, %v165_v25  ;;  %v227_v31 = vsel %vm105_vm2, %v224_v22, %v226_v29 }
   0xe   :  { %212 = vmatpush.msrb.mxu0 %v34_v1  ;;  %246 = vmatpush.msrb.mxu1 %v104_v8 }
  0x10   :  { %213 = vmatpush.msrb.mxu0 %v33_v3  ;;  %247 = vmatpush.msrb.mxu1 %v103_v14 }
  0x11   :  { %282 = vmatmul.msk.f32.vlgmr.msrb.gmra.mxu3 %vm47_vm1, %v164_v20 }
  0x13   :  { %277 = vmatmul.msk.f32.vlgmr.msrb.gmra.mxu2 %vm47_vm1, %v108_v23 }
  0x14   :  { %284 = vmatmul.msk.f32.vlgmr.msrb.gmra.mxu0 %vm47_vm1, %v279_v11 }
  0x15   :  { %286 = vmatmul.msk.f32.vlgmr.msrb.gmra.mxu1 %vm47_vm1, %v225_v26 }
  0x19   :  { %283 = vmatmul.msk.f32.gmra.mxu3 %vm47_vm1, %v166_v28 }
  0x1b   :  { %278 = vmatmul.msk.f32.gmra.mxu2 %vm47_vm1, %v110_v30 }
  0x1c   :  { %285 = vmatmul.msk.f32.gmra.mxu0 %vm47_vm1, %v280_v12 }
  0x1d   :  { %287 = vmatmul.msk.f32.gmra.mxu1 %vm47_vm1, %v227_v31 }
  0x89   :  { %v69_v32 = vpop.f32.mrf.mxu0 }
  0x8a   :  { %v96_v33 = vpop.f32.mrf.mxu1 }
  0x8b   :  { %v97_v38 = vadd.f32 %v96_v33, %v69_v32 }
  0x8c   :  { %v99_v34 = vpop.f32.mrf.mxu3 }
  0x8e   :  { %v72_v35 = vpop.f32.mrf.mxu2 }
  0x8f   :  { %v100_v51 = vadd.f32 %v99_v34, %v72_v35 }
  0x91   :  { %v215_v36 = vpop.f32.mrf.mxu0 }
  0x92   :  { %v249_v37 = vpop.f32.mrf.mxu1 }
  0x94   :  { %v188_v40 = vpop.f32.mrf.mxu3 }
  0x95   :  { %v216_v42 = vadd.f32 %v215_v36, %v188_v40 }
  0x96   :  { %v132_v41 = vpop.f32.mrf.mxu2 }
  0x97   :  { %v138_v44 = vadd.f32 %v132_v41, %v97_v38  ;;  %v255_v45 = vadd.f32 %v249_v37, %v216_v42 }
  0x99   :  { %v144_v46 = vadd.f32 %v297_v39, %v138_v44  ;;  %v261_v47 = vadd.f32 %v298_v43, %v255_v45  ;;  %v218_v49 = vpop.f32.mrf.mxu0 }
  0x9a   :  { %v252_v53 = vpop.f32.mrf.mxu1 }
  0x9b   :  { %v146_v48 = vmax.f32 %v144_v46, 0.0  ;;  %v263_v50 = vmax.f32 %v261_v47, 0.0 }
  0x9c   :  { %v191_v52 = vpop.f32.mrf.mxu3 }
  0x9d   :  { %149 = vst.msk [vmem:[%s414_s3] sm:$0xff] %vm148_vm3, %v146_v48  ;;  %v219_v55 = vadd.f32 %v218_v49, %v191_v52 }
  0x9e   :  { %288 = vst.msk [vmem:[%s414_s3 + $0x10] sm:$0xff] %vm148_vm3, %v263_v50  ;;  %v135_v54 = vpop.f32.mrf.mxu2 }
  0x9f   :  { %v139_v56 = vadd.f32 %v135_v54, %v100_v51  ;;  %v256_v57 = vadd.f32 %v252_v53, %v219_v55 }
  0xa1   :  { %v145_v58 = vadd.f32 %v297_v39, %v139_v56  ;;  %v262_v59 = vadd.f32 %v298_v43, %v256_v57 }
  0xa3   :  { %v147_v60 = vmax.f32 %v145_v58, 0.0  ;;  %v264_v61 = vmax.f32 %v262_v59, 0.0 }
  0xa5   :  { %150 = vst.msk [vmem:[%s414_s3 + $0x8] sm:$0xff] %vm148_vm3, %v147_v60 }
  0xa6   :  { %289 = vst.msk [vmem:[%s414_s3 + $0x18] sm:$0xff] %vm148_vm3, %v264_v61 }
  0xa7   :  { %272 = vsyncpa [#allocation3], 1 }

// kernel: vqvae2_forward.15
= control target key start
LH: loop header
LB: loop body
LE: loop exit
PB: predicated region body
PF: predicated region fallthrough
CT: control target
= control target key end

     0   :  { %vm83_vm0 = vcmask 1046528   ;;  %vm30_vm1 = vcmask 261120   ;;  %s443_s2 = inlined_call_operand.vmem [shape: f32[4,32,32], index: 2, kind: input, shape index: {}]   ;;  %s444_s0 = inlined_call_operand.vmem [shape: f32[2,9,32], index: 0, kind: input, shape index: {}]   ;;  %s445_s1 = inlined_call_operand.vmem [shape: f32[2,9,32], index: 1, kind: input, shape index: {}]   ;;  %s446_s3 = inlined_call_operand.vmem [shape: f32[1,32], index: 3, kind: input, shape index: {}]   ;;  %s447_s4 = inlined_call_operand.vmem [shape: f32[2,8,32], index: 4, kind: output, shape index: {}]  }
   0x1   :  { %v290_v0 = vld [vmem:[%s443_s2 + $0x58] sm:$0xff]  ;;  %v289_v1 = vld [vmem:[%s443_s2 + $0x50] sm:$0xff]  ;;  %v288_v5 = vld [vmem:[%s443_s2 + $0x48] sm:$0xff] }
   0x2   :  { %v295_v2 = vld [vmem:[%s443_s2 + $0x78] sm:$0xff]  ;;  %101 = vmatpush.msra.mxu2 %v290_v0  ;;  %v294_v6 = vld [vmem:[%s443_s2 + $0x70] sm:$0xff]  ;;  %v287_v9 = vld [vmem:[%s443_s2 + $0x40] sm:$0xff] }
   0x3   :  { %133 = vmatpush.msra.mxu3 %v295_v2  ;;  %v284_v3 = vld [vmem:[%s443_s2 + $0x38] sm:$0xff]  ;;  %v283_v7 = vld [vmem:[%s443_s2 + $0x30] sm:$0xff]  ;;  %v293_v10 = vld [vmem:[%s443_s2 + $0x68] sm:$0xff] }
   0x4   :  { %v24_v4 = vld [vmem:[%s443_s2 + $0x18] sm:$0xff]  ;;  %46 = vmatpush.msra.mxu0 %v284_v3  ;;  %v23_v8 = vld [vmem:[%s443_s2 + $0x10] sm:$0xff]  ;;  %102 = vmatpush.msra.mxu2 %v289_v1  ;;  %v17_v11 = vld [vmem:[%s444_s0] sm:$0xff] }
   0x5   :  { %69 = vmatpush.msra.mxu1 %v24_v4  ;;  %134 = vmatpush.msra.mxu3 %v294_v6  ;;  %v18_v12 = vld [vmem:[%s444_s0 + $0x8] sm:$0x1]  ;;  %v84_v13 = vrot.slane %v17_v11, 1  ;;  %v292_v17 = vld [vmem:[%s443_s2 + $0x60] sm:$0xff]  ;;  %v297_v25 = vld [vmem:[%s444_s0 + $0x10] sm:$0xff] }
   0x6   :  { %47 = vmatpush.msra.mxu0 %v283_v7  ;;  %v282_v14 = vld [vmem:[%s443_s2 + $0x28] sm:$0xff]  ;;  %103 = vmatpush.msra.mxu2 %v288_v5  ;;  %v85_v16 = vrot.slane %v18_v12, 1  ;;  %v19_v18 = vld [vmem:[%s445_s1] sm:$0xff]  ;;  %v298_v26 = vld [vmem:[%s444_s0 + $0x18] sm:$0x1]  ;;  %v213_v30 = vrot.slane %v297_v25, 1 }
   0x7   :  { %70 = vmatpush.msra.mxu1 %v23_v8  ;;  %v22_v15 = vld [vmem:[%s443_s2 + $0x8] sm:$0xff]  ;;  %135 = vmatpush.msra.mxu3 %v293_v10  ;;  %v116_v20 = vrot.slane %v19_v18, 1  ;;  %v281_v22 = vld [vmem:[%s443_s2 + $0x20] sm:$0xff]  ;;  %v299_v28 = vld [vmem:[%s445_s1 + $0x10] sm:$0xff]  ;;  %v214_v31 = vrot.slane %v298_v26, 1 }
   0x8   :  { %v20_v19 = vld [vmem:[%s445_s1 + $0x8] sm:$0x1]  ;;  %48 = vmatpush.msra.mxu0 %v282_v14  ;;  %104 = vmatpush.msra.mxu2 %v287_v9  ;;  %v86_v23 = vsel %vm83_vm0, %v84_v13, %v85_v16  ;;  %v21_v24 = vld [vmem:[%s443_s2] sm:$0xff]  ;;  %v300_v29 = vld [vmem:[%s445_s1 + $0x18] sm:$0x1]  ;;  %v244_v32 = vrot.slane %v299_v28, 1 }
   0x9   :  { %71 = vmatpush.msra.mxu1 %v22_v15  ;;  %v117_v21 = vrot.slane %v20_v19, 1  ;;  %136 = vmatpush.msra.mxu3 %v292_v17  ;;  %v245_v33 = vrot.slane %v300_v29, 1  ;;  %v215_v34 = vsel %vm83_vm0, %v213_v30, %v214_v31  ;;  %v318_v42 = vld [vmem:[%s446_s3] ss:$0 sm:$0xff] }
   0xa   :  { %291 = vmatmul.msk.f32.vlgmr.msra.gmra.mxu2 %vm30_vm1, %v86_v23  ;;  %49 = vmatpush.msra.mxu0 %v281_v22  ;;  %v319_v50 = vld [vmem:[%s446_s3] ss:$0 sm:$0xff] }
   0xb   :  { %v118_v27 = vsel %vm83_vm0, %v116_v20, %v117_v21  ;;  %261 = vmatpush.msrb.mxu3 %v295_v2  ;;  %230 = vmatpush.msrb.mxu2 %v290_v0  ;;  %v246_v35 = vsel %vm83_vm0, %v244_v32, %v245_v33 }
   0xc   :  { %296 = vmatmul.msk.f32.vlgmr.msra.gmra.mxu3 %vm30_vm1, %v118_v27  ;;  %72 = vmatpush.msra.mxu1 %v21_v24 }
   0xd   :  { %231 = vmatpush.msrb.mxu2 %v289_v1  ;;  %285 = vmatmul.msk.f32.vlgmr.msra.gmra.mxu0 %vm30_vm1, %v19_v18 }
   0xe   :  { %286 = vmatmul.msk.f32.vlgmr.msra.gmra.mxu1 %vm30_vm1, %v17_v11  ;;  %177 = vmatpush.msrb.mxu0 %v284_v3 }
   0xf   :  { %200 = vmatpush.msrb.mxu1 %v24_v4  ;;  %232 = vmatpush.msrb.mxu2 %v288_v5 }
  0x10   :  { %262 = vmatpush.msrb.mxu3 %v294_v6  ;;  %178 = vmatpush.msrb.mxu0 %v283_v7 }
  0x11   :  { %201 = vmatpush.msrb.mxu1 %v23_v8  ;;  %233 = vmatpush.msrb.mxu2 %v287_v9 }
  0x12   :  { %263 = vmatpush.msrb.mxu3 %v293_v10  ;;  %179 = vmatpush.msrb.mxu0 %v282_v14 }
  0x13   :  { %202 = vmatpush.msrb.mxu1 %v22_v15  ;;  %311 = vmatmul.msk.f32.vlgmr.msrb.gmra.mxu2 %vm30_vm1, %v215_v34 }
  0x14   :  { %264 = vmatpush.msrb.mxu3 %v292_v17  ;;  %180 = vmatpush.msrb.mxu0 %v281_v22 }
  0x15   :  { %203 = vmatpush.msrb.mxu1 %v21_v24  ;;  %316 = vmatmul.msk.f32.vlgmr.msrb.gmra.mxu3 %vm30_vm1, %v246_v35 }
  0x16   :  { %305 = vmatmul.msk.f32.vlgmr.msrb.gmra.mxu0 %vm30_vm1, %v299_v28  ;;  %306 = vmatmul.msk.f32.vlgmr.msrb.gmra.mxu1 %vm30_vm1, %v297_v25 }
  0x8a   :  { %v51_v36 = vpop.f32.mrf.mxu0 }
  0x8b   :  { %v74_v37 = vpop.f32.mrf.mxu1 }
  0x8c   :  { %v75_v38 = vadd.f32 %v74_v37, %v51_v36 }
  0x8d   :  { %v106_v39 = vpop.f32.mrf.mxu2 }
  0x8e   :  { %v109_v40 = vadd.f32 %v106_v39, %v75_v38 }
  0x8f   :  { %v138_v41 = vpop.f32.mrf.mxu3 }
  0x90   :  { %v141_v43 = vadd.f32 %v138_v41, %v109_v40 }
  0x92   :  { %v146_v44 = vadd.f32 %v318_v42, %v141_v43 }
  0x93   :  { %v182_v45 = vpop.f32.mrf.mxu0  ;;  %v205_v46 = vpop.f32.mrf.mxu1 }
  0x94   :  { %147 = vst.msk [vmem:[%s447_s4] sm:$0xff] %vm30_vm1, %v146_v44  ;;  %v206_v47 = vadd.f32 %v205_v46, %v182_v45 }
  0x96   :  { %v235_v48 = vpop.f32.mrf.mxu2 }
  0x97   :  { %v238_v49 = vadd.f32 %v235_v48, %v206_v47 }
  0x98   :  { %v266_v51 = vpop.f32.mrf.mxu3 }
  0x99   :  { %v269_v52 = vadd.f32 %v266_v51, %v238_v49 }
  0x9b   :  { %v274_v53 = vadd.f32 %v319_v50, %v269_v52 }
  0x9d   :  { %317 = vst.msk [vmem:[%s447_s4 + $0x8] sm:$0xff] %vm30_vm1, %v274_v53 }

// kernel: vqvae2_forward.17
= control target key start
LH: loop header
LB: loop body
LE: loop exit
PB: predicated region body
PF: predicated region fallthrough
CT: control target
= control target key end

     0   :  { %vm28_vm0 = vcmask 261120   ;;  %vm138_vm1 = vcmask 257024   ;;  %s407_s2 = inlined_call_operand.vmem [shape: f32[4,32,32], index: 2, kind: input, shape index: {}]   ;;  %s408_s0 = inlined_call_operand.vmem [shape: f32[2,5,32], index: 0, kind: input, shape index: {}]   ;;  %s409_s1 = inlined_call_operand.vmem [shape: f32[2,5,32], index: 1, kind: input, shape index: {}]   ;;  %s410_s3 = inlined_call_operand.vmem [shape: f32[1,32], index: 3, kind: input, shape index: {}]   ;;  %s411_s4 = inlined_call_operand.vmem [shape: f32[2,4,32], index: 4, kind: output, shape index: {}]  }
   0x1   :  { %v274_v0 = vld [vmem:[%s407_s2 + $0x58] sm:$0xff]  ;;  %v273_v1 = vld [vmem:[%s407_s2 + $0x50] sm:$0xff]  ;;  %v272_v5 = vld [vmem:[%s407_s2 + $0x48] sm:$0xff] }
   0x2   :  { %v279_v2 = vld [vmem:[%s407_s2 + $0x78] sm:$0xff]  ;;  %95 = vmatpush.msra.mxu2 %v274_v0  ;;  %v278_v6 = vld [vmem:[%s407_s2 + $0x70] sm:$0xff]  ;;  %v277_v9 = vld [vmem:[%s407_s2 + $0x68] sm:$0xff] }
   0x3   :  { %124 = vmatpush.msra.mxu3 %v279_v2  ;;  %v268_v3 = vld [vmem:[%s407_s2 + $0x38] sm:$0xff]  ;;  %v267_v7 = vld [vmem:[%s407_s2 + $0x30] sm:$0xff]  ;;  %v17_v10 = vld [vmem:[%s408_s0] sm:$0x1f] }
   0x4   :  { %v22_v4 = vld [vmem:[%s407_s2 + $0x18] sm:$0xff]  ;;  %44 = vmatpush.msra.mxu0 %v268_v3  ;;  %v21_v8 = vld [vmem:[%s407_s2 + $0x10] sm:$0xff]  ;;  %96 = vmatpush.msra.mxu2 %v273_v1  ;;  %v271_v11 = vld [vmem:[%s407_s2 + $0x40] sm:$0xff]  ;;  %v80_v12 = vrot.slane %v17_v10, 1 }
   0x5   :  { %67 = vmatpush.msra.mxu1 %v22_v4  ;;  %125 = vmatpush.msra.mxu3 %v278_v6  ;;  %v266_v13 = vld [vmem:[%s407_s2 + $0x28] sm:$0xff]  ;;  %v276_v15 = vld [vmem:[%s407_s2 + $0x60] sm:$0xff] }
   0x6   :  { %45 = vmatpush.msra.mxu0 %v267_v7  ;;  %v20_v14 = vld [vmem:[%s407_s2 + $0x8] sm:$0xff]  ;;  %97 = vmatpush.msra.mxu2 %v272_v5  ;;  %v18_v16 = vld [vmem:[%s409_s1] sm:$0x1f] }
   0x7   :  { %68 = vmatpush.msra.mxu1 %v21_v8  ;;  %126 = vmatpush.msra.mxu3 %v277_v9  ;;  %v109_v17 = vrot.slane %v18_v16, 1  ;;  %v265_v18 = vld [vmem:[%s407_s2 + $0x20] sm:$0xff]  ;;  %v281_v20 = vld [vmem:[%s408_s0 + $0x8] sm:$0x1f] }
   0x8   :  { %46 = vmatpush.msra.mxu0 %v266_v13  ;;  %98 = vmatpush.msra.mxu2 %v271_v11  ;;  %v19_v19 = vld [vmem:[%s407_s2] sm:$0xff]  ;;  %v282_v21 = vld [vmem:[%s409_s1 + $0x8] sm:$0x1f]  ;;  %v202_v22 = vrot.slane %v281_v20, 1 }
   0x9   :  { %69 = vmatpush.msra.mxu1 %v20_v14  ;;  %127 = vmatpush.msra.mxu3 %v276_v15  ;;  %v230_v23 = vrot.slane %v282_v21, 1  ;;  %v300_v30 = vld [vmem:[%s410_s3] ss:$0 sm:$0xff] }
   0xa   :  { %275 = vmatmul.msk.f32.vlgmr.msra.gmra.mxu2 %vm28_vm0, %v80_v12  ;;  %280 = vmatmul.msk.f32.vlgmr.msra.gmra.mxu3 %vm28_vm0, %v109_v17  ;;  %v301_v38 = vld [vmem:[%s410_s3] ss:$0 sm:$0xff] }
   0xb   :  { %217 = vmatpush.msrb.mxu2 %v274_v0  ;;  %245 = vmatpush.msrb.mxu3 %v279_v2 }
   0xc   :  { %47 = vmatpush.msra.mxu0 %v265_v18  ;;  %70 = vmatpush.msra.mxu1 %v19_v19 }
   0xd   :  { %218 = vmatpush.msrb.mxu2 %v273_v1  ;;  %269 = vmatmul.msk.f32.vlgmr.msra.gmra.mxu0 %vm28_vm0, %v18_v16 }
   0xe   :  { %270 = vmatmul.msk.f32.vlgmr.msra.gmra.mxu1 %vm28_vm0, %v17_v10  ;;  %167 = vmatpush.msrb.mxu0 %v268_v3 }
   0xf   :  { %190 = vmatpush.msrb.mxu1 %v22_v4  ;;  %219 = vmatpush.msrb.mxu2 %v272_v5 }
  0x10   :  { %246 = vmatpush.msrb.mxu3 %v278_v6  ;;  %168 = vmatpush.msrb.mxu0 %v267_v7 }
  0x11   :  { %191 = vmatpush.msrb.mxu1 %v21_v8  ;;  %220 = vmatpush.msrb.mxu2 %v271_v11 }
  0x12   :  { %247 = vmatpush.msrb.mxu3 %v277_v9  ;;  %169 = vmatpush.msrb.mxu0 %v266_v13 }
  0x13   :  { %192 = vmatpush.msrb.mxu1 %v20_v14  ;;  %293 = vmatmul.msk.f32.vlgmr.msrb.gmra.mxu2 %vm28_vm0, %v202_v22 }
  0x14   :  { %248 = vmatpush.msrb.mxu3 %v276_v15  ;;  %170 = vmatpush.msrb.mxu0 %v265_v18 }
  0x15   :  { %193 = vmatpush.msrb.mxu1 %v19_v19  ;;  %298 = vmatmul.msk.f32.vlgmr.msrb.gmra.mxu3 %vm28_vm0, %v230_v23 }
  0x16   :  { %287 = vmatmul.msk.f32.vlgmr.msrb.gmra.mxu0 %vm28_vm0, %v282_v21  ;;  %288 = vmatmul.msk.f32.vlgmr.msrb.gmra.mxu1 %vm28_vm0, %v281_v20 }
  0x8a   :  { %v49_v24 = vpop.f32.mrf.mxu0 }
  0x8b   :  { %v72_v25 = vpop.f32.mrf.mxu1 }
  0x8c   :  { %v73_v26 = vadd.f32 %v72_v25, %v49_v24 }
  0x8d   :  { %v100_v27 = vpop.f32.mrf.mxu2  ;;  %v129_v28 = vpop.f32.mrf.mxu3 }
  0x8e   :  { %v103_v29 = vadd.f32 %v100_v27, %v73_v26 }
  0x90   :  { %v132_v31 = vadd.f32 %v129_v28, %v103_v29 }
  0x92   :  { %v137_v32 = vadd.f32 %v300_v30, %v132_v31 }
  0x93   :  { %v172_v33 = vpop.f32.mrf.mxu0  ;;  %v195_v34 = vpop.f32.mrf.mxu1 }
  0x94   :  { %139 = vst.msk [vmem:[%s411_s4] sm:$0xf] %vm138_vm1, %v137_v32  ;;  %v196_v35 = vadd.f32 %v195_v34, %v172_v33 }
  0x96   :  { %v222_v36 = vpop.f32.mrf.mxu2 }
  0x97   :  { %v225_v37 = vadd.f32 %v222_v36, %v196_v35 }
  0x98   :  { %v250_v39 = vpop.f32.mrf.mxu3 }
  0x99   :  { %v253_v40 = vadd.f32 %v250_v39, %v225_v37 }
  0x9b   :  { %v258_v41 = vadd.f32 %v301_v38, %v253_v40 }
  0x9d   :  { %299 = vst.msk [vmem:[%s411_s4 + $0x4] sm:$0xf] %vm138_vm1, %v258_v41 }

// kernel: vqvae2_forward.16
= control target key start
LH: loop header
LB: loop body
LE: loop exit
PB: predicated region body
PF: predicated region fallthrough
CT: control target
= control target key end

     0   :  { %14 = vsyncpa [#allocation4], 0  ;;  %s965_s0 = inlined_call_operand.vmem [shape: f32[2,8,32], index: 0, kind: input, shape index: {}]   ;;  %s966_s1 = inlined_call_operand.vmem [shape: f32[3,32,32], index: 1, kind: input, shape index: {}]   ;;  %s967_s2 = inlined_call_operand.vmem [shape: f32[1,32], index: 2, kind: input, shape index: {}]   ;;  %s968_s3 = inlined_call_operand.vmem [shape: f32[1,32,32], index: 3, kind: input, shape index: {}]   ;;  %s969_s4 = inlined_call_operand.vmem [shape: f32[1,32], index: 4, kind: input, shape index: {}]   ;;  %s970_s5 = inlined_call_operand.hbm [shape: f32[3,32,32], index: 5, kind: input, shape index: {}]   ;;  %s971_s6 = inlined_call_operand.vmem [shape: f32[1,32], index: 6, kind: input, shape index: {}]   ;;  %s972_s7 = inlined_call_operand.hbm [shape: f32[1,32,32], index: 7, kind: input, shape index: {}]   ;;  %s973_s8 = inlined_call_operand.vmem [shape: f32[1,32], index: 8, kind: input, shape index: {}]   ;;  %s974_s9 = inlined_call_operand.vmem [shape: f32[2,8,32], index: 9, kind: output, shape index: {}]  }
   0x1   :  { %s30_s11 = sshll.u32 %s970_s5, 4  ;;  %s31_s11 = int_to_ptr.hbm [resolvable:$true] %s30_s11 }
   0x2   :  { %15 = vsyncpa [#allocation6], 0  ;;  %s721_s12 = smov [#allocation3]   ;;  %s45_s16 = sshll.u32 %s972_s7, 4  ;;  %s46_s16 = int_to_ptr.hbm [resolvable:$true] %s45_s16 }
   0x3   :  { %s32_s13 = sshll.u32 %s721_s12, 4  ;;  %s722_s17 = smov 128   ;;  %s33_s13 = int_to_ptr.vmem [resolvable:$true] %s32_s13 }
   0x4   :  { %s723_s18 = smov 8   ;;  %s724_s19 = smov [#allocation5]  }
   0x5   :  { %38 = dma.hbm_to_vmem [thread:$0]  %s31_s11, 1536, %s33_s13, [#allocation4], %s722_s17, %s722_s17, %s723_s18  }
   0x6   :  { %s47_s20 = sshll.u32 %s724_s19, 4  ;;  %s48_s20 = int_to_ptr.vmem [resolvable:$true] %s47_s20 }
   0x7   :  { %53 = dma.hbm_to_vmem [thread:$0]  %s46_s16, 512, %s48_s20, [#allocation6], %s722_s17, %s722_s17, %s723_s18  }
   0x8   :  { %717 = dma.done.wait [#allocation4], 1536  }
   0x9   :  { %718 = vsyncadd [#allocation4], 4294965760 }
   0xa   :  { %719 = dma.done.wait [#allocation6], 512  }
   0xb   :  { %720 = vsyncadd [#allocation6], 4294966784  ;;  %vm64_vm0 = vcmask 261120   ;;  %vm66_vm1 = vcmask 259072   ;;  %v725_v0 = vmov 0.0   ;;  %v786_v1 = vld [vmem:[%s966_s1 + $0x58] sm:$0xff] }
   0xc   :  { %65 = vst.msk [vmem:[#allocation2] sm:$0xff] %vm64_vm0, %v725_v0  ;;  %v791_v2 = vld [vmem:[%s966_s1 + $0x50] sm:$0xff]  ;;  %v796_v3 = vld [vmem:[%s966_s1 + $0x38] sm:$0xff]  ;;  %156 = vmatpush.msra.mxu2 %v786_v1  ;;  %v808_v5 = vld [vmem:[%s966_s1 + $0x48] sm:$0xff]  ;;  %vm138_vm2 = vcmask 1041408   ;;  %vm85_vm3 = vcmask 1044480  }
   0xd   :  { %67 = vst.msk [vmem:[#allocation2 + $0x8] sm:$0x3f] %vm66_vm1, %v725_v0  ;;  %103 = vmatpush.msra.mxu0 %v796_v3  ;;  %v803_v4 = vld [vmem:[%s966_s1 + $0x18] sm:$0xff]  ;;  %v813_v6 = vld [vmem:[%s966_s1 + $0x30] sm:$0xff]  ;;  %v824_v8 = vld [vmem:[%s966_s1 + $0x40] sm:$0xff]  ;;  %vm245_vm4 = vcmask 1045504  }
   0xe   :  { %125 = vmatpush.msra.mxu1 %v803_v4  ;;  %v819_v7 = vld [vmem:[%s966_s1 + $0x10] sm:$0xff]  ;;  %v68_v9 = vld [vmem:[%s965_s0] sm:$0xff]  ;;  %157 = vmatpush.msra.mxu2 %v791_v2  ;;  %v835_v10 = vld [vmem:[%s966_s1 + $0x28] sm:$0xff]  ;;  %vm276_vm5 = vcmask 1043456  }
   0xf   :  { %104 = vmatpush.msra.mxu0 %v813_v6  ;;  %69 = vst.msk [vmem:[#allocation2 + $0x3] sm:$0xff] %vm64_vm0, %v68_v9  ;;  %v840_v11 = vld [vmem:[%s966_s1 + $0x8] sm:$0xff]  ;;  %v845_v12 = vld [vmem:[%s966_s1 + $0x20] sm:$0xff]  ;;  %v867_v24 = vld [vmem:[%s968_s3 + $0x18] sm:$0xff] }
  0x10   :  { %126 = vmatpush.msra.mxu1 %v819_v7  ;;  %v851_v13 = vld [vmem:[%s966_s1] sm:$0xff]  ;;  %158 = vmatpush.msra.mxu2 %v808_v5  ;;  %v873_v25 = vld [vmem:[%s968_s3 + $0x10] sm:$0xff]  ;;  %v879_v26 = vld [vmem:[%s968_s3 + $0x8] sm:$0xff] }
  0x11   :  { %105 = vmatpush.msra.mxu0 %v835_v10  ;;  %194 = vmatpush.msra.mxu3 %v867_v24  ;;  %v885_v27 = vld [vmem:[%s968_s3] sm:$0xff]  ;;  %v275_v36 = vld [vmem:[#allocation3 + $0x58] sm:$0xff]  ;;  %v273_v42 = vld [vmem:[#allocation3 + $0x48] sm:$0xff] }
  0x12   :  { %127 = vmatpush.msra.mxu1 %v840_v11  ;;  %159 = vmatpush.msra.mxu2 %v824_v8  ;;  %v661_v31 = vld [vmem:[%s967_s2] ss:$0 sm:$0xff]  ;;  %v217_v37 = vld [vmem:[#allocation3 + $0x38] sm:$0xff]  ;;  %v215_v43 = vld [vmem:[#allocation3 + $0x28] sm:$0xff] }
  0x13   :  { %106 = vmatpush.msra.mxu0 %v845_v12  ;;  %195 = vmatpush.msra.mxu3 %v873_v25  ;;  %v212_v38 = vld [vmem:[#allocation3 + $0x18] sm:$0xff]  ;;  %v274_v39 = vld [vmem:[#allocation3 + $0x50] sm:$0xff]  ;;  %v210_v44 = vld [vmem:[#allocation3 + $0x8] sm:$0xff] }
  0x14   :  { %128 = vmatpush.msra.mxu1 %v851_v13  ;;  %294 = vmatpush.msrb.mxu2 %v275_v36  ;;  %v216_v40 = vld [vmem:[#allocation3 + $0x30] sm:$0xff]  ;;  %v272_v45 = vld [vmem:[#allocation3 + $0x40] sm:$0xff] }
  0x15   :  { %196 = vmatpush.msra.mxu3 %v879_v26  ;;  %237 = vmatpush.msrb.mxu0 %v217_v37  ;;  %v211_v41 = vld [vmem:[#allocation3 + $0x10] sm:$0xff]  ;;  %v214_v46 = vld [vmem:[#allocation3 + $0x20] sm:$0xff] }
  0x16   :  { %v70_v14 = vld [vmem:[#allocation2] sm:$0xff]  ;;  %v71_v15 = vld [vmem:[#allocation2 + $0x8] sm:$0x3f]  ;;  %263 = vmatpush.msrb.mxu1 %v212_v38  ;;  %295 = vmatpush.msrb.mxu2 %v274_v39  ;;  %v209_v47 = vld [vmem:[#allocation3] sm:$0xff] }
  0x17   :  { %v72_v16 = vmax.f32 %v70_v14, 0.0  ;;  %v73_v17 = vmax.f32 %v71_v15, 0.0  ;;  %197 = vmatpush.msra.mxu3 %v885_v27  ;;  %238 = vmatpush.msrb.mxu0 %v216_v40  ;;  %v662_v48 = vld [vmem:[%s969_s4] ss:$0 sm:$0xff]  ;;  %v202_v50 = vld [vmem:[#allocation2 + $0x3] sm:$0xff] }
  0x18   :  { %264 = vmatpush.msrb.mxu1 %v211_v41  ;;  %296 = vmatpush.msrb.mxu2 %v273_v42  ;;  %v663_v9 = vld [vmem:[%s971_s6] ss:$0 sm:$0xff] }
  0x19   :  { %v139_v18 = vrot.slane %v72_v16, 6  ;;  %v140_v19 = vrot.slane %v73_v17, 6  ;;  %v86_v20 = vrot.slane %v72_v16, 3  ;;  %v87_v21 = vrot.slane %v73_v17, 3  ;;  %627 = vmatmul.msk.f32.vlgmr.msra.gmra.mxu1 %vm64_vm0, %v72_v16  ;;  %239 = vmatpush.msrb.mxu0 %v215_v43  ;;  %v664_v14 = vld [vmem:[%s973_s8] ss:$0 sm:$0xff] }
  0x1a   :  { %265 = vmatpush.msrb.mxu1 %v210_v44  ;;  %297 = vmatpush.msrb.mxu2 %v272_v45 }
  0x1b   :  { %v141_v22 = vsel %vm138_vm2, %v139_v18, %v140_v19  ;;  %v88_v23 = vsel %vm85_vm3, %v86_v20, %v87_v21  ;;  %240 = vmatpush.msrb.mxu0 %v214_v46  ;;  %v638_v19 = vld [vmem:[%s965_s0 + $0x8] sm:$0xff] }
  0x1c   :  { %632 = vmatmul.msk.f32.vlgmr.msra.gmra.mxu2 %vm64_vm0, %v141_v22  ;;  %626 = vmatmul.msk.f32.vlgmr.msra.gmra.mxu0 %vm64_vm0, %v88_v23 }
  0x1d   :  { %266 = vmatpush.msrb.mxu1 %v209_v47  ;;  %430 = vmatpush.msra.mxu2 %v786_v1 }
  0x1e   :  { %379 = vmatpush.msra.mxu0 %v796_v3  ;;  %v311_v3 = vld [vmem:[#allocation5 + $0x10] sm:$0xff] }
  0x1f   :  { %401 = vmatpush.msra.mxu1 %v803_v4  ;;  %431 = vmatpush.msra.mxu2 %v791_v2  ;;  %v312_v2 = vld [vmem:[#allocation5 + $0x18] sm:$0xff]  ;;  %v310_v4 = vld [vmem:[#allocation5 + $0x8] sm:$0xff] }
  0x20   :  { %380 = vmatpush.msra.mxu0 %v813_v6  ;;  %332 = vmatpush.msrb.mxu3 %v312_v2 }
  0x21   :  { %402 = vmatpush.msra.mxu1 %v819_v7  ;;  %432 = vmatpush.msra.mxu2 %v808_v5  ;;  %v309_v5 = vld [vmem:[#allocation5] sm:$0xff] }
  0x22   :  { %381 = vmatpush.msra.mxu0 %v835_v10  ;;  %333 = vmatpush.msrb.mxu3 %v311_v3 }
  0x23   :  { %403 = vmatpush.msra.mxu1 %v840_v11  ;;  %433 = vmatpush.msra.mxu2 %v824_v8 }
  0x24   :  { %382 = vmatpush.msra.mxu0 %v845_v12  ;;  %334 = vmatpush.msrb.mxu3 %v310_v4 }
  0x25   :  { %404 = vmatpush.msra.mxu1 %v851_v13 }
  0x26   :  { %335 = vmatpush.msrb.mxu3 %v309_v5 }
  0x96   :  { %v130_v29 = vpop.f32.mrf.mxu1 }
  0x99   :  { %v108_v28 = vpop.f32.mrf.mxu0 }
  0x9a   :  { %v131_v30 = vadd.f32 %v130_v29, %v108_v28 }
  0x9f   :  { %v161_v32 = vpop.f32.mrf.mxu2 }
  0xa0   :  { %v164_v33 = vadd.f32 %v161_v32, %v131_v30 }
  0xa2   :  { %v169_v34 = vadd.f32 %v661_v31, %v164_v33 }
  0xa4   :  { %v170_v35 = vmax.f32 %v169_v34, 0.0  ;;  %v665_v34 = vld [vmem:[%s967_s2] ss:$0 sm:$0xff] }
  0xa6   :  { %633 = vmatmul.msk.f32.vlgmr.msra.gmra.mxu3 %vm64_vm0, %v170_v35 }
  0xa7   :  { %468 = vmatpush.msra.mxu3 %v867_v24 }
  0xa9   :  { %469 = vmatpush.msra.mxu3 %v873_v25 }
  0xab   :  { %470 = vmatpush.msra.mxu3 %v879_v26 }
  0xad   :  { %471 = vmatpush.msra.mxu3 %v885_v27 }
 0x129   :  { %v199_v49 = vpop.f32.mrf.mxu3 }
 0x12a   :  { %v200_v51 = vadd.f32 %v662_v48, %v199_v49 }
 0x12c   :  { %v203_v52 = vadd.f32 %v202_v50, %v200_v51 }
 0x12e   :  { %204 = vst.msk [vmem:[#allocation2 + $0x3] sm:$0xff] %vm64_vm0, %v203_v52 }
 0x135   :  { %v205_v53 = vld [vmem:[#allocation2] sm:$0xff]  ;;  %v206_v54 = vld [vmem:[#allocation2 + $0x8] sm:$0x3f] }
 0x136   :  { %v207_v55 = vmax.f32 %v205_v53, 0.0  ;;  %v208_v56 = vmax.f32 %v206_v54, 0.0  ;;  %v340_v17 = vld [vmem:[#allocation2 + $0x3] sm:$0xff] }
 0x138   :  { %v220_v57 = vrot.slane %v207_v55, 3  ;;  %v221_v58 = vrot.slane %v208_v56, 3  ;;  %v246_v59 = vrot.slane %v207_v55, 2  ;;  %v247_v60 = vrot.slane %v208_v56, 2 }
 0x139   :  { %v277_v61 = vrot.slane %v207_v55, 4  ;;  %v278_v62 = vrot.slane %v208_v56, 4 }
 0x13a   :  { %v222_v63 = vsel %vm85_vm3, %v220_v57, %v221_v58  ;;  %v248_v0 = vsel %vm245_vm4, %v246_v59, %v247_v60  ;;  %v667_v60 = vld [vmem:[%s971_s6] ss:$0 sm:$0xff] }
 0x13b   :  { %634 = vmatmul.msk.f32.vlgmr.msrb.gmra.mxu0 %vm64_vm0, %v222_v63  ;;  %635 = vmatmul.msk.f32.vlgmr.msrb.gmra.mxu1 %vm64_vm0, %v248_v0  ;;  %v279_v1 = vsel %vm276_vm5, %v277_v61, %v278_v62 }
 0x13c   :  { %636 = vmatmul.msk.f32.vlgmr.msrb.gmra.mxu2 %vm64_vm0, %v279_v1  ;;  %510 = vmatpush.msrb.mxu0 %v217_v37  ;;  %v668_v1 = vld [vmem:[%s973_s8] ss:$0 sm:$0xff] }
 0x13d   :  { %564 = vmatpush.msrb.mxu2 %v275_v36  ;;  %535 = vmatpush.msrb.mxu1 %v212_v38 }
 0x13e   :  { %511 = vmatpush.msrb.mxu0 %v216_v40 }
 0x13f   :  { %565 = vmatpush.msrb.mxu2 %v274_v39  ;;  %536 = vmatpush.msrb.mxu1 %v211_v41  ;;  %v666_v39 = vld [vmem:[%s969_s4] ss:$0 sm:$0xff] }
 0x140   :  { %512 = vmatpush.msrb.mxu0 %v215_v43 }
 0x141   :  { %566 = vmatpush.msrb.mxu2 %v273_v42  ;;  %537 = vmatpush.msrb.mxu1 %v210_v44 }
 0x142   :  { %513 = vmatpush.msrb.mxu0 %v214_v46 }
 0x143   :  { %567 = vmatpush.msrb.mxu2 %v272_v45  ;;  %538 = vmatpush.msrb.mxu1 %v209_v47 }
 0x1b8   :  { %v242_v6 = vpop.f32.mrf.mxu0  ;;  %v268_v7 = vpop.f32.mrf.mxu1 }
 0x1b9   :  { %v269_v8 = vadd.f32 %v268_v7, %v242_v6 }
 0x1bf   :  { %v299_v10 = vpop.f32.mrf.mxu2 }
 0x1c0   :  { %v302_v11 = vadd.f32 %v299_v10, %v269_v8 }
 0x1c2   :  { %v307_v12 = vadd.f32 %v663_v9, %v302_v11 }
 0x1c4   :  { %v308_v13 = vmax.f32 %v307_v12, 0.0 }
 0x1c6   :  { %637 = vmatmul.msk.f32.vlgmr.msrb.gmra.mxu3 %vm64_vm0, %v308_v13 }
 0x1c7   :  { %602 = vmatpush.msrb.mxu3 %v312_v2 }
 0x1c9   :  { %603 = vmatpush.msrb.mxu3 %v311_v3 }
 0x1cb   :  { %604 = vmatpush.msrb.mxu3 %v310_v4 }
 0x1cd   :  { %605 = vmatpush.msrb.mxu3 %v309_v5 }
 0x249   :  { %v337_v15 = vpop.f32.mrf.mxu3 }
 0x24a   :  { %v338_v16 = vadd.f32 %v664_v14, %v337_v15 }
 0x24c   :  { %v341_v18 = vadd.f32 %v340_v17, %v338_v16 }
 0x24e   :  { %342 = vst.msk [vmem:[#allocation2 + $0x3] sm:$0xff] %vm64_vm0, %v341_v18 }
 0x255   :  { %v343_v20 = vld [vmem:[#allocation2 + $0x3] sm:$0xff] }
 0x256   :  { %344 = vst.msk [vmem:[%s974_s9] sm:$0xff] %vm64_vm0, %v343_v20 }
 0x257   :  { %347 = vst.msk [vmem:[#allocation2 + $0x3] sm:$0xff] %vm64_vm0, %v638_v19 }
 0x25e   :  { %v348_v21 = vld [vmem:[#allocation2] sm:$0xff]  ;;  %v349_v22 = vld [vmem:[#allocation2 + $0x8] sm:$0x3f] }
 0x25f   :  { %v350_v23 = vmax.f32 %v348_v21, 0.0  ;;  %v351_v24 = vmax.f32 %v349_v22, 0.0  ;;  %v476_v41 = vld [vmem:[#allocation2 + $0x3] sm:$0xff] }
 0x261   :  { %v413_v25 = vrot.slane %v350_v23, 6  ;;  %v414_v26 = vrot.slane %v351_v24, 6  ;;  %v362_v27 = vrot.slane %v350_v23, 3  ;;  %v363_v28 = vrot.slane %v351_v24, 3  ;;  %644 = vmatmul.msk.f32.vlgmr.msra.gmra.mxu1 %vm64_vm0, %v350_v23 }
 0x263   :  { %v415_v29 = vsel %vm138_vm2, %v413_v25, %v414_v26  ;;  %v364_v30 = vsel %vm85_vm3, %v362_v27, %v363_v28 }
 0x264   :  { %649 = vmatmul.msk.f32.vlgmr.msra.gmra.mxu2 %vm64_vm0, %v415_v29  ;;  %643 = vmatmul.msk.f32.vlgmr.msra.gmra.mxu0 %vm64_vm0, %v364_v30 }
 0x2de   :  { %v406_v32 = vpop.f32.mrf.mxu1 }
 0x2e1   :  { %v384_v31 = vpop.f32.mrf.mxu0 }
 0x2e2   :  { %v407_v33 = vadd.f32 %v406_v32, %v384_v31 }
 0x2e7   :  { %v435_v35 = vpop.f32.mrf.mxu2 }
 0x2e8   :  { %v438_v36 = vadd.f32 %v435_v35, %v407_v33 }
 0x2ea   :  { %v443_v37 = vadd.f32 %v665_v34, %v438_v36 }
 0x2ec   :  { %v444_v38 = vmax.f32 %v443_v37, 0.0 }
 0x2ee   :  { %650 = vmatmul.msk.f32.vlgmr.msra.gmra.mxu3 %vm64_vm0, %v444_v38 }
 0x371   :  { %v473_v40 = vpop.f32.mrf.mxu3 }
 0x372   :  { %v474_v42 = vadd.f32 %v666_v39, %v473_v40 }
 0x374   :  { %v477_v43 = vadd.f32 %v476_v41, %v474_v42 }
 0x376   :  { %478 = vst.msk [vmem:[#allocation2 + $0x3] sm:$0xff] %vm64_vm0, %v477_v43 }
 0x37d   :  { %v479_v44 = vld [vmem:[#allocation2] sm:$0xff]  ;;  %v480_v45 = vld [vmem:[#allocation2 + $0x8] sm:$0x3f] }
 0x37e   :  { %v481_v46 = vmax.f32 %v479_v44, 0.0  ;;  %v482_v47 = vmax.f32 %v480_v45, 0.0  ;;  %v610_v4 = vld [vmem:[#allocation2 + $0x3] sm:$0xff] }
 0x380   :  { %v493_v48 = vrot.slane %v481_v46, 3  ;;  %v494_v49 = vrot.slane %v482_v47, 3  ;;  %v518_v50 = vrot.slane %v481_v46, 2  ;;  %v519_v51 = vrot.slane %v482_v47, 2 }
 0x381   :  { %v547_v52 = vrot.slane %v481_v46, 4  ;;  %v548_v53 = vrot.slane %v482_v47, 4 }
 0x382   :  { %v495_v54 = vsel %vm85_vm3, %v493_v48, %v494_v49  ;;  %v520_v55 = vsel %vm245_vm4, %v518_v50, %v519_v51 }
 0x383   :  { %651 = vmatmul.msk.f32.vlgmr.msrb.gmra.mxu0 %vm64_vm0, %v495_v54  ;;  %652 = vmatmul.msk.f32.vlgmr.msrb.gmra.mxu1 %vm64_vm0, %v520_v55  ;;  %v549_v56 = vsel %vm276_vm5, %v547_v52, %v548_v53 }
 0x384   :  { %653 = vmatmul.msk.f32.vlgmr.msrb.gmra.mxu2 %vm64_vm0, %v549_v56 }
 0x400   :  { %v515_v57 = vpop.f32.mrf.mxu0  ;;  %v540_v58 = vpop.f32.mrf.mxu1 }
 0x401   :  { %v541_v59 = vadd.f32 %v540_v58, %v515_v57 }
 0x407   :  { %v569_v61 = vpop.f32.mrf.mxu2 }
 0x408   :  { %v572_v62 = vadd.f32 %v569_v61, %v541_v59 }
 0x40a   :  { %v577_v63 = vadd.f32 %v667_v60, %v572_v62 }
 0x40c   :  { %v578_v0 = vmax.f32 %v577_v63, 0.0 }
 0x40e   :  { %654 = vmatmul.msk.f32.vlgmr.msrb.gmra.mxu3 %vm64_vm0, %v578_v0 }
 0x491   :  { %v607_v2 = vpop.f32.mrf.mxu3 }
 0x492   :  { %v608_v3 = vadd.f32 %v668_v1, %v607_v2 }
 0x494   :  { %v611_v5 = vadd.f32 %v610_v4, %v608_v3 }
 0x496   :  { %612 = vst.msk [vmem:[#allocation2 + $0x3] sm:$0xff] %vm64_vm0, %v611_v5 }
 0x49d   :  { %v613_v6 = vld [vmem:[#allocation2 + $0x3] sm:$0xff] }
 0x49e   :  { %655 = vst.msk [vmem:[%s974_s9 + $0x8] sm:$0xff] %vm64_vm0, %v613_v6 }
 0x49f   :  { %620 = vsyncpa [#allocation4], 1 }
 0x4a0   :  { %621 = vsyncpa [#allocation6], 1 }

// kernel: vqvae2_forward.20
= control target key start
LH: loop header
LB: loop body
LE: loop exit
PB: predicated region body
PF: predicated region fallthrough
CT: control target
= control target key end

     0   :  { %vm21_vm0 = vcmask 261120   ;;  %v66_v10 = vlaneseq  ;;  %vm69_vm1 = vcmask 57344   ;;  %v115_v14 = vmov 0.0   ;;  %s173_s1 = inlined_call_operand.vmem [shape: f32[32,32], index: 1, kind: input, shape index: {}]   ;;  %s174_s0 = inlined_call_operand.vmem [shape: f32[8,32], index: 0, kind: input, shape index: {}]   ;;  %s175_s2 = inlined_call_operand.vmem [shape: f32[1,32], index: 2, kind: input, shape index: {}]   ;;  %s176_s3 = inlined_call_operand.vmem [shape: s32[1,8], index: 3, kind: output, shape index: {0}]   ;;  %s177_s4 = inlined_call_operand.vmem [shape: f32[8,32], index: 4, kind: output, shape index: {1}]  }
   0x1   :  { %v20_v0 = vld [vmem:[%s173_s1 + $0x18] sm:$0xff]  ;;  %v19_v1 = vld [vmem:[%s173_s1 + $0x10] sm:$0xff]  ;;  %v18_v2 = vld [vmem:[%s173_s1 + $0x8] sm:$0xff] }
   0x2   :  { %106 = vmatpush.xpose.msk.msra.mxu0 %vm21_vm0, %v20_v0  ;;  %89 = vmatpush.msra.mxu1 %v20_v0  ;;  %v17_v3 = vld [vmem:[%s173_s1] sm:$0xff]  ;;  %v67_v11 = vand.u32 127, %v66_v10 }
   0x3   :  { %v16_v4 = vld [vmem:[%s174_s0] sm:$0xff] }
   0x4   :  { %90 = vmatpush.msra.mxu1 %v19_v1  ;;  %v114_v5 = vld [vmem:[%s175_s2] ss:$0 sm:$0xff] }
   0x6   :  { %107 = vmatpush.xpose.msk.msra.mxu0 %vm21_vm0, %v19_v1  ;;  %91 = vmatpush.msra.mxu1 %v18_v2 }
   0x8   :  { %92 = vmatpush.msra.mxu1 %v17_v3 }
   0xa   :  { %108 = vmatpush.xpose.msk.msra.mxu0 %vm21_vm0, %v18_v2 }
   0xe   :  { %109 = vmatpush.xpose.msk.msra.mxu0 %vm21_vm0, %v17_v3 }
  0x11   :  { %110 = vmatmul.msk.f32.vlgmr.msra.gmra.mxu0 %vm21_vm0, %v16_v4 }
  0x8e   :  { %v54_v6 = vpop.f32.mrf.mxu0 }
  0x8f   :  { %v58_v7 = vmul.f32 2.0, %v54_v6 }
  0x91   :  { %v62_v8 = vsub.f32 %v114_v5, %v58_v7 }
  0x93   :  { %v63_v9 = vsel %vm21_vm0, %v62_v8, inf }
  0x94   :  { %64 = vmin.index.xlane.f32.xlu0 %v63_v9 }
 0x107   :  { %v65_v12 = vpop.xlane.xlu0 %64 }
 0x108   :  { %v68_v13 = vperm.slane %v65_v12, %v67_v11  ;;  %vm71_vm2 = vcmp.eq.s32.totalorder %v67_v11, %v65_v12 }
 0x109   :  { %v111_v15 = vsel %vm71_vm2, 1.0, %v115_v14 }
 0x10a   :  { %70 = vst.msk [vmem:[%s176_s3] sm:$0x1] %vm69_vm1, %v68_v13  ;;  %112 = vmatmul.msk.f32.vlgmr.msra.gmra.mxu1 %vm21_vm0, %v111_v15 }
 0x187   :  { %v94_v16 = vpop.f32.mrf.mxu1 }
 0x188   :  { %97 = vst.msk [vmem:[%s177_s4] sm:$0xff] %vm21_vm0, %v94_v16 }

// kernel: vqvae2_forward.18
= control target key start
LH: loop header
LB: loop body
LE: loop exit
PB: predicated region body
PF: predicated region fallthrough
CT: control target
= control target key end

     0   :  { %14 = vsyncpa [#allocation4], 0  ;;  %s961_s0 = inlined_call_operand.vmem [shape: f32[2,4,32], index: 0, kind: input, shape index: {}]   ;;  %s962_s1 = inlined_call_operand.hbm [shape: f32[3,32,32], index: 1, kind: input, shape index: {}]   ;;  %s963_s2 = inlined_call_operand.vmem [shape: f32[1,32], index: 2, kind: input, shape index: {}]   ;;  %s964_s3 = inlined_call_operand.hbm [shape: f32[1,32,32], index: 3, kind: input, shape index: {}]   ;;  %s965_s4 = inlined_call_operand.vmem [shape: f32[1,32], index: 4, kind: input, shape index: {}]   ;;  %s966_s5 = inlined_call_operand.hbm [shape: f32[3,32,32], index: 5, kind: input, shape index: {}]   ;;  %s967_s6 = inlined_call_operand.vmem [shape: f32[1,32], index: 6, kind: input, shape index: {}]   ;;  %s968_s7 = inlined_call_operand.hbm [shape: f32[1,32,32], index: 7, kind: input, shape index: {}]   ;;  %s969_s8 = inlined_call_operand.vmem [shape: f32[1,32], index: 8, kind: input, shape index: {}]   ;;  %s970_s9 = inlined_call_operand.vmem [shape: f32[2,4,32], index: 9, kind: output, shape index: {}]  }
   0x1   :  { %15 = vsyncpa [#allocation6], 0 }
   0x2   :  { %16 = vsyncpa [#allocation9], 0  ;;  %s38_s11 = sshll.u32 %s964_s3, 4  ;;  %s765_s12 = smov [#allocation5]   ;;  %s39_s11 = int_to_ptr.hbm [resolvable:$true] %s38_s11 }
   0x3   :  { %s40_s13 = sshll.u32 %s765_s12, 4  ;;  %s23_s16 = sshll.u32 %s962_s1, 4  ;;  %s41_s13 = int_to_ptr.vmem [resolvable:$true] %s40_s13  ;;  %s24_s16 = int_to_ptr.hbm [resolvable:$true] %s23_s16 }
   0x4   :  { %s766_s17 = smov 128   ;;  %s767_s18 = smov 8  }
   0x5   :  { %46 = dma.hbm_to_vmem [thread:$0]  %s39_s11, 512, %s41_s13, [#allocation6], %s766_s17, %s766_s17, %s767_s18  }
   0x6   :  { %s768_s19 = smov [#allocation3]   ;;  %s53_s23 = sshll.u32 %s966_s5, 4  ;;  %s54_s23 = int_to_ptr.hbm [resolvable:$true] %s53_s23 }
   0x7   :  { %s25_s20 = sshll.u32 %s768_s19, 4  ;;  %s68_s25 = sshll.u32 %s968_s7, 4  ;;  %s26_s20 = int_to_ptr.vmem [resolvable:$true] %s25_s20  ;;  %s69_s25 = int_to_ptr.hbm [resolvable:$true] %s68_s25 }
   0x8   :  { %31 = dma.hbm_to_vmem [thread:$0]  %s24_s16, 1536, %s26_s20, [#allocation4], %s766_s17, %s766_s17, %s767_s18  }
   0x9   :  { %s769_s26 = smov [#allocation7]   ;;  %s770_s1 = smov [#allocation8]  }
   0xa   :  { %s55_s27 = sshll.u32 %s769_s26, 4  ;;  %s70_s28 = sshll.u32 %s770_s1, 4  ;;  %s56_s27 = int_to_ptr.vmem [resolvable:$true] %s55_s27  ;;  %s71_s28 = int_to_ptr.vmem [resolvable:$true] %s70_s28 }
   0xb   :  { %61 = dma.hbm_to_vmem [thread:$0]  %s54_s23, 1536, %s56_s27, [#allocation6], %s766_s17, %s766_s17, %s767_s18  }
   0xc   :  { %76 = dma.hbm_to_vmem [thread:$0]  %s69_s25, 512, %s71_s28, [#allocation9], %s766_s17, %s766_s17, %s767_s18  }
   0xd   :  { %759 = dma.done.wait [#allocation4], 1536  }
   0xe   :  { %760 = vsyncadd [#allocation4], 4294965760 }
   0xf   :  { %761 = dma.done.wait [#allocation6], 2048  }
  0x10   :  { %762 = vsyncadd [#allocation6], 4294965248 }
  0x11   :  { %763 = dma.done.wait [#allocation9], 512  }
  0x12   :  { %764 = vsyncadd [#allocation9], 4294966784  ;;  %vm95_vm0 = vcmask 261120   ;;  %vm97_vm1 = vcmask 254976   ;;  %v771_v0 = vmov 0.0   ;;  %v835_v1 = vld [vmem:[#allocation3 + $0x58] sm:$0xff] }
  0x13   :  { %96 = vst.msk [vmem:[#allocation2] sm:$0xff] %vm95_vm0, %v771_v0  ;;  %v837_v2 = vld [vmem:[#allocation3 + $0x50] sm:$0xff]  ;;  %v839_v3 = vld [vmem:[#allocation3 + $0x38] sm:$0xff]  ;;  %vm100_vm2 = vcmask 257024   ;;  %185 = vmatpush.msra.mxu2 %v835_v1  ;;  %v845_v5 = vld [vmem:[#allocation3 + $0x48] sm:$0xff]  ;;  %vm167_vm3 = vcmask 1041408  }
  0x14   :  { %98 = vst.msk [vmem:[#allocation2 + $0x8] sm:$0x3] %vm97_vm1, %v771_v0  ;;  %131 = vmatpush.msra.mxu0 %v839_v3  ;;  %v843_v4 = vld [vmem:[#allocation3 + $0x18] sm:$0xff]  ;;  %v847_v6 = vld [vmem:[#allocation3 + $0x30] sm:$0xff]  ;;  %v852_v8 = vld [vmem:[#allocation3 + $0x40] sm:$0xff] }
  0x15   :  { %153 = vmatpush.msra.mxu1 %v843_v4  ;;  %v850_v7 = vld [vmem:[#allocation3 + $0x10] sm:$0xff]  ;;  %186 = vmatpush.msra.mxu2 %v837_v2  ;;  %v860_v11 = vld [vmem:[#allocation3 + $0x28] sm:$0xff]  ;;  %v865_v13 = vld [vmem:[#allocation3 + $0x20] sm:$0xff] }
  0x16   :  { %v99_v9 = vld [vmem:[%s961_s0] sm:$0xf]  ;;  %132 = vmatpush.msra.mxu0 %v847_v6  ;;  %v862_v12 = vld [vmem:[#allocation3 + $0x8] sm:$0xff]  ;;  %v867_v14 = vld [vmem:[#allocation3] sm:$0xff] }
  0x17   :  { %101 = vst.msk [vmem:[#allocation2 + $0x3] sm:$0xf] %vm100_vm2, %v99_v9  ;;  %154 = vmatpush.msra.mxu1 %v850_v7  ;;  %187 = vmatpush.msra.mxu2 %v845_v5  ;;  %v879_v22 = vld [vmem:[#allocation5 + $0x18] sm:$0xff]  ;;  %v882_v23 = vld [vmem:[#allocation5 + $0x10] sm:$0xff]  ;;  %v885_v24 = vld [vmem:[#allocation5 + $0x8] sm:$0xff] }
  0x18   :  { %133 = vmatpush.msra.mxu0 %v860_v11  ;;  %223 = vmatpush.msra.mxu3 %v879_v22  ;;  %v888_v25 = vld [vmem:[#allocation5] sm:$0xff]  ;;  %v655_v29 = vld [vmem:[%s963_s2] ss:$0 sm:$0xff]  ;;  %v296_v34 = vld [vmem:[#allocation7 + $0x58] sm:$0xff] }
  0x19   :  { %155 = vmatpush.msra.mxu1 %v862_v12  ;;  %188 = vmatpush.msra.mxu2 %v852_v8  ;;  %v244_v35 = vld [vmem:[#allocation7 + $0x38] sm:$0xff]  ;;  %v295_v37 = vld [vmem:[#allocation7 + $0x50] sm:$0xff]  ;;  %v294_v40 = vld [vmem:[#allocation7 + $0x48] sm:$0xff] }
  0x1a   :  { %134 = vmatpush.msra.mxu0 %v865_v13  ;;  %224 = vmatpush.msra.mxu3 %v882_v23  ;;  %v239_v36 = vld [vmem:[#allocation7 + $0x18] sm:$0xff]  ;;  %v243_v38 = vld [vmem:[#allocation7 + $0x30] sm:$0xff]  ;;  %v242_v41 = vld [vmem:[#allocation7 + $0x28] sm:$0xff] }
  0x1b   :  { %v103_v10 = vld [vmem:[#allocation2 + $0x8] sm:$0x3]  ;;  %156 = vmatpush.msra.mxu1 %v867_v14  ;;  %312 = vmatpush.msrb.mxu2 %v296_v34  ;;  %v238_v39 = vld [vmem:[#allocation7 + $0x10] sm:$0xff]  ;;  %v237_v42 = vld [vmem:[#allocation7 + $0x8] sm:$0xff] }
  0x1c   :  { %v105_v15 = vmax.f32 %v103_v10, 0.0  ;;  %225 = vmatpush.msra.mxu3 %v885_v24  ;;  %261 = vmatpush.msrb.mxu0 %v244_v35  ;;  %v293_v43 = vld [vmem:[#allocation7 + $0x40] sm:$0xff]  ;;  %v656_v46 = vld [vmem:[%s965_s4] ss:$0 sm:$0xff]  ;;  %v330_v56 = vld [vmem:[#allocation8 + $0x18] sm:$0xff] }
  0x1d   :  { %284 = vmatpush.msrb.mxu1 %v239_v36  ;;  %313 = vmatpush.msrb.mxu2 %v295_v37  ;;  %v241_v44 = vld [vmem:[#allocation7 + $0x20] sm:$0xff]  ;;  %v329_v57 = vld [vmem:[#allocation8 + $0x10] sm:$0xff]  ;;  %v328_v58 = vld [vmem:[#allocation8 + $0x8] sm:$0xff] }
  0x1e   :  { %v102_v16 = vld [vmem:[#allocation2] sm:$0xff]  ;;  %v169_v18 = vrot.slane %v105_v15, 6  ;;  %226 = vmatpush.msra.mxu3 %v888_v25  ;;  %262 = vmatpush.msrb.mxu0 %v243_v38  ;;  %v236_v45 = vld [vmem:[#allocation7] sm:$0xff] }
  0x1f   :  { %v104_v17 = vmax.f32 %v102_v16, 0.0  ;;  %285 = vmatpush.msrb.mxu1 %v238_v39  ;;  %314 = vmatpush.msrb.mxu2 %v294_v40  ;;  %v231_v48 = vld [vmem:[#allocation2 + $0x3] sm:$0xf]  ;;  %v327_v59 = vld [vmem:[#allocation8] sm:$0xff]  ;;  %v657_v63 = vld [vmem:[%s967_s6] ss:$0 sm:$0xff] }
  0x20   :  { %263 = vmatpush.msrb.mxu0 %v242_v41  ;;  %350 = vmatpush.msrb.mxu3 %v330_v56  ;;  %v638_v9 = vld [vmem:[%s961_s0 + $0x4] sm:$0xf] }
  0x21   :  { %v168_v19 = vrot.slane %v104_v17, 6  ;;  %v116_v20 = vrot.slane %v104_v17, 3  ;;  %631 = vmatmul.msk.f32.vlgmr.msra.gmra.mxu1 %vm95_vm0, %v104_v17  ;;  %315 = vmatpush.msrb.mxu2 %v293_v43 }
  0x22   :  { %286 = vmatpush.msrb.mxu1 %v237_v42  ;;  %264 = vmatpush.msrb.mxu0 %v241_v44 }
  0x23   :  { %v170_v21 = vsel %vm167_vm3, %v168_v19, %v169_v18  ;;  %630 = vmatmul.msk.f32.vlgmr.msra.gmra.mxu0 %vm95_vm0, %v116_v20  ;;  %351 = vmatpush.msrb.mxu3 %v329_v57 }
  0x24   :  { %632 = vmatmul.msk.f32.vlgmr.msra.gmra.mxu2 %vm95_vm0, %v170_v21  ;;  %287 = vmatpush.msrb.mxu1 %v236_v45 }
  0x25   :  { %446 = vmatpush.msra.mxu2 %v835_v1  ;;  %394 = vmatpush.msra.mxu0 %v839_v3 }
  0x26   :  { %416 = vmatpush.msra.mxu1 %v843_v4  ;;  %352 = vmatpush.msrb.mxu3 %v328_v58  ;;  %v658_v4 = vld [vmem:[%s969_s8] ss:$0 sm:$0xff] }
  0x27   :  { %447 = vmatpush.msra.mxu2 %v837_v2  ;;  %395 = vmatpush.msra.mxu0 %v847_v6 }
  0x28   :  { %417 = vmatpush.msra.mxu1 %v850_v7  ;;  %353 = vmatpush.msrb.mxu3 %v327_v59 }
  0x29   :  { %448 = vmatpush.msra.mxu2 %v845_v5  ;;  %396 = vmatpush.msra.mxu0 %v860_v11  ;;  %v367_v11 = vld [vmem:[#allocation2 + $0x8] sm:$0x3] }
  0x2a   :  { %418 = vmatpush.msra.mxu1 %v862_v12  ;;  %v369_v12 = vmax.f32 %v367_v11, 0.0 }
  0x2b   :  { %449 = vmatpush.msra.mxu2 %v852_v8  ;;  %397 = vmatpush.msra.mxu0 %v865_v13 }
  0x2c   :  { %419 = vmatpush.msra.mxu1 %v867_v14  ;;  %v430_v15 = vrot.slane %v369_v12, 6 }
  0x9e   :  { %v158_v27 = vpop.f32.mrf.mxu1 }
  0xa0   :  { %v136_v26 = vpop.f32.mrf.mxu0 }
  0xa1   :  { %v159_v28 = vadd.f32 %v158_v27, %v136_v26  ;;  %v660_v27 = vld [vmem:[%s965_s4] ss:$0 sm:$0xff] }
  0xa7   :  { %v190_v30 = vpop.f32.mrf.mxu2 }
  0xa8   :  { %v193_v31 = vadd.f32 %v190_v30, %v159_v28 }
  0xaa   :  { %v198_v32 = vadd.f32 %v655_v29, %v193_v31 }
  0xac   :  { %v199_v33 = vmax.f32 %v198_v32, 0.0 }
  0xae   :  { %633 = vmatmul.msk.f32.vlgmr.msra.gmra.mxu3 %vm95_vm0, %v199_v33 }
  0xaf   :  { %484 = vmatpush.msra.mxu3 %v879_v22  ;;  %v659_v22 = vld [vmem:[%s963_s2] ss:$0 sm:$0xff] }
  0xb1   :  { %485 = vmatpush.msra.mxu3 %v882_v23 }
  0xb3   :  { %486 = vmatpush.msra.mxu3 %v885_v24 }
  0xb5   :  { %487 = vmatpush.msra.mxu3 %v888_v25 }
 0x131   :  { %v228_v47 = vpop.f32.mrf.mxu3 }
 0x132   :  { %v229_v49 = vadd.f32 %v656_v46, %v228_v47 }
 0x134   :  { %v232_v50 = vadd.f32 %v231_v48, %v229_v49 }
 0x136   :  { %233 = vst.msk [vmem:[#allocation2 + $0x3] sm:$0xf] %vm100_vm2, %v232_v50 }
 0x13d   :  { %v234_v51 = vld [vmem:[#allocation2] sm:$0xff] }
 0x13e   :  { %v235_v52 = vmax.f32 %v234_v51, 0.0  ;;  %v358_v7 = vld [vmem:[#allocation2 + $0x3] sm:$0xf] }
 0x140   :  { %v246_v53 = vrot.slane %v235_v52, 3  ;;  %v269_v54 = vrot.slane %v235_v52, 2  ;;  %v297_v55 = vrot.slane %v235_v52, 4 }
 0x142   :  { %634 = vmatmul.msk.f32.vlgmr.msrb.gmra.mxu0 %vm95_vm0, %v246_v53  ;;  %635 = vmatmul.msk.f32.vlgmr.msrb.gmra.mxu1 %vm95_vm0, %v269_v54 }
 0x143   :  { %636 = vmatmul.msk.f32.vlgmr.msrb.gmra.mxu2 %vm95_vm0, %v297_v55  ;;  %521 = vmatpush.msrb.mxu0 %v244_v35 }
 0x144   :  { %571 = vmatpush.msrb.mxu2 %v296_v34  ;;  %544 = vmatpush.msrb.mxu1 %v239_v36 }
 0x145   :  { %522 = vmatpush.msrb.mxu0 %v243_v38 }
 0x146   :  { %572 = vmatpush.msrb.mxu2 %v295_v37  ;;  %545 = vmatpush.msrb.mxu1 %v238_v39 }
 0x147   :  { %523 = vmatpush.msrb.mxu0 %v242_v41 }
 0x148   :  { %573 = vmatpush.msrb.mxu2 %v294_v40  ;;  %546 = vmatpush.msrb.mxu1 %v237_v42  ;;  %v661_v40 = vld [vmem:[%s967_s6] ss:$0 sm:$0xff] }
 0x149   :  { %524 = vmatpush.msrb.mxu0 %v241_v44 }
 0x14a   :  { %574 = vmatpush.msrb.mxu2 %v293_v43  ;;  %547 = vmatpush.msrb.mxu1 %v236_v45  ;;  %v662_v45 = vld [vmem:[%s969_s8] ss:$0 sm:$0xff] }
 0x1bf   :  { %v266_v60 = vpop.f32.mrf.mxu0  ;;  %v289_v61 = vpop.f32.mrf.mxu1 }
 0x1c0   :  { %v290_v62 = vadd.f32 %v289_v61, %v266_v60 }
 0x1c6   :  { %v317_v0 = vpop.f32.mrf.mxu2 }
 0x1c7   :  { %v320_v1 = vadd.f32 %v317_v0, %v290_v62 }
 0x1c9   :  { %v325_v2 = vadd.f32 %v657_v63, %v320_v1 }
 0x1cb   :  { %v326_v3 = vmax.f32 %v325_v2, 0.0 }
 0x1cd   :  { %637 = vmatmul.msk.f32.vlgmr.msrb.gmra.mxu3 %vm95_vm0, %v326_v3 }
 0x1ce   :  { %609 = vmatpush.msrb.mxu3 %v330_v56 }
 0x1d0   :  { %610 = vmatpush.msrb.mxu3 %v329_v57 }
 0x1d2   :  { %611 = vmatpush.msrb.mxu3 %v328_v58 }
 0x1d4   :  { %612 = vmatpush.msrb.mxu3 %v327_v59 }
 0x250   :  { %v355_v5 = vpop.f32.mrf.mxu3 }
 0x251   :  { %v356_v6 = vadd.f32 %v658_v4, %v355_v5 }
 0x253   :  { %v359_v8 = vadd.f32 %v358_v7, %v356_v6 }
 0x255   :  { %360 = vst.msk [vmem:[#allocation2 + $0x3] sm:$0xf] %vm100_vm2, %v359_v8 }
 0x25c   :  { %v361_v10 = vld [vmem:[#allocation2 + $0x3] sm:$0xf] }
 0x25d   :  { %362 = vst.msk [vmem:[%s970_s9] sm:$0xf] %vm100_vm2, %v361_v10 }
 0x25e   :  { %365 = vst.msk [vmem:[#allocation2 + $0x3] sm:$0xf] %vm100_vm2, %v638_v9 }
 0x265   :  { %v366_v13 = vld [vmem:[#allocation2] sm:$0xff] }
 0x266   :  { %v368_v14 = vmax.f32 %v366_v13, 0.0  ;;  %v492_v29 = vld [vmem:[#allocation2 + $0x3] sm:$0xf] }
 0x268   :  { %v429_v16 = vrot.slane %v368_v14, 6  ;;  %v379_v17 = vrot.slane %v368_v14, 3  ;;  %640 = vmatmul.msk.f32.vlgmr.msra.gmra.mxu1 %vm95_vm0, %v368_v14 }
 0x26a   :  { %v431_v18 = vsel %vm167_vm3, %v429_v16, %v430_v15  ;;  %639 = vmatmul.msk.f32.vlgmr.msra.gmra.mxu0 %vm95_vm0, %v379_v17 }
 0x26b   :  { %641 = vmatmul.msk.f32.vlgmr.msra.gmra.mxu2 %vm95_vm0, %v431_v18 }
 0x2e5   :  { %v421_v20 = vpop.f32.mrf.mxu1 }
 0x2e7   :  { %v399_v19 = vpop.f32.mrf.mxu0 }
 0x2e8   :  { %v422_v21 = vadd.f32 %v421_v20, %v399_v19 }
 0x2ee   :  { %v451_v23 = vpop.f32.mrf.mxu2 }
 0x2ef   :  { %v454_v24 = vadd.f32 %v451_v23, %v422_v21 }
 0x2f1   :  { %v459_v25 = vadd.f32 %v659_v22, %v454_v24 }
 0x2f3   :  { %v460_v26 = vmax.f32 %v459_v25, 0.0 }
 0x2f5   :  { %642 = vmatmul.msk.f32.vlgmr.msra.gmra.mxu3 %vm95_vm0, %v460_v26 }
 0x378   :  { %v489_v28 = vpop.f32.mrf.mxu3 }
 0x379   :  { %v490_v30 = vadd.f32 %v660_v27, %v489_v28 }
 0x37b   :  { %v493_v31 = vadd.f32 %v492_v29, %v490_v30 }
 0x37d   :  { %494 = vst.msk [vmem:[#allocation2 + $0x3] sm:$0xf] %vm100_vm2, %v493_v31 }
 0x384   :  { %v495_v32 = vld [vmem:[#allocation2] sm:$0xff] }
 0x385   :  { %v496_v33 = vmax.f32 %v495_v32, 0.0  ;;  %v617_v48 = vld [vmem:[#allocation2 + $0x3] sm:$0xf] }
 0x387   :  { %v506_v34 = vrot.slane %v496_v33, 3  ;;  %v529_v35 = vrot.slane %v496_v33, 2  ;;  %v556_v36 = vrot.slane %v496_v33, 4 }
 0x389   :  { %643 = vmatmul.msk.f32.vlgmr.msrb.gmra.mxu0 %vm95_vm0, %v506_v34  ;;  %644 = vmatmul.msk.f32.vlgmr.msrb.gmra.mxu1 %vm95_vm0, %v529_v35 }
 0x38a   :  { %645 = vmatmul.msk.f32.vlgmr.msrb.gmra.mxu2 %vm95_vm0, %v556_v36 }
 0x406   :  { %v526_v37 = vpop.f32.mrf.mxu0  ;;  %v549_v38 = vpop.f32.mrf.mxu1 }
 0x407   :  { %v550_v39 = vadd.f32 %v549_v38, %v526_v37 }
 0x40d   :  { %v576_v41 = vpop.f32.mrf.mxu2 }
 0x40e   :  { %v579_v42 = vadd.f32 %v576_v41, %v550_v39 }
 0x410   :  { %v584_v43 = vadd.f32 %v661_v40, %v579_v42 }
 0x412   :  { %v585_v44 = vmax.f32 %v584_v43, 0.0 }
 0x414   :  { %646 = vmatmul.msk.f32.vlgmr.msrb.gmra.mxu3 %vm95_vm0, %v585_v44 }
 0x497   :  { %v614_v46 = vpop.f32.mrf.mxu3 }
 0x498   :  { %v615_v47 = vadd.f32 %v662_v45, %v614_v46 }
 0x49a   :  { %v618_v49 = vadd.f32 %v617_v48, %v615_v47 }
 0x49c   :  { %619 = vst.msk [vmem:[#allocation2 + $0x3] sm:$0xf] %vm100_vm2, %v618_v49 }
 0x4a3   :  { %v620_v50 = vld [vmem:[#allocation2 + $0x3] sm:$0xf] }
 0x4a4   :  { %647 = vst.msk [vmem:[%s970_s9 + $0x4] sm:$0xf] %vm100_vm2, %v620_v50 }
 0x4a5   :  { %627 = vsyncpa [#allocation4], 1 }
 0x4a6   :  { %628 = vsyncpa [#allocation6], 1 }
 0x4a7   :  { %629 = vsyncpa [#allocation9], 1 }

// kernel: squeeze.1
= control target key start
LH: loop header
LB: loop body
LE: loop exit
PB: predicated region body
PF: predicated region fallthrough
CT: control target
= control target key end

     0   :  { %s80_s0 = inlined_call_operand.vmem [shape: s32[8], index: 0, kind: input, shape index: {}]   ;;  %s81_s1 = inlined_call_operand.hbm [shape: s32[2,4], index: 1, kind: output, shape index: {}]  }
   0x1   :  { %v5_v0 = vld [vmem:[%s80_s0] sm:$0x1] }
   0x2   :  { %2 = vsyncpa [#allocation1], 0  ;;  %6 = vst [vmem:[#allocation3] sm:$0x1] %v5_v0  ;;  %vm8_vm0 = vcmask 31744   ;;  %s62_s0 = smov 124  }
   0x3   :  { %s63_s8 = smov [#allocation0]   ;;  %s27_s1 = sshll.u32 %s81_s1, 4  ;;  %s28_s1 = int_to_ptr.hbm [resolvable:$true] %s27_s1 }
   0x4   :  { %s25_s9 = sshll.u32 %s63_s8, 4  ;;  %s26_s9 = int_to_ptr.vmem [resolvable:$true] %s25_s9 }
   0x9   :  { %v10_v1 = vld [vmem:[#allocation3] sm:$0x1]  }
   0xa   :  { %v7_v2 = vld [vmem:[#allocation3] sm:$0x1]   ;;  %11 = vrot.lane.b32.xlu0 %v10_v1, %s62_s0 }
   0xb   :  { %9 = vst.msk [vmem:[#allocation2] sm:$0x1] %vm8_vm0, %v7_v2  }
  0x7c   :  { %v12_v3 = vpop.permute.xlu0 %11  }
  0x7d   :  { %15 = vst.msk [vmem:[#allocation2 + $0x1] sm:$0x1] %vm8_vm0, %v12_v3  }
  0x84   :  { %v18_v4 = vld [vmem:[#allocation2] sm:$0x3] }
  0x85   :  { %21 = vst [vmem:[#allocation0] sm:$0x3] %v18_v4 }
  0x86   :  { %30 = dma.vmem_to_hbm [thread:$0]  %s26_s9, 32, %s28_s1, [#allocation1]  }
  0x87   :  { %60 = dma.done.wait [#allocation1], 32  }
  0x88   :  { %61 = vsyncadd [#allocation1], 4294967264 }
  0x89   :  { %33 = vsyncpa [#allocation1], 1 }

// kernel: vqvae2_forward.19
= control target key start
LH: loop header
LB: loop body
LE: loop exit
PB: predicated region body
PF: predicated region fallthrough
CT: control target
= control target key end

     0   :  { %8 = vsyncpa [#allocation3], 0  ;;  %s258_s15 = smov [#allocation2]   ;;  %s259_s17 = smov 128   ;;  %s308_s0 = inlined_call_operand.vmem [shape: f32[2,6,32], index: 0, kind: input, shape index: {}]   ;;  %s309_s1 = inlined_call_operand.hbm [shape: f32[3,32,32], index: 1, kind: input, shape index: {}]   ;;  %s310_s2 = inlined_call_operand.vmem [shape: f32[1,32], index: 2, kind: input, shape index: {}]   ;;  %s311_s3 = inlined_call_operand.vmem [shape: f32[2,4,32], index: 3, kind: output, shape index: {}]  }
   0x1   :  { %s15_s14 = sshll.u32 %s309_s1, 4  ;;  %s17_s16 = sshll.u32 %s258_s15, 4  ;;  %s16_s14 = int_to_ptr.hbm [resolvable:$true] %s15_s14  ;;  %s18_s16 = int_to_ptr.vmem [resolvable:$true] %s17_s16 }
   0x2   :  { %s260_s18 = smov 8  }
   0x3   :  { %23 = dma.hbm_to_vmem [thread:$0]  %s16_s14, 1536, %s18_s16, [#allocation3], %s259_s17, %s259_s17, %s260_s18  }
   0x4   :  { %256 = dma.done.wait [#allocation3], 1536  }
   0x5   :  { %257 = vsyncadd [#allocation3], 4294965760  ;;  %v39_v0 = vld [vmem:[#allocation2 + $0x38] sm:$0xff]  ;;  %v38_v3 = vld [vmem:[#allocation2 + $0x30] sm:$0xff]  ;;  %vm42_vm0 = vcmask 261120   ;;  %vm121_vm1 = vcmask 257024  }
   0x6   :  { %v34_v1 = vld [vmem:[#allocation2 + $0x18] sm:$0xff]  ;;  %57 = vmatpush.msra.mxu0 %v39_v0  ;;  %v33_v4 = vld [vmem:[#allocation2 + $0x10] sm:$0xff]  ;;  %149 = vmatpush.msra.mxu3 %v39_v0  ;;  %v37_v6 = vld [vmem:[#allocation2 + $0x28] sm:$0xff] }
   0x7   :  { %v91_v2 = vld [vmem:[#allocation2 + $0x58] sm:$0xff]  ;;  %79 = vmatpush.msra.mxu1 %v34_v1  ;;  %v90_v5 = vld [vmem:[#allocation2 + $0x50] sm:$0xff]  ;;  %v32_v7 = vld [vmem:[#allocation2 + $0x8] sm:$0xff] }
   0x8   :  { %107 = vmatpush.msra.mxu2 %v91_v2  ;;  %58 = vmatpush.msra.mxu0 %v38_v3  ;;  %v89_v8 = vld [vmem:[#allocation2 + $0x48] sm:$0xff]  ;;  %v36_v9 = vld [vmem:[#allocation2 + $0x20] sm:$0xff] }
   0x9   :  { %80 = vmatpush.msra.mxu1 %v33_v4  ;;  %v31_v10 = vld [vmem:[#allocation2] sm:$0xff]  ;;  %150 = vmatpush.msra.mxu3 %v38_v3  ;;  %v222_v12 = vld [vmem:[%s308_s0 + $0x8] sm:$0x3f] }
   0xa   :  { %108 = vmatpush.msra.mxu2 %v90_v5  ;;  %v30_v11 = vld [vmem:[%s308_s0] sm:$0x3f]  ;;  %59 = vmatpush.msra.mxu0 %v37_v6  ;;  %v134_v16 = vrot.slane %v222_v12, 1  ;;  %v183_v17 = vrot.slane %v222_v12, 2 }
   0xb   :  { %81 = vmatpush.msra.mxu1 %v32_v7  ;;  %v88_v13 = vld [vmem:[#allocation2 + $0x40] sm:$0xff]  ;;  %v41_v14 = vrot.slane %v30_v11, 1  ;;  %v92_v15 = vrot.slane %v30_v11, 2  ;;  %151 = vmatpush.msra.mxu3 %v37_v6 }
   0xc   :  { %109 = vmatpush.msra.mxu2 %v89_v8  ;;  %60 = vmatpush.msra.mxu0 %v36_v9  ;;  %v230_v21 = vld [vmem:[%s310_s2] ss:$0 sm:$0xff] }
   0xd   :  { %82 = vmatpush.msra.mxu1 %v31_v10  ;;  %219 = vmatmul.msk.f32.vlgmr.msra.gmra.mxu0 %vm42_vm0, %v41_v14  ;;  %v231_v29 = vld [vmem:[%s310_s2] ss:$0 sm:$0xff] }
   0xe   :  { %110 = vmatpush.msra.mxu2 %v88_v13  ;;  %220 = vmatmul.msk.f32.vlgmr.msra.gmra.mxu1 %vm42_vm0, %v30_v11 }
   0xf   :  { %221 = vmatmul.msk.f32.vlgmr.msra.gmra.mxu2 %vm42_vm0, %v92_v15  ;;  %171 = vmatpush.msrb.mxu0 %v34_v1 }
  0x10   :  { %152 = vmatpush.msra.mxu3 %v36_v9  ;;  %198 = vmatpush.msrb.mxu1 %v91_v2 }
  0x11   :  { %223 = vmatmul.msk.f32.vlgmr.msra.gmra.mxu3 %vm42_vm0, %v134_v16  ;;  %172 = vmatpush.msrb.mxu0 %v33_v4 }
  0x12   :  { %199 = vmatpush.msrb.mxu1 %v90_v5 }
  0x13   :  { %173 = vmatpush.msrb.mxu0 %v32_v7 }
  0x14   :  { %200 = vmatpush.msrb.mxu1 %v89_v8 }
  0x15   :  { %174 = vmatpush.msrb.mxu0 %v31_v10 }
  0x16   :  { %224 = vmatmul.msk.f32.vlgmr.msrb.gmra.mxu0 %vm42_vm0, %v222_v12  ;;  %201 = vmatpush.msrb.mxu1 %v88_v13 }
  0x17   :  { %225 = vmatmul.msk.f32.vlgmr.msrb.gmra.mxu1 %vm42_vm0, %v183_v17 }
  0x8a   :  { %v62_v18 = vpop.f32.mrf.mxu0 }
  0x8b   :  { %v84_v19 = vpop.f32.mrf.mxu1 }
  0x8c   :  { %v85_v20 = vadd.f32 %v84_v19, %v62_v18 }
  0x92   :  { %v112_v22 = vpop.f32.mrf.mxu2 }
  0x93   :  { %v115_v23 = vadd.f32 %v112_v22, %v85_v20  ;;  %v176_v25 = vpop.f32.mrf.mxu0 }
  0x94   :  { %v154_v24 = vpop.f32.mrf.mxu3  ;;  %v203_v28 = vpop.f32.mrf.mxu1 }
  0x95   :  { %v120_v26 = vadd.f32 %v230_v21, %v115_v23  ;;  %v177_v27 = vadd.f32 %v176_v25, %v154_v24 }
  0x97   :  { %122 = vst.msk [vmem:[%s311_s3] sm:$0xf] %vm121_vm1, %v120_v26  ;;  %v206_v30 = vadd.f32 %v203_v28, %v177_v27 }
  0x99   :  { %v211_v31 = vadd.f32 %v231_v29, %v206_v30 }
  0x9b   :  { %226 = vst.msk [vmem:[%s311_s3 + $0x4] sm:$0xf] %vm121_vm1, %v211_v31 }
  0x9c   :  { %218 = vsyncpa [#allocation3], 1 }

// kernel: vqvae2_forward.21
= control target key start
LH: loop header
LB: loop body
LE: loop exit
PB: predicated region body
PF: predicated region fallthrough
CT: control target
= control target key end

     0   :  { %vm26_vm0 = vcmask 261120   ;;  %vm106_vm1 = vcmask 257024   ;;  %s310_s1 = inlined_call_operand.vmem [shape: f32[3,32,32], index: 1, kind: input, shape index: {}]   ;;  %s311_s0 = inlined_call_operand.vmem [shape: f32[2,6,32], index: 0, kind: input, shape index: {}]   ;;  %s312_s2 = inlined_call_operand.vmem [shape: f32[1,32], index: 2, kind: input, shape index: {}]   ;;  %s313_s3 = inlined_call_operand.vmem [shape: f32[2,4,32], index: 3, kind: output, shape index: {}]  }
   0x1   :  { %v207_v0 = vld [vmem:[%s310_s1 + $0x38] sm:$0xff]  ;;  %v206_v3 = vld [vmem:[%s310_s1 + $0x30] sm:$0xff]  ;;  %v205_v6 = vld [vmem:[%s310_s1 + $0x28] sm:$0xff] }
   0x2   :  { %v18_v1 = vld [vmem:[%s310_s1 + $0x18] sm:$0xff]  ;;  %41 = vmatpush.msra.mxu0 %v207_v0  ;;  %v17_v4 = vld [vmem:[%s310_s1 + $0x10] sm:$0xff]  ;;  %134 = vmatpush.msra.mxu3 %v207_v0  ;;  %v16_v7 = vld [vmem:[%s310_s1 + $0x8] sm:$0xff] }
   0x3   :  { %v213_v2 = vld [vmem:[%s310_s1 + $0x58] sm:$0xff]  ;;  %63 = vmatpush.msra.mxu1 %v18_v1  ;;  %v212_v5 = vld [vmem:[%s310_s1 + $0x50] sm:$0xff]  ;;  %v211_v8 = vld [vmem:[%s310_s1 + $0x48] sm:$0xff] }
   0x4   :  { %91 = vmatpush.msra.mxu2 %v213_v2  ;;  %42 = vmatpush.msra.mxu0 %v206_v3  ;;  %v204_v9 = vld [vmem:[%s310_s1 + $0x20] sm:$0xff]  ;;  %v215_v12 = vld [vmem:[%s311_s0 + $0x8] sm:$0x3f] }
   0x5   :  { %64 = vmatpush.msra.mxu1 %v17_v4  ;;  %135 = vmatpush.msra.mxu3 %v206_v3  ;;  %v15_v10 = vld [vmem:[%s310_s1] sm:$0xff]  ;;  %v119_v16 = vrot.slane %v215_v12, 1  ;;  %v168_v17 = vrot.slane %v215_v12, 2 }
   0x6   :  { %92 = vmatpush.msra.mxu2 %v212_v5  ;;  %v14_v11 = vld [vmem:[%s311_s0] sm:$0x3f]  ;;  %43 = vmatpush.msra.mxu0 %v205_v6 }
   0x7   :  { %65 = vmatpush.msra.mxu1 %v16_v7  ;;  %v210_v13 = vld [vmem:[%s310_s1 + $0x40] sm:$0xff]  ;;  %v25_v14 = vrot.slane %v14_v11, 1  ;;  %v76_v15 = vrot.slane %v14_v11, 2  ;;  %136 = vmatpush.msra.mxu3 %v205_v6 }
   0x8   :  { %93 = vmatpush.msra.mxu2 %v211_v8  ;;  %44 = vmatpush.msra.mxu0 %v204_v9  ;;  %v228_v21 = vld [vmem:[%s312_s2] ss:$0 sm:$0xff] }
   0x9   :  { %66 = vmatpush.msra.mxu1 %v15_v10  ;;  %208 = vmatmul.msk.f32.vlgmr.msra.gmra.mxu0 %vm26_vm0, %v25_v14  ;;  %v229_v29 = vld [vmem:[%s312_s2] ss:$0 sm:$0xff] }
   0xa   :  { %94 = vmatpush.msra.mxu2 %v210_v13  ;;  %209 = vmatmul.msk.f32.vlgmr.msra.gmra.mxu1 %vm26_vm0, %v14_v11 }
   0xb   :  { %214 = vmatmul.msk.f32.vlgmr.msra.gmra.mxu2 %vm26_vm0, %v76_v15  ;;  %156 = vmatpush.msrb.mxu0 %v18_v1 }
   0xc   :  { %137 = vmatpush.msra.mxu3 %v204_v9  ;;  %183 = vmatpush.msrb.mxu1 %v213_v2 }
   0xd   :  { %220 = vmatmul.msk.f32.vlgmr.msra.gmra.mxu3 %vm26_vm0, %v119_v16  ;;  %157 = vmatpush.msrb.mxu0 %v17_v4 }
   0xe   :  { %184 = vmatpush.msrb.mxu1 %v212_v5 }
   0xf   :  { %158 = vmatpush.msrb.mxu0 %v16_v7 }
  0x10   :  { %185 = vmatpush.msrb.mxu1 %v211_v8 }
  0x11   :  { %159 = vmatpush.msrb.mxu0 %v15_v10 }
  0x12   :  { %221 = vmatmul.msk.f32.vlgmr.msrb.gmra.mxu0 %vm26_vm0, %v215_v12  ;;  %186 = vmatpush.msrb.mxu1 %v210_v13 }
  0x13   :  { %226 = vmatmul.msk.f32.vlgmr.msrb.gmra.mxu1 %vm26_vm0, %v168_v17 }
  0x86   :  { %v46_v18 = vpop.f32.mrf.mxu0 }
  0x87   :  { %v68_v19 = vpop.f32.mrf.mxu1 }
  0x88   :  { %v69_v20 = vadd.f32 %v68_v19, %v46_v18 }
  0x8e   :  { %v96_v22 = vpop.f32.mrf.mxu2 }
  0x8f   :  { %v99_v23 = vadd.f32 %v96_v22, %v69_v20  ;;  %v161_v25 = vpop.f32.mrf.mxu0 }
  0x90   :  { %v139_v24 = vpop.f32.mrf.mxu3  ;;  %v188_v28 = vpop.f32.mrf.mxu1 }
  0x91   :  { %v104_v26 = vadd.f32 %v228_v21, %v99_v23  ;;  %v162_v27 = vadd.f32 %v161_v25, %v139_v24 }
  0x93   :  { %v105_v30 = vmax.f32 %v104_v26, 0.0  ;;  %v191_v31 = vadd.f32 %v188_v28, %v162_v27 }
  0x95   :  { %107 = vst.msk [vmem:[%s313_s3] sm:$0xf] %vm106_vm1, %v105_v30  ;;  %v196_v32 = vadd.f32 %v229_v29, %v191_v31 }
  0x97   :  { %v197_v33 = vmax.f32 %v196_v32, 0.0 }
  0x99   :  { %227 = vst.msk [vmem:[%s313_s3 + $0x4] sm:$0xf] %vm106_vm1, %v197_v33 }

// kernel: vqvae2_forward.23
= control target key start
LH: loop header
LB: loop body
LE: loop exit
PB: predicated region body
PF: predicated region fallthrough
CT: control target
= control target key end

     0   :  { %8 = vsyncpa [#allocation3], 0  ;;  %s340_s15 = smov [#allocation2]   ;;  %s341_s17 = smov 128   ;;  %s447_s0 = inlined_call_operand.vmem [shape: f32[2,6,32], index: 0, kind: input, shape index: {}]   ;;  %s448_s1 = inlined_call_operand.hbm [shape: f32[3,32,32], index: 1, kind: input, shape index: {}]   ;;  %s449_s2 = inlined_call_operand.vmem [shape: f32[1,32], index: 2, kind: input, shape index: {}]   ;;  %s450_s3 = inlined_call_operand.vmem [shape: f32[2,4,2,32], index: 3, kind: output, shape index: {}]  }
   0x1   :  { %s15_s14 = sshll.u32 %s448_s1, 4  ;;  %s17_s16 = sshll.u32 %s340_s15, 4  ;;  %s16_s14 = int_to_ptr.hbm [resolvable:$true] %s15_s14  ;;  %s18_s16 = int_to_ptr.vmem [resolvable:$true] %s17_s16 }
   0x2   :  { %s342_s18 = smov 8  }
   0x3   :  { %23 = dma.hbm_to_vmem [thread:$0]  %s16_s14, 1536, %s18_s16, [#allocation3], %s341_s17, %s341_s17, %s342_s18  }
   0x4   :  { %338 = dma.done.wait [#allocation3], 1536  }
   0x5   :  { %339 = vsyncadd [#allocation3], 4294965760  ;;  %v43_v0 = vld [vmem:[#allocation2 + $0x58] sm:$0xff]  ;;  %v42_v4 = vld [vmem:[#allocation2 + $0x50] sm:$0xff]  ;;  %vm56_vm0 = vcmask 261120   ;;  %vm156_vm1 = vcmask 253952  }
   0x6   :  { %v33_v1 = vld [vmem:[#allocation2 + $0x18] sm:$0xff]  ;;  %120 = vmatpush.msra.mxu2 %v43_v0  ;;  %v32_v5 = vld [vmem:[#allocation2 + $0x10] sm:$0xff]  ;;  %v41_v9 = vld [vmem:[#allocation2 + $0x48] sm:$0xff] }
   0x7   :  { %v38_v2 = vld [vmem:[#allocation2 + $0x38] sm:$0xff]  ;;  %v37_v6 = vld [vmem:[#allocation2 + $0x30] sm:$0xff]  ;;  %93 = vmatpush.msra.mxu1 %v33_v1  ;;  %v31_v10 = vld [vmem:[#allocation2 + $0x8] sm:$0xff] }
   0x8   :  { %v51_v3 = vadd.f32 %v38_v2, %v33_v1  ;;  %v47_v7 = vadd.f32 %v43_v0, %v38_v2  ;;  %v50_v8 = vadd.f32 %v37_v6, %v32_v5  ;;  %v36_v11 = vld [vmem:[#allocation2 + $0x28] sm:$0xff]  ;;  %v46_v12 = vadd.f32 %v42_v4, %v37_v6  ;;  %121 = vmatpush.msra.mxu2 %v42_v4  ;;  %v30_v14 = vld [vmem:[#allocation2] sm:$0xff] }
   0x9   :  { %v49_v13 = vadd.f32 %v36_v11, %v31_v10  ;;  %v35_v15 = vld [vmem:[#allocation2 + $0x20] sm:$0xff]  ;;  %94 = vmatpush.msra.mxu1 %v32_v5  ;;  %v45_v18 = vadd.f32 %v41_v9, %v36_v11  ;;  %v297_v23 = vld [vmem:[%s447_s0 + $0x8] sm:$0x3f] }
   0xa   :  { %140 = vmatpush.msra.mxu3 %v51_v3  ;;  %71 = vmatpush.msra.mxu0 %v47_v7  ;;  %v40_v16 = vld [vmem:[#allocation2 + $0x40] sm:$0xff]  ;;  %v48_v19 = vadd.f32 %v35_v15, %v30_v14  ;;  %v221_v24 = vrot.slane %v297_v23, 2  ;;  %v175_v25 = vrot.slane %v297_v23, 1 }
   0xb   :  { %v53_v17 = vld [vmem:[%s447_s0] sm:$0x3f]  ;;  %122 = vmatpush.msra.mxu2 %v41_v9  ;;  %95 = vmatpush.msra.mxu1 %v31_v10  ;;  %v44_v22 = vadd.f32 %v40_v16, %v35_v15 }
   0xc   :  { %141 = vmatpush.msra.mxu3 %v50_v8  ;;  %v105_v20 = vrot.slane %v53_v17, 2  ;;  %v55_v21 = vrot.slane %v53_v17, 1  ;;  %72 = vmatpush.msra.mxu0 %v46_v12  ;;  %v313_v27 = vld [vmem:[%s449_s2] ss:$0 sm:$0xff] }
   0xd   :  { %123 = vmatpush.msra.mxu2 %v40_v16  ;;  %96 = vmatpush.msra.mxu1 %v30_v14 }
   0xe   :  { %142 = vmatpush.msra.mxu3 %v49_v13  ;;  %295 = vmatmul.msk.f32.vlgmr.msra.gmra.mxu2 %vm56_vm0, %v105_v20 }
   0xf   :  { %73 = vmatpush.msra.mxu0 %v45_v18  ;;  %236 = vmatpush.msrb.mxu2 %v43_v0 }
  0x10   :  { %143 = vmatpush.msra.mxu3 %v48_v19  ;;  %294 = vmatmul.msk.f32.vlgmr.msra.gmra.mxu1 %vm56_vm0, %v53_v17 }
  0x11   :  { %296 = vmatmul.msk.f32.vlgmr.msra.gmra.mxu3 %vm56_vm0, %v55_v21  ;;  %74 = vmatpush.msra.mxu0 %v44_v22 }
  0x12   :  { %256 = vmatpush.msrb.mxu3 %v51_v3  ;;  %237 = vmatpush.msrb.mxu2 %v42_v4 }
  0x13   :  { %293 = vmatmul.msk.f32.vlgmr.msra.gmra.mxu0 %vm56_vm0, %v55_v21  ;;  %212 = vmatpush.msrb.mxu1 %v33_v1 }
  0x14   :  { %257 = vmatpush.msrb.mxu3 %v50_v8  ;;  %238 = vmatpush.msrb.mxu2 %v41_v9 }
  0x15   :  { %190 = vmatpush.msrb.mxu0 %v47_v7  ;;  %213 = vmatpush.msrb.mxu1 %v32_v5 }
  0x16   :  { %258 = vmatpush.msrb.mxu3 %v49_v13  ;;  %239 = vmatpush.msrb.mxu2 %v40_v16 }
  0x17   :  { %191 = vmatpush.msrb.mxu0 %v46_v12  ;;  %300 = vmatmul.msk.f32.vlgmr.msrb.gmra.mxu2 %vm56_vm0, %v221_v24 }
  0x18   :  { %259 = vmatpush.msrb.mxu3 %v48_v19  ;;  %214 = vmatpush.msrb.mxu1 %v31_v10 }
  0x19   :  { %301 = vmatmul.msk.f32.vlgmr.msrb.gmra.mxu3 %vm56_vm0, %v175_v25  ;;  %192 = vmatpush.msrb.mxu0 %v45_v18 }
  0x1a   :  { %215 = vmatpush.msrb.mxu1 %v30_v14 }
  0x1b   :  { %193 = vmatpush.msrb.mxu0 %v44_v22  ;;  %299 = vmatmul.msk.f32.vlgmr.msrb.gmra.mxu1 %vm56_vm0, %v297_v23 }
  0x1c   :  { %298 = vmatmul.msk.f32.vlgmr.msrb.gmra.mxu0 %vm56_vm0, %v175_v25 }
  0x8d   :  { %v98_v28 = vpop.f32.mrf.mxu1 }
  0x90   :  { %v76_v26 = vpop.f32.mrf.mxu0 }
  0x91   :  { %v125_v29 = vpop.f32.mrf.mxu2  ;;  %v99_v30 = vadd.f32 %v98_v28, %v76_v26 }
  0x93   :  { %v104_v32 = vadd.f32 %v313_v27, %v99_v30 }
  0x94   :  { %v145_v31 = vpop.f32.mrf.mxu3 }
  0x95   :  { %v146_v33 = vadd.f32 %v145_v31, %v125_v29  ;;  %v150_v34 = vrot.slane %v104_v32, 1  ;;  %v151_v35 = vrot.slane %v104_v32, 2  ;;  %v152_v36 = vrot.slane %v104_v32, 3  ;;  %157 = vst.msk [vmem:[%s450_s3] sm:$0x1] %vm156_vm1, %v104_v32 }
  0x97   :  { %v148_v37 = vadd.f32 %v313_v27, %v146_v33  ;;  %158 = vst.msk [vmem:[%s450_s3 + $0x2] sm:$0x1] %vm156_vm1, %v150_v34 }
  0x98   :  { %159 = vst.msk [vmem:[%s450_s3 + $0x4] sm:$0x1] %vm156_vm1, %v151_v35  ;;  %v217_v41 = vpop.f32.mrf.mxu1 }
  0x99   :  { %v162_v38 = vrot.slane %v148_v37, 1  ;;  %v163_v39 = vrot.slane %v148_v37, 2  ;;  %v195_v40 = vpop.f32.mrf.mxu0  ;;  %160 = vst.msk [vmem:[%s450_s3 + $0x6] sm:$0x1] %vm156_vm1, %v152_v36  ;;  %v164_v42 = vrot.slane %v148_v37, 3 }
  0x9a   :  { %v218_v43 = vadd.f32 %v217_v41, %v195_v40  ;;  %168 = vst.msk [vmem:[%s450_s3 + $0x1] sm:$0x1] %vm156_vm1, %v148_v37  ;;  %v241_v44 = vpop.f32.mrf.mxu2 }
  0x9b   :  { %169 = vst.msk [vmem:[%s450_s3 + $0x3] sm:$0x1] %vm156_vm1, %v162_v38 }
  0x9c   :  { %v261_v45 = vpop.f32.mrf.mxu3  ;;  %v220_v46 = vadd.f32 %v313_v27, %v218_v43  ;;  %170 = vst.msk [vmem:[%s450_s3 + $0x5] sm:$0x1] %vm156_vm1, %v163_v39 }
  0x9d   :  { %v262_v47 = vadd.f32 %v261_v45, %v241_v44  ;;  %171 = vst.msk [vmem:[%s450_s3 + $0x7] sm:$0x1] %vm156_vm1, %v164_v42 }
  0x9e   :  { %v266_v48 = vrot.slane %v220_v46, 1  ;;  %v267_v49 = vrot.slane %v220_v46, 2  ;;  %v268_v50 = vrot.slane %v220_v46, 3  ;;  %302 = vst.msk [vmem:[%s450_s3 + $0x8] sm:$0x1] %vm156_vm1, %v220_v46 }
  0x9f   :  { %v264_v51 = vadd.f32 %v313_v27, %v262_v47 }
  0xa0   :  { %303 = vst.msk [vmem:[%s450_s3 + $0xa] sm:$0x1] %vm156_vm1, %v266_v48 }
  0xa1   :  { %v278_v52 = vrot.slane %v264_v51, 1  ;;  %304 = vst.msk [vmem:[%s450_s3 + $0xc] sm:$0x1] %vm156_vm1, %v267_v49  ;;  %v279_v53 = vrot.slane %v264_v51, 2  ;;  %v280_v54 = vrot.slane %v264_v51, 3 }
  0xa2   :  { %305 = vst.msk [vmem:[%s450_s3 + $0xe] sm:$0x1] %vm156_vm1, %v268_v50 }
  0xa3   :  { %306 = vst.msk [vmem:[%s450_s3 + $0x9] sm:$0x1] %vm156_vm1, %v264_v51 }
  0xa4   :  { %307 = vst.msk [vmem:[%s450_s3 + $0xb] sm:$0x1] %vm156_vm1, %v278_v52 }
  0xa5   :  { %308 = vst.msk [vmem:[%s450_s3 + $0xd] sm:$0x1] %vm156_vm1, %v279_v53 }
  0xa6   :  { %309 = vst.msk [vmem:[%s450_s3 + $0xf] sm:$0x1] %vm156_vm1, %v280_v54 }
  0xa7   :  { %292 = vsyncpa [#allocation3], 1 }

// kernel: vqvae2_forward.22
= control target key start
LH: loop header
LB: loop body
LE: loop exit
PB: predicated region body
PF: predicated region fallthrough
CT: control target
= control target key end

     0   :  { %14 = vsyncpa [#allocation4], 0  ;;  %s1073_s0 = inlined_call_operand.vmem [shape: f32[2,4,32], index: 0, kind: input, shape index: {}]   ;;  %s1074_s1 = inlined_call_operand.hbm [shape: f32[3,32,32], index: 1, kind: input, shape index: {}]   ;;  %s1075_s2 = inlined_call_operand.hbm [shape: f32[1,32], index: 2, kind: input, shape index: {}]   ;;  %s1076_s3 = inlined_call_operand.hbm [shape: f32[1,32,32], index: 3, kind: input, shape index: {}]   ;;  %s1077_s4 = inlined_call_operand.hbm [shape: f32[1,32], index: 4, kind: input, shape index: {}]   ;;  %s1078_s5 = inlined_call_operand.hbm [shape: f32[3,32,32], index: 5, kind: input, shape index: {}]   ;;  %s1079_s6 = inlined_call_operand.hbm [shape: f32[1,32], index: 6, kind: input, shape index: {}]   ;;  %s1080_s7 = inlined_call_operand.hbm [shape: f32[1,32,32], index: 7, kind: input, shape index: {}]   ;;  %s1081_s8 = inlined_call_operand.vmem [shape: f32[1,32], index: 8, kind: input, shape index: {}]   ;;  %s1082_s9 = inlined_call_operand.vmem [shape: f32[2,4,32], index: 9, kind: output, shape index: {}]  }
   0x1   :  { %15 = vsyncpa [#allocation6], 0 }
   0x2   :  { %16 = vsyncpa [#allocation9], 0  ;;  %s38_s11 = sshll.u32 %s1075_s2, 4  ;;  %s39_s11 = int_to_ptr.hbm [resolvable:$true] %s38_s11 }
   0x3   :  { %17 = vsyncpa [#allocation12], 0  ;;  %s883_s12 = smov [#allocation5]   ;;  %s62_s16 = sshll.u32 %s1077_s4, 4  ;;  %s63_s16 = int_to_ptr.hbm [resolvable:$true] %s62_s16 }
   0x4   :  { %s40_s13 = sshll.u32 %s883_s12, 4  ;;  %s884_s17 = smov [#allocation8]   ;;  %s41_s13 = int_to_ptr.vmem [resolvable:$true] %s40_s13 }
   0x5   :  { %43 = dma.hbm_to_vmem [thread:$0]  %s39_s11, 16, %s41_s13, [#allocation6]  }
   0x6   :  { %s64_s18 = sshll.u32 %s884_s17, 4  ;;  %s86_s21 = sshll.u32 %s1079_s6, 4  ;;  %s65_s18 = int_to_ptr.vmem [resolvable:$true] %s64_s18  ;;  %s87_s21 = int_to_ptr.hbm [resolvable:$true] %s86_s21 }
   0x7   :  { %67 = dma.hbm_to_vmem [thread:$0]  %s63_s16, 16, %s65_s18, [#allocation9]  }
   0x8   :  { %s24_s23 = sshll.u32 %s1074_s1, 4  ;;  %s885_s24 = smov [#allocation11]   ;;  %s25_s23 = int_to_ptr.hbm [resolvable:$true] %s24_s23 }
   0x9   :  { %s88_s25 = sshll.u32 %s885_s24, 4  ;;  %s886_s4 = smov [#allocation3]   ;;  %s89_s25 = int_to_ptr.vmem [resolvable:$true] %s88_s25 }
   0xa   :  { %91 = dma.hbm_to_vmem [thread:$0]  %s87_s21, 16, %s89_s25, [#allocation12]  }
   0xb   :  { %s26_s26 = sshll.u32 %s886_s4, 4  ;;  %s887_s27 = smov 128   ;;  %s27_s26 = int_to_ptr.vmem [resolvable:$true] %s26_s26 }
   0xc   :  { %s888_s28 = smov 8   ;;  %s48_s30 = sshll.u32 %s1076_s3, 4  ;;  %s49_s30 = int_to_ptr.hbm [resolvable:$true] %s48_s30 }
   0xd   :  { %32 = dma.hbm_to_vmem [thread:$0]  %s25_s23, 1536, %s27_s26, [#allocation4], %s887_s27, %s887_s27, %s888_s28  }
   0xe   :  { %s889_s10 = smov [#allocation7]   ;;  %s72_s13 = sshll.u32 %s1078_s5, 4  ;;  %s73_s13 = int_to_ptr.hbm [resolvable:$true] %s72_s13 }
   0xf   :  { %s50_s11 = sshll.u32 %s889_s10, 4  ;;  %s890_s14 = smov [#allocation10]   ;;  %s51_s11 = int_to_ptr.vmem [resolvable:$true] %s50_s11 }
  0x10   :  { %56 = dma.hbm_to_vmem [thread:$0]  %s49_s30, 512, %s51_s11, [#allocation6], %s887_s27, %s887_s27, %s888_s28  }
  0x11   :  { %s74_s15 = sshll.u32 %s890_s14, 4  ;;  %s96_s18 = sshll.u32 %s1080_s7, 4  ;;  %s75_s15 = int_to_ptr.vmem [resolvable:$true] %s74_s15  ;;  %s97_s18 = int_to_ptr.hbm [resolvable:$true] %s96_s18 }
  0x12   :  { %80 = dma.hbm_to_vmem [thread:$0]  %s73_s13, 1536, %s75_s15, [#allocation9], %s887_s27, %s887_s27, %s888_s28  }
  0x13   :  { %s891_s3 = smov [#allocation13]  }
  0x14   :  { %s98_s19 = sshll.u32 %s891_s3, 4  ;;  %s99_s19 = int_to_ptr.vmem [resolvable:$true] %s98_s19 }
  0x15   :  { %104 = dma.hbm_to_vmem [thread:$0]  %s97_s18, 512, %s99_s19, [#allocation12], %s887_s27, %s887_s27, %s888_s28  }
  0x16   :  { %875 = dma.done.wait [#allocation4], 1536  }
  0x17   :  { %876 = vsyncadd [#allocation4], 4294965760 }
  0x18   :  { %877 = dma.done.wait [#allocation6], 528  }
  0x19   :  { %878 = vsyncadd [#allocation6], 4294966768 }
  0x1a   :  { %879 = dma.done.wait [#allocation9], 1552  }
  0x1b   :  { %880 = vsyncadd [#allocation9], 4294965744 }
  0x1c   :  { %881 = dma.done.wait [#allocation12], 528  }
  0x1d   :  { %882 = vsyncadd [#allocation12], 4294966768  ;;  %vm135_vm0 = vcmask 261120   ;;  %vm137_vm1 = vcmask 254976   ;;  %v892_v0 = vmov 0.0   ;;  %v965_v1 = vld [vmem:[#allocation3 + $0x58] sm:$0xff] }
  0x1e   :  { %136 = vst.msk [vmem:[#allocation2] sm:$0xff] %vm135_vm0, %v892_v0  ;;  %v967_v2 = vld [vmem:[#allocation3 + $0x50] sm:$0xff]  ;;  %v969_v3 = vld [vmem:[#allocation3 + $0x38] sm:$0xff]  ;;  %vm140_vm2 = vcmask 257024   ;;  %225 = vmatpush.msra.mxu2 %v965_v1  ;;  %v975_v5 = vld [vmem:[#allocation3 + $0x48] sm:$0xff]  ;;  %vm207_vm3 = vcmask 1041408  }
  0x1f   :  { %138 = vst.msk [vmem:[#allocation2 + $0x8] sm:$0x3] %vm137_vm1, %v892_v0  ;;  %171 = vmatpush.msra.mxu0 %v969_v3  ;;  %v973_v4 = vld [vmem:[#allocation3 + $0x18] sm:$0xff]  ;;  %v977_v6 = vld [vmem:[#allocation3 + $0x30] sm:$0xff]  ;;  %v982_v8 = vld [vmem:[#allocation3 + $0x40] sm:$0xff] }
  0x20   :  { %193 = vmatpush.msra.mxu1 %v973_v4  ;;  %v980_v7 = vld [vmem:[#allocation3 + $0x10] sm:$0xff]  ;;  %226 = vmatpush.msra.mxu2 %v967_v2  ;;  %v990_v11 = vld [vmem:[#allocation3 + $0x28] sm:$0xff]  ;;  %v995_v13 = vld [vmem:[#allocation3 + $0x20] sm:$0xff] }
  0x21   :  { %v139_v9 = vld [vmem:[%s1073_s0] sm:$0xf]  ;;  %172 = vmatpush.msra.mxu0 %v977_v6  ;;  %v992_v12 = vld [vmem:[#allocation3 + $0x8] sm:$0xff]  ;;  %v997_v14 = vld [vmem:[#allocation3] sm:$0xff] }
  0x22   :  { %141 = vst.msk [vmem:[#allocation2 + $0x3] sm:$0xf] %vm140_vm2, %v139_v9  ;;  %194 = vmatpush.msra.mxu1 %v980_v7  ;;  %227 = vmatpush.msra.mxu2 %v975_v5  ;;  %v1009_v22 = vld [vmem:[#allocation7 + $0x18] sm:$0xff]  ;;  %v1012_v23 = vld [vmem:[#allocation7 + $0x10] sm:$0xff]  ;;  %v1015_v24 = vld [vmem:[#allocation7 + $0x8] sm:$0xff] }
  0x23   :  { %173 = vmatpush.msra.mxu0 %v990_v11  ;;  %263 = vmatpush.msra.mxu3 %v1009_v22  ;;  %v1018_v25 = vld [vmem:[#allocation7] sm:$0xff]  ;;  %v699_v29 = vld [vmem:[#allocation5] ss:$0 sm:$0xff]  ;;  %v335_v37 = vld [vmem:[#allocation10 + $0x50] sm:$0xff] }
  0x24   :  { %195 = vmatpush.msra.mxu1 %v992_v12  ;;  %228 = vmatpush.msra.mxu2 %v982_v8  ;;  %v336_v34 = vld [vmem:[#allocation10 + $0x58] sm:$0xff]  ;;  %v283_v38 = vld [vmem:[#allocation10 + $0x30] sm:$0xff]  ;;  %v334_v40 = vld [vmem:[#allocation10 + $0x48] sm:$0xff] }
  0x25   :  { %174 = vmatpush.msra.mxu0 %v995_v13  ;;  %264 = vmatpush.msra.mxu3 %v1012_v23  ;;  %v284_v35 = vld [vmem:[#allocation10 + $0x38] sm:$0xff]  ;;  %v278_v39 = vld [vmem:[#allocation10 + $0x10] sm:$0xff]  ;;  %v282_v41 = vld [vmem:[#allocation10 + $0x28] sm:$0xff] }
  0x26   :  { %v143_v10 = vld [vmem:[#allocation2 + $0x8] sm:$0x3]  ;;  %196 = vmatpush.msra.mxu1 %v997_v14  ;;  %v279_v36 = vld [vmem:[#allocation10 + $0x18] sm:$0xff]  ;;  %352 = vmatpush.msrb.mxu2 %v336_v34  ;;  %v277_v42 = vld [vmem:[#allocation10 + $0x8] sm:$0xff] }
  0x27   :  { %v145_v15 = vmax.f32 %v143_v10, 0.0  ;;  %265 = vmatpush.msra.mxu3 %v1015_v24  ;;  %301 = vmatpush.msrb.mxu0 %v284_v35  ;;  %v333_v43 = vld [vmem:[#allocation10 + $0x40] sm:$0xff]  ;;  %v700_v46 = vld [vmem:[#allocation8] ss:$0 sm:$0xff]  ;;  %v369_v57 = vld [vmem:[#allocation13 + $0x10] sm:$0xff] }
  0x28   :  { %324 = vmatpush.msrb.mxu1 %v279_v36  ;;  %353 = vmatpush.msrb.mxu2 %v335_v37  ;;  %v281_v44 = vld [vmem:[#allocation10 + $0x20] sm:$0xff]  ;;  %v368_v58 = vld [vmem:[#allocation13 + $0x8] sm:$0xff] }
  0x29   :  { %v142_v16 = vld [vmem:[#allocation2] sm:$0xff]  ;;  %v209_v18 = vrot.slane %v145_v15, 6  ;;  %266 = vmatpush.msra.mxu3 %v1018_v25  ;;  %302 = vmatpush.msrb.mxu0 %v283_v38  ;;  %v276_v45 = vld [vmem:[#allocation10] sm:$0xff] }
  0x2a   :  { %v144_v17 = vmax.f32 %v142_v16, 0.0  ;;  %325 = vmatpush.msrb.mxu1 %v278_v39  ;;  %354 = vmatpush.msrb.mxu2 %v334_v40  ;;  %v271_v48 = vld [vmem:[#allocation2 + $0x3] sm:$0xf]  ;;  %v370_v56 = vld [vmem:[#allocation13 + $0x18] sm:$0xff]  ;;  %v367_v59 = vld [vmem:[#allocation13] sm:$0xff] }
  0x2b   :  { %303 = vmatpush.msrb.mxu0 %v282_v41  ;;  %390 = vmatpush.msrb.mxu3 %v370_v56  ;;  %v701_v63 = vld [vmem:[#allocation11] ss:$0 sm:$0xff]  ;;  %v679_v9 = vld [vmem:[%s1073_s0 + $0x4] sm:$0xf] }
  0x2c   :  { %v208_v19 = vrot.slane %v144_v17, 6  ;;  %v156_v20 = vrot.slane %v144_v17, 3  ;;  %672 = vmatmul.msk.f32.vlgmr.msra.gmra.mxu1 %vm135_vm0, %v144_v17  ;;  %355 = vmatpush.msrb.mxu2 %v333_v43 }
  0x2d   :  { %326 = vmatpush.msrb.mxu1 %v277_v42  ;;  %304 = vmatpush.msrb.mxu0 %v281_v44 }
  0x2e   :  { %v210_v21 = vsel %vm207_vm3, %v208_v19, %v209_v18  ;;  %671 = vmatmul.msk.f32.vlgmr.msra.gmra.mxu0 %vm135_vm0, %v156_v20  ;;  %391 = vmatpush.msrb.mxu3 %v369_v57 }
  0x2f   :  { %673 = vmatmul.msk.f32.vlgmr.msra.gmra.mxu2 %vm135_vm0, %v210_v21  ;;  %327 = vmatpush.msrb.mxu1 %v276_v45 }
  0x30   :  { %486 = vmatpush.msra.mxu2 %v965_v1  ;;  %434 = vmatpush.msra.mxu0 %v969_v3 }
  0x31   :  { %456 = vmatpush.msra.mxu1 %v973_v4  ;;  %392 = vmatpush.msrb.mxu3 %v368_v58  ;;  %v702_v4 = vld [vmem:[%s1081_s8] ss:$0 sm:$0xff] }
  0x32   :  { %487 = vmatpush.msra.mxu2 %v967_v2  ;;  %435 = vmatpush.msra.mxu0 %v977_v6 }
  0x33   :  { %457 = vmatpush.msra.mxu1 %v980_v7  ;;  %393 = vmatpush.msrb.mxu3 %v367_v59 }
  0x34   :  { %488 = vmatpush.msra.mxu2 %v975_v5  ;;  %436 = vmatpush.msra.mxu0 %v990_v11  ;;  %v407_v11 = vld [vmem:[#allocation2 + $0x8] sm:$0x3] }
  0x35   :  { %458 = vmatpush.msra.mxu1 %v992_v12  ;;  %v409_v12 = vmax.f32 %v407_v11, 0.0 }
  0x36   :  { %489 = vmatpush.msra.mxu2 %v982_v8  ;;  %437 = vmatpush.msra.mxu0 %v995_v13 }
  0x37   :  { %459 = vmatpush.msra.mxu1 %v997_v14  ;;  %v470_v15 = vrot.slane %v409_v12, 6 }
  0xa9   :  { %v198_v27 = vpop.f32.mrf.mxu1 }
  0xab   :  { %v176_v26 = vpop.f32.mrf.mxu0 }
  0xac   :  { %v199_v28 = vadd.f32 %v198_v27, %v176_v26  ;;  %v704_v27 = vld [vmem:[#allocation8] ss:$0 sm:$0xff] }
  0xb2   :  { %v230_v30 = vpop.f32.mrf.mxu2 }
  0xb3   :  { %v233_v31 = vadd.f32 %v230_v30, %v199_v28 }
  0xb5   :  { %v238_v32 = vadd.f32 %v699_v29, %v233_v31 }
  0xb7   :  { %v239_v33 = vmax.f32 %v238_v32, 0.0 }
  0xb9   :  { %674 = vmatmul.msk.f32.vlgmr.msra.gmra.mxu3 %vm135_vm0, %v239_v33 }
  0xba   :  { %524 = vmatpush.msra.mxu3 %v1009_v22  ;;  %v703_v22 = vld [vmem:[#allocation5] ss:$0 sm:$0xff] }
  0xbc   :  { %525 = vmatpush.msra.mxu3 %v1012_v23 }
  0xbe   :  { %526 = vmatpush.msra.mxu3 %v1015_v24 }
  0xc0   :  { %527 = vmatpush.msra.mxu3 %v1018_v25 }
 0x13c   :  { %v268_v47 = vpop.f32.mrf.mxu3 }
 0x13d   :  { %v269_v49 = vadd.f32 %v700_v46, %v268_v47 }
 0x13f   :  { %v272_v50 = vadd.f32 %v271_v48, %v269_v49 }
 0x141   :  { %273 = vst.msk [vmem:[#allocation2 + $0x3] sm:$0xf] %vm140_vm2, %v272_v50 }
 0x148   :  { %v274_v51 = vld [vmem:[#allocation2] sm:$0xff] }
 0x149   :  { %v275_v52 = vmax.f32 %v274_v51, 0.0  ;;  %v398_v7 = vld [vmem:[#allocation2 + $0x3] sm:$0xf] }
 0x14b   :  { %v286_v53 = vrot.slane %v275_v52, 3  ;;  %v309_v54 = vrot.slane %v275_v52, 2  ;;  %v337_v55 = vrot.slane %v275_v52, 4 }
 0x14d   :  { %675 = vmatmul.msk.f32.vlgmr.msrb.gmra.mxu0 %vm135_vm0, %v286_v53  ;;  %676 = vmatmul.msk.f32.vlgmr.msrb.gmra.mxu1 %vm135_vm0, %v309_v54 }
 0x14e   :  { %677 = vmatmul.msk.f32.vlgmr.msrb.gmra.mxu2 %vm135_vm0, %v337_v55  ;;  %561 = vmatpush.msrb.mxu0 %v284_v35 }
 0x14f   :  { %611 = vmatpush.msrb.mxu2 %v336_v34  ;;  %584 = vmatpush.msrb.mxu1 %v279_v36 }
 0x150   :  { %562 = vmatpush.msrb.mxu0 %v283_v38 }
 0x151   :  { %612 = vmatpush.msrb.mxu2 %v335_v37  ;;  %585 = vmatpush.msrb.mxu1 %v278_v39 }
 0x152   :  { %563 = vmatpush.msrb.mxu0 %v282_v41 }
 0x153   :  { %613 = vmatpush.msrb.mxu2 %v334_v40  ;;  %586 = vmatpush.msrb.mxu1 %v277_v42  ;;  %v705_v40 = vld [vmem:[#allocation11] ss:$0 sm:$0xff] }
 0x154   :  { %564 = vmatpush.msrb.mxu0 %v281_v44 }
 0x155   :  { %614 = vmatpush.msrb.mxu2 %v333_v43  ;;  %587 = vmatpush.msrb.mxu1 %v276_v45  ;;  %v706_v45 = vld [vmem:[%s1081_s8] ss:$0 sm:$0xff] }
 0x1ca   :  { %v306_v60 = vpop.f32.mrf.mxu0  ;;  %v329_v61 = vpop.f32.mrf.mxu1 }
 0x1cb   :  { %v330_v62 = vadd.f32 %v329_v61, %v306_v60 }
 0x1d1   :  { %v357_v0 = vpop.f32.mrf.mxu2 }
 0x1d2   :  { %v360_v1 = vadd.f32 %v357_v0, %v330_v62 }
 0x1d4   :  { %v365_v2 = vadd.f32 %v701_v63, %v360_v1 }
 0x1d6   :  { %v366_v3 = vmax.f32 %v365_v2, 0.0 }
 0x1d8   :  { %678 = vmatmul.msk.f32.vlgmr.msrb.gmra.mxu3 %vm135_vm0, %v366_v3 }
 0x1d9   :  { %649 = vmatpush.msrb.mxu3 %v370_v56 }
 0x1db   :  { %650 = vmatpush.msrb.mxu3 %v369_v57 }
 0x1dd   :  { %651 = vmatpush.msrb.mxu3 %v368_v58 }
 0x1df   :  { %652 = vmatpush.msrb.mxu3 %v367_v59 }
 0x25b   :  { %v395_v5 = vpop.f32.mrf.mxu3 }
 0x25c   :  { %v396_v6 = vadd.f32 %v702_v4, %v395_v5 }
 0x25e   :  { %v399_v8 = vadd.f32 %v398_v7, %v396_v6 }
 0x260   :  { %400 = vst.msk [vmem:[#allocation2 + $0x3] sm:$0xf] %vm140_vm2, %v399_v8 }
 0x267   :  { %v401_v10 = vld [vmem:[#allocation2 + $0x3] sm:$0xf] }
 0x268   :  { %402 = vst.msk [vmem:[%s1082_s9] sm:$0xf] %vm140_vm2, %v401_v10 }
 0x269   :  { %405 = vst.msk [vmem:[#allocation2 + $0x3] sm:$0xf] %vm140_vm2, %v679_v9 }
 0x270   :  { %v406_v13 = vld [vmem:[#allocation2] sm:$0xff] }
 0x271   :  { %v408_v14 = vmax.f32 %v406_v13, 0.0  ;;  %v532_v29 = vld [vmem:[#allocation2 + $0x3] sm:$0xf] }
 0x273   :  { %v469_v16 = vrot.slane %v408_v14, 6  ;;  %v419_v17 = vrot.slane %v408_v14, 3  ;;  %681 = vmatmul.msk.f32.vlgmr.msra.gmra.mxu1 %vm135_vm0, %v408_v14 }
 0x275   :  { %v471_v18 = vsel %vm207_vm3, %v469_v16, %v470_v15  ;;  %680 = vmatmul.msk.f32.vlgmr.msra.gmra.mxu0 %vm135_vm0, %v419_v17 }
 0x276   :  { %682 = vmatmul.msk.f32.vlgmr.msra.gmra.mxu2 %vm135_vm0, %v471_v18 }
 0x2f0   :  { %v461_v20 = vpop.f32.mrf.mxu1 }
 0x2f2   :  { %v439_v19 = vpop.f32.mrf.mxu0 }
 0x2f3   :  { %v462_v21 = vadd.f32 %v461_v20, %v439_v19 }
 0x2f9   :  { %v491_v23 = vpop.f32.mrf.mxu2 }
 0x2fa   :  { %v494_v24 = vadd.f32 %v491_v23, %v462_v21 }
 0x2fc   :  { %v499_v25 = vadd.f32 %v703_v22, %v494_v24 }
 0x2fe   :  { %v500_v26 = vmax.f32 %v499_v25, 0.0 }
 0x300   :  { %683 = vmatmul.msk.f32.vlgmr.msra.gmra.mxu3 %vm135_vm0, %v500_v26 }
 0x383   :  { %v529_v28 = vpop.f32.mrf.mxu3 }
 0x384   :  { %v530_v30 = vadd.f32 %v704_v27, %v529_v28 }
 0x386   :  { %v533_v31 = vadd.f32 %v532_v29, %v530_v30 }
 0x388   :  { %534 = vst.msk [vmem:[#allocation2 + $0x3] sm:$0xf] %vm140_vm2, %v533_v31 }
 0x38f   :  { %v535_v32 = vld [vmem:[#allocation2] sm:$0xff] }
 0x390   :  { %v536_v33 = vmax.f32 %v535_v32, 0.0  ;;  %v657_v48 = vld [vmem:[#allocation2 + $0x3] sm:$0xf] }
 0x392   :  { %v546_v34 = vrot.slane %v536_v33, 3  ;;  %v569_v35 = vrot.slane %v536_v33, 2  ;;  %v596_v36 = vrot.slane %v536_v33, 4 }
 0x394   :  { %684 = vmatmul.msk.f32.vlgmr.msrb.gmra.mxu0 %vm135_vm0, %v546_v34  ;;  %685 = vmatmul.msk.f32.vlgmr.msrb.gmra.mxu1 %vm135_vm0, %v569_v35 }
 0x395   :  { %686 = vmatmul.msk.f32.vlgmr.msrb.gmra.mxu2 %vm135_vm0, %v596_v36 }
 0x411   :  { %v566_v37 = vpop.f32.mrf.mxu0  ;;  %v589_v38 = vpop.f32.mrf.mxu1 }
 0x412   :  { %v590_v39 = vadd.f32 %v589_v38, %v566_v37 }
 0x418   :  { %v616_v41 = vpop.f32.mrf.mxu2 }
 0x419   :  { %v619_v42 = vadd.f32 %v616_v41, %v590_v39 }
 0x41b   :  { %v624_v43 = vadd.f32 %v705_v40, %v619_v42 }
 0x41d   :  { %v625_v44 = vmax.f32 %v624_v43, 0.0 }
 0x41f   :  { %687 = vmatmul.msk.f32.vlgmr.msrb.gmra.mxu3 %vm135_vm0, %v625_v44 }
 0x4a2   :  { %v654_v46 = vpop.f32.mrf.mxu3 }
 0x4a3   :  { %v655_v47 = vadd.f32 %v706_v45, %v654_v46 }
 0x4a5   :  { %v658_v49 = vadd.f32 %v657_v48, %v655_v47 }
 0x4a7   :  { %659 = vst.msk [vmem:[#allocation2 + $0x3] sm:$0xf] %vm140_vm2, %v658_v49 }
 0x4ae   :  { %v660_v50 = vld [vmem:[#allocation2 + $0x3] sm:$0xf] }
 0x4af   :  { %688 = vst.msk [vmem:[%s1082_s9 + $0x4] sm:$0xf] %vm140_vm2, %v660_v50 }
 0x4b0   :  { %667 = vsyncpa [#allocation4], 1 }
 0x4b1   :  { %668 = vsyncpa [#allocation6], 1 }
 0x4b2   :  { %669 = vsyncpa [#allocation9], 1 }
 0x4b3   :  { %670 = vsyncpa [#allocation12], 1 }

// kernel: vqvae2_forward.24
= control target key start
LH: loop header
LB: loop body
LE: loop exit
PB: predicated region body
PF: predicated region fallthrough
CT: control target
= control target key end

     0   :  { %14 = vsyncpa [#allocation4], 0  ;;  %s1145_s0 = inlined_call_operand.vmem [shape: f32[2,8,32], index: 0, kind: input, shape index: {}]   ;;  %s1146_s1 = inlined_call_operand.hbm [shape: f32[3,32,32], index: 1, kind: input, shape index: {}]   ;;  %s1147_s2 = inlined_call_operand.hbm [shape: f32[1,32], index: 2, kind: input, shape index: {}]   ;;  %s1148_s3 = inlined_call_operand.hbm [shape: f32[1,32,32], index: 3, kind: input, shape index: {}]   ;;  %s1149_s4 = inlined_call_operand.hbm [shape: f32[1,32], index: 4, kind: input, shape index: {}]   ;;  %s1150_s5 = inlined_call_operand.hbm [shape: f32[3,32,32], index: 5, kind: input, shape index: {}]   ;;  %s1151_s6 = inlined_call_operand.hbm [shape: f32[1,32], index: 6, kind: input, shape index: {}]   ;;  %s1152_s7 = inlined_call_operand.hbm [shape: f32[1,32,32], index: 7, kind: input, shape index: {}]   ;;  %s1153_s8 = inlined_call_operand.hbm [shape: f32[1,32], index: 8, kind: input, shape index: {}]   ;;  %s1154_s9 = inlined_call_operand.vmem [shape: f32[2,8,32], index: 9, kind: output, shape index: {}]  }
   0x1   :  { %15 = vsyncpa [#allocation6], 0 }
   0x2   :  { %16 = vsyncpa [#allocation9], 0 }
   0x3   :  { %17 = vsyncpa [#allocation12], 0  ;;  %s39_s11 = sshll.u32 %s1147_s2, 4  ;;  %s40_s11 = int_to_ptr.hbm [resolvable:$true] %s39_s11 }
   0x4   :  { %18 = vsyncpa [#allocation15], 0  ;;  %s949_s12 = smov [#allocation5]   ;;  %s63_s16 = sshll.u32 %s1149_s4, 4  ;;  %s64_s16 = int_to_ptr.hbm [resolvable:$true] %s63_s16 }
   0x5   :  { %s41_s13 = sshll.u32 %s949_s12, 4  ;;  %s950_s17 = smov [#allocation8]   ;;  %s42_s13 = int_to_ptr.vmem [resolvable:$true] %s41_s13 }
   0x6   :  { %44 = dma.hbm_to_vmem [thread:$0]  %s40_s11, 16, %s42_s13, [#allocation6]  }
   0x7   :  { %s65_s18 = sshll.u32 %s950_s17, 4  ;;  %s87_s21 = sshll.u32 %s1151_s6, 4  ;;  %s66_s18 = int_to_ptr.vmem [resolvable:$true] %s65_s18  ;;  %s88_s21 = int_to_ptr.hbm [resolvable:$true] %s87_s21 }
   0x8   :  { %68 = dma.hbm_to_vmem [thread:$0]  %s64_s16, 16, %s66_s18, [#allocation9]  }
   0x9   :  { %s25_s23 = sshll.u32 %s1146_s1, 4  ;;  %s951_s24 = smov [#allocation11]   ;;  %s26_s23 = int_to_ptr.hbm [resolvable:$true] %s25_s23 }
   0xa   :  { %s89_s25 = sshll.u32 %s951_s24, 4  ;;  %s952_s4 = smov [#allocation3]   ;;  %s90_s25 = int_to_ptr.vmem [resolvable:$true] %s89_s25 }
   0xb   :  { %92 = dma.hbm_to_vmem [thread:$0]  %s88_s21, 16, %s90_s25, [#allocation12]  }
   0xc   :  { %s27_s26 = sshll.u32 %s952_s4, 4  ;;  %s953_s27 = smov 128   ;;  %s28_s26 = int_to_ptr.vmem [resolvable:$true] %s27_s26 }
   0xd   :  { %s954_s28 = smov 8   ;;  %s49_s30 = sshll.u32 %s1148_s3, 4  ;;  %s50_s30 = int_to_ptr.hbm [resolvable:$true] %s49_s30 }
   0xe   :  { %33 = dma.hbm_to_vmem [thread:$0]  %s26_s23, 1536, %s28_s26, [#allocation4], %s953_s27, %s953_s27, %s954_s28  }
   0xf   :  { %s955_s10 = smov [#allocation7]   ;;  %s73_s13 = sshll.u32 %s1150_s5, 4  ;;  %s74_s13 = int_to_ptr.hbm [resolvable:$true] %s73_s13 }
  0x10   :  { %s51_s11 = sshll.u32 %s955_s10, 4  ;;  %s956_s14 = smov [#allocation10]   ;;  %s52_s11 = int_to_ptr.vmem [resolvable:$true] %s51_s11 }
  0x11   :  { %57 = dma.hbm_to_vmem [thread:$0]  %s50_s30, 512, %s52_s11, [#allocation6], %s953_s27, %s953_s27, %s954_s28  }
  0x12   :  { %s75_s15 = sshll.u32 %s956_s14, 4  ;;  %s97_s18 = sshll.u32 %s1152_s7, 4  ;;  %s76_s15 = int_to_ptr.vmem [resolvable:$true] %s75_s15  ;;  %s98_s18 = int_to_ptr.hbm [resolvable:$true] %s97_s18 }
  0x13   :  { %81 = dma.hbm_to_vmem [thread:$0]  %s74_s13, 1536, %s76_s15, [#allocation9], %s953_s27, %s953_s27, %s954_s28  }
  0x14   :  { %s111_s20 = sshll.u32 %s1153_s8, 4  ;;  %s957_s21 = smov [#allocation13]   ;;  %s112_s20 = int_to_ptr.hbm [resolvable:$true] %s111_s20 }
  0x15   :  { %s99_s2 = sshll.u32 %s957_s21, 4  ;;  %s958_s5 = smov [#allocation14]   ;;  %s100_s2 = int_to_ptr.vmem [resolvable:$true] %s99_s2 }
  0x16   :  { %105 = dma.hbm_to_vmem [thread:$0]  %s98_s18, 512, %s100_s2, [#allocation12], %s953_s27, %s953_s27, %s954_s28  }
  0x17   :  { %s113_s22 = sshll.u32 %s958_s5, 4  ;;  %s114_s22 = int_to_ptr.vmem [resolvable:$true] %s113_s22 }
  0x18   :  { %116 = dma.hbm_to_vmem [thread:$0]  %s112_s20, 16, %s114_s22, [#allocation15]  }
  0x19   :  { %939 = dma.done.wait [#allocation4], 1536  }
  0x1a   :  { %940 = vsyncadd [#allocation4], 4294965760 }
  0x1b   :  { %941 = dma.done.wait [#allocation6], 528  }
  0x1c   :  { %942 = vsyncadd [#allocation6], 4294966768 }
  0x1d   :  { %943 = dma.done.wait [#allocation9], 1552  }
  0x1e   :  { %944 = vsyncadd [#allocation9], 4294965744 }
  0x1f   :  { %945 = dma.done.wait [#allocation12], 528  }
  0x20   :  { %946 = vsyncadd [#allocation12], 4294966768 }
  0x21   :  { %947 = dma.done.wait [#allocation15], 16  }
  0x22   :  { %948 = vsyncadd [#allocation15], 4294967280  ;;  %vm149_vm0 = vcmask 261120   ;;  %vm151_vm1 = vcmask 259072   ;;  %v959_v0 = vmov 0.0   ;;  %v1035_v1 = vld [vmem:[#allocation3 + $0x58] sm:$0xff] }
  0x23   :  { %150 = vst.msk [vmem:[#allocation2] sm:$0xff] %vm149_vm0, %v959_v0  ;;  %v1037_v2 = vld [vmem:[#allocation3 + $0x50] sm:$0xff]  ;;  %v1039_v3 = vld [vmem:[#allocation3 + $0x38] sm:$0xff]  ;;  %241 = vmatpush.msra.mxu2 %v1035_v1  ;;  %v1045_v5 = vld [vmem:[#allocation3 + $0x48] sm:$0xff]  ;;  %vm223_vm2 = vcmask 1041408   ;;  %vm170_vm3 = vcmask 1044480  }
  0x24   :  { %152 = vst.msk [vmem:[#allocation2 + $0x8] sm:$0x3f] %vm151_vm1, %v959_v0  ;;  %188 = vmatpush.msra.mxu0 %v1039_v3  ;;  %v1043_v4 = vld [vmem:[#allocation3 + $0x18] sm:$0xff]  ;;  %v1047_v6 = vld [vmem:[#allocation3 + $0x30] sm:$0xff]  ;;  %v1052_v8 = vld [vmem:[#allocation3 + $0x40] sm:$0xff]  ;;  %vm330_vm4 = vcmask 1045504  }
  0x25   :  { %210 = vmatpush.msra.mxu1 %v1043_v4  ;;  %v1050_v7 = vld [vmem:[#allocation3 + $0x10] sm:$0xff]  ;;  %242 = vmatpush.msra.mxu2 %v1037_v2  ;;  %v1060_v10 = vld [vmem:[#allocation3 + $0x28] sm:$0xff]  ;;  %v1064_v12 = vld [vmem:[#allocation3 + $0x20] sm:$0xff]  ;;  %vm361_vm5 = vcmask 1043456  }
  0x26   :  { %v153_v9 = vld [vmem:[%s1145_s0] sm:$0xff]  ;;  %189 = vmatpush.msra.mxu0 %v1047_v6  ;;  %v1062_v11 = vld [vmem:[#allocation3 + $0x8] sm:$0xff]  ;;  %v1067_v13 = vld [vmem:[#allocation3] sm:$0xff] }
  0x27   :  { %154 = vst.msk [vmem:[#allocation2 + $0x3] sm:$0xff] %vm149_vm0, %v153_v9  ;;  %211 = vmatpush.msra.mxu1 %v1050_v7  ;;  %243 = vmatpush.msra.mxu2 %v1045_v5  ;;  %v1080_v24 = vld [vmem:[#allocation7 + $0x18] sm:$0xff]  ;;  %v1083_v25 = vld [vmem:[#allocation7 + $0x10] sm:$0xff]  ;;  %v1086_v26 = vld [vmem:[#allocation7 + $0x8] sm:$0xff] }
  0x28   :  { %190 = vmatpush.msra.mxu0 %v1060_v10  ;;  %279 = vmatpush.msra.mxu3 %v1080_v24  ;;  %v1089_v27 = vld [vmem:[#allocation7] sm:$0xff]  ;;  %v739_v31 = vld [vmem:[#allocation5] ss:$0 sm:$0xff]  ;;  %v359_v39 = vld [vmem:[#allocation10 + $0x50] sm:$0xff] }
  0x29   :  { %212 = vmatpush.msra.mxu1 %v1062_v11  ;;  %244 = vmatpush.msra.mxu2 %v1052_v8  ;;  %v360_v36 = vld [vmem:[#allocation10 + $0x58] sm:$0xff]  ;;  %v301_v40 = vld [vmem:[#allocation10 + $0x30] sm:$0xff]  ;;  %v358_v42 = vld [vmem:[#allocation10 + $0x48] sm:$0xff] }
  0x2a   :  { %191 = vmatpush.msra.mxu0 %v1064_v12  ;;  %280 = vmatpush.msra.mxu3 %v1083_v25  ;;  %v302_v37 = vld [vmem:[#allocation10 + $0x38] sm:$0xff]  ;;  %v296_v41 = vld [vmem:[#allocation10 + $0x10] sm:$0xff]  ;;  %v300_v43 = vld [vmem:[#allocation10 + $0x28] sm:$0xff] }
  0x2b   :  { %213 = vmatpush.msra.mxu1 %v1067_v13  ;;  %v297_v38 = vld [vmem:[#allocation10 + $0x18] sm:$0xff]  ;;  %379 = vmatpush.msrb.mxu2 %v360_v36  ;;  %v295_v44 = vld [vmem:[#allocation10 + $0x8] sm:$0xff]  ;;  %v357_v45 = vld [vmem:[#allocation10 + $0x40] sm:$0xff] }
  0x2c   :  { %281 = vmatpush.msra.mxu3 %v1086_v26  ;;  %322 = vmatpush.msrb.mxu0 %v302_v37  ;;  %v299_v46 = vld [vmem:[#allocation10 + $0x20] sm:$0xff]  ;;  %v740_v48 = vld [vmem:[#allocation8] ss:$0 sm:$0xff] }
  0x2d   :  { %348 = vmatpush.msrb.mxu1 %v297_v38  ;;  %380 = vmatpush.msrb.mxu2 %v359_v39  ;;  %v294_v47 = vld [vmem:[#allocation10] sm:$0xff] }
  0x2e   :  { %v155_v14 = vld [vmem:[#allocation2] sm:$0xff]  ;;  %v156_v15 = vld [vmem:[#allocation2 + $0x8] sm:$0x3f]  ;;  %282 = vmatpush.msra.mxu3 %v1089_v27  ;;  %323 = vmatpush.msrb.mxu0 %v301_v40  ;;  %v741_v9 = vld [vmem:[#allocation11] ss:$0 sm:$0xff] }
  0x2f   :  { %v157_v16 = vmax.f32 %v155_v14, 0.0  ;;  %v158_v17 = vmax.f32 %v156_v15, 0.0  ;;  %349 = vmatpush.msrb.mxu1 %v296_v41  ;;  %381 = vmatpush.msrb.mxu2 %v358_v42  ;;  %v287_v50 = vld [vmem:[#allocation2 + $0x3] sm:$0xff]  ;;  %v742_v14 = vld [vmem:[#allocation14] ss:$0 sm:$0xff] }
  0x30   :  { %324 = vmatpush.msrb.mxu0 %v300_v43 }
  0x31   :  { %v224_v18 = vrot.slane %v157_v16, 6  ;;  %v225_v19 = vrot.slane %v158_v17, 6  ;;  %v171_v20 = vrot.slane %v157_v16, 3  ;;  %v172_v21 = vrot.slane %v158_v17, 3  ;;  %711 = vmatmul.msk.f32.vlgmr.msra.gmra.mxu1 %vm149_vm0, %v157_v16  ;;  %382 = vmatpush.msrb.mxu2 %v357_v45 }
  0x32   :  { %350 = vmatpush.msrb.mxu1 %v295_v44  ;;  %325 = vmatpush.msrb.mxu0 %v299_v46 }
  0x33   :  { %v226_v22 = vsel %vm223_vm2, %v224_v18, %v225_v19  ;;  %v173_v23 = vsel %vm170_vm3, %v171_v20, %v172_v21  ;;  %v718_v19 = vld [vmem:[%s1145_s0 + $0x8] sm:$0xff] }
  0x34   :  { %712 = vmatmul.msk.f32.vlgmr.msra.gmra.mxu2 %vm149_vm0, %v226_v22  ;;  %710 = vmatmul.msk.f32.vlgmr.msra.gmra.mxu0 %vm149_vm0, %v173_v23 }
  0x35   :  { %351 = vmatpush.msrb.mxu1 %v294_v47  ;;  %515 = vmatpush.msra.mxu2 %v1035_v1 }
  0x36   :  { %464 = vmatpush.msra.mxu0 %v1039_v3  ;;  %v396_v3 = vld [vmem:[#allocation13 + $0x10] sm:$0xff] }
  0x37   :  { %486 = vmatpush.msra.mxu1 %v1043_v4  ;;  %516 = vmatpush.msra.mxu2 %v1037_v2  ;;  %v397_v2 = vld [vmem:[#allocation13 + $0x18] sm:$0xff]  ;;  %v395_v4 = vld [vmem:[#allocation13 + $0x8] sm:$0xff] }
  0x38   :  { %465 = vmatpush.msra.mxu0 %v1047_v6  ;;  %417 = vmatpush.msrb.mxu3 %v397_v2 }
  0x39   :  { %487 = vmatpush.msra.mxu1 %v1050_v7  ;;  %517 = vmatpush.msra.mxu2 %v1045_v5  ;;  %v394_v5 = vld [vmem:[#allocation13] sm:$0xff] }
  0x3a   :  { %466 = vmatpush.msra.mxu0 %v1060_v10  ;;  %418 = vmatpush.msrb.mxu3 %v396_v3 }
  0x3b   :  { %488 = vmatpush.msra.mxu1 %v1062_v11  ;;  %518 = vmatpush.msra.mxu2 %v1052_v8 }
  0x3c   :  { %467 = vmatpush.msra.mxu0 %v1064_v12  ;;  %419 = vmatpush.msrb.mxu3 %v395_v4 }
  0x3d   :  { %489 = vmatpush.msra.mxu1 %v1067_v13 }
  0x3e   :  { %420 = vmatpush.msrb.mxu3 %v394_v5 }
  0xae   :  { %v215_v29 = vpop.f32.mrf.mxu1 }
  0xb1   :  { %v193_v28 = vpop.f32.mrf.mxu0 }
  0xb2   :  { %v216_v30 = vadd.f32 %v215_v29, %v193_v28 }
  0xb7   :  { %v246_v32 = vpop.f32.mrf.mxu2 }
  0xb8   :  { %v249_v33 = vadd.f32 %v246_v32, %v216_v30 }
  0xba   :  { %v254_v34 = vadd.f32 %v739_v31, %v249_v33 }
  0xbc   :  { %v255_v35 = vmax.f32 %v254_v34, 0.0  ;;  %v743_v34 = vld [vmem:[#allocation5] ss:$0 sm:$0xff] }
  0xbe   :  { %713 = vmatmul.msk.f32.vlgmr.msra.gmra.mxu3 %vm149_vm0, %v255_v35 }
  0xbf   :  { %553 = vmatpush.msra.mxu3 %v1080_v24 }
  0xc1   :  { %554 = vmatpush.msra.mxu3 %v1083_v25 }
  0xc3   :  { %555 = vmatpush.msra.mxu3 %v1086_v26 }
  0xc5   :  { %556 = vmatpush.msra.mxu3 %v1089_v27 }
 0x141   :  { %v284_v49 = vpop.f32.mrf.mxu3 }
 0x142   :  { %v285_v51 = vadd.f32 %v740_v48, %v284_v49 }
 0x144   :  { %v288_v52 = vadd.f32 %v287_v50, %v285_v51 }
 0x146   :  { %289 = vst.msk [vmem:[#allocation2 + $0x3] sm:$0xff] %vm149_vm0, %v288_v52 }
 0x14d   :  { %v290_v53 = vld [vmem:[#allocation2] sm:$0xff]  ;;  %v291_v54 = vld [vmem:[#allocation2 + $0x8] sm:$0x3f] }
 0x14e   :  { %v292_v55 = vmax.f32 %v290_v53, 0.0  ;;  %v293_v56 = vmax.f32 %v291_v54, 0.0  ;;  %v425_v17 = vld [vmem:[#allocation2 + $0x3] sm:$0xff] }
 0x150   :  { %v305_v57 = vrot.slane %v292_v55, 3  ;;  %v306_v58 = vrot.slane %v293_v56, 3  ;;  %v331_v59 = vrot.slane %v292_v55, 2  ;;  %v332_v60 = vrot.slane %v293_v56, 2 }
 0x151   :  { %v362_v61 = vrot.slane %v292_v55, 4  ;;  %v363_v62 = vrot.slane %v293_v56, 4 }
 0x152   :  { %v307_v63 = vsel %vm170_vm3, %v305_v57, %v306_v58  ;;  %v333_v0 = vsel %vm330_vm4, %v331_v59, %v332_v60  ;;  %v745_v60 = vld [vmem:[#allocation11] ss:$0 sm:$0xff] }
 0x153   :  { %714 = vmatmul.msk.f32.vlgmr.msrb.gmra.mxu0 %vm149_vm0, %v307_v63  ;;  %715 = vmatmul.msk.f32.vlgmr.msrb.gmra.mxu1 %vm149_vm0, %v333_v0  ;;  %v364_v1 = vsel %vm361_vm5, %v362_v61, %v363_v62 }
 0x154   :  { %716 = vmatmul.msk.f32.vlgmr.msrb.gmra.mxu2 %vm149_vm0, %v364_v1  ;;  %595 = vmatpush.msrb.mxu0 %v302_v37  ;;  %v746_v1 = vld [vmem:[#allocation14] ss:$0 sm:$0xff] }
 0x155   :  { %649 = vmatpush.msrb.mxu2 %v360_v36  ;;  %620 = vmatpush.msrb.mxu1 %v297_v38 }
 0x156   :  { %596 = vmatpush.msrb.mxu0 %v301_v40 }
 0x157   :  { %650 = vmatpush.msrb.mxu2 %v359_v39  ;;  %621 = vmatpush.msrb.mxu1 %v296_v41  ;;  %v744_v39 = vld [vmem:[#allocation8] ss:$0 sm:$0xff] }
 0x158   :  { %597 = vmatpush.msrb.mxu0 %v300_v43 }
 0x159   :  { %651 = vmatpush.msrb.mxu2 %v358_v42  ;;  %622 = vmatpush.msrb.mxu1 %v295_v44 }
 0x15a   :  { %598 = vmatpush.msrb.mxu0 %v299_v46 }
 0x15b   :  { %652 = vmatpush.msrb.mxu2 %v357_v45  ;;  %623 = vmatpush.msrb.mxu1 %v294_v47 }
 0x1d0   :  { %v327_v6 = vpop.f32.mrf.mxu0  ;;  %v353_v7 = vpop.f32.mrf.mxu1 }
 0x1d1   :  { %v354_v8 = vadd.f32 %v353_v7, %v327_v6 }
 0x1d7   :  { %v384_v10 = vpop.f32.mrf.mxu2 }
 0x1d8   :  { %v387_v11 = vadd.f32 %v384_v10, %v354_v8 }
 0x1da   :  { %v392_v12 = vadd.f32 %v741_v9, %v387_v11 }
 0x1dc   :  { %v393_v13 = vmax.f32 %v392_v12, 0.0 }
 0x1de   :  { %717 = vmatmul.msk.f32.vlgmr.msrb.gmra.mxu3 %vm149_vm0, %v393_v13 }
 0x1df   :  { %687 = vmatpush.msrb.mxu3 %v397_v2 }
 0x1e1   :  { %688 = vmatpush.msrb.mxu3 %v396_v3 }
 0x1e3   :  { %689 = vmatpush.msrb.mxu3 %v395_v4 }
 0x1e5   :  { %690 = vmatpush.msrb.mxu3 %v394_v5 }
 0x261   :  { %v422_v15 = vpop.f32.mrf.mxu3 }
 0x262   :  { %v423_v16 = vadd.f32 %v742_v14, %v422_v15 }
 0x264   :  { %v426_v18 = vadd.f32 %v425_v17, %v423_v16 }
 0x266   :  { %427 = vst.msk [vmem:[#allocation2 + $0x3] sm:$0xff] %vm149_vm0, %v426_v18 }
 0x26d   :  { %v428_v20 = vld [vmem:[#allocation2 + $0x3] sm:$0xff] }
 0x26e   :  { %429 = vst.msk [vmem:[%s1154_s9] sm:$0xff] %vm149_vm0, %v428_v20 }
 0x26f   :  { %432 = vst.msk [vmem:[#allocation2 + $0x3] sm:$0xff] %vm149_vm0, %v718_v19 }
 0x276   :  { %v433_v21 = vld [vmem:[#allocation2] sm:$0xff]  ;;  %v434_v22 = vld [vmem:[#allocation2 + $0x8] sm:$0x3f] }
 0x277   :  { %v435_v23 = vmax.f32 %v433_v21, 0.0  ;;  %v436_v24 = vmax.f32 %v434_v22, 0.0  ;;  %v561_v41 = vld [vmem:[#allocation2 + $0x3] sm:$0xff] }
 0x279   :  { %v498_v25 = vrot.slane %v435_v23, 6  ;;  %v499_v26 = vrot.slane %v436_v24, 6  ;;  %v447_v27 = vrot.slane %v435_v23, 3  ;;  %v448_v28 = vrot.slane %v436_v24, 3  ;;  %720 = vmatmul.msk.f32.vlgmr.msra.gmra.mxu1 %vm149_vm0, %v435_v23 }
 0x27b   :  { %v500_v29 = vsel %vm223_vm2, %v498_v25, %v499_v26  ;;  %v449_v30 = vsel %vm170_vm3, %v447_v27, %v448_v28 }
 0x27c   :  { %721 = vmatmul.msk.f32.vlgmr.msra.gmra.mxu2 %vm149_vm0, %v500_v29  ;;  %719 = vmatmul.msk.f32.vlgmr.msra.gmra.mxu0 %vm149_vm0, %v449_v30 }
 0x2f6   :  { %v491_v32 = vpop.f32.mrf.mxu1 }
 0x2f9   :  { %v469_v31 = vpop.f32.mrf.mxu0 }
 0x2fa   :  { %v492_v33 = vadd.f32 %v491_v32, %v469_v31 }
 0x2ff   :  { %v520_v35 = vpop.f32.mrf.mxu2 }
 0x300   :  { %v523_v36 = vadd.f32 %v520_v35, %v492_v33 }
 0x302   :  { %v528_v37 = vadd.f32 %v743_v34, %v523_v36 }
 0x304   :  { %v529_v38 = vmax.f32 %v528_v37, 0.0 }
 0x306   :  { %722 = vmatmul.msk.f32.vlgmr.msra.gmra.mxu3 %vm149_vm0, %v529_v38 }
 0x389   :  { %v558_v40 = vpop.f32.mrf.mxu3 }
 0x38a   :  { %v559_v42 = vadd.f32 %v744_v39, %v558_v40 }
 0x38c   :  { %v562_v43 = vadd.f32 %v561_v41, %v559_v42 }
 0x38e   :  { %563 = vst.msk [vmem:[#allocation2 + $0x3] sm:$0xff] %vm149_vm0, %v562_v43 }
 0x395   :  { %v564_v44 = vld [vmem:[#allocation2] sm:$0xff]  ;;  %v565_v45 = vld [vmem:[#allocation2 + $0x8] sm:$0x3f] }
 0x396   :  { %v566_v46 = vmax.f32 %v564_v44, 0.0  ;;  %v567_v47 = vmax.f32 %v565_v45, 0.0  ;;  %v695_v4 = vld [vmem:[#allocation2 + $0x3] sm:$0xff] }
 0x398   :  { %v578_v48 = vrot.slane %v566_v46, 3  ;;  %v579_v49 = vrot.slane %v567_v47, 3  ;;  %v603_v50 = vrot.slane %v566_v46, 2  ;;  %v604_v51 = vrot.slane %v567_v47, 2 }
 0x399   :  { %v632_v52 = vrot.slane %v566_v46, 4  ;;  %v633_v53 = vrot.slane %v567_v47, 4 }
 0x39a   :  { %v580_v54 = vsel %vm170_vm3, %v578_v48, %v579_v49  ;;  %v605_v55 = vsel %vm330_vm4, %v603_v50, %v604_v51 }
 0x39b   :  { %723 = vmatmul.msk.f32.vlgmr.msrb.gmra.mxu0 %vm149_vm0, %v580_v54  ;;  %724 = vmatmul.msk.f32.vlgmr.msrb.gmra.mxu1 %vm149_vm0, %v605_v55  ;;  %v634_v56 = vsel %vm361_vm5, %v632_v52, %v633_v53 }
 0x39c   :  { %725 = vmatmul.msk.f32.vlgmr.msrb.gmra.mxu2 %vm149_vm0, %v634_v56 }
 0x418   :  { %v600_v57 = vpop.f32.mrf.mxu0  ;;  %v625_v58 = vpop.f32.mrf.mxu1 }
 0x419   :  { %v626_v59 = vadd.f32 %v625_v58, %v600_v57 }
 0x41f   :  { %v654_v61 = vpop.f32.mrf.mxu2 }
 0x420   :  { %v657_v62 = vadd.f32 %v654_v61, %v626_v59 }
 0x422   :  { %v662_v63 = vadd.f32 %v745_v60, %v657_v62 }
 0x424   :  { %v663_v0 = vmax.f32 %v662_v63, 0.0 }
 0x426   :  { %726 = vmatmul.msk.f32.vlgmr.msrb.gmra.mxu3 %vm149_vm0, %v663_v0 }
 0x4a9   :  { %v692_v2 = vpop.f32.mrf.mxu3 }
 0x4aa   :  { %v693_v3 = vadd.f32 %v746_v1, %v692_v2 }
 0x4ac   :  { %v696_v5 = vadd.f32 %v695_v4, %v693_v3 }
 0x4ae   :  { %697 = vst.msk [vmem:[#allocation2 + $0x3] sm:$0xff] %vm149_vm0, %v696_v5 }
 0x4b5   :  { %v698_v6 = vld [vmem:[#allocation2 + $0x3] sm:$0xff] }
 0x4b6   :  { %727 = vst.msk [vmem:[%s1154_s9 + $0x8] sm:$0xff] %vm149_vm0, %v698_v6 }
 0x4b7   :  { %705 = vsyncpa [#allocation4], 1 }
 0x4b8   :  { %706 = vsyncpa [#allocation6], 1 }
 0x4b9   :  { %707 = vsyncpa [#allocation9], 1 }
 0x4ba   :  { %708 = vsyncpa [#allocation12], 1 }
 0x4bb   :  { %709 = vsyncpa [#allocation15], 1 }

// kernel: vqvae2_forward.25
= control target key start
LH: loop header
LB: loop body
LE: loop exit
PB: predicated region body
PF: predicated region fallthrough
CT: control target
= control target key end

     0   :  { %8 = vsyncpa [#allocation3], 0  ;;  %s415_s15 = smov [#allocation2]   ;;  %s632_s0 = inlined_call_operand.vmem [shape: f32[2,10,32], index: 0, kind: input, shape index: {}]   ;;  %s633_s1 = inlined_call_operand.vmem [shape: f32[3,32,32], index: 1, kind: input, shape index: {}]   ;;  %s634_s2 = inlined_call_operand.hbm [shape: f32[1,32], index: 2, kind: input, shape index: {}]   ;;  %s635_s3 = inlined_call_operand.vmem [shape: f32[2,8,2,32], index: 3, kind: output, shape index: {}]  }
   0x1   :  { %s18_s14 = sshll.u32 %s634_s2, 4  ;;  %s20_s16 = sshll.u32 %s415_s15, 4  ;;  %s19_s14 = int_to_ptr.hbm [resolvable:$true] %s18_s14  ;;  %s21_s16 = int_to_ptr.vmem [resolvable:$true] %s20_s16 }
   0x2   :  { %23 = dma.hbm_to_vmem [thread:$0]  %s19_s14, 16, %s21_s16, [#allocation3]  }
   0x3   :  { %413 = dma.done.wait [#allocation3], 16  }
   0x4   :  { %414 = vsyncadd [#allocation3], 4294967280  ;;  %v360_v0 = vld [vmem:[%s633_s1 + $0x58] sm:$0xff]  ;;  %v359_v4 = vld [vmem:[%s633_s1 + $0x50] sm:$0xff]  ;;  %vm59_vm0 = vcmask 261120   ;;  %vm108_vm1 = vcmask 1045504  }
   0x5   :  { %v31_v1 = vld [vmem:[%s633_s1 + $0x18] sm:$0xff]  ;;  %126 = vmatpush.msra.mxu2 %v360_v0  ;;  %v454_v5 = vld [vmem:[%s633_s1 + $0x10] sm:$0xff]  ;;  %v358_v9 = vld [vmem:[%s633_s1 + $0x48] sm:$0xff]  ;;  %vm55_vm2 = vcmask 1046528   ;;  %vm170_vm3 = vcmask 253952  }
   0x6   :  { %v356_v2 = vld [vmem:[%s633_s1 + $0x38] sm:$0xff]  ;;  %v355_v6 = vld [vmem:[%s633_s1 + $0x30] sm:$0xff]  ;;  %96 = vmatpush.msra.mxu1 %v31_v1  ;;  %v29_v10 = vld [vmem:[%s633_s1 + $0x8] sm:$0xff] }
   0x7   :  { %v49_v3 = vadd.f32 %v356_v2, %v31_v1  ;;  %v45_v7 = vadd.f32 %v360_v0, %v356_v2  ;;  %v48_v8 = vadd.f32 %v355_v6, %v454_v5  ;;  %v354_v11 = vld [vmem:[%s633_s1 + $0x28] sm:$0xff]  ;;  %v44_v12 = vadd.f32 %v359_v4, %v355_v6  ;;  %127 = vmatpush.msra.mxu2 %v359_v4  ;;  %v28_v14 = vld [vmem:[%s633_s1] sm:$0xff]  ;;  %v365_v28 = vld [vmem:[%s632_s0 + $0x10] sm:$0xff] }
   0x8   :  { %v47_v13 = vadd.f32 %v354_v11, %v29_v10  ;;  %v353_v15 = vld [vmem:[%s633_s1 + $0x20] sm:$0xff]  ;;  %v52_v19 = vld [vmem:[%s632_s0 + $0x8] sm:$0x3]  ;;  %97 = vmatpush.msra.mxu1 %v454_v5  ;;  %v43_v20 = vadd.f32 %v358_v9, %v354_v11  ;;  %v366_v29 = vld [vmem:[%s632_s0 + $0x18] sm:$0x3]  ;;  %v255_v30 = vrot.slane %v365_v28, 2 }
   0x9   :  { %146 = vmatpush.msra.mxu3 %v49_v3  ;;  %74 = vmatpush.msra.mxu0 %v45_v7  ;;  %v357_v16 = vld [vmem:[%s633_s1 + $0x40] sm:$0xff]  ;;  %v46_v17 = vadd.f32 %v353_v15, %v28_v14  ;;  %v110_v22 = vrot.slane %v52_v19, 2  ;;  %v57_v24 = vrot.slane %v52_v19, 1  ;;  %v256_v31 = vrot.slane %v366_v29, 2 }
   0xa   :  { %v51_v18 = vld [vmem:[%s632_s0] sm:$0xff]  ;;  %128 = vmatpush.msra.mxu2 %v358_v9  ;;  %98 = vmatpush.msra.mxu1 %v29_v10  ;;  %v42_v25 = vadd.f32 %v357_v16, %v353_v15  ;;  %v207_v32 = vrot.slane %v365_v28, 1  ;;  %v208_v33 = vrot.slane %v366_v29, 1 }
   0xb   :  { %147 = vmatpush.msra.mxu3 %v48_v8  ;;  %v109_v21 = vrot.slane %v51_v18, 2  ;;  %v56_v23 = vrot.slane %v51_v18, 1  ;;  %75 = vmatpush.msra.mxu0 %v44_v12  ;;  %v257_v34 = vsel %vm108_vm1, %v255_v30, %v256_v31  ;;  %v388_v37 = vld [vmem:[#allocation2] ss:$0 sm:$0xff] }
   0xc   :  { %129 = vmatpush.msra.mxu2 %v357_v16  ;;  %99 = vmatpush.msra.mxu1 %v28_v14  ;;  %v209_v35 = vsel %vm55_vm2, %v207_v32, %v208_v33 }
   0xd   :  { %148 = vmatpush.msra.mxu3 %v47_v13  ;;  %v111_v26 = vsel %vm108_vm1, %v109_v21, %v110_v22  ;;  %v58_v27 = vsel %vm55_vm2, %v56_v23, %v57_v24  ;;  %76 = vmatpush.msra.mxu0 %v43_v20 }
   0xe   :  { %363 = vmatmul.msk.f32.vlgmr.msra.gmra.mxu2 %vm59_vm0, %v111_v26  ;;  %362 = vmatmul.msk.f32.vlgmr.msra.gmra.mxu1 %vm59_vm0, %v51_v18 }
   0xf   :  { %149 = vmatpush.msra.mxu3 %v46_v17  ;;  %272 = vmatpush.msrb.mxu2 %v360_v0 }
  0x10   :  { %364 = vmatmul.msk.f32.vlgmr.msra.gmra.mxu3 %vm59_vm0, %v58_v27  ;;  %77 = vmatpush.msra.mxu0 %v42_v25 }
  0x11   :  { %292 = vmatpush.msrb.mxu3 %v49_v3  ;;  %273 = vmatpush.msrb.mxu2 %v359_v4 }
  0x12   :  { %361 = vmatmul.msk.f32.vlgmr.msra.gmra.mxu0 %vm59_vm0, %v58_v27  ;;  %246 = vmatpush.msrb.mxu1 %v31_v1 }
  0x13   :  { %293 = vmatpush.msrb.mxu3 %v48_v8  ;;  %274 = vmatpush.msrb.mxu2 %v358_v9 }
  0x14   :  { %224 = vmatpush.msrb.mxu0 %v45_v7  ;;  %247 = vmatpush.msrb.mxu1 %v454_v5 }
  0x15   :  { %294 = vmatpush.msrb.mxu3 %v47_v13  ;;  %275 = vmatpush.msrb.mxu2 %v357_v16 }
  0x16   :  { %225 = vmatpush.msrb.mxu0 %v44_v12  ;;  %369 = vmatmul.msk.f32.vlgmr.msrb.gmra.mxu2 %vm59_vm0, %v257_v34 }
  0x17   :  { %295 = vmatpush.msrb.mxu3 %v46_v17  ;;  %248 = vmatpush.msrb.mxu1 %v29_v10 }
  0x18   :  { %370 = vmatmul.msk.f32.vlgmr.msrb.gmra.mxu3 %vm59_vm0, %v209_v35  ;;  %226 = vmatpush.msrb.mxu0 %v43_v20 }
  0x19   :  { %249 = vmatpush.msrb.mxu1 %v28_v14 }
  0x1a   :  { %227 = vmatpush.msrb.mxu0 %v42_v25  ;;  %368 = vmatmul.msk.f32.vlgmr.msrb.gmra.mxu1 %vm59_vm0, %v365_v28 }
  0x1b   :  { %367 = vmatmul.msk.f32.vlgmr.msrb.gmra.mxu0 %vm59_vm0, %v209_v35 }
  0x8b   :  { %v101_v38 = vpop.f32.mrf.mxu1 }
  0x8f   :  { %v79_v36 = vpop.f32.mrf.mxu0 }
  0x90   :  { %v102_v40 = vadd.f32 %v101_v38, %v79_v36 }
  0x91   :  { %v131_v39 = vpop.f32.mrf.mxu2 }
  0x92   :  { %v107_v42 = vadd.f32 %v388_v37, %v102_v40 }
  0x93   :  { %v151_v41 = vpop.f32.mrf.mxu3 }
  0x94   :  { %v152_v43 = vadd.f32 %v151_v41, %v131_v39  ;;  %v156_v44 = vrot.slane %v107_v42, 1  ;;  %v157_v45 = vrot.slane %v107_v42, 2  ;;  %v158_v46 = vrot.slane %v107_v42, 3  ;;  %171 = vst.msk [vmem:[%s635_s3] sm:$0x1] %vm170_vm3, %v107_v42 }
  0x95   :  { %v159_v47 = vrot.slane %v107_v42, 4  ;;  %v160_v48 = vrot.slane %v107_v42, 5  ;;  %v161_v50 = vrot.slane %v107_v42, 6  ;;  %v162_v53 = vrot.slane %v107_v42, 7 }
  0x96   :  { %172 = vst.msk [vmem:[%s635_s3 + $0x2] sm:$0x1] %vm170_vm3, %v156_v44  ;;  %v154_v49 = vadd.f32 %v388_v37, %v152_v43 }
  0x97   :  { %173 = vst.msk [vmem:[%s635_s3 + $0x4] sm:$0x1] %vm170_vm3, %v157_v45  ;;  %v251_v52 = vpop.f32.mrf.mxu1 }
  0x98   :  { %v229_v51 = vpop.f32.mrf.mxu0  ;;  %174 = vst.msk [vmem:[%s635_s3 + $0x6] sm:$0x1] %vm170_vm3, %v158_v46  ;;  %v180_v54 = vrot.slane %v154_v49, 1  ;;  %v181_v56 = vrot.slane %v154_v49, 2  ;;  %v182_v57 = vrot.slane %v154_v49, 3  ;;  %v183_v58 = vrot.slane %v154_v49, 4 }
  0x99   :  { %175 = vst.msk [vmem:[%s635_s3 + $0x8] sm:$0x1] %vm170_vm3, %v159_v47  ;;  %v252_v55 = vadd.f32 %v251_v52, %v229_v51  ;;  %v184_v59 = vrot.slane %v154_v49, 5  ;;  %v185_v61 = vrot.slane %v154_v49, 6  ;;  %v277_v62 = vpop.f32.mrf.mxu2  ;;  %v186_v0 = vrot.slane %v154_v49, 7 }
  0x9a   :  { %176 = vst.msk [vmem:[%s635_s3 + $0xa] sm:$0x1] %vm170_vm3, %v160_v48 }
  0x9b   :  { %177 = vst.msk [vmem:[%s635_s3 + $0xc] sm:$0x1] %vm170_vm3, %v161_v50  ;;  %v254_v60 = vadd.f32 %v388_v37, %v252_v55  ;;  %v297_v63 = vpop.f32.mrf.mxu3 }
  0x9c   :  { %178 = vst.msk [vmem:[%s635_s3 + $0xe] sm:$0x1] %vm170_vm3, %v162_v53  ;;  %v298_v2 = vadd.f32 %v297_v63, %v277_v62 }
  0x9d   :  { %194 = vst.msk [vmem:[%s635_s3 + $0x1] sm:$0x1] %vm170_vm3, %v154_v49  ;;  %v302_v1 = vrot.slane %v254_v60, 1  ;;  %v303_v3 = vrot.slane %v254_v60, 2  ;;  %v304_v4 = vrot.slane %v254_v60, 3  ;;  %v305_v5 = vrot.slane %v254_v60, 4 }
  0x9e   :  { %195 = vst.msk [vmem:[%s635_s3 + $0x3] sm:$0x1] %vm170_vm3, %v180_v54  ;;  %v306_v6 = vrot.slane %v254_v60, 5  ;;  %v300_v7 = vadd.f32 %v388_v37, %v298_v2  ;;  %v307_v8 = vrot.slane %v254_v60, 6  ;;  %v308_v9 = vrot.slane %v254_v60, 7 }
  0x9f   :  { %196 = vst.msk [vmem:[%s635_s3 + $0x5] sm:$0x1] %vm170_vm3, %v181_v56 }
  0xa0   :  { %197 = vst.msk [vmem:[%s635_s3 + $0x7] sm:$0x1] %vm170_vm3, %v182_v57  ;;  %v326_v10 = vrot.slane %v300_v7, 1  ;;  %v327_v11 = vrot.slane %v300_v7, 2  ;;  %v328_v12 = vrot.slane %v300_v7, 3  ;;  %v329_v13 = vrot.slane %v300_v7, 4 }
  0xa1   :  { %198 = vst.msk [vmem:[%s635_s3 + $0x9] sm:$0x1] %vm170_vm3, %v183_v58  ;;  %v330_v14 = vrot.slane %v300_v7, 5  ;;  %v331_v15 = vrot.slane %v300_v7, 6  ;;  %v332_v16 = vrot.slane %v300_v7, 7 }
  0xa2   :  { %199 = vst.msk [vmem:[%s635_s3 + $0xb] sm:$0x1] %vm170_vm3, %v184_v59 }
  0xa3   :  { %200 = vst.msk [vmem:[%s635_s3 + $0xd] sm:$0x1] %vm170_vm3, %v185_v61 }
  0xa4   :  { %201 = vst.msk [vmem:[%s635_s3 + $0xf] sm:$0x1] %vm170_vm3, %v186_v0 }
  0xa5   :  { %371 = vst.msk [vmem:[%s635_s3 + $0x10] sm:$0x1] %vm170_vm3, %v254_v60 }
  0xa6   :  { %372 = vst.msk [vmem:[%s635_s3 + $0x12] sm:$0x1] %vm170_vm3, %v302_v1 }
  0xa7   :  { %373 = vst.msk [vmem:[%s635_s3 + $0x14] sm:$0x1] %vm170_vm3, %v303_v3 }
  0xa8   :  { %374 = vst.msk [vmem:[%s635_s3 + $0x16] sm:$0x1] %vm170_vm3, %v304_v4 }
  0xa9   :  { %375 = vst.msk [vmem:[%s635_s3 + $0x18] sm:$0x1] %vm170_vm3, %v305_v5 }
  0xaa   :  { %376 = vst.msk [vmem:[%s635_s3 + $0x1a] sm:$0x1] %vm170_vm3, %v306_v6 }
  0xab   :  { %377 = vst.msk [vmem:[%s635_s3 + $0x1c] sm:$0x1] %vm170_vm3, %v307_v8 }
  0xac   :  { %378 = vst.msk [vmem:[%s635_s3 + $0x1e] sm:$0x1] %vm170_vm3, %v308_v9 }
  0xad   :  { %379 = vst.msk [vmem:[%s635_s3 + $0x11] sm:$0x1] %vm170_vm3, %v300_v7 }
  0xae   :  { %380 = vst.msk [vmem:[%s635_s3 + $0x13] sm:$0x1] %vm170_vm3, %v326_v10 }
  0xaf   :  { %381 = vst.msk [vmem:[%s635_s3 + $0x15] sm:$0x1] %vm170_vm3, %v327_v11 }
  0xb0   :  { %382 = vst.msk [vmem:[%s635_s3 + $0x17] sm:$0x1] %vm170_vm3, %v328_v12 }
  0xb1   :  { %383 = vst.msk [vmem:[%s635_s3 + $0x19] sm:$0x1] %vm170_vm3, %v329_v13 }
  0xb2   :  { %384 = vst.msk [vmem:[%s635_s3 + $0x1b] sm:$0x1] %vm170_vm3, %v330_v14 }
  0xb3   :  { %385 = vst.msk [vmem:[%s635_s3 + $0x1d] sm:$0x1] %vm170_vm3, %v331_v15 }
  0xb4   :  { %386 = vst.msk [vmem:[%s635_s3 + $0x1f] sm:$0x1] %vm170_vm3, %v332_v16 }
  0xb5   :  { %352 = vsyncpa [#allocation3], 1 }

// kernel: vqvae2_forward.26
= control target key start
LH: loop header
LB: loop body
LE: loop exit
PB: predicated region body
PF: predicated region fallthrough
CT: control target
= control target key end

     0   :  { %8 = vsyncpa [#allocation3], 0  ;;  %s352_s15 = smov [#allocation2]   ;;  %s475_s0 = inlined_call_operand.vmem [shape: f32[2,18,32], index: 0, kind: input, shape index: {}]   ;;  %s476_s1 = inlined_call_operand.vmem [shape: f32[3,32,32], index: 1, kind: input, shape index: {}]   ;;  %s477_s2 = inlined_call_operand.hbm [shape: f32[1,32], index: 2, kind: input, shape index: {}]   ;;  %s478_s3 = inlined_call_operand.vmem [shape: f32[2,16,32], index: 3, kind: output, shape index: {}]  }
   0x1   :  { %s18_s14 = sshll.u32 %s477_s2, 4  ;;  %s20_s16 = sshll.u32 %s352_s15, 4  ;;  %s19_s14 = int_to_ptr.hbm [resolvable:$true] %s18_s14  ;;  %s21_s16 = int_to_ptr.vmem [resolvable:$true] %s20_s16 }
   0x2   :  { %23 = dma.hbm_to_vmem [thread:$0]  %s19_s14, 16, %s21_s16, [#allocation3]  }
   0x3   :  { %350 = dma.done.wait [#allocation3], 16  }
   0x4   :  { %351 = vsyncadd [#allocation3], 4294967280  ;;  %v285_v0 = vld [vmem:[%s476_s1 + $0x38] sm:$0xff]  ;;  %v284_v2 = vld [vmem:[%s476_s1 + $0x30] sm:$0xff]  ;;  %vm43_vm0 = vcmask 1046528   ;;  %vm49_vm1 = vcmask 261120  }
   0x5   :  { %v34_v1 = vld [vmem:[%s476_s1 + $0x18] sm:$0xff]  ;;  %315 = vmatpush.msra.mxu2 %v285_v0  ;;  %v33_v3 = vld [vmem:[%s476_s1 + $0x10] sm:$0xff]  ;;  %v283_v4 = vld [vmem:[%s476_s1 + $0x28] sm:$0xff]  ;;  %66 = vmatpush.msra.mxu0 %v285_v0  ;;  %vm109_vm2 = vcmask 1045504  }
   0x6   :  { %319 = vmatpush.msra.mxu3 %v34_v1  ;;  %v32_v5 = vld [vmem:[%s476_s1 + $0x8] sm:$0xff]  ;;  %93 = vmatpush.msra.mxu1 %v34_v1  ;;  %v402_v7 = vld [vmem:[%s475_s0 + $0x10] sm:$0x3]  ;;  %v282_v9 = vld [vmem:[%s476_s1 + $0x20] sm:$0xff] }
   0x7   :  { %v397_v6 = vld [vmem:[%s475_s0 + $0x8] sm:$0xff]  ;;  %316 = vmatpush.msra.mxu2 %v284_v2  ;;  %v31_v10 = vld [vmem:[%s476_s1] sm:$0xff]  ;;  %v47_v11 = vrot.slane %v402_v7, 1  ;;  %67 = vmatpush.msra.mxu0 %v284_v2  ;;  %v293_v13 = vld [vmem:[%s476_s1 + $0x58] sm:$0xff]  ;;  %v113_v31 = vrot.slane %v402_v7, 2 }
   0x8   :  { %320 = vmatpush.msra.mxu3 %v33_v3  ;;  %v45_v8 = vrot.slane %v397_v6, 1  ;;  %94 = vmatpush.msra.mxu1 %v33_v3  ;;  %v28_v12 = vld [vmem:[%s475_s0] sm:$0xff]  ;;  %v296_v15 = vld [vmem:[%s475_s0 + $0x18] sm:$0xff]  ;;  %v292_v18 = vld [vmem:[%s476_s1 + $0x50] sm:$0xff]  ;;  %v111_v19 = vrot.slane %v397_v6, 2 }
   0x9   :  { %317 = vmatpush.msra.mxu2 %v283_v4  ;;  %v44_v14 = vrot.slane %v28_v12, 1  ;;  %68 = vmatpush.msra.mxu0 %v283_v4  ;;  %v297_v17 = vld [vmem:[%s475_s0 + $0x20] sm:$0xff]  ;;  %v110_v21 = vrot.slane %v28_v12, 2  ;;  %v169_v22 = vrot.slane %v296_v15, 1  ;;  %v291_v24 = vld [vmem:[%s476_s1 + $0x48] sm:$0xff]  ;;  %v232_v29 = vrot.slane %v296_v15, 2 }
   0xa   :  { %321 = vmatpush.msra.mxu3 %v32_v5  ;;  %v48_v16 = vsel %vm43_vm0, %v45_v8, %v47_v11  ;;  %95 = vmatpush.msra.mxu1 %v32_v5  ;;  %v170_v23 = vrot.slane %v297_v17, 1  ;;  %v290_v25 = vld [vmem:[%s476_s1 + $0x40] sm:$0xff]  ;;  %v298_v28 = vld [vmem:[%s475_s0 + $0x28] sm:$0x3]  ;;  %v233_v30 = vrot.slane %v297_v17, 2  ;;  %v114_v34 = vsel %vm109_vm2, %v111_v19, %v113_v31 }
   0xb   :  { %318 = vmatpush.msra.mxu2 %v282_v9  ;;  %v46_v20 = vsel %vm43_vm0, %v44_v14, %v45_v8  ;;  %69 = vmatpush.msra.mxu0 %v282_v9  ;;  %v112_v26 = vsel %vm109_vm2, %v110_v21, %v111_v19  ;;  %v172_v32 = vrot.slane %v298_v28, 1  ;;  %v235_v36 = vrot.slane %v298_v28, 2  ;;  %v324_v43 = vld [vmem:[#allocation2] ss:$0 sm:$0xff] }
   0xc   :  { %322 = vmatpush.msra.mxu3 %v31_v10  ;;  %287 = vmatmul.msk.f32.vlgmr.msra.gmra.mxu2 %vm49_vm1, %v48_v16  ;;  %v171_v27 = vsel %vm43_vm0, %v169_v22, %v170_v23  ;;  %v234_v33 = vsel %vm109_vm2, %v232_v29, %v233_v30  ;;  %v325_v50 = vld [vmem:[#allocation2] ss:$0 sm:$0xff] }
   0xd   :  { %289 = vmatmul.msk.f32.vlgmr.msra.gmra.mxu3 %vm49_vm1, %v397_v6  ;;  %131 = vmatpush.msrb.mxu2 %v293_v13  ;;  %v173_v35 = vsel %vm43_vm0, %v170_v23, %v172_v32  ;;  %v236_v37 = vsel %vm109_vm2, %v233_v30, %v235_v36 }
   0xe   :  { %190 = vmatpush.msrb.mxu3 %v285_v0  ;;  %96 = vmatpush.msra.mxu1 %v31_v10 }
   0xf   :  { %132 = vmatpush.msrb.mxu2 %v292_v18  ;;  %286 = vmatmul.msk.f32.vlgmr.msra.gmra.mxu0 %vm49_vm1, %v46_v20 }
  0x10   :  { %191 = vmatpush.msrb.mxu3 %v284_v2  ;;  %288 = vmatmul.msk.f32.vlgmr.msra.gmra.mxu1 %vm49_vm1, %v28_v12 }
  0x11   :  { %133 = vmatpush.msrb.mxu2 %v291_v24  ;;  %217 = vmatpush.msrb.mxu0 %v34_v1 }
  0x12   :  { %192 = vmatpush.msrb.mxu3 %v283_v4  ;;  %253 = vmatpush.msrb.mxu1 %v293_v13 }
  0x13   :  { %134 = vmatpush.msrb.mxu2 %v290_v25  ;;  %218 = vmatpush.msrb.mxu0 %v33_v3 }
  0x14   :  { %193 = vmatpush.msrb.mxu3 %v282_v9  ;;  %294 = vmatmul.msk.f32.vlgmr.msrb.gmra.mxu2 %vm49_vm1, %v112_v26 }
  0x15   :  { %303 = vmatmul.msk.f32.vlgmr.msrb.gmra.mxu3 %vm49_vm1, %v171_v27  ;;  %254 = vmatpush.msrb.mxu1 %v292_v18 }
  0x16   :  { %219 = vmatpush.msrb.mxu0 %v32_v5 }
  0x17   :  { %255 = vmatpush.msrb.mxu1 %v291_v24 }
  0x18   :  { %220 = vmatpush.msrb.mxu0 %v31_v10 }
  0x19   :  { %256 = vmatpush.msrb.mxu1 %v290_v25  ;;  %305 = vmatmul.msk.f32.vlgmr.msrb.gmra.mxu0 %vm49_vm1, %v296_v15 }
  0x1a   :  { %311 = vmatmul.msk.f32.vlgmr.msrb.gmra.mxu1 %vm49_vm1, %v234_v33 }
  0x1c   :  { %295 = vmatmul.msk.f32.gmra.mxu2 %vm49_vm1, %v114_v34 }
  0x1d   :  { %304 = vmatmul.msk.f32.gmra.mxu3 %vm49_vm1, %v173_v35 }
  0x21   :  { %306 = vmatmul.msk.f32.gmra.mxu0 %vm49_vm1, %v297_v17 }
  0x22   :  { %312 = vmatmul.msk.f32.gmra.mxu1 %vm49_vm1, %v236_v37 }
  0x8c   :  { %v71_v38 = vpop.f32.mrf.mxu0 }
  0x8d   :  { %v98_v41 = vpop.f32.mrf.mxu1 }
  0x8e   :  { %v99_v42 = vadd.f32 %v98_v41, %v71_v38 }
  0x8f   :  { %v74_v39 = vpop.f32.mrf.mxu2 }
  0x90   :  { %v101_v40 = vpop.f32.mrf.mxu3 }
  0x91   :  { %v102_v55 = vadd.f32 %v101_v40, %v74_v39 }
  0x96   :  { %v222_v47 = vpop.f32.mrf.mxu0 }
  0x97   :  { %v136_v44 = vpop.f32.mrf.mxu2  ;;  %v258_v48 = vpop.f32.mrf.mxu1 }
  0x98   :  { %v195_v45 = vpop.f32.mrf.mxu3  ;;  %v142_v46 = vadd.f32 %v136_v44, %v99_v42 }
  0x99   :  { %v223_v49 = vadd.f32 %v222_v47, %v195_v45 }
  0x9a   :  { %v148_v51 = vadd.f32 %v324_v43, %v142_v46 }
  0x9b   :  { %v264_v52 = vadd.f32 %v258_v48, %v223_v49 }
  0x9c   :  { %v150_v53 = vmax.f32 %v148_v51, 0.0 }
  0x9d   :  { %v270_v54 = vadd.f32 %v325_v50, %v264_v52 }
  0x9e   :  { %152 = vst.msk [vmem:[%s478_s3] sm:$0xff] %vm49_vm1, %v150_v53  ;;  %v225_v60 = vpop.f32.mrf.mxu0 }
  0x9f   :  { %v272_v56 = vmax.f32 %v270_v54, 0.0  ;;  %v139_v57 = vpop.f32.mrf.mxu2  ;;  %v261_v61 = vpop.f32.mrf.mxu1 }
  0xa0   :  { %v198_v58 = vpop.f32.mrf.mxu3  ;;  %v143_v59 = vadd.f32 %v139_v57, %v102_v55 }
  0xa1   :  { %313 = vst.msk [vmem:[%s478_s3 + $0x10] sm:$0xff] %vm49_vm1, %v272_v56  ;;  %v226_v62 = vadd.f32 %v225_v60, %v198_v58 }
  0xa2   :  { %v149_v63 = vadd.f32 %v324_v43, %v143_v59 }
  0xa3   :  { %v265_v0 = vadd.f32 %v261_v61, %v226_v62 }
  0xa4   :  { %v151_v1 = vmax.f32 %v149_v63, 0.0 }
  0xa5   :  { %v271_v2 = vadd.f32 %v325_v50, %v265_v0 }
  0xa6   :  { %153 = vst.msk [vmem:[%s478_s3 + $0x8] sm:$0xff] %vm49_vm1, %v151_v1 }
  0xa7   :  { %v273_v3 = vmax.f32 %v271_v2, 0.0 }
  0xa9   :  { %314 = vst.msk [vmem:[%s478_s3 + $0x18] sm:$0xff] %vm49_vm1, %v273_v3 }
  0xaa   :  { %281 = vsyncpa [#allocation3], 1 }

// kernel: vqvae2_forward.27
= control target key start
LH: loop header
LB: loop body
LE: loop exit
PB: predicated region body
PF: predicated region fallthrough
CT: control target
= control target key end

     0   :  { %vm30_vm0 = vcmask 1046528   ;;  %vm36_vm1 = vcmask 261120   ;;  %s473_s0 = inlined_call_operand.vmem [shape: f32[2,18,32], index: 0, kind: input, shape index: {}]   ;;  %s474_s1 = inlined_call_operand.vmem [shape: f32[3,32,16], index: 1, kind: input, shape index: {}]   ;;  %s475_s2 = inlined_call_operand.vmem [shape: f32[1,16], index: 2, kind: input, shape index: {}]   ;;  %s476_s3 = inlined_call_operand.hbm [shape: f32[2,16,16], index: 3, kind: output, shape index: {}]  }
   0x1   :  { %v282_v0 = vld [vmem:[%s474_s1 + $0x38] sm:$0xff]  ;;  %v281_v2 = vld [vmem:[%s474_s1 + $0x30] sm:$0xff]  ;;  %v280_v4 = vld [vmem:[%s474_s1 + $0x28] sm:$0xff] }
   0x2   :  { %v21_v1 = vld [vmem:[%s474_s1 + $0x18] sm:$0xff]  ;;  %310 = vmatpush.msra.mxu2 %v282_v0  ;;  %v20_v3 = vld [vmem:[%s474_s1 + $0x10] sm:$0xff]  ;;  %v390_v5 = vld [vmem:[%s474_s1 + $0x8] sm:$0xff]  ;;  %53 = vmatpush.msra.mxu0 %v282_v0 }
   0x3   :  { %314 = vmatpush.msra.mxu3 %v21_v1  ;;  %80 = vmatpush.msra.mxu1 %v21_v1  ;;  %v395_v6 = vld [vmem:[%s473_s0 + $0x8] sm:$0xff]  ;;  %v400_v7 = vld [vmem:[%s473_s0 + $0x10] sm:$0x3]  ;;  %v279_v9 = vld [vmem:[%s474_s1 + $0x20] sm:$0xff] }
   0x4   :  { %311 = vmatpush.msra.mxu2 %v281_v2  ;;  %v32_v8 = vrot.slane %v395_v6, 1  ;;  %v18_v10 = vld [vmem:[%s474_s1] sm:$0xff]  ;;  %v34_v11 = vrot.slane %v400_v7, 1  ;;  %54 = vmatpush.msra.mxu0 %v281_v2  ;;  %v290_v13 = vld [vmem:[%s474_s1 + $0x58] sm:$0xff] }
   0x5   :  { %315 = vmatpush.msra.mxu3 %v20_v3  ;;  %81 = vmatpush.msra.mxu1 %v20_v3  ;;  %v15_v12 = vld [vmem:[%s473_s0] sm:$0xff]  ;;  %v293_v15 = vld [vmem:[%s473_s0 + $0x18] sm:$0xff] }
   0x6   :  { %312 = vmatpush.msra.mxu2 %v280_v4  ;;  %v31_v14 = vrot.slane %v15_v12, 1  ;;  %v35_v16 = vsel %vm30_vm0, %v32_v8, %v34_v11  ;;  %55 = vmatpush.msra.mxu0 %v280_v4  ;;  %v294_v17 = vld [vmem:[%s473_s0 + $0x20] sm:$0xff] }
   0x7   :  { %316 = vmatpush.msra.mxu3 %v390_v5  ;;  %82 = vmatpush.msra.mxu1 %v390_v5 }
   0x8   :  { %313 = vmatpush.msra.mxu2 %v279_v9 }
   0x9   :  { %317 = vmatpush.msra.mxu3 %v18_v10 }
   0xa   :  { %8 = vsyncpa [#allocation3], 0  ;;  %284 = vmatmul.msk.f32.vlgmr.msra.gmra.mxu2 %vm36_vm1, %v35_v16  ;;  %286 = vmatmul.msk.f32.vlgmr.msra.gmra.mxu3 %vm36_vm1, %v395_v6  ;;  %v289_v18 = vld [vmem:[%s474_s1 + $0x50] sm:$0xff]  ;;  %v98_v19 = vrot.slane %v395_v6, 2  ;;  %v33_v20 = vsel %vm30_vm0, %v31_v14, %v32_v8  ;;  %v97_v21 = vrot.slane %v15_v12, 2  ;;  %v155_v22 = vrot.slane %v293_v15, 1 }
   0xb   :  { %176 = vmatpush.msrb.mxu3 %v282_v0  ;;  %118 = vmatpush.msrb.mxu2 %v290_v13  ;;  %v156_v23 = vrot.slane %v294_v17, 1  ;;  %v288_v24 = vld [vmem:[%s474_s1 + $0x48] sm:$0xff]  ;;  %vm96_vm2 = vcmask 1045504   ;;  %v287_v25 = vld [vmem:[%s474_s1 + $0x40] sm:$0xff]  ;;  %v218_v29 = vrot.slane %v293_v15, 2  ;;  %v219_v30 = vrot.slane %v294_v17, 2 }
   0xc   :  { %56 = vmatpush.msra.mxu0 %v279_v9  ;;  %83 = vmatpush.msra.mxu1 %v18_v10  ;;  %v99_v26 = vsel %vm96_vm2, %v97_v21, %v98_v19  ;;  %v295_v28 = vld [vmem:[%s473_s0 + $0x28] sm:$0x3]  ;;  %v100_v31 = vrot.slane %v400_v7, 2  ;;  %v321_v43 = vld [vmem:[%s475_s2] ss:$0 sm:$0xff]  ;;  %vm137_vm3 = vcmask 130048  }
   0xd   :  { %177 = vmatpush.msrb.mxu3 %v281_v2  ;;  %119 = vmatpush.msrb.mxu2 %v289_v18  ;;  %v157_v27 = vsel %vm30_vm0, %v155_v22, %v156_v23  ;;  %v158_v32 = vrot.slane %v295_v28, 1  ;;  %v220_v33 = vsel %vm96_vm2, %v218_v29, %v219_v30  ;;  %v221_v36 = vrot.slane %v295_v28, 2  ;;  %v322_v50 = vld [vmem:[%s475_s2] ss:$0 sm:$0xff]  ;;  %s349_s23 = smov [#allocation2]   ;;  %s267_s2 = sshll.u32 %s476_s3, 4  ;;  %s268_s2 = int_to_ptr.hbm [resolvable:$true] %s267_s2 }
   0xe   :  { %283 = vmatmul.msk.f32.vlgmr.msra.gmra.mxu0 %vm36_vm1, %v33_v20  ;;  %285 = vmatmul.msk.f32.vlgmr.msra.gmra.mxu1 %vm36_vm1, %v15_v12  ;;  %v101_v34 = vsel %vm96_vm2, %v98_v19, %v100_v31  ;;  %s265_s24 = sshll.u32 %s349_s23, 4  ;;  %s350_s27 = smov 128   ;;  %s266_s24 = int_to_ptr.vmem [resolvable:$true] %s265_s24 }
   0xf   :  { %178 = vmatpush.msrb.mxu3 %v280_v4  ;;  %120 = vmatpush.msrb.mxu2 %v288_v24  ;;  %v159_v35 = vsel %vm30_vm0, %v156_v23, %v158_v32  ;;  %v222_v37 = vsel %vm96_vm2, %v219_v30, %v221_v36  ;;  %s351_s28 = smov 8  }
  0x10   :  { %203 = vmatpush.msrb.mxu0 %v21_v1  ;;  %239 = vmatpush.msrb.mxu1 %v290_v13 }
  0x11   :  { %179 = vmatpush.msrb.mxu3 %v279_v9  ;;  %121 = vmatpush.msrb.mxu2 %v287_v25 }
  0x12   :  { %291 = vmatmul.msk.f32.vlgmr.msrb.gmra.mxu2 %vm36_vm1, %v99_v26  ;;  %300 = vmatmul.msk.f32.vlgmr.msrb.gmra.mxu3 %vm36_vm1, %v157_v27 }
  0x13   :  { %204 = vmatpush.msrb.mxu0 %v20_v3  ;;  %240 = vmatpush.msrb.mxu1 %v289_v18 }
  0x15   :  { %205 = vmatpush.msrb.mxu0 %v390_v5  ;;  %241 = vmatpush.msrb.mxu1 %v288_v24 }
  0x17   :  { %206 = vmatpush.msrb.mxu0 %v18_v10  ;;  %242 = vmatpush.msrb.mxu1 %v287_v25 }
  0x18   :  { %302 = vmatmul.msk.f32.vlgmr.msrb.gmra.mxu0 %vm36_vm1, %v293_v15  ;;  %308 = vmatmul.msk.f32.vlgmr.msrb.gmra.mxu1 %vm36_vm1, %v220_v33 }
  0x1a   :  { %292 = vmatmul.msk.f32.gmra.mxu2 %vm36_vm1, %v101_v34  ;;  %301 = vmatmul.msk.f32.gmra.mxu3 %vm36_vm1, %v159_v35 }
  0x20   :  { %303 = vmatmul.msk.f32.gmra.mxu0 %vm36_vm1, %v294_v17  ;;  %309 = vmatmul.msk.f32.gmra.mxu1 %vm36_vm1, %v222_v37 }
  0x8b   :  { %v58_v38 = vpop.f32.mrf.mxu0  ;;  %v85_v41 = vpop.f32.mrf.mxu1 }
  0x8c   :  { %v86_v42 = vadd.f32 %v85_v41, %v58_v38 }
  0x8d   :  { %v61_v39 = vpop.f32.mrf.mxu2  ;;  %v88_v40 = vpop.f32.mrf.mxu3 }
  0x8e   :  { %v89_v54 = vadd.f32 %v88_v40, %v61_v39 }
  0x95   :  { %v123_v44 = vpop.f32.mrf.mxu2  ;;  %v181_v45 = vpop.f32.mrf.mxu3 }
  0x96   :  { %v129_v46 = vadd.f32 %v123_v44, %v86_v42  ;;  %v208_v47 = vpop.f32.mrf.mxu0  ;;  %v244_v48 = vpop.f32.mrf.mxu1 }
  0x97   :  { %v209_v49 = vadd.f32 %v208_v47, %v181_v45 }
  0x98   :  { %v135_v51 = vadd.f32 %v321_v43, %v129_v46 }
  0x99   :  { %v250_v52 = vadd.f32 %v244_v48, %v209_v49 }
  0x9a   :  { %138 = vst.msk [vmem:[#allocation2] sm:$0xff] %vm137_vm3, %v135_v51 }
  0x9b   :  { %v256_v53 = vadd.f32 %v322_v50, %v250_v52 }
  0x9d   :  { %259 = vst.msk [vmem:[#allocation2 + $0x10] sm:$0xff] %vm137_vm3, %v256_v53  ;;  %v126_v55 = vpop.f32.mrf.mxu2  ;;  %v184_v56 = vpop.f32.mrf.mxu3 }
  0x9e   :  { %v130_v57 = vadd.f32 %v126_v55, %v89_v54  ;;  %v211_v58 = vpop.f32.mrf.mxu0  ;;  %v247_v59 = vpop.f32.mrf.mxu1 }
  0x9f   :  { %v212_v60 = vadd.f32 %v211_v58, %v184_v56 }
  0xa0   :  { %v136_v61 = vadd.f32 %v321_v43, %v130_v57 }
  0xa1   :  { %v251_v62 = vadd.f32 %v247_v59, %v212_v60 }
  0xa2   :  { %139 = vst.msk [vmem:[#allocation2 + $0x8] sm:$0xff] %vm137_vm3, %v136_v61 }
  0xa3   :  { %v257_v63 = vadd.f32 %v322_v50, %v251_v62 }
  0xa5   :  { %260 = vst.msk [vmem:[#allocation2 + $0x18] sm:$0xff] %vm137_vm3, %v257_v63 }
  0xa6   :  { %273 = dma.vmem_to_hbm [thread:$0]  %s266_s24, 512, %s268_s2, [#allocation3], %s350_s27, %s350_s27, %s351_s28  }
  0xa7   :  { %347 = dma.done.wait [#allocation3], 512  }
  0xa8   :  { %348 = vsyncadd [#allocation3], 4294966784 }
  0xa9   :  { %278 = vsyncpa [#allocation3], 1 }

</bundles_post_ra>
